<compile_context>
chip_gen: v6e
topology: v6e:2x2x1
jax: 0.10.0
libtpu: 0.0.40
codegen_flags: <defaults>
</compile_context>

<pallas_src>
import numpy as np
import jax
import jax.numpy as jnp
from jax.experimental import pallas as pl
from jax.experimental.pallas import tpu as pltpu

BN_EPS = 1e-5


def _elu(x):
    # PyTorch ELU(alpha=1).  exp(x)-1 instead of expm1 (expm1 has no
    # guaranteed Mosaic lowering); difference is < 1e-7 absolute in f32.
    return jnp.where(x > 0, x, jnp.exp(x) - 1.0)


# ----------------------------------------------------------------------------
# Parameter preparation (one-time, free at inference)
# ----------------------------------------------------------------------------
def prepare_params(p, in_shape, lane_pad=128):
    """Fold BN into the weights, reshape conv weights into per-tap blocks,
    fold the torch NCHW-flatten permutation into per-position fc1 blocks and
    pad the classifier to 128 lanes.  MXU operands are cast to bf16."""
    H, W = in_shape
    fp = {}

    def bn(q):
        scale = q["gamma"] / jnp.sqrt(q["var"] + BN_EPS)
        shift = q["beta"] - q["mean"] * scale
        return scale, shift

    # conv1 (Cin == 1): per-tap weight rows, f32 (rank-1 VPU path).
    q = p["conv1"]
    scale, shift = bn(q)
    kh, kw, cin, c1 = q["w"].shape
    assert cin == 1
    fp["conv1"] = dict(
        w=(q["w"] * scale).reshape(kh * kw, c1).astype(jnp.float32),
        c=(q["b"] * scale + shift).reshape(1, c1).astype(jnp.float32))

    # conv2: per-tap (C1, C2) blocks, bf16 MXU operands.
    q = p["conv2"]
    scale, shift = bn(q)
    kh, kw, c1_, c2 = q["w"].shape
    fp["conv2"] = dict(
        w=(q["w"] * scale).reshape(kh * kw, c1_, c2).astype(jnp.bfloat16),
        c=(q["b"] * scale + shift).reshape(1, c2).astype(jnp.float32))

    # fc1: fold BN and the torch (c, h, w) flatten order into per-spatial-
    # position (C2, F) blocks so the kernel never materialises a flat vector.
    q = p["fc1"]
    scale, shift = bn(q)
    w1 = q["w"] * scale                                   # (FLAT, F)
    flat, F = w1.shape
    H4, W4 = H // 4, W // 4
    assert flat == c2 * H4 * W4
    w1 = w1.reshape(c2, H4, W4, F).transpose(1, 2, 0, 3).reshape(H4 * W4, c2, F)
    fp["fc1"] = dict(
        w=w1.astype(jnp.bfloat16),
        c=(q["b"] * scale + shift).reshape(1, F).astype(jnp.float32))

    # fc2: zero-pad the classes up to a lane-dense 128-wide output.
    q = p["fc2"]
    F2, C = q["w"].shape
    CP = max(lane_pad, C)
    fp["fc2"] = dict(
        w=jnp.zeros((F2, CP), jnp.float32).at[:, :C].set(q["w"]).astype(jnp.bfloat16),
        b=jnp.zeros((1, CP), jnp.float32).at[0, :C].set(q["b"]),
        n_classes=C)
    return fp


# ----------------------------------------------------------------------------
# Fused kernel: conv1 -> pool -> conv2 -> pool -> flatten -> fc1 -> fc2
# ----------------------------------------------------------------------------
def _make_fused_kernel(NB, H, W, C1, C2, F):
    H2, W2 = H // 2, W // 2          # after pool1
    H4, W4 = H2 // 2, W2 // 2        # after pool2
    S = H4 * W4                      # spatial positions feeding the FC head

    def kernel(xe_ref, xo_ref, w1_ref, c1_ref, w2_ref, c2_ref,
               wf1_ref, cf1_ref, wf2_ref, bf2_ref,
               o_ref, hpad_ref):
        f32 = jnp.float32
        bf16 = jnp.bfloat16

        # ---- conv1 (3x3, 1->C1): rank-1 VPU taps read straight from the
        #      parity-split, zero-padded input refs (no im2col tensor). ------
        acc_e = jnp.zeros((NB, H, W2, C1), f32)           # even output columns
        acc_o = jnp.zeros((NB, H, W2, C1), f32)           # odd output columns
        for dy in range(3):
            e0 = xe_ref[:, dy:dy + H, 0:W2][..., None]            # (NB,H,W2,1)
            o0 = xo_ref[:, dy:dy + H, 0:W2][..., None]
            e1 = xe_ref[:, dy:dy + H, 1:W2 + 1][..., None]
            o1 = xo_ref[:, dy:dy + H, 1:W2 + 1][..., None]
            k0 = w1_ref[3 * dy + 0:3 * dy + 1, :]                 # (1, C1)
            k1 = w1_ref[3 * dy + 1:3 * dy + 2, :]
            k2 = w1_ref[3 * dy + 2:3 * dy + 3, :]
            acc_e = acc_e + e0 * k0 + o0 * k1 + e1 * k2
            acc_o = acc_o + o0 * k0 + e1 * k1 + o1 * k2

        # ---- pool1 (2x2 max), THEN folded bias/BN + ELU (commute with max) -
        mw = jnp.maximum(acc_e, acc_o)                    # W-pool (elementwise)
        mw = mw.reshape(NB, H2, 2, W2, C1)
        m1 = jnp.maximum(mw[:, :, 0], mw[:, :, 1])        # H-pool (NB,H2,W2,C1)
        r1 = _elu(m1 + c1_ref[...])

        # ---- conv2 input: zero-halo scratch (halo ring + interior only) ----
        hpad_ref[:, 0:1, :, :] = jnp.zeros((NB, 1, W2 + 2, C1), f32)
        hpad_ref[:, H2 + 1:H2 + 2, :, :] = jnp.zeros((NB, 1, W2 + 2, C1), f32)
        hpad_ref[:, 1:H2 + 1, 0:1, :] = jnp.zeros((NB, H2, 1, C1), f32)
        hpad_ref[:, 1:H2 + 1, W2 + 1:W2 + 2, :] = jnp.zeros((NB, H2, 1, C1), f32)
        hpad_ref[:, 1:H2 + 1, 1:W2 + 1, :] = r1

        # ---- conv2 (3x3, C1->C2): 9 accumulated bf16 MXU matmuls fed by
        #      plain ref slices of the halo scratch (no staging stores). -----
        acc2 = jnp.zeros((NB * H2 * W2, C2), f32)
        for t in range(9):
            dy, dx = divmod(t, 3)
            tap = hpad_ref[:, dy:dy + H2, dx:dx + W2, :]  # (NB,H2,W2,C1) f32
            acc2 = acc2 + jnp.dot(
                tap.astype(bf16).reshape(NB * H2 * W2, C1), w2_ref[t],
                preferred_element_type=f32)

        # ---- pool2: H-pool as a leading-axis max, bias/ELU after the pool,
        #      W-pool as an in-register adjacent-pair max (no scratch). ------
        y2 = acc2.reshape(NB, H4, 2, W2, C2)
        hmax = jnp.maximum(y2[:, :, 0], y2[:, :, 1])      # (NB, H4, W2, C2)
        a2 = _elu(hmax + c2_ref[...])
        wmax = jnp.maximum(a2[:, :, 0:W2 - 1, :],
                           a2[:, :, 1:W2, :]).astype(bf16)  # pairs at even idx

        # ---- flatten + fc1: S accumulated (NB,C2)x(C2,F) MXU dots; the torch
        #      NCHW flatten permutation is pre-folded into wf1's blocks. ------
        h1 = jnp.zeros((NB, F), f32)
        for s in range(S):
            h4_, w4_ = divmod(s, W4)
            v = wmax[:, h4_, 2 * w4_, :]                  # (NB, C2) bf16
            h1 = h1 + jnp.dot(v, wf1_ref[s], preferred_element_type=f32)
        h1 = _elu(h1 + cf1_ref[...]).astype(bf16)

        # ---- fc2 (classes zero-padded to a lane-dense 128-wide store) ------
        o_ref[...] = (jnp.dot(h1, wf2_ref[...], preferred_element_type=f32)
                      + bf2_ref[...])

    return kernel


def cnn_forward(x_nchw, fp):
    N, Cin, H, W = x_nchw.shape
    assert Cin == 1 and H % 4 == 0 and W % 4 == 0
    C1 = fp["conv1"]["w"].shape[1]
    C2 = fp["conv2"]["w"].shape[2]
    F = fp["fc1"]["w"].shape[2]
    CP = fp["fc2"]["w"].shape[1]
    n_classes = fp["fc2"]["n_classes"]
    H2, W2 = H // 2, W // 2

    # Grid sizing (per review): the grid is a strictly serial loop on a
    # single-TC v5e/v6e, so keep one fat batch block; only split across the
    # two v7x TensorCores when each step still feeds the FC head >=128 rows.
    G = 2 if (N % 2 == 0 and (N // 2) >= 128) else 1
    NB = N // G

    # Zero-pad spatially and split the padded width by column parity so every
    # conv1 tap is a plain (unstrided) ref slice inside the kernel.  The image
    # is shipped exactly once (no 9x im2col blow-up, no 9-wide patch tensor).
    x = x_nchw[:, 0].astype(jnp.float32)
    xp = jnp.pad(x, ((0, 0), (1, 1), (1, 1)))             # (N, H+2, W+2)
    xe = xp[:, :, 0::2]                                   # (N, H+2, W2+1)
    xo = xp[:, :, 1::2]                                   # (N, H+2, W2+1)

    kernel = _make_fused_kernel(NB, H, W, C1, C2, F)

    def _full(a):
        return pl.BlockSpec(a.shape, lambda i: (0,) * a.ndim)

    weights = (fp["conv1"]["w"], fp["conv1"]["c"],
               fp["conv2"]["w"], fp["conv2"]["c"],
               fp["fc1"]["w"], fp["fc1"]["c"],
               fp["fc2"]["w"], fp["fc2"]["b"])

    out = pl.pallas_call(
        kernel,
        out_shape=jax.ShapeDtypeStruct((N, CP), jnp.float32),
        grid_spec=pltpu.PrefetchScalarGridSpec(
            num_scalar_prefetch=0,
            grid=(G,),
            in_specs=[pl.BlockSpec((NB, H + 2, W2 + 1), lambda i: (i, 0, 0)),
                      pl.BlockSpec((NB, H + 2, W2 + 1), lambda i: (i, 0, 0))]
                     + [_full(a) for a in weights],
            out_specs=pl.BlockSpec((NB, CP), lambda i: (i, 0)),
            scratch_shapes=[
                pltpu.VMEM((NB, H2 + 2, W2 + 2, C1), jnp.float32),  # conv2 halo
            ]),
        compiler_params=pltpu.CompilerParams(
            dimension_semantics=("parallel",)),
    )(xe, xo, *weights)

    return out[:, :n_classes]


# ----------------------------------------------------------------------------
# Deterministic synthetic parameters (shapes from CNN.__init__)
# ----------------------------------------------------------------------------
def init_params(key, in_shape, n_classes, fc_units=128):
    H, W = in_shape
    flat_dim = (H // 4) * (W // 4) * 32
    ks = iter(jax.random.split(key, 32))

    def nrm(shape, s=0.1):
        return (s * jax.random.normal(next(ks), shape)).astype(jnp.float32)

    def bn(c):
        return dict(
            gamma=(1.0 + nrm((c,))),
            beta=nrm((c,)),
            mean=nrm((c,)),
            var=(1.0 + 0.1 * jnp.abs(jax.random.normal(next(ks), (c,)))
                 ).astype(jnp.float32),
        )

    p = {}
    p["conv1"] = dict(w=nrm((3, 3, 1, 16)), b=nrm((16,)), **bn(16))
    p["conv2"] = dict(w=nrm((3, 3, 16, 32)), b=nrm((32,)), **bn(32))
    p["fc1"] = dict(w=nrm((flat_dim, fc_units), 0.05), b=nrm((fc_units,)),
                    **bn(fc_units))
    p["fc2"] = dict(w=nrm((fc_units, n_classes), 0.05), b=nrm((n_classes,)))
    return p


# ----------------------------------------------------------------------------
# Pure-JAX reference (for correctness check)
# ----------------------------------------------------------------------------
def reference_forward(x_nchw, p):
    x = jnp.transpose(x_nchw, (0, 2, 3, 1)).astype(jnp.float32)

    def block(x, q):
        y = jax.lax.conv_general_dilated(
            x, q["w"], (1, 1), "SAME",
            dimension_numbers=("NHWC", "HWIO", "NHWC"))
        y = y + q["b"]
        y = (y - q["mean"]) / jnp.sqrt(q["var"] + BN_EPS) * q["gamma"] + q["beta"]
        y = _elu(y)
        return jax.lax.reduce_window(y, -jnp.inf, jax.lax.max,
                                     (1, 2, 2, 1), (1, 2, 2, 1), "VALID")

    x = block(x, p["conv1"])
    x = block(x, p["conv2"])
    N = x.shape[0]
    x = jnp.transpose(x, (0, 3, 1, 2)).reshape(N, -1)      # torch NCHW flatten
    q = p["fc1"]
    h = x @ q["w"] + q["b"]
    h = (h - q["mean"]) / jnp.sqrt(q["var"] + BN_EPS) * q["gamma"] + q["beta"]
    h = _elu(h)
    q2 = p["fc2"]
    return h @ q2["w"] + q2["b"]


if __name__ == "__main__":
    key = jax.random.PRNGKey(0)
    kx, kp = jax.random.split(key)

    N, H, W = 2, 16, 16          # small spatial size consistent with the module
    n_classes = 4
    x = jax.random.normal(kx, (N, 1, H, W), dtype=jnp.float32)  # NCHW like torch
    params = init_params(kp, (H, W), n_classes)
    fused_params = prepare_params(params, (H, W))

    out = jax.block_until_ready(cnn_forward(x, fused_params))
    ref = jax.block_until_ready(reference_forward(x, params))

    assert out.shape == (N, n_classes)
    # bf16 MXU operands (f32 accumulation) -> compare at bf16-level tolerance.
    np.testing.assert_allclose(np.asarray(out), np.asarray(ref),
                               rtol=1e-2, atol=1e-2)
    print("KERNEL_OK")
</pallas_src>

<mosaic_0001>
module attributes {stable_mosaic.version = 11 : i64} {
  func.func @kernel(%arg0: i32, %arg1: memref<2x18x9xf32, #tpu.memory_space<vmem>>, %arg2: memref<2x18x9xf32, #tpu.memory_space<vmem>>, %arg3: memref<9x16xf32, #tpu.memory_space<vmem>>, %arg4: memref<1x16xf32, #tpu.memory_space<vmem>>, %arg5: memref<9x16x32xbf16, #tpu.memory_space<vmem>>, %arg6: memref<1x32xf32, #tpu.memory_space<vmem>>, %arg7: memref<16x32x128xbf16, #tpu.memory_space<vmem>>, %arg8: memref<1x128xf32, #tpu.memory_space<vmem>>, %arg9: memref<128x128xbf16, #tpu.memory_space<vmem>>, %arg10: memref<1x128xf32, #tpu.memory_space<vmem>>, %arg11: memref<2x128xf32, #tpu.memory_space<vmem>>, %arg12: memref<2x10x10x16xf32, #tpu.memory_space<vmem>>) attributes {dimension_semantics = [#tpu.dimension_semantics<parallel>], iteration_bounds = array<i64: 1>, scalar_prefetch = 0 : i64, scratch_operands = 1 : i64, tpu.core_type = #tpu.core_type<tc>, window_params = [{transform_indices = @transform_0, window_bounds = array<i64: 2, 18, 9>}, {transform_indices = @transform_1, window_bounds = array<i64: 2, 18, 9>}, {pipeline_mode = #tpu.pipeline_mode<synchronous>, transform_indices = @transform_2, window_bounds = array<i64: 9, 16>}, {pipeline_mode = #tpu.pipeline_mode<synchronous>, transform_indices = @transform_3, window_bounds = array<i64: 1, 16>}, {pipeline_mode = #tpu.pipeline_mode<synchronous>, transform_indices = @transform_4, window_bounds = array<i64: 9, 16, 32>}, {pipeline_mode = #tpu.pipeline_mode<synchronous>, transform_indices = @transform_5, window_bounds = array<i64: 1, 32>}, {pipeline_mode = #tpu.pipeline_mode<synchronous>, transform_indices = @transform_6, window_bounds = array<i64: 16, 32, 128>}, {pipeline_mode = #tpu.pipeline_mode<synchronous>, transform_indices = @transform_7, window_bounds = array<i64: 1, 128>}, {pipeline_mode = #tpu.pipeline_mode<synchronous>, transform_indices = @transform_8, window_bounds = array<i64: 128, 128>}, {pipeline_mode = #tpu.pipeline_mode<synchronous>, transform_indices = @transform_9, window_bounds = array<i64: 1, 128>}, {transform_indices = @transform_10, window_bounds = array<i64: 2, 128>}]} {
    %cst = arith.constant 0.000000e+00 : f32
    %0 = vector.broadcast %cst : f32 to vector<2x16x8x16xf32>
    %cst_0 = arith.constant 0.000000e+00 : f32
    %1 = vector.broadcast %cst_0 : f32 to vector<2x16x8x16xf32>
    %c0 = arith.constant 0 : index
    %c0_1 = arith.constant 0 : index
    %c0_2 = arith.constant 0 : index
    %2 = vector.load %arg1[%c0, %c0_1, %c0_2] : memref<2x18x9xf32, #tpu.memory_space<vmem>>, vector<2x16x8xf32>
    %3 = vector.shape_cast %2 : vector<2x16x8xf32> to vector<2x16x8x1xf32>
    %c0_3 = arith.constant 0 : index
    %c0_4 = arith.constant 0 : index
    %c0_5 = arith.constant 0 : index
    %4 = vector.load %arg2[%c0_3, %c0_4, %c0_5] : memref<2x18x9xf32, #tpu.memory_space<vmem>>, vector<2x16x8xf32>
    %5 = vector.shape_cast %4 : vector<2x16x8xf32> to vector<2x16x8x1xf32>
    %c0_6 = arith.constant 0 : index
    %c0_7 = arith.constant 0 : index
    %c1 = arith.constant 1 : index
    %6 = vector.load %arg1[%c0_6, %c0_7, %c1] : memref<2x18x9xf32, #tpu.memory_space<vmem>>, vector<2x16x8xf32>
    %7 = vector.shape_cast %6 : vector<2x16x8xf32> to vector<2x16x8x1xf32>
    %c0_8 = arith.constant 0 : index
    %c0_9 = arith.constant 0 : index
    %c1_10 = arith.constant 1 : index
    %8 = vector.load %arg2[%c0_8, %c0_9, %c1_10] : memref<2x18x9xf32, #tpu.memory_space<vmem>>, vector<2x16x8xf32>
    %9 = vector.shape_cast %8 : vector<2x16x8xf32> to vector<2x16x8x1xf32>
    %c0_11 = arith.constant 0 : index
    %c0_12 = arith.constant 0 : index
    %10 = vector.load %arg3[%c0_11, %c0_12] : memref<9x16xf32, #tpu.memory_space<vmem>>, vector<1x16xf32>
    %c1_13 = arith.constant 1 : index
    %c0_14 = arith.constant 0 : index
    %11 = vector.load %arg3[%c1_13, %c0_14] : memref<9x16xf32, #tpu.memory_space<vmem>>, vector<1x16xf32>
    %c2 = arith.constant 2 : index
    %c0_15 = arith.constant 0 : index
    %12 = vector.load %arg3[%c2, %c0_15] : memref<9x16xf32, #tpu.memory_space<vmem>>, vector<1x16xf32>
    %13 = vector.shape_cast %10 : vector<1x16xf32> to vector<1x1x1x16xf32>
    %14 = vector.broadcast %3 : vector<2x16x8x1xf32> to vector<2x16x8x16xf32>
    %15 = vector.broadcast %13 : vector<1x1x1x16xf32> to vector<2x16x8x16xf32>
    %16 = arith.mulf %14, %15 : vector<2x16x8x16xf32>
    %17 = arith.addf %0, %16 : vector<2x16x8x16xf32>
    %18 = vector.shape_cast %11 : vector<1x16xf32> to vector<1x1x1x16xf32>
    %19 = vector.broadcast %5 : vector<2x16x8x1xf32> to vector<2x16x8x16xf32>
    %20 = vector.broadcast %18 : vector<1x1x1x16xf32> to vector<2x16x8x16xf32>
    %21 = arith.mulf %19, %20 : vector<2x16x8x16xf32>
    %22 = arith.addf %17, %21 : vector<2x16x8x16xf32>
    %23 = vector.shape_cast %12 : vector<1x16xf32> to vector<1x1x1x16xf32>
    %24 = vector.broadcast %7 : vector<2x16x8x1xf32> to vector<2x16x8x16xf32>
    %25 = vector.broadcast %23 : vector<1x1x1x16xf32> to vector<2x16x8x16xf32>
    %26 = arith.mulf %24, %25 : vector<2x16x8x16xf32>
    %27 = arith.addf %22, %26 : vector<2x16x8x16xf32>
    %28 = vector.shape_cast %10 : vector<1x16xf32> to vector<1x1x1x16xf32>
    %29 = vector.broadcast %5 : vector<2x16x8x1xf32> to vector<2x16x8x16xf32>
    %30 = vector.broadcast %28 : vector<1x1x1x16xf32> to vector<2x16x8x16xf32>
    %31 = arith.mulf %29, %30 : vector<2x16x8x16xf32>
    %32 = arith.addf %1, %31 : vector<2x16x8x16xf32>
    %33 = vector.shape_cast %11 : vector<1x16xf32> to vector<1x1x1x16xf32>
    %34 = vector.broadcast %7 : vector<2x16x8x1xf32> to vector<2x16x8x16xf32>
    %35 = vector.broadcast %33 : vector<1x1x1x16xf32> to vector<2x16x8x16xf32>
    %36 = arith.mulf %34, %35 : vector<2x16x8x16xf32>
    %37 = arith.addf %32, %36 : vector<2x16x8x16xf32>
    %38 = vector.shape_cast %12 : vector<1x16xf32> to vector<1x1x1x16xf32>
    %39 = vector.broadcast %9 : vector<2x16x8x1xf32> to vector<2x16x8x16xf32>
    %40 = vector.broadcast %38 : vector<1x1x1x16xf32> to vector<2x16x8x16xf32>
    %41 = arith.mulf %39, %40 : vector<2x16x8x16xf32>
    %42 = arith.addf %37, %41 : vector<2x16x8x16xf32>
    %c0_16 = arith.constant 0 : index
    %c1_17 = arith.constant 1 : index
    %c0_18 = arith.constant 0 : index
    %43 = vector.load %arg1[%c0_16, %c1_17, %c0_18] : memref<2x18x9xf32, #tpu.memory_space<vmem>>, vector<2x16x8xf32>
    %44 = vector.shape_cast %43 : vector<2x16x8xf32> to vector<2x16x8x1xf32>
    %c0_19 = arith.constant 0 : index
    %c1_20 = arith.constant 1 : index
    %c0_21 = arith.constant 0 : index
    %45 = vector.load %arg2[%c0_19, %c1_20, %c0_21] : memref<2x18x9xf32, #tpu.memory_space<vmem>>, vector<2x16x8xf32>
    %46 = vector.shape_cast %45 : vector<2x16x8xf32> to vector<2x16x8x1xf32>
    %c0_22 = arith.constant 0 : index
    %c1_23 = arith.constant 1 : index
    %c1_24 = arith.constant 1 : index
    %47 = vector.load %arg1[%c0_22, %c1_23, %c1_24] : memref<2x18x9xf32, #tpu.memory_space<vmem>>, vector<2x16x8xf32>
    %48 = vector.shape_cast %47 : vector<2x16x8xf32> to vector<2x16x8x1xf32>
    %c0_25 = arith.constant 0 : index
    %c1_26 = arith.constant 1 : index
    %c1_27 = arith.constant 1 : index
    %49 = vector.load %arg2[%c0_25, %c1_26, %c1_27] : memref<2x18x9xf32, #tpu.memory_space<vmem>>, vector<2x16x8xf32>
    %50 = vector.shape_cast %49 : vector<2x16x8xf32> to vector<2x16x8x1xf32>
    %c3 = arith.constant 3 : index
    %c0_28 = arith.constant 0 : index
    %51 = vector.load %arg3[%c3, %c0_28] : memref<9x16xf32, #tpu.memory_space<vmem>>, vector<1x16xf32>
    %c4 = arith.constant 4 : index
    %c0_29 = arith.constant 0 : index
    %52 = vector.load %arg3[%c4, %c0_29] : memref<9x16xf32, #tpu.memory_space<vmem>>, vector<1x16xf32>
    %c5 = arith.constant 5 : index
    %c0_30 = arith.constant 0 : index
    %53 = vector.load %arg3[%c5, %c0_30] : memref<9x16xf32, #tpu.memory_space<vmem>>, vector<1x16xf32>
    %54 = vector.shape_cast %51 : vector<1x16xf32> to vector<1x1x1x16xf32>
    %55 = vector.broadcast %44 : vector<2x16x8x1xf32> to vector<2x16x8x16xf32>
    %56 = vector.broadcast %54 : vector<1x1x1x16xf32> to vector<2x16x8x16xf32>
    %57 = arith.mulf %55, %56 : vector<2x16x8x16xf32>
    %58 = arith.addf %27, %57 : vector<2x16x8x16xf32>
    %59 = vector.shape_cast %52 : vector<1x16xf32> to vector<1x1x1x16xf32>
    %60 = vector.broadcast %46 : vector<2x16x8x1xf32> to vector<2x16x8x16xf32>
    %61 = vector.broadcast %59 : vector<1x1x1x16xf32> to vector<2x16x8x16xf32>
    %62 = arith.mulf %60, %61 : vector<2x16x8x16xf32>
    %63 = arith.addf %58, %62 : vector<2x16x8x16xf32>
    %64 = vector.shape_cast %53 : vector<1x16xf32> to vector<1x1x1x16xf32>
    %65 = vector.broadcast %48 : vector<2x16x8x1xf32> to vector<2x16x8x16xf32>
    %66 = vector.broadcast %64 : vector<1x1x1x16xf32> to vector<2x16x8x16xf32>
    %67 = arith.mulf %65, %66 : vector<2x16x8x16xf32>
    %68 = arith.addf %63, %67 : vector<2x16x8x16xf32>
    %69 = vector.shape_cast %51 : vector<1x16xf32> to vector<1x1x1x16xf32>
    %70 = vector.broadcast %46 : vector<2x16x8x1xf32> to vector<2x16x8x16xf32>
    %71 = vector.broadcast %69 : vector<1x1x1x16xf32> to vector<2x16x8x16xf32>
    %72 = arith.mulf %70, %71 : vector<2x16x8x16xf32>
    %73 = arith.addf %42, %72 : vector<2x16x8x16xf32>
    %74 = vector.shape_cast %52 : vector<1x16xf32> to vector<1x1x1x16xf32>
    %75 = vector.broadcast %48 : vector<2x16x8x1xf32> to vector<2x16x8x16xf32>
    %76 = vector.broadcast %74 : vector<1x1x1x16xf32> to vector<2x16x8x16xf32>
    %77 = arith.mulf %75, %76 : vector<2x16x8x16xf32>
    %78 = arith.addf %73, %77 : vector<2x16x8x16xf32>
    %79 = vector.shape_cast %53 : vector<1x16xf32> to vector<1x1x1x16xf32>
    %80 = vector.broadcast %50 : vector<2x16x8x1xf32> to vector<2x16x8x16xf32>
    %81 = vector.broadcast %79 : vector<1x1x1x16xf32> to vector<2x16x8x16xf32>
    %82 = arith.mulf %80, %81 : vector<2x16x8x16xf32>
    %83 = arith.addf %78, %82 : vector<2x16x8x16xf32>
    %c0_31 = arith.constant 0 : index
    %c2_32 = arith.constant 2 : index
    %c0_33 = arith.constant 0 : index
    %84 = vector.load %arg1[%c0_31, %c2_32, %c0_33] : memref<2x18x9xf32, #tpu.memory_space<vmem>>, vector<2x16x8xf32>
    %85 = vector.shape_cast %84 : vector<2x16x8xf32> to vector<2x16x8x1xf32>
    %c0_34 = arith.constant 0 : index
    %c2_35 = arith.constant 2 : index
    %c0_36 = arith.constant 0 : index
    %86 = vector.load %arg2[%c0_34, %c2_35, %c0_36] : memref<2x18x9xf32, #tpu.memory_space<vmem>>, vector<2x16x8xf32>
    %87 = vector.shape_cast %86 : vector<2x16x8xf32> to vector<2x16x8x1xf32>
    %c0_37 = arith.constant 0 : index
    %c2_38 = arith.constant 2 : index
    %c1_39 = arith.constant 1 : index
    %88 = vector.load %arg1[%c0_37, %c2_38, %c1_39] : memref<2x18x9xf32, #tpu.memory_space<vmem>>, vector<2x16x8xf32>
    %89 = vector.shape_cast %88 : vector<2x16x8xf32> to vector<2x16x8x1xf32>
    %c0_40 = arith.constant 0 : index
    %c2_41 = arith.constant 2 : index
    %c1_42 = arith.constant 1 : index
    %90 = vector.load %arg2[%c0_40, %c2_41, %c1_42] : memref<2x18x9xf32, #tpu.memory_space<vmem>>, vector<2x16x8xf32>
    %91 = vector.shape_cast %90 : vector<2x16x8xf32> to vector<2x16x8x1xf32>
    %c6 = arith.constant 6 : index
    %c0_43 = arith.constant 0 : index
    %92 = vector.load %arg3[%c6, %c0_43] : memref<9x16xf32, #tpu.memory_space<vmem>>, vector<1x16xf32>
    %c7 = arith.constant 7 : index
    %c0_44 = arith.constant 0 : index
    %93 = vector.load %arg3[%c7, %c0_44] : memref<9x16xf32, #tpu.memory_space<vmem>>, vector<1x16xf32>
    %c8 = arith.constant 8 : index
    %c0_45 = arith.constant 0 : index
    %94 = vector.load %arg3[%c8, %c0_45] : memref<9x16xf32, #tpu.memory_space<vmem>>, vector<1x16xf32>
    %95 = vector.shape_cast %92 : vector<1x16xf32> to vector<1x1x1x16xf32>
    %96 = vector.broadcast %85 : vector<2x16x8x1xf32> to vector<2x16x8x16xf32>
    %97 = vector.broadcast %95 : vector<1x1x1x16xf32> to vector<2x16x8x16xf32>
    %98 = arith.mulf %96, %97 : vector<2x16x8x16xf32>
    %99 = arith.addf %68, %98 : vector<2x16x8x16xf32>
    %100 = vector.shape_cast %93 : vector<1x16xf32> to vector<1x1x1x16xf32>
    %101 = vector.broadcast %87 : vector<2x16x8x1xf32> to vector<2x16x8x16xf32>
    %102 = vector.broadcast %100 : vector<1x1x1x16xf32> to vector<2x16x8x16xf32>
    %103 = arith.mulf %101, %102 : vector<2x16x8x16xf32>
    %104 = arith.addf %99, %103 : vector<2x16x8x16xf32>
    %105 = vector.shape_cast %94 : vector<1x16xf32> to vector<1x1x1x16xf32>
    %106 = vector.broadcast %89 : vector<2x16x8x1xf32> to vector<2x16x8x16xf32>
    %107 = vector.broadcast %105 : vector<1x1x1x16xf32> to vector<2x16x8x16xf32>
    %108 = arith.mulf %106, %107 : vector<2x16x8x16xf32>
    %109 = arith.addf %104, %108 : vector<2x16x8x16xf32>
    %110 = vector.shape_cast %92 : vector<1x16xf32> to vector<1x1x1x16xf32>
    %111 = vector.broadcast %87 : vector<2x16x8x1xf32> to vector<2x16x8x16xf32>
    %112 = vector.broadcast %110 : vector<1x1x1x16xf32> to vector<2x16x8x16xf32>
    %113 = arith.mulf %111, %112 : vector<2x16x8x16xf32>
    %114 = arith.addf %83, %113 : vector<2x16x8x16xf32>
    %115 = vector.shape_cast %93 : vector<1x16xf32> to vector<1x1x1x16xf32>
    %116 = vector.broadcast %89 : vector<2x16x8x1xf32> to vector<2x16x8x16xf32>
    %117 = vector.broadcast %115 : vector<1x1x1x16xf32> to vector<2x16x8x16xf32>
    %118 = arith.mulf %116, %117 : vector<2x16x8x16xf32>
    %119 = arith.addf %114, %118 : vector<2x16x8x16xf32>
    %120 = vector.shape_cast %94 : vector<1x16xf32> to vector<1x1x1x16xf32>
    %121 = vector.broadcast %91 : vector<2x16x8x1xf32> to vector<2x16x8x16xf32>
    %122 = vector.broadcast %120 : vector<1x1x1x16xf32> to vector<2x16x8x16xf32>
    %123 = arith.mulf %121, %122 : vector<2x16x8x16xf32>
    %124 = arith.addf %119, %123 : vector<2x16x8x16xf32>
    %125 = arith.maximumf %109, %124 : vector<2x16x8x16xf32>
    %126 = vector.shape_cast %125 : vector<2x16x8x16xf32> to vector<2x8x2x8x16xf32>
    %127 = vector.extract_strided_slice %126 {offsets = [0, 0, 0, 0, 0], sizes = [2, 8, 1, 8, 16], strides = [1, 1, 1, 1, 1]} : vector<2x8x2x8x16xf32> to vector<2x8x1x8x16xf32>
    %128 = vector.shape_cast %127 : vector<2x8x1x8x16xf32> to vector<2x8x8x16xf32>
    %129 = vector.extract_strided_slice %126 {offsets = [0, 0, 1, 0, 0], sizes = [2, 8, 1, 8, 16], strides = [1, 1, 1, 1, 1]} : vector<2x8x2x8x16xf32> to vector<2x8x1x8x16xf32>
    %130 = vector.shape_cast %129 : vector<2x8x1x8x16xf32> to vector<2x8x8x16xf32>
    %131 = arith.maximumf %128, %130 : vector<2x8x8x16xf32>
    %c0_46 = arith.constant 0 : index
    %c0_47 = arith.constant 0 : index
    %132 = vector.load %arg4[%c0_46, %c0_47] : memref<1x16xf32, #tpu.memory_space<vmem>>, vector<1x16xf32>
    %133 = vector.shape_cast %132 : vector<1x16xf32> to vector<1x1x1x16xf32>
    %134 = vector.broadcast %133 : vector<1x1x1x16xf32> to vector<2x8x8x16xf32>
    %135 = arith.addf %131, %134 : vector<2x8x8x16xf32>
    %cst_48 = arith.constant 0.000000e+00 : f32
    %136 = vector.broadcast %cst_48 : f32 to vector<2x8x8x16xf32>
    %137 = arith.cmpf ogt, %135, %136 : vector<2x8x8x16xf32>
    %138 = math.exp %135 : vector<2x8x8x16xf32>
    %cst_49 = arith.constant 1.000000e+00 : f32
    %139 = vector.broadcast %cst_49 : f32 to vector<2x8x8x16xf32>
    %140 = arith.subf %138, %139 : vector<2x8x8x16xf32>
    %141 = arith.select %137, %135, %140 : vector<2x8x8x16xi1>, vector<2x8x8x16xf32>
    %cst_50 = arith.constant 0.000000e+00 : f32
    %142 = vector.broadcast %cst_50 : f32 to vector<2x1x10x16xf32>
    %c0_51 = arith.constant 0 : index
    %c0_52 = arith.constant 0 : index
    %c0_53 = arith.constant 0 : index
    %c0_54 = arith.constant 0 : index
    %143 = vector.load %arg12[%c0_51, %c0_52, %c0_53, %c0_54] : memref<2x10x10x16xf32, #tpu.memory_space<vmem>>, vector<2x1x10x16xf32>
    tpu.vector_store %arg12[%c0_51, %c0_52, %c0_53, %c0_54], %142 {strides = array<i32>} : memref<2x10x10x16xf32, #tpu.memory_space<vmem>>, vector<2x1x10x16xf32>,
    %cst_55 = arith.constant 0.000000e+00 : f32
    %144 = vector.broadcast %cst_55 : f32 to vector<2x1x10x16xf32>
    %c0_56 = arith.constant 0 : index
    %c9 = arith.constant 9 : index
    %c0_57 = arith.constant 0 : index
    %c0_58 = arith.constant 0 : index
    %145 = vector.load %arg12[%c0_56, %c9, %c0_57, %c0_58] : memref<2x10x10x16xf32, #tpu.memory_space<vmem>>, vector<2x1x10x16xf32>
    tpu.vector_store %arg12[%c0_56, %c9, %c0_57, %c0_58], %144 {strides = array<i32>} : memref<2x10x10x16xf32, #tpu.memory_space<vmem>>, vector<2x1x10x16xf32>,
    %cst_59 = arith.constant 0.000000e+00 : f32
    %146 = vector.broadcast %cst_59 : f32 to vector<2x8x1x16xf32>
    %c0_60 = arith.constant 0 : index
    %c1_61 = arith.constant 1 : index
    %c0_62 = arith.constant 0 : index
    %c0_63 = arith.constant 0 : index
    %147 = vector.load %arg12[%c0_60, %c1_61, %c0_62, %c0_63] : memref<2x10x10x16xf32, #tpu.memory_space<vmem>>, vector<2x8x1x16xf32>
    tpu.vector_store %arg12[%c0_60, %c1_61, %c0_62, %c0_63], %146 {strides = array<i32>} : memref<2x10x10x16xf32, #tpu.memory_space<vmem>>, vector<2x8x1x16xf32>,
    %cst_64 = arith.constant 0.000000e+00 : f32
    %148 = vector.broadcast %cst_64 : f32 to vector<2x8x1x16xf32>
    %c0_65 = arith.constant 0 : index
    %c1_66 = arith.constant 1 : index
    %c9_67 = arith.constant 9 : index
    %c0_68 = arith.constant 0 : index
    %149 = vector.load %arg12[%c0_65, %c1_66, %c9_67, %c0_68] : memref<2x10x10x16xf32, #tpu.memory_space<vmem>>, vector<2x8x1x16xf32>
    tpu.vector_store %arg12[%c0_65, %c1_66, %c9_67, %c0_68], %148 {strides = array<i32>} : memref<2x10x10x16xf32, #tpu.memory_space<vmem>>, vector<2x8x1x16xf32>,
    %c0_69 = arith.constant 0 : index
    %c1_70 = arith.constant 1 : index
    %c1_71 = arith.constant 1 : index
    %c0_72 = arith.constant 0 : index
    %150 = vector.load %arg12[%c0_69, %c1_70, %c1_71, %c0_72] : memref<2x10x10x16xf32, #tpu.memory_space<vmem>>, vector<2x8x8x16xf32>
    tpu.vector_store %arg12[%c0_69, %c1_70, %c1_71, %c0_72], %141 {strides = array<i32>} : memref<2x10x10x16xf32, #tpu.memory_space<vmem>>, vector<2x8x8x16xf32>,
    %cst_73 = arith.constant 0.000000e+00 : f32
    %151 = vector.broadcast %cst_73 : f32 to vector<128x32xf32>
    %c0_74 = arith.constant 0 : index
    %c0_75 = arith.constant 0 : index
    %c0_76 = arith.constant 0 : index
    %c0_77 = arith.constant 0 : index
    %152 = vector.load %arg12[%c0_74, %c0_75, %c0_76, %c0_77] : memref<2x10x10x16xf32, #tpu.memory_space<vmem>>, vector<2x8x8x16xf32>
    %153 = arith.truncf %152 : vector<2x8x8x16xf32> to vector<2x8x8x16xbf16>
    %154 = vector.shape_cast %153 : vector<2x8x8x16xbf16> to vector<128x16xbf16>
    %c0_78 = arith.constant 0 : index
    %c0_79 = arith.constant 0 : index
    %c0_80 = arith.constant 0 : index
    %155 = vector.load %arg5[%c0_78, %c0_79, %c0_80] : memref<9x16x32xbf16, #tpu.memory_space<vmem>>, vector<1x16x32xbf16>
    %156 = vector.shape_cast %155 : vector<1x16x32xbf16> to vector<16x32xbf16>
    %cst_81 = arith.constant dense<0.000000e+00> : vector<128x32xf32>
    %157 = tpu.matmul %154, %156, %cst_81 {dimension_numbers = #tpu.dot_dimension_numbers<[1], [0], [0], [1], [0, 0, 1, 1], [], []>} : vector<128x16xbf16>, vector<16x32xbf16>, vector<128x32xf32> -> vector<128x32xf32>
    %158 = arith.addf %151, %157 : vector<128x32xf32>
    %c0_82 = arith.constant 0 : index
    %c0_83 = arith.constant 0 : index
    %c1_84 = arith.constant 1 : index
    %c0_85 = arith.constant 0 : index
    %159 = vector.load %arg12[%c0_82, %c0_83, %c1_84, %c0_85] : memref<2x10x10x16xf32, #tpu.memory_space<vmem>>, vector<2x8x8x16xf32>
    %160 = arith.truncf %159 : vector<2x8x8x16xf32> to vector<2x8x8x16xbf16>
    %161 = vector.shape_cast %160 : vector<2x8x8x16xbf16> to vector<128x16xbf16>
    %c1_86 = arith.constant 1 : index
    %c0_87 = arith.constant 0 : index
    %c0_88 = arith.constant 0 : index
    %162 = vector.load %arg5[%c1_86, %c0_87, %c0_88] : memref<9x16x32xbf16, #tpu.memory_space<vmem>>, vector<1x16x32xbf16>
    %163 = vector.shape_cast %162 : vector<1x16x32xbf16> to vector<16x32xbf16>
    %cst_89 = arith.constant dense<0.000000e+00> : vector<128x32xf32>
    %164 = tpu.matmul %161, %163, %cst_89 {dimension_numbers = #tpu.dot_dimension_numbers<[1], [0], [0], [1], [0, 0, 1, 1], [], []>} : vector<128x16xbf16>, vector<16x32xbf16>, vector<128x32xf32> -> vector<128x32xf32>
    %165 = arith.addf %158, %164 : vector<128x32xf32>
    %c0_90 = arith.constant 0 : index
    %c0_91 = arith.constant 0 : index
    %c2_92 = arith.constant 2 : index
    %c0_93 = arith.constant 0 : index
    %166 = vector.load %arg12[%c0_90, %c0_91, %c2_92, %c0_93] : memref<2x10x10x16xf32, #tpu.memory_space<vmem>>, vector<2x8x8x16xf32>
    %167 = arith.truncf %166 : vector<2x8x8x16xf32> to vector<2x8x8x16xbf16>
    %168 = vector.shape_cast %167 : vector<2x8x8x16xbf16> to vector<128x16xbf16>
    %c2_94 = arith.constant 2 : index
    %c0_95 = arith.constant 0 : index
    %c0_96 = arith.constant 0 : index
    %169 = vector.load %arg5[%c2_94, %c0_95, %c0_96] : memref<9x16x32xbf16, #tpu.memory_space<vmem>>, vector<1x16x32xbf16>
    %170 = vector.shape_cast %169 : vector<1x16x32xbf16> to vector<16x32xbf16>
    %cst_97 = arith.constant dense<0.000000e+00> : vector<128x32xf32>
    %171 = tpu.matmul %168, %170, %cst_97 {dimension_numbers = #tpu.dot_dimension_numbers<[1], [0], [0], [1], [0, 0, 1, 1], [], []>} : vector<128x16xbf16>, vector<16x32xbf16>, vector<128x32xf32> -> vector<128x32xf32>
    %172 = arith.addf %165, %171 : vector<128x32xf32>
    %c0_98 = arith.constant 0 : index
    %c1_99 = arith.constant 1 : index
    %c0_100 = arith.constant 0 : index
    %c0_101 = arith.constant 0 : index
    %173 = vector.load %arg12[%c0_98, %c1_99, %c0_100, %c0_101] : memref<2x10x10x16xf32, #tpu.memory_space<vmem>>, vector<2x8x8x16xf32>
    %174 = arith.truncf %173 : vector<2x8x8x16xf32> to vector<2x8x8x16xbf16>
    %175 = vector.shape_cast %174 : vector<2x8x8x16xbf16> to vector<128x16xbf16>
    %c3_102 = arith.constant 3 : index
    %c0_103 = arith.constant 0 : index
    %c0_104 = arith.constant 0 : index
    %176 = vector.load %arg5[%c3_102, %c0_103, %c0_104] : memref<9x16x32xbf16, #tpu.memory_space<vmem>>, vector<1x16x32xbf16>
    %177 = vector.shape_cast %176 : vector<1x16x32xbf16> to vector<16x32xbf16>
    %cst_105 = arith.constant dense<0.000000e+00> : vector<128x32xf32>
    %178 = tpu.matmul %175, %177, %cst_105 {dimension_numbers = #tpu.dot_dimension_numbers<[1], [0], [0], [1], [0, 0, 1, 1], [], []>} : vector<128x16xbf16>, vector<16x32xbf16>, vector<128x32xf32> -> vector<128x32xf32>
    %179 = arith.addf %172, %178 : vector<128x32xf32>
    %c0_106 = arith.constant 0 : index
    %c1_107 = arith.constant 1 : index
    %c1_108 = arith.constant 1 : index
    %c0_109 = arith.constant 0 : index
    %180 = vector.load %arg12[%c0_106, %c1_107, %c1_108, %c0_109] : memref<2x10x10x16xf32, #tpu.memory_space<vmem>>, vector<2x8x8x16xf32>
    %181 = arith.truncf %180 : vector<2x8x8x16xf32> to vector<2x8x8x16xbf16>
    %182 = vector.shape_cast %181 : vector<2x8x8x16xbf16> to vector<128x16xbf16>
    %c4_110 = arith.constant 4 : index
    %c0_111 = arith.constant 0 : index
    %c0_112 = arith.constant 0 : index
    %183 = vector.load %arg5[%c4_110, %c0_111, %c0_112] : memref<9x16x32xbf16, #tpu.memory_space<vmem>>, vector<1x16x32xbf16>
    %184 = vector.shape_cast %183 : vector<1x16x32xbf16> to vector<16x32xbf16>
    %cst_113 = arith.constant dense<0.000000e+00> : vector<128x32xf32>
    %185 = tpu.matmul %182, %184, %cst_113 {dimension_numbers = #tpu.dot_dimension_numbers<[1], [0], [0], [1], [0, 0, 1, 1], [], []>} : vector<128x16xbf16>, vector<16x32xbf16>, vector<128x32xf32> -> vector<128x32xf32>
    %186 = arith.addf %179, %185 : vector<128x32xf32>
    %c0_114 = arith.constant 0 : index
    %c1_115 = arith.constant 1 : index
    %c2_116 = arith.constant 2 : index
    %c0_117 = arith.constant 0 : index
    %187 = vector.load %arg12[%c0_114, %c1_115, %c2_116, %c0_117] : memref<2x10x10x16xf32, #tpu.memory_space<vmem>>, vector<2x8x8x16xf32>
    %188 = arith.truncf %187 : vector<2x8x8x16xf32> to vector<2x8x8x16xbf16>
    %189 = vector.shape_cast %188 : vector<2x8x8x16xbf16> to vector<128x16xbf16>
    %c5_118 = arith.constant 5 : index
    %c0_119 = arith.constant 0 : index
    %c0_120 = arith.constant 0 : index
    %190 = vector.load %arg5[%c5_118, %c0_119, %c0_120] : memref<9x16x32xbf16, #tpu.memory_space<vmem>>, vector<1x16x32xbf16>
    %191 = vector.shape_cast %190 : vector<1x16x32xbf16> to vector<16x32xbf16>
    %cst_121 = arith.constant dense<0.000000e+00> : vector<128x32xf32>
    %192 = tpu.matmul %189, %191, %cst_121 {dimension_numbers = #tpu.dot_dimension_numbers<[1], [0], [0], [1], [0, 0, 1, 1], [], []>} : vector<128x16xbf16>, vector<16x32xbf16>, vector<128x32xf32> -> vector<128x32xf32>
    %193 = arith.addf %186, %192 : vector<128x32xf32>
    %c0_122 = arith.constant 0 : index
    %c2_123 = arith.constant 2 : index
    %c0_124 = arith.constant 0 : index
    %c0_125 = arith.constant 0 : index
    %194 = vector.load %arg12[%c0_122, %c2_123, %c0_124, %c0_125] : memref<2x10x10x16xf32, #tpu.memory_space<vmem>>, vector<2x8x8x16xf32>
    %195 = arith.truncf %194 : vector<2x8x8x16xf32> to vector<2x8x8x16xbf16>
    %196 = vector.shape_cast %195 : vector<2x8x8x16xbf16> to vector<128x16xbf16>
    %c6_126 = arith.constant 6 : index
    %c0_127 = arith.constant 0 : index
    %c0_128 = arith.constant 0 : index
    %197 = vector.load %arg5[%c6_126, %c0_127, %c0_128] : memref<9x16x32xbf16, #tpu.memory_space<vmem>>, vector<1x16x32xbf16>
    %198 = vector.shape_cast %197 : vector<1x16x32xbf16> to vector<16x32xbf16>
    %cst_129 = arith.constant dense<0.000000e+00> : vector<128x32xf32>
    %199 = tpu.matmul %196, %198, %cst_129 {dimension_numbers = #tpu.dot_dimension_numbers<[1], [0], [0], [1], [0, 0, 1, 1], [], []>} : vector<128x16xbf16>, vector<16x32xbf16>, vector<128x32xf32> -> vector<128x32xf32>
    %200 = arith.addf %193, %199 : vector<128x32xf32>
    %c0_130 = arith.constant 0 : index
    %c2_131 = arith.constant 2 : index
    %c1_132 = arith.constant 1 : index
    %c0_133 = arith.constant 0 : index
    %201 = vector.load %arg12[%c0_130, %c2_131, %c1_132, %c0_133] : memref<2x10x10x16xf32, #tpu.memory_space<vmem>>, vector<2x8x8x16xf32>
    %202 = arith.truncf %201 : vector<2x8x8x16xf32> to vector<2x8x8x16xbf16>
    %203 = vector.shape_cast %202 : vector<2x8x8x16xbf16> to vector<128x16xbf16>
    %c7_134 = arith.constant 7 : index
    %c0_135 = arith.constant 0 : index
    %c0_136 = arith.constant 0 : index
    %204 = vector.load %arg5[%c7_134, %c0_135, %c0_136] : memref<9x16x32xbf16, #tpu.memory_space<vmem>>, vector<1x16x32xbf16>
    %205 = vector.shape_cast %204 : vector<1x16x32xbf16> to vector<16x32xbf16>
    %cst_137 = arith.constant dense<0.000000e+00> : vector<128x32xf32>
    %206 = tpu.matmul %203, %205, %cst_137 {dimension_numbers = #tpu.dot_dimension_numbers<[1], [0], [0], [1], [0, 0, 1, 1], [], []>} : vector<128x16xbf16>, vector<16x32xbf16>, vector<128x32xf32> -> vector<128x32xf32>
    %207 = arith.addf %200, %206 : vector<128x32xf32>
    %c0_138 = arith.constant 0 : index
    %c2_139 = arith.constant 2 : index
    %c2_140 = arith.constant 2 : index
    %c0_141 = arith.constant 0 : index
    %208 = vector.load %arg12[%c0_138, %c2_139, %c2_140, %c0_141] : memref<2x10x10x16xf32, #tpu.memory_space<vmem>>, vector<2x8x8x16xf32>
    %209 = arith.truncf %208 : vector<2x8x8x16xf32> to vector<2x8x8x16xbf16>
    %210 = vector.shape_cast %209 : vector<2x8x8x16xbf16> to vector<128x16xbf16>
    %c8_142 = arith.constant 8 : index
    %c0_143 = arith.constant 0 : index
    %c0_144 = arith.constant 0 : index
    %211 = vector.load %arg5[%c8_142, %c0_143, %c0_144] : memref<9x16x32xbf16, #tpu.memory_space<vmem>>, vector<1x16x32xbf16>
    %212 = vector.shape_cast %211 : vector<1x16x32xbf16> to vector<16x32xbf16>
    %cst_145 = arith.constant dense<0.000000e+00> : vector<128x32xf32>
    %213 = tpu.matmul %210, %212, %cst_145 {dimension_numbers = #tpu.dot_dimension_numbers<[1], [0], [0], [1], [0, 0, 1, 1], [], []>} : vector<128x16xbf16>, vector<16x32xbf16>, vector<128x32xf32> -> vector<128x32xf32>
    %214 = arith.addf %207, %213 : vector<128x32xf32>
    %215 = vector.shape_cast %214 : vector<128x32xf32> to vector<2x4x2x8x32xf32>
    %216 = vector.extract_strided_slice %215 {offsets = [0, 0, 0, 0, 0], sizes = [2, 4, 1, 8, 32], strides = [1, 1, 1, 1, 1]} : vector<2x4x2x8x32xf32> to vector<2x4x1x8x32xf32>
    %217 = vector.shape_cast %216 : vector<2x4x1x8x32xf32> to vector<2x4x8x32xf32>
    %218 = vector.extract_strided_slice %215 {offsets = [0, 0, 1, 0, 0], sizes = [2, 4, 1, 8, 32], strides = [1, 1, 1, 1, 1]} : vector<2x4x2x8x32xf32> to vector<2x4x1x8x32xf32>
    %219 = vector.shape_cast %218 : vector<2x4x1x8x32xf32> to vector<2x4x8x32xf32>
    %220 = arith.maximumf %217, %219 : vector<2x4x8x32xf32>
    %c0_146 = arith.constant 0 : index
    %c0_147 = arith.constant 0 : index
    %221 = vector.load %arg6[%c0_146, %c0_147] : memref<1x32xf32, #tpu.memory_space<vmem>>, vector<1x32xf32>
    %222 = vector.shape_cast %221 : vector<1x32xf32> to vector<1x1x1x32xf32>
    %223 = vector.broadcast %222 : vector<1x1x1x32xf32> to vector<2x4x8x32xf32>
    %224 = arith.addf %220, %223 : vector<2x4x8x32xf32>
    %cst_148 = arith.constant 0.000000e+00 : f32
    %225 = vector.broadcast %cst_148 : f32 to vector<2x4x8x32xf32>
    %226 = arith.cmpf ogt, %224, %225 : vector<2x4x8x32xf32>
    %227 = math.exp %224 : vector<2x4x8x32xf32>
    %cst_149 = arith.constant 1.000000e+00 : f32
    %228 = vector.broadcast %cst_149 : f32 to vector<2x4x8x32xf32>
    %229 = arith.subf %227, %228 : vector<2x4x8x32xf32>
    %230 = arith.select %226, %224, %229 : vector<2x4x8x32xi1>, vector<2x4x8x32xf32>
    %231 = vector.extract_strided_slice %230 {offsets = [0, 0, 0, 0], sizes = [2, 4, 7, 32], strides = [1, 1, 1, 1]} : vector<2x4x8x32xf32> to vector<2x4x7x32xf32>
    %232 = vector.extract_strided_slice %230 {offsets = [0, 0, 1, 0], sizes = [2, 4, 7, 32], strides = [1, 1, 1, 1]} : vector<2x4x8x32xf32> to vector<2x4x7x32xf32>
    %233 = arith.maximumf %231, %232 : vector<2x4x7x32xf32>
    %234 = arith.truncf %233 : vector<2x4x7x32xf32> to vector<2x4x7x32xbf16>
    %cst_150 = arith.constant 0.000000e+00 : f32
    %235 = vector.broadcast %cst_150 : f32 to vector<2x128xf32>
    %236 = vector.extract_strided_slice %234 {offsets = [0, 0, 0, 0], sizes = [2, 1, 1, 32], strides = [1, 1, 1, 1]} : vector<2x4x7x32xbf16> to vector<2x1x1x32xbf16>
    %237 = vector.shape_cast %236 : vector<2x1x1x32xbf16> to vector<2x32xbf16>
    %c0_151 = arith.constant 0 : index
    %c0_152 = arith.constant 0 : index
    %c0_153 = arith.constant 0 : index
    %238 = vector.load %arg7[%c0_151, %c0_152, %c0_153] : memref<16x32x128xbf16, #tpu.memory_space<vmem>>, vector<1x32x128xbf16>
    %239 = vector.shape_cast %238 : vector<1x32x128xbf16> to vector<32x128xbf16>
    %cst_154 = arith.constant dense<0.000000e+00> : vector<2x128xf32>
    %240 = tpu.matmul %237, %239, %cst_154 {dimension_numbers = #tpu.dot_dimension_numbers<[1], [0], [0], [1], [0, 0, 1, 1], [], []>} : vector<2x32xbf16>, vector<32x128xbf16>, vector<2x128xf32> -> vector<2x128xf32>
    %241 = arith.addf %235, %240 : vector<2x128xf32>
    %242 = vector.extract_strided_slice %234 {offsets = [0, 0, 2, 0], sizes = [2, 1, 1, 32], strides = [1, 1, 1, 1]} : vector<2x4x7x32xbf16> to vector<2x1x1x32xbf16>
    %243 = vector.shape_cast %242 : vector<2x1x1x32xbf16> to vector<2x32xbf16>
    %c1_155 = arith.constant 1 : index
    %c0_156 = arith.constant 0 : index
    %c0_157 = arith.constant 0 : index
    %244 = vector.load %arg7[%c1_155, %c0_156, %c0_157] : memref<16x32x128xbf16, #tpu.memory_space<vmem>>, vector<1x32x128xbf16>
    %245 = vector.shape_cast %244 : vector<1x32x128xbf16> to vector<32x128xbf16>
    %cst_158 = arith.constant dense<0.000000e+00> : vector<2x128xf32>
    %246 = tpu.matmul %243, %245, %cst_158 {dimension_numbers = #tpu.dot_dimension_numbers<[1], [0], [0], [1], [0, 0, 1, 1], [], []>} : vector<2x32xbf16>, vector<32x128xbf16>, vector<2x128xf32> -> vector<2x128xf32>
    %247 = arith.addf %241, %246 : vector<2x128xf32>
    %248 = vector.extract_strided_slice %234 {offsets = [0, 0, 4, 0], sizes = [2, 1, 1, 32], strides = [1, 1, 1, 1]} : vector<2x4x7x32xbf16> to vector<2x1x1x32xbf16>
    %249 = vector.shape_cast %248 : vector<2x1x1x32xbf16> to vector<2x32xbf16>
    %c2_159 = arith.constant 2 : index
    %c0_160 = arith.constant 0 : index
    %c0_161 = arith.constant 0 : index
    %250 = vector.load %arg7[%c2_159, %c0_160, %c0_161] : memref<16x32x128xbf16, #tpu.memory_space<vmem>>, vector<1x32x128xbf16>
    %251 = vector.shape_cast %250 : vector<1x32x128xbf16> to vector<32x128xbf16>
    %cst_162 = arith.constant dense<0.000000e+00> : vector<2x128xf32>
    %252 = tpu.matmul %249, %251, %cst_162 {dimension_numbers = #tpu.dot_dimension_numbers<[1], [0], [0], [1], [0, 0, 1, 1], [], []>} : vector<2x32xbf16>, vector<32x128xbf16>, vector<2x128xf32> -> vector<2x128xf32>
    %253 = arith.addf %247, %252 : vector<2x128xf32>
    %254 = vector.extract_strided_slice %234 {offsets = [0, 0, 6, 0], sizes = [2, 1, 1, 32], strides = [1, 1, 1, 1]} : vector<2x4x7x32xbf16> to vector<2x1x1x32xbf16>
    %255 = vector.shape_cast %254 : vector<2x1x1x32xbf16> to vector<2x32xbf16>
    %c3_163 = arith.constant 3 : index
    %c0_164 = arith.constant 0 : index
    %c0_165 = arith.constant 0 : index
    %256 = vector.load %arg7[%c3_163, %c0_164, %c0_165] : memref<16x32x128xbf16, #tpu.memory_space<vmem>>, vector<1x32x128xbf16>
    %257 = vector.shape_cast %256 : vector<1x32x128xbf16> to vector<32x128xbf16>
    %cst_166 = arith.constant dense<0.000000e+00> : vector<2x128xf32>
    %258 = tpu.matmul %255, %257, %cst_166 {dimension_numbers = #tpu.dot_dimension_numbers<[1], [0], [0], [1], [0, 0, 1, 1], [], []>} : vector<2x32xbf16>, vector<32x128xbf16>, vector<2x128xf32> -> vector<2x128xf32>
    %259 = arith.addf %253, %258 : vector<2x128xf32>
    %260 = vector.extract_strided_slice %234 {offsets = [0, 1, 0, 0], sizes = [2, 1, 1, 32], strides = [1, 1, 1, 1]} : vector<2x4x7x32xbf16> to vector<2x1x1x32xbf16>
    %261 = vector.shape_cast %260 : vector<2x1x1x32xbf16> to vector<2x32xbf16>
    %c4_167 = arith.constant 4 : index
    %c0_168 = arith.constant 0 : index
    %c0_169 = arith.constant 0 : index
    %262 = vector.load %arg7[%c4_167, %c0_168, %c0_169] : memref<16x32x128xbf16, #tpu.memory_space<vmem>>, vector<1x32x128xbf16>
    %263 = vector.shape_cast %262 : vector<1x32x128xbf16> to vector<32x128xbf16>
    %cst_170 = arith.constant dense<0.000000e+00> : vector<2x128xf32>
    %264 = tpu.matmul %261, %263, %cst_170 {dimension_numbers = #tpu.dot_dimension_numbers<[1], [0], [0], [1], [0, 0, 1, 1], [], []>} : vector<2x32xbf16>, vector<32x128xbf16>, vector<2x128xf32> -> vector<2x128xf32>
    %265 = arith.addf %259, %264 : vector<2x128xf32>
    %266 = vector.extract_strided_slice %234 {offsets = [0, 1, 2, 0], sizes = [2, 1, 1, 32], strides = [1, 1, 1, 1]} : vector<2x4x7x32xbf16> to vector<2x1x1x32xbf16>
    %267 = vector.shape_cast %266 : vector<2x1x1x32xbf16> to vector<2x32xbf16>
    %c5_171 = arith.constant 5 : index
    %c0_172 = arith.constant 0 : index
    %c0_173 = arith.constant 0 : index
    %268 = vector.load %arg7[%c5_171, %c0_172, %c0_173] : memref<16x32x128xbf16, #tpu.memory_space<vmem>>, vector<1x32x128xbf16>
    %269 = vector.shape_cast %268 : vector<1x32x128xbf16> to vector<32x128xbf16>
    %cst_174 = arith.constant dense<0.000000e+00> : vector<2x128xf32>
    %270 = tpu.matmul %267, %269, %cst_174 {dimension_numbers = #tpu.dot_dimension_numbers<[1], [0], [0], [1], [0, 0, 1, 1], [], []>} : vector<2x32xbf16>, vector<32x128xbf16>, vector<2x128xf32> -> vector<2x128xf32>
    %271 = arith.addf %265, %270 : vector<2x128xf32>
    %272 = vector.extract_strided_slice %234 {offsets = [0, 1, 4, 0], sizes = [2, 1, 1, 32], strides = [1, 1, 1, 1]} : vector<2x4x7x32xbf16> to vector<2x1x1x32xbf16>
    %273 = vector.shape_cast %272 : vector<2x1x1x32xbf16> to vector<2x32xbf16>
    %c6_175 = arith.constant 6 : index
    %c0_176 = arith.constant 0 : index
    %c0_177 = arith.constant 0 : index
    %274 = vector.load %arg7[%c6_175, %c0_176, %c0_177] : memref<16x32x128xbf16, #tpu.memory_space<vmem>>, vector<1x32x128xbf16>
    %275 = vector.shape_cast %274 : vector<1x32x128xbf16> to vector<32x128xbf16>
    %cst_178 = arith.constant dense<0.000000e+00> : vector<2x128xf32>
    %276 = tpu.matmul %273, %275, %cst_178 {dimension_numbers = #tpu.dot_dimension_numbers<[1], [0], [0], [1], [0, 0, 1, 1], [], []>} : vector<2x32xbf16>, vector<32x128xbf16>, vector<2x128xf32> -> vector<2x128xf32>
    %277 = arith.addf %271, %276 : vector<2x128xf32>
    %278 = vector.extract_strided_slice %234 {offsets = [0, 1, 6, 0], sizes = [2, 1, 1, 32], strides = [1, 1, 1, 1]} : vector<2x4x7x32xbf16> to vector<2x1x1x32xbf16>
    %279 = vector.shape_cast %278 : vector<2x1x1x32xbf16> to vector<2x32xbf16>
    %c7_179 = arith.constant 7 : index
    %c0_180 = arith.constant 0 : index
    %c0_181 = arith.constant 0 : index
    %280 = vector.load %arg7[%c7_179, %c0_180, %c0_181] : memref<16x32x128xbf16, #tpu.memory_space<vmem>>, vector<1x32x128xbf16>
    %281 = vector.shape_cast %280 : vector<1x32x128xbf16> to vector<32x128xbf16>
    %cst_182 = arith.constant dense<0.000000e+00> : vector<2x128xf32>
    %282 = tpu.matmul %279, %281, %cst_182 {dimension_numbers = #tpu.dot_dimension_numbers<[1], [0], [0], [1], [0, 0, 1, 1], [], []>} : vector<2x32xbf16>, vector<32x128xbf16>, vector<2x128xf32> -> vector<2x128xf32>
    %283 = arith.addf %277, %282 : vector<2x128xf32>
    %284 = vector.extract_strided_slice %234 {offsets = [0, 2, 0, 0], sizes = [2, 1, 1, 32], strides = [1, 1, 1, 1]} : vector<2x4x7x32xbf16> to vector<2x1x1x32xbf16>
    %285 = vector.shape_cast %284 : vector<2x1x1x32xbf16> to vector<2x32xbf16>
    %c8_183 = arith.constant 8 : index
    %c0_184 = arith.constant 0 : index
    %c0_185 = arith.constant 0 : index
    %286 = vector.load %arg7[%c8_183, %c0_184, %c0_185] : memref<16x32x128xbf16, #tpu.memory_space<vmem>>, vector<1x32x128xbf16>
    %287 = vector.shape_cast %286 : vector<1x32x128xbf16> to vector<32x128xbf16>
    %cst_186 = arith.constant dense<0.000000e+00> : vector<2x128xf32>
    %288 = tpu.matmul %285, %287, %cst_186 {dimension_numbers = #tpu.dot_dimension_numbers<[1], [0], [0], [1], [0, 0, 1, 1], [], []>} : vector<2x32xbf16>, vector<32x128xbf16>, vector<2x128xf32> -> vector<2x128xf32>
    %289 = arith.addf %283, %288 : vector<2x128xf32>
    %290 = vector.extract_strided_slice %234 {offsets = [0, 2, 2, 0], sizes = [2, 1, 1, 32], strides = [1, 1, 1, 1]} : vector<2x4x7x32xbf16> to vector<2x1x1x32xbf16>
    %291 = vector.shape_cast %290 : vector<2x1x1x32xbf16> to vector<2x32xbf16>
    %c9_187 = arith.constant 9 : index
    %c0_188 = arith.constant 0 : index
    %c0_189 = arith.constant 0 : index
    %292 = vector.load %arg7[%c9_187, %c0_188, %c0_189] : memref<16x32x128xbf16, #tpu.memory_space<vmem>>, vector<1x32x128xbf16>
    %293 = vector.shape_cast %292 : vector<1x32x128xbf16> to vector<32x128xbf16>
    %cst_190 = arith.constant dense<0.000000e+00> : vector<2x128xf32>
    %294 = tpu.matmul %291, %293, %cst_190 {dimension_numbers = #tpu.dot_dimension_numbers<[1], [0], [0], [1], [0, 0, 1, 1], [], []>} : vector<2x32xbf16>, vector<32x128xbf16>, vector<2x128xf32> -> vector<2x128xf32>
    %295 = arith.addf %289, %294 : vector<2x128xf32>
    %296 = vector.extract_strided_slice %234 {offsets = [0, 2, 4, 0], sizes = [2, 1, 1, 32], strides = [1, 1, 1, 1]} : vector<2x4x7x32xbf16> to vector<2x1x1x32xbf16>
    %297 = vector.shape_cast %296 : vector<2x1x1x32xbf16> to vector<2x32xbf16>
    %c10 = arith.constant 10 : index
    %c0_191 = arith.constant 0 : index
    %c0_192 = arith.constant 0 : index
    %298 = vector.load %arg7[%c10, %c0_191, %c0_192] : memref<16x32x128xbf16, #tpu.memory_space<vmem>>, vector<1x32x128xbf16>
    %299 = vector.shape_cast %298 : vector<1x32x128xbf16> to vector<32x128xbf16>
    %cst_193 = arith.constant dense<0.000000e+00> : vector<2x128xf32>
    %300 = tpu.matmul %297, %299, %cst_193 {dimension_numbers = #tpu.dot_dimension_numbers<[1], [0], [0], [1], [0, 0, 1, 1], [], []>} : vector<2x32xbf16>, vector<32x128xbf16>, vector<2x128xf32> -> vector<2x128xf32>
    %301 = arith.addf %295, %300 : vector<2x128xf32>
    %302 = vector.extract_strided_slice %234 {offsets = [0, 2, 6, 0], sizes = [2, 1, 1, 32], strides = [1, 1, 1, 1]} : vector<2x4x7x32xbf16> to vector<2x1x1x32xbf16>
    %303 = vector.shape_cast %302 : vector<2x1x1x32xbf16> to vector<2x32xbf16>
    %c11 = arith.constant 11 : index
    %c0_194 = arith.constant 0 : index
    %c0_195 = arith.constant 0 : index
    %304 = vector.load %arg7[%c11, %c0_194, %c0_195] : memref<16x32x128xbf16, #tpu.memory_space<vmem>>, vector<1x32x128xbf16>
    %305 = vector.shape_cast %304 : vector<1x32x128xbf16> to vector<32x128xbf16>
    %cst_196 = arith.constant dense<0.000000e+00> : vector<2x128xf32>
    %306 = tpu.matmul %303, %305, %cst_196 {dimension_numbers = #tpu.dot_dimension_numbers<[1], [0], [0], [1], [0, 0, 1, 1], [], []>} : vector<2x32xbf16>, vector<32x128xbf16>, vector<2x128xf32> -> vector<2x128xf32>
    %307 = arith.addf %301, %306 : vector<2x128xf32>
    %308 = vector.extract_strided_slice %234 {offsets = [0, 3, 0, 0], sizes = [2, 1, 1, 32], strides = [1, 1, 1, 1]} : vector<2x4x7x32xbf16> to vector<2x1x1x32xbf16>
    %309 = vector.shape_cast %308 : vector<2x1x1x32xbf16> to vector<2x32xbf16>
    %c12 = arith.constant 12 : index
    %c0_197 = arith.constant 0 : index
    %c0_198 = arith.constant 0 : index
    %310 = vector.load %arg7[%c12, %c0_197, %c0_198] : memref<16x32x128xbf16, #tpu.memory_space<vmem>>, vector<1x32x128xbf16>
    %311 = vector.shape_cast %310 : vector<1x32x128xbf16> to vector<32x128xbf16>
    %cst_199 = arith.constant dense<0.000000e+00> : vector<2x128xf32>
    %312 = tpu.matmul %309, %311, %cst_199 {dimension_numbers = #tpu.dot_dimension_numbers<[1], [0], [0], [1], [0, 0, 1, 1], [], []>} : vector<2x32xbf16>, vector<32x128xbf16>, vector<2x128xf32> -> vector<2x128xf32>
    %313 = arith.addf %307, %312 : vector<2x128xf32>
    %314 = vector.extract_strided_slice %234 {offsets = [0, 3, 2, 0], sizes = [2, 1, 1, 32], strides = [1, 1, 1, 1]} : vector<2x4x7x32xbf16> to vector<2x1x1x32xbf16>
    %315 = vector.shape_cast %314 : vector<2x1x1x32xbf16> to vector<2x32xbf16>
    %c13 = arith.constant 13 : index
    %c0_200 = arith.constant 0 : index
    %c0_201 = arith.constant 0 : index
    %316 = vector.load %arg7[%c13, %c0_200, %c0_201] : memref<16x32x128xbf16, #tpu.memory_space<vmem>>, vector<1x32x128xbf16>
    %317 = vector.shape_cast %316 : vector<1x32x128xbf16> to vector<32x128xbf16>
    %cst_202 = arith.constant dense<0.000000e+00> : vector<2x128xf32>
    %318 = tpu.matmul %315, %317, %cst_202 {dimension_numbers = #tpu.dot_dimension_numbers<[1], [0], [0], [1], [0, 0, 1, 1], [], []>} : vector<2x32xbf16>, vector<32x128xbf16>, vector<2x128xf32> -> vector<2x128xf32>
    %319 = arith.addf %313, %318 : vector<2x128xf32>
    %320 = vector.extract_strided_slice %234 {offsets = [0, 3, 4, 0], sizes = [2, 1, 1, 32], strides = [1, 1, 1, 1]} : vector<2x4x7x32xbf16> to vector<2x1x1x32xbf16>
    %321 = vector.shape_cast %320 : vector<2x1x1x32xbf16> to vector<2x32xbf16>
    %c14 = arith.constant 14 : index
    %c0_203 = arith.constant 0 : index
    %c0_204 = arith.constant 0 : index
    %322 = vector.load %arg7[%c14, %c0_203, %c0_204] : memref<16x32x128xbf16, #tpu.memory_space<vmem>>, vector<1x32x128xbf16>
    %323 = vector.shape_cast %322 : vector<1x32x128xbf16> to vector<32x128xbf16>
    %cst_205 = arith.constant dense<0.000000e+00> : vector<2x128xf32>
    %324 = tpu.matmul %321, %323, %cst_205 {dimension_numbers = #tpu.dot_dimension_numbers<[1], [0], [0], [1], [0, 0, 1, 1], [], []>} : vector<2x32xbf16>, vector<32x128xbf16>, vector<2x128xf32> -> vector<2x128xf32>
    %325 = arith.addf %319, %324 : vector<2x128xf32>
    %326 = vector.extract_strided_slice %234 {offsets = [0, 3, 6, 0], sizes = [2, 1, 1, 32], strides = [1, 1, 1, 1]} : vector<2x4x7x32xbf16> to vector<2x1x1x32xbf16>
    %327 = vector.shape_cast %326 : vector<2x1x1x32xbf16> to vector<2x32xbf16>
    %c15 = arith.constant 15 : index
    %c0_206 = arith.constant 0 : index
    %c0_207 = arith.constant 0 : index
    %328 = vector.load %arg7[%c15, %c0_206, %c0_207] : memref<16x32x128xbf16, #tpu.memory_space<vmem>>, vector<1x32x128xbf16>
    %329 = vector.shape_cast %328 : vector<1x32x128xbf16> to vector<32x128xbf16>
    %cst_208 = arith.constant dense<0.000000e+00> : vector<2x128xf32>
    %330 = tpu.matmul %327, %329, %cst_208 {dimension_numbers = #tpu.dot_dimension_numbers<[1], [0], [0], [1], [0, 0, 1, 1], [], []>} : vector<2x32xbf16>, vector<32x128xbf16>, vector<2x128xf32> -> vector<2x128xf32>
    %331 = arith.addf %325, %330 : vector<2x128xf32>
    %c0_209 = arith.constant 0 : index
    %c0_210 = arith.constant 0 : index
    %332 = vector.load %arg8[%c0_209, %c0_210] : memref<1x128xf32, #tpu.memory_space<vmem>>, vector<1x128xf32>
    %333 = vector.broadcast %332 : vector<1x128xf32> to vector<2x128xf32>
    %334 = arith.addf %331, %333 : vector<2x128xf32>
    %cst_211 = arith.constant 0.000000e+00 : f32
    %335 = vector.broadcast %cst_211 : f32 to vector<2x128xf32>
    %336 = arith.cmpf ogt, %334, %335 : vector<2x128xf32>
    %337 = math.exp %334 : vector<2x128xf32>
    %cst_212 = arith.constant 1.000000e+00 : f32
    %338 = vector.broadcast %cst_212 : f32 to vector<2x128xf32>
    %339 = arith.subf %337, %338 : vector<2x128xf32>
    %340 = arith.select %336, %334, %339 : vector<2x128xi1>, vector<2x128xf32>
    %341 = arith.truncf %340 : vector<2x128xf32> to vector<2x128xbf16>
    %c0_213 = arith.constant 0 : index
    %c0_214 = arith.constant 0 : index
    %342 = vector.load %arg9[%c0_213, %c0_214] : memref<128x128xbf16, #tpu.memory_space<vmem>>, vector<128x128xbf16>
    %cst_215 = arith.constant dense<0.000000e+00> : vector<2x128xf32>
    %343 = tpu.matmul %341, %342, %cst_215 {dimension_numbers = #tpu.dot_dimension_numbers<[1], [0], [0], [1], [0, 0, 1, 1], [], []>} : vector<2x128xbf16>, vector<128x128xbf16>, vector<2x128xf32> -> vector<2x128xf32>
    %c0_216 = arith.constant 0 : index
    %c0_217 = arith.constant 0 : index
    %344 = vector.load %arg10[%c0_216, %c0_217] : memref<1x128xf32, #tpu.memory_space<vmem>>, vector<1x128xf32>
    %345 = vector.broadcast %344 : vector<1x128xf32> to vector<2x128xf32>
    %346 = arith.addf %343, %345 : vector<2x128xf32>
    %c0_218 = arith.constant 0 : index
    %c0_219 = arith.constant 0 : index
    %347 = vector.load %arg11[%c0_218, %c0_219] : memref<2x128xf32, #tpu.memory_space<vmem>>, vector<2x128xf32>
    tpu.vector_store %arg11[%c0_218, %c0_219], %346 {strides = array<i32>} : memref<2x128xf32, #tpu.memory_space<vmem>>, vector<2x128xf32>,
    return
  }
  func.func @transform_0(%arg0: i32) -> (i32, i32, i32) {
    %c0_i32 = arith.constant 0 : i32
    %c0_i32_0 = arith.constant 0 : i32
    %c0_i32_1 = arith.constant 0 : i32
    return %arg0, %c0_i32, %c0_i32_0 : i32, i32, i32
  }
  func.func @transform_1(%arg0: i32) -> (i32, i32, i32) {
    %c0_i32 = arith.constant 0 : i32
    %c0_i32_0 = arith.constant 0 : i32
    %c0_i32_1 = arith.constant 0 : i32
    return %arg0, %c0_i32, %c0_i32_0 : i32, i32, i32
  }
  func.func @transform_2(%arg0: i32) -> (i32, i32) {
    %c0_i32 = arith.constant 0 : i32
    %c0_i32_0 = arith.constant 0 : i32
    %c0_i32_1 = arith.constant 0 : i32
    return %c0_i32, %c0_i32_0 : i32, i32
  }
  func.func @transform_3(%arg0: i32) -> (i32, i32) {
    %c0_i32 = arith.constant 0 : i32
    %c0_i32_0 = arith.constant 0 : i32
    %c0_i32_1 = arith.constant 0 : i32
    return %c0_i32, %c0_i32_0 : i32, i32
  }
  func.func @transform_4(%arg0: i32) -> (i32, i32, i32) {
    %c0_i32 = arith.constant 0 : i32
    %c0_i32_0 = arith.constant 0 : i32
    %c0_i32_1 = arith.constant 0 : i32
    %c0_i32_2 = arith.constant 0 : i32
    return %c0_i32, %c0_i32_0, %c0_i32_1 : i32, i32, i32
  }
  func.func @transform_5(%arg0: i32) -> (i32, i32) {
    %c0_i32 = arith.constant 0 : i32
    %c0_i32_0 = arith.constant 0 : i32
    %c0_i32_1 = arith.constant 0 : i32
    return %c0_i32, %c0_i32_0 : i32, i32
  }
  func.func @transform_6(%arg0: i32) -> (i32, i32, i32) {
    %c0_i32 = arith.constant 0 : i32
    %c0_i32_0 = arith.constant 0 : i32
    %c0_i32_1 = arith.constant 0 : i32
    %c0_i32_2 = arith.constant 0 : i32
    return %c0_i32, %c0_i32_0, %c0_i32_1 : i32, i32, i32
  }
  func.func @transform_7(%arg0: i32) -> (i32, i32) {
    %c0_i32 = arith.constant 0 : i32
    %c0_i32_0 = arith.constant 0 : i32
    %c0_i32_1 = arith.constant 0 : i32
    return %c0_i32, %c0_i32_0 : i32, i32
  }
  func.func @transform_8(%arg0: i32) -> (i32, i32) {
    %c0_i32 = arith.constant 0 : i32
    %c0_i32_0 = arith.constant 0 : i32
    %c0_i32_1 = arith.constant 0 : i32
    return %c0_i32, %c0_i32_0 : i32, i32
  }
  func.func @transform_9(%arg0: i32) -> (i32, i32) {
    %c0_i32 = arith.constant 0 : i32
    %c0_i32_0 = arith.constant 0 : i32
    %c0_i32_1 = arith.constant 0 : i32
    return %c0_i32, %c0_i32_0 : i32, i32
  }
  func.func @transform_10(%arg0: i32) -> (i32, i32) {
    %c0_i32 = arith.constant 0 : i32
    %c0_i32_0 = arith.constant 0 : i32
    return %arg0, %c0_i32 : i32, i32
  }
}

</mosaic_0001>

<bundles_post_ra>
// kernel: tpu_custom_call.1
= control target key start
LH: loop header
LB: loop body
LE: loop exit
PB: predicated region body
PF: predicated region fallthrough
CT: control target
= control target key end

     0   :  { %15 = vsyncpa [#allocation4], 0  ;;  %s12349_s0 = inlined_call_operand.vmem [shape: f32[2,18,9], index: 0, kind: input, shape index: {}]   ;;  %s12350_s1 = inlined_call_operand.vmem [shape: f32[2,18,9], index: 1, kind: input, shape index: {}]   ;;  %s12351_s2 = inlined_call_operand.hbm [shape: f32[9,16], index: 2, kind: input, shape index: {}]   ;;  %s12352_s3 = inlined_call_operand.vmem [shape: f32[1,16], index: 3, kind: input, shape index: {}]   ;;  %s12353_s4 = inlined_call_operand.vmem [shape: bf16[9,16,32], index: 4, kind: input, shape index: {}]   ;;  %s12354_s5 = inlined_call_operand.vmem [shape: f32[1,32], index: 5, kind: input, shape index: {}]   ;;  %s12355_s6 = inlined_call_operand.hbm [shape: bf16[16,32,128], index: 6, kind: input, shape index: {}]   ;;  %s12356_s7 = inlined_call_operand.vmem [shape: f32[1,128], index: 7, kind: input, shape index: {}]   ;;  %s12357_s8 = inlined_call_operand.vmem [shape: bf16[128,128], index: 8, kind: input, shape index: {}]   ;;  %s12358_s9 = inlined_call_operand.vmem [shape: f32[1,128], index: 9, kind: input, shape index: {}]   ;;  %s12359_s10 = inlined_call_operand.hbm [shape: f32[2,128], index: 10, kind: output, shape index: {}]  }
   0x1   :  { %16 = vsyncpa [#allocation7], 0 }
   0x2   :  { %17 = vsyncpa [#allocation5], 0  ;;  %s7834_s13 = smov [#allocation3]  }
   0x3   :  { %s27_s14 = sshll.u32 %s7834_s13, 4  ;;  %s28_s14 = int_to_ptr.vmem [resolvable:$true] %s27_s14 }
   0x4   :  { %s7776_s15 = scalar_lea.vmem %s28_s14, 256  ;;  %p7781_p1 = scmp.lt.s32.totalorder %s28_s14, %s28_s14 }
   0x5   :  { %p7777_p0 = scmp.ne.s32.totalorder %s28_s14, %s7776_s15  ;;  %p7782_p2 = scmp.lt.s32.totalorder %s7776_s15, %s7776_s15 }
   0x7   :  { %p7783_p3 = por %p7782_p2, %p7781_p1 }
   0x9   :  { %p7784_p4 = pnand %p7783_p3, %p7777_p0 }
   0xb   :  { %7787 = shalt.err (!%p7784_p4)
}
   0xc   :  { %s7835_s16 = smov 128   ;;  %s7836_s17 = smov 8  }
   0xd   :  { %33 = dma.hbm_to_vmem [thread:$0]  %s12351_s2, 256, %s28_s14, [#allocation4], %s7835_s16, %s7835_s16, %s7836_s17  }
   0xe   :  { %s7837_s20 = smov [#allocation6]  }
   0xf   :  { %s45_s21 = sshll.u32 %s7837_s20, 4  ;;  %s46_s21 = int_to_ptr.vmem [resolvable:$true] %s45_s21 }
  0x10   :  { %s7796_s22 = scalar_lea.vmem %s46_s21, 4096  ;;  %p7801_p6 = scmp.lt.s32.totalorder %s46_s21, %s46_s21 }
  0x11   :  { %p7797_p5 = scmp.ne.s32.totalorder %s46_s21, %s7796_s22  ;;  %p7802_p7 = scmp.lt.s32.totalorder %s7796_s22, %s7796_s22 }
  0x13   :  { %p7803_p8 = por %p7802_p7, %p7801_p6 }
  0x15   :  { %p7804_p9 = pnand %p7803_p8, %p7797_p5 }
  0x17   :  { %7807 = shalt.err (!%p7804_p9)
}
  0x18   :  { %s7838_s23 = smov 64   ;;  %s7839_s24 = smov 4  }
  0x19   :  { %51 = dma.hbm_to_vmem [thread:$0]  %s12355_s6, 4096, %s46_s21, [#allocation7], %s7838_s23, %s7838_s23, %s7839_s24  }
  0x1a   :  { %7828 = dma.done.wait [#allocation4], 256  }
  0x1b   :  { %7829 = vsyncadd [#allocation4], 4294967040 }
  0x1c   :  { %7830 = dma.done.wait [#allocation7], 4096  }
  0x1d   :  { %7831 = vsyncadd [#allocation7], 4294963200  ;;  %v69_v0 = vlaneseq  ;;  %v7915_v4 = vld [vmem:[%s12350_s1 + $0x18] sm:$0xff]  ;;  %v7961_v22 = vld [vmem:[%s12349_s0] sm:$0xff]  ;;  %vm3549_vm0 = vcmask 130048   ;;  %vm3551_vm1 = vcmask 123904  }
  0x1e   :  { %v7920_v5 = vld [vmem:[%s12349_s0 + $0x18] sm:$0xff]  ;;  %v7966_v23 = vld [vmem:[%s12350_s1] sm:$0xff]  ;;  %vm3561_vm2 = vcmask 122880   ;;  %s7842_s30 = smov [#allocation8]  }
  0x1f   :  { %v7904_v1 = vshrl.u32 %v69_v0, 7  ;;  %v7995_v36 = vld [vmem:[%s12349_s0 + $0x19] sm:$0xff]  ;;  %v8051_v50 = vld [vmem:[%s12349_s0 + $0x1] sm:$0xff]  ;;  %s6826_s11 = sshll.u32 %s7842_s30, 4  ;;  %s6827_s11 = int_to_ptr.vmem [resolvable:$true] %s6826_s11 }
  0x20   :  { %v8004_v39 = vld [vmem:[%s12350_s1 + $0x19] sm:$0xff]  ;;  %v8070_v55 = vld [vmem:[%s12350_s1 + $0x1] sm:$0xff]  ;;  %p7813_p11 = scmp.lt.s32.totalorder %s6827_s11, %s6827_s11 }
  0x21   :  { %v7907_v2 = vsub.s32 0, %v7904_v1  ;;  %v7910_v3 = vsub.s32 1, %v7904_v1  ;;  %v7927_v8 = vsub.s32 3, %v7904_v1  ;;  %v7930_v9 = vsub.s32 2, %v7904_v1 }
  0x22   :  { %v7937_v12 = vsub.s32 5, %v7904_v1  ;;  %v7940_v13 = vsub.s32 4, %v7904_v1 }
  0x23   :  { %12565 = vst [vmem:[#allocation12_spill] sm:$0xff] %v7907_v2  ;;  %12566 = vst [vmem:[#allocation13_spill] sm:$0xff] %v7910_v3  ;;  %v412_v6 = vrot.slane %v7915_v4, %v7907_v2  ;;  %v184_v7 = vrot.slane %v7920_v5, %v7907_v2  ;;  %v419_v10 = vrot.slane %v7915_v4, %v7910_v3 }
  0x24   :  { %v191_v11 = vrot.slane %v7920_v5, %v7910_v3  ;;  %12567 = vst [vmem:[#allocation14_spill] sm:$0xff] %v7937_v12  ;;  %12568 = vst [vmem:[#allocation15_spill] sm:$0xff] %v7940_v13  ;;  %v205_v14 = vrot.slane %v7920_v5, %v7927_v8  ;;  %v198_v15 = vrot.slane %v7920_v5, %v7930_v9 }
  0x25   :  { %414 = vbcast.lane.b32.xlu1 %v412_v6, 256  ;;  %186 = vbcast.lane.b32.xlu0 %v184_v7, 256  ;;  %v219_v16 = vrot.slane %v7920_v5, %v7937_v12  ;;  %v212_v17 = vrot.slane %v7920_v5, %v7940_v13  ;;  %v433_v18 = vrot.slane %v7915_v4, %v7927_v8 }
  0x26   :  { %v426_v19 = vrot.slane %v7915_v4, %v7930_v9  ;;  %v447_v20 = vrot.slane %v7915_v4, %v7937_v12  ;;  %v440_v21 = vrot.slane %v7915_v4, %v7940_v13  ;;  %v79_v24 = vrot.slane %v7961_v22, %v7910_v3 }
  0x27   :  { %v72_v25 = vrot.slane %v7961_v22, %v7907_v2  ;;  %v307_v26 = vrot.slane %v7966_v23, %v7910_v3  ;;  %v300_v27 = vrot.slane %v7966_v23, %v7907_v2  ;;  %v93_v28 = vrot.slane %v7961_v22, %v7927_v8 }
  0x28   :  { %v86_v29 = vrot.slane %v7961_v22, %v7930_v9  ;;  %v107_v30 = vrot.slane %v7961_v22, %v7937_v12  ;;  %v100_v31 = vrot.slane %v7961_v22, %v7940_v13  ;;  %v321_v32 = vrot.slane %v7966_v23, %v7927_v8 }
  0x29   :  { %421 = vbcast.lane.b32.xlu1 %v419_v10, 256  ;;  %193 = vbcast.lane.b32.xlu0 %v191_v11, 256  ;;  %v314_v33 = vrot.slane %v7966_v23, %v7930_v9  ;;  %v335_v34 = vrot.slane %v7966_v23, %v7937_v12  ;;  %v328_v35 = vrot.slane %v7966_v23, %v7940_v13 }
  0x2a   :  { %v1302_v37 = vrot.slane %v7995_v36, %v7910_v3  ;;  %v1295_v38 = vrot.slane %v7995_v36, %v7907_v2  ;;  %v8008_v40 = vrot.slane %v8004_v39, %v7910_v3  ;;  %v8012_v41 = vrot.slane %v8004_v39, %v7907_v2 }
  0x2b   :  { %v1316_v42 = vrot.slane %v7995_v36, %v7927_v8  ;;  %v1309_v43 = vrot.slane %v7995_v36, %v7930_v9  ;;  %v8022_v44 = vrot.slane %v7995_v36, %v7937_v12  ;;  %v8026_v45 = vrot.slane %v7995_v36, %v7940_v13 }
  0x2c   :  { %v8032_v46 = vrot.slane %v8004_v39, %v7927_v8  ;;  %v8036_v47 = vrot.slane %v8004_v39, %v7930_v9  ;;  %v8042_v48 = vrot.slane %v8004_v39, %v7937_v12  ;;  %v8046_v49 = vrot.slane %v8004_v39, %v7940_v13 }
  0x2d   :  { %591 = vbcast.lane.b32.xlu1 %v191_v11, 257  ;;  %587 = vbcast.lane.b32.xlu0 %v184_v7, 257  ;;  %v8061_v53 = vrot.slane %v8051_v50, %v7910_v3  ;;  %v8065_v54 = vrot.slane %v8051_v50, %v7907_v2  ;;  %v8080_v58 = vrot.slane %v8070_v55, %v7910_v3 }
  0x2e   :  { %v8084_v59 = vrot.slane %v8070_v55, %v7907_v2  ;;  %v8098_v0 = vrot.slane %v8051_v50, %v7927_v8  ;;  %v8112_v11 = vrot.slane %v8051_v50, %v7937_v12 }
  0x31   :  { %207 = vbcast.lane.b32.xlu1 %v205_v14, 256  ;;  %200 = vbcast.lane.b32.xlu0 %v198_v15, 256 }
  0x35   :  { %221 = vbcast.lane.b32.xlu1 %v219_v16, 256  ;;  %214 = vbcast.lane.b32.xlu0 %v212_v17, 256 }
  0x39   :  { %435 = vbcast.lane.b32.xlu1 %v433_v18, 256  ;;  %428 = vbcast.lane.b32.xlu0 %v426_v19, 256 }
  0x3d   :  { %449 = vbcast.lane.b32.xlu1 %v447_v20, 256  ;;  %442 = vbcast.lane.b32.xlu0 %v440_v21, 256 }
  0x41   :  { %599 = vbcast.lane.b32.xlu1 %v205_v14, 257  ;;  %595 = vbcast.lane.b32.xlu0 %v198_v15, 257  ;;  %v8116_v14 = vrot.slane %v8051_v50, %v7940_v13 }
  0x45   :  { %607 = vbcast.lane.b32.xlu1 %v219_v16, 257  ;;  %603 = vbcast.lane.b32.xlu0 %v212_v17, 257  ;;  %v8126_v17 = vrot.slane %v8070_v55, %v7927_v8 }
  0x49   :  { %81 = vbcast.lane.b32.xlu1 %v79_v24, 256  ;;  %74 = vbcast.lane.b32.xlu0 %v72_v25, 256 }
  0x4d   :  { %309 = vbcast.lane.b32.xlu1 %v307_v26, 256  ;;  %302 = vbcast.lane.b32.xlu0 %v300_v27, 256 }
  0x51   :  { %527 = vbcast.lane.b32.xlu1 %v79_v24, 257  ;;  %523 = vbcast.lane.b32.xlu0 %v72_v25, 257  ;;  %v8144_v24 = vrot.slane %v8070_v55, %v7940_v13 }
  0x55   :  { %719 = vbcast.lane.b32.xlu1 %v419_v10, 257  ;;  %715 = vbcast.lane.b32.xlu0 %v412_v6, 257  ;;  %v8102_v6 = vrot.slane %v8051_v50, %v7930_v9 }
  0x59   :  { %95 = vbcast.lane.b32.xlu1 %v93_v28, 256  ;;  %88 = vbcast.lane.b32.xlu0 %v86_v29, 256 }
  0x5d   :  { %109 = vbcast.lane.b32.xlu1 %v107_v30, 256  ;;  %102 = vbcast.lane.b32.xlu0 %v100_v31, 256 }
  0x61   :  { %323 = vbcast.lane.b32.xlu1 %v321_v32, 256  ;;  %316 = vbcast.lane.b32.xlu0 %v314_v33, 256 }
  0x65   :  { %337 = vbcast.lane.b32.xlu1 %v335_v34, 256  ;;  %330 = vbcast.lane.b32.xlu0 %v328_v35, 256 }
  0x69   :  { %535 = vbcast.lane.b32.xlu1 %v93_v28, 257  ;;  %531 = vbcast.lane.b32.xlu0 %v86_v29, 257  ;;  %v8157_v29 = vsub.s32 7, %v7904_v1 }
  0x6b   :  { %12572 = vst [vmem:[#allocation19_spill] sm:$0xff] %v8157_v29 }
  0x6d   :  { %543 = vbcast.lane.b32.xlu1 %v107_v30, 257  ;;  %539 = vbcast.lane.b32.xlu0 %v100_v31, 257  ;;  %v8160_v30 = vsub.s32 6, %v7904_v1 }
  0x6f   :  { %12573 = vst [vmem:[#allocation20_spill] sm:$0xff] %v8160_v30 }
  0x71   :  { %727 = vbcast.lane.b32.xlu1 %v433_v18, 257  ;;  %723 = vbcast.lane.b32.xlu0 %v426_v19, 257  ;;  %v8130_v18 = vrot.slane %v8070_v55, %v7930_v9 }
  0x75   :  { %735 = vbcast.lane.b32.xlu1 %v447_v20, 257  ;;  %731 = vbcast.lane.b32.xlu0 %v440_v21, 257  ;;  %v8140_v21 = vrot.slane %v8070_v55, %v7937_v12 }
  0x79   :  { %655 = vbcast.lane.b32.xlu1 %v307_v26, 257  ;;  %651 = vbcast.lane.b32.xlu0 %v300_v27, 257 }
  0x7d   :  { %1304 = vbcast.lane.b32.xlu1 %v1302_v37, 256  ;;  %1297 = vbcast.lane.b32.xlu0 %v1295_v38, 256 }
  0x81   :  { %1532 = vbcast.lane.b32.xlu1 %v8008_v40, 256  ;;  %1525 = vbcast.lane.b32.xlu0 %v8012_v41, 256 }
  0x85   :  { %663 = vbcast.lane.b32.xlu1 %v321_v32, 257  ;;  %659 = vbcast.lane.b32.xlu0 %v314_v33, 257  ;;  %v233_v33 = vrot.slane %v7920_v5, %v8157_v29 }
  0x89   :  { %671 = vbcast.lane.b32.xlu1 %v335_v34, 257  ;;  %667 = vbcast.lane.b32.xlu0 %v328_v35, 257  ;;  %v226_v34 = vrot.slane %v7920_v5, %v8160_v30  ;;  %v68_v35 = vld [vmem:[%s12349_s0 + $0x20] sm:$0xff]  ;;  %v8187_v5 = vrot.slane %v7915_v4, %v8157_v29 }
  0x8d   :  { %1318 = vbcast.lane.b32.xlu1 %v1316_v42, 256  ;;  %1311 = vbcast.lane.b32.xlu0 %v1309_v43, 256 }
  0x91   :  { %1332 = vbcast.lane.b32.xlu1 %v8022_v44, 256  ;;  %1325 = vbcast.lane.b32.xlu0 %v8026_v45, 256 }
  0x95   :  { %1546 = vbcast.lane.b32.xlu1 %v8032_v46, 256  ;;  %1539 = vbcast.lane.b32.xlu0 %v8036_v47, 256 }
  0x97   :  { %v8053_v51 = vpop.permute.xlu1 %414  ;;  %v8055_v52 = vpop.permute.xlu0 %186 }
  0x99   :  { %1560 = vbcast.lane.b32.xlu1 %v8042_v48, 256  ;;  %1553 = vbcast.lane.b32.xlu0 %v8046_v49, 256 }
  0x9b   :  { %v8072_v56 = vpop.permute.xlu1 %421  ;;  %v8074_v57 = vpop.permute.xlu0 %193 }
  0x9d   :  { %1192 = vbcast.lane.b32.xlu1 %v8061_v53, 256  ;;  %1185 = vbcast.lane.b32.xlu0 %v8065_v54, 256 }
  0x9f   :  { %v8086_v60 = vpop.permute.xlu1 %591  ;;  %v8088_v61 = vpop.permute.xlu0 %587 }
  0xa1   :  { %1420 = vbcast.lane.b32.xlu1 %v8080_v58, 256  ;;  %1413 = vbcast.lane.b32.xlu0 %v8084_v59, 256 }
  0xa3   :  { %v8092_v62 = vpop.permute.xlu1 %207  ;;  %v8094_v63 = vpop.permute.xlu0 %200 }
  0xa5   :  { %1702 = vbcast.lane.b32.xlu1 %v1302_v37, 257  ;;  %1698 = vbcast.lane.b32.xlu0 %v1295_v38, 257  ;;  %v247_v38 = vrot.slane %v68_v35, %v7910_v3 }
  0xa7   :  { %v8104_v7 = vpop.permute.xlu1 %221  ;;  %v8106_v10 = vpop.permute.xlu0 %214 }
  0xa8   :  { %12569 = vst [vmem:[#allocation16_spill] sm:$0xff] %v8106_v10 }
  0xa9   :  { %1206 = vbcast.lane.b32.xlu1 %v8098_v0, 256  ;;  %1199 = vbcast.lane.b32.xlu0 %v8102_v6, 256 }
  0xab   :  { %v8118_v15 = vpop.permute.xlu1 %435  ;;  %v8120_v16 = vpop.permute.xlu0 %428 }
  0xad   :  { %1220 = vbcast.lane.b32.xlu1 %v8112_v11, 256  ;;  %1213 = vbcast.lane.b32.xlu0 %v8116_v14, 256 }
  0xaf   :  { %v8132_v19 = vpop.permute.xlu1 %449  ;;  %v8134_v20 = vpop.permute.xlu0 %442 }
  0xb1   :  { %1434 = vbcast.lane.b32.xlu1 %v8126_v17, 256  ;;  %1427 = vbcast.lane.b32.xlu0 %v8130_v18, 256 }
  0xb3   :  { %v8146_v25 = vpop.permute.xlu1 %599  ;;  %v8148_v26 = vpop.permute.xlu0 %595 }
  0xb5   :  { %1448 = vbcast.lane.b32.xlu1 %v8140_v21, 256  ;;  %1441 = vbcast.lane.b32.xlu0 %v8144_v24, 256 }
  0xb7   :  { %v8152_v27 = vpop.permute.xlu1 %607  ;;  %v8154_v28 = vpop.permute.xlu0 %603 }
  0xb8   :  { %12570 = vst [vmem:[#allocation17_spill] sm:$0xff] %v8152_v27  ;;  %12571 = vst [vmem:[#allocation18_spill] sm:$0xff] %v8154_v28 }
  0xb9   :  { %1710 = vbcast.lane.b32.xlu1 %v1316_v42, 257  ;;  %1706 = vbcast.lane.b32.xlu0 %v1309_v43, 257  ;;  %v240_v42 = vrot.slane %v68_v35, %v7907_v2 }
  0xbb   :  { %v8162_v31 = vpop.permute.xlu1 %81  ;;  %v8164_v32 = vpop.permute.xlu0 %74 }
  0xbc   :  { %12574 = vst [vmem:[#allocation21_spill] sm:$0xff] %v8162_v31  ;;  %12575 = vst [vmem:[#allocation22_spill] sm:$0xff] %v8164_v32  ;;  %v296_v32 = vld [vmem:[%s12350_s1 + $0x20] sm:$0xff] }
  0xbd   :  { %1718 = vbcast.lane.b32.xlu1 %v8022_v44, 257  ;;  %1714 = vbcast.lane.b32.xlu0 %v8026_v45, 257  ;;  %v8191_v45 = vrot.slane %v7915_v4, %v8160_v30 }
  0xbf   :  { %v8175_v1 = vpop.permute.xlu1 %309  ;;  %v8177_v37 = vpop.permute.xlu0 %302 }
  0xc0   :  { %12576 = vst [vmem:[#allocation23_spill] sm:$0xff] %v8175_v1  ;;  %12577 = vst [vmem:[#allocation24_spill] sm:$0xff] %v8177_v37 }
  0xc1   :  { %235 = vbcast.lane.b32.xlu1 %v233_v33, 256  ;;  %228 = vbcast.lane.b32.xlu0 %v226_v34, 256 }
  0xc3   :  { %v8181_v43 = vpop.permute.xlu1 %527  ;;  %v8183_v44 = vpop.permute.xlu0 %523 }
  0xc4   :  { %12578 = vst [vmem:[#allocation25_spill] sm:$0xff] %v8181_v43  ;;  %12579 = vst [vmem:[#allocation26_spill] sm:$0xff] %v8183_v44  ;;  %v8203_v44 = vrot.slane %v296_v32, %v7910_v3  ;;  %v8206_v43 = vrot.slane %v296_v32, %v7907_v2 }
  0xc5   :  { %249 = vbcast.lane.b32.xlu1 %v247_v38, 256  ;;  %242 = vbcast.lane.b32.xlu0 %v240_v42, 256 }
  0xc7   :  { %v8196_v37 = vpop.permute.xlu1 %719  ;;  %v8198_v31 = vpop.permute.xlu0 %715 }
  0xc8   :  { %12580 = vst [vmem:[#allocation27_spill] sm:$0xff] %v8196_v37  ;;  %12581 = vst [vmem:[#allocation28_spill] sm:$0xff] %v8198_v31 }
  0xc9   :  { %463 = vbcast.lane.b32.xlu1 %v8187_v5, 256  ;;  %456 = vbcast.lane.b32.xlu0 %v8191_v45, 256 }
  0xcb   :  { %v8208_v4 = vpop.permute.xlu1 %95  ;;  %v8210_v28 = vpop.permute.xlu0 %88 }
  0xcc   :  { %12582 = vst [vmem:[#allocation29_spill] sm:$0xff] %v8208_v4  ;;  %12583 = vst [vmem:[#allocation30_spill] sm:$0xff] %v8210_v28 }
  0xcd   :  { %477 = vbcast.lane.b32.xlu1 %v8203_v44, 256  ;;  %470 = vbcast.lane.b32.xlu0 %v8206_v43, 256 }
  0xcf   :  { %v8214_v37 = vpop.permute.xlu1 %109  ;;  %v8216_v31 = vpop.permute.xlu0 %102 }
  0xd0   :  { %12584 = vst [vmem:[#allocation31_spill] sm:$0xff] %v8214_v37  ;;  %12585 = vst [vmem:[#allocation32_spill] sm:$0xff] %v8216_v31 }
  0xd1   :  { %615 = vbcast.lane.b32.xlu1 %v233_v33, 257  ;;  %611 = vbcast.lane.b32.xlu0 %v226_v34, 257  ;;  %v261_v33 = vrot.slane %v68_v35, %v7927_v8  ;;  %v254_v34 = vrot.slane %v68_v35, %v7930_v9 }
  0xd3   :  { %v8218_v1 = vpop.permute.xlu1 %323  ;;  %v8220_v27 = vpop.permute.xlu0 %316 }
  0xd4   :  { %12586 = vst [vmem:[#allocation33_spill] sm:$0xff] %v8218_v1  ;;  %12587 = vst [vmem:[#allocation34_spill] sm:$0xff] %v8220_v27 }
  0xd5   :  { %623 = vbcast.lane.b32.xlu1 %v247_v38, 257  ;;  %619 = vbcast.lane.b32.xlu0 %v240_v42, 257 }
  0xd7   :  { %v8222_v10 = vpop.permute.xlu1 %337  ;;  %v8224_v4 = vpop.permute.xlu0 %330 }
  0xd8   :  { %12588 = vst [vmem:[#allocation35_spill] sm:$0xff] %v8222_v10  ;;  %12589 = vst [vmem:[#allocation36_spill] sm:$0xff] %v8224_v4 }
  0xd9   :  { %1638 = vbcast.lane.b32.xlu1 %v8061_v53, 257  ;;  %1634 = vbcast.lane.b32.xlu0 %v8065_v54, 257  ;;  %v275_v53 = vrot.slane %v68_v35, %v7937_v12  ;;  %v268_v54 = vrot.slane %v68_v35, %v7940_v13  ;;  %v8259_v35 = vrot.slane %v296_v32, %v7937_v12 }
  0xdb   :  { %v8228_v28 = vpop.permute.xlu1 %535  ;;  %v8230_v37 = vpop.permute.xlu0 %531 }
  0xdc   :  { %12590 = vst [vmem:[#allocation37_spill] sm:$0xff] %v8228_v28  ;;  %12591 = vst [vmem:[#allocation38_spill] sm:$0xff] %v8230_v37 }
  0xdd   :  { %1830 = vbcast.lane.b32.xlu1 %v8008_v40, 257  ;;  %1826 = vbcast.lane.b32.xlu0 %v8012_v41, 257  ;;  %v8247_v40 = vrot.slane %v296_v32, %v7927_v8  ;;  %v8250_v41 = vrot.slane %v296_v32, %v7930_v9 }
  0xdf   :  { %v8236_v38 = vpop.permute.xlu1 %543  ;;  %v8238_v42 = vpop.permute.xlu0 %539 }
  0xe0   :  { %12592 = vst [vmem:[#allocation39_spill] sm:$0xff] %v8236_v38  ;;  %12593 = vst [vmem:[#allocation40_spill] sm:$0xff] %v8238_v42 }
  0xe1   :  { %263 = vbcast.lane.b32.xlu1 %v261_v33, 256  ;;  %256 = vbcast.lane.b32.xlu0 %v254_v34, 256 }
  0xe3   :  { %v8242_v28 = vpop.permute.xlu1 %727  ;;  %v8244_v37 = vpop.permute.xlu0 %723 }
  0xe4   :  { %12594 = vst [vmem:[#allocation41_spill] sm:$0xff] %v8242_v28  ;;  %12595 = vst [vmem:[#allocation42_spill] sm:$0xff] %v8244_v37  ;;  %v8262_v37 = vrot.slane %v296_v32, %v7940_v13 }
  0xe5   :  { %277 = vbcast.lane.b32.xlu1 %v275_v53, 256  ;;  %270 = vbcast.lane.b32.xlu0 %v268_v54, 256 }
  0xe7   :  { %v8252_v38 = vpop.permute.xlu1 %735  ;;  %v8254_v42 = vpop.permute.xlu0 %731 }
  0xe8   :  { %12596 = vst [vmem:[#allocation43_spill] sm:$0xff] %v8252_v38  ;;  %12597 = vst [vmem:[#allocation44_spill] sm:$0xff] %v8254_v42 }
  0xe9   :  { %491 = vbcast.lane.b32.xlu1 %v8247_v40, 256  ;;  %484 = vbcast.lane.b32.xlu0 %v8250_v41, 256 }
  0xeb   :  { %v8264_v28 = vpop.permute.xlu1 %655  ;;  %v8266_v31 = vpop.permute.xlu0 %651 }
  0xec   :  { %12598 = vst [vmem:[#allocation45_spill] sm:$0xff] %v8264_v28  ;;  %12599 = vst [vmem:[#allocation46_spill] sm:$0xff] %v8266_v31 }
  0xed   :  { %505 = vbcast.lane.b32.xlu1 %v8259_v35, 256  ;;  %498 = vbcast.lane.b32.xlu0 %v8262_v37, 256 }
  0xef   :  { %v8270_v38 = vpop.permute.xlu1 %1304  ;;  %v8272_v42 = vpop.permute.xlu0 %1297 }
  0xf0   :  { %12600 = vst [vmem:[#allocation47_spill] sm:$0xff] %v8270_v38  ;;  %12601 = vst [vmem:[#allocation48_spill] sm:$0xff] %v8272_v42 }
  0xf1   :  { %631 = vbcast.lane.b32.xlu1 %v261_v33, 257  ;;  %627 = vbcast.lane.b32.xlu0 %v254_v34, 257 }
  0xf3   :  { %v8274_v4 = vpop.permute.xlu1 %1532  ;;  %v8276_v10 = vpop.permute.xlu0 %1525 }
  0xf4   :  { %12602 = vst [vmem:[#allocation49_spill] sm:$0xff] %v8274_v4  ;;  %12603 = vst [vmem:[#allocation50_spill] sm:$0xff] %v8276_v10 }
  0xf5   :  { %639 = vbcast.lane.b32.xlu1 %v275_v53, 257  ;;  %635 = vbcast.lane.b32.xlu0 %v268_v54, 257 }
  0xf7   :  { %v8278_v32 = vpop.permute.xlu1 %663  ;;  %v8280_v28 = vpop.permute.xlu0 %659 }
  0xf8   :  { %12604 = vst [vmem:[#allocation51_spill] sm:$0xff] %v8278_v32  ;;  %12605 = vst [vmem:[#allocation52_spill] sm:$0xff] %v8280_v28 }
  0xf9   :  { %1646 = vbcast.lane.b32.xlu1 %v8098_v0, 257  ;;  %1642 = vbcast.lane.b32.xlu0 %v8102_v6, 257  ;;  %v121_v6 = vrot.slane %v7961_v22, %v8157_v29 }
  0xfb   :  { %v8284_v31 = vpop.permute.xlu1 %671  ;;  %v8286_v38 = vpop.permute.xlu0 %667 }
  0xfc   :  { %12606 = vst [vmem:[#allocation53_spill] sm:$0xff] %v8284_v31  ;;  %12607 = vst [vmem:[#allocation54_spill] sm:$0xff] %v8286_v38 }
  0xfd   :  { %1654 = vbcast.lane.b32.xlu1 %v8112_v11, 257  ;;  %1650 = vbcast.lane.b32.xlu0 %v8116_v14, 257  ;;  %v114_v11 = vrot.slane %v7961_v22, %v8160_v30 }
  0xff   :  { %v8290_v33 = vpop.permute.xlu1 %1318  ;;  %v8292_v34 = vpop.permute.xlu0 %1311 }
 0x100   :  { %12608 = vst [vmem:[#allocation55_spill] sm:$0xff] %v8290_v33  ;;  %12609 = vst [vmem:[#allocation56_spill] sm:$0xff] %v8292_v34 }
 0x101   :  { %1838 = vbcast.lane.b32.xlu1 %v8032_v46, 257  ;;  %1834 = vbcast.lane.b32.xlu0 %v8036_v47, 257  ;;  %v8309_v46 = vld [vmem:[%s12349_s0 + $0x8] sm:$0xff] }
 0x103   :  { %v8296_v53 = vpop.permute.xlu1 %1332  ;;  %v8298_v0 = vpop.permute.xlu0 %1325 }
 0x104   :  { %12610 = vst [vmem:[#allocation57_spill] sm:$0xff] %v8296_v53  ;;  %12611 = vst [vmem:[#allocation58_spill] sm:$0xff] %v8298_v0  ;;  %v8325_v0 = vrot.slane %v7966_v23, %v8157_v29 }
 0x105   :  { %1846 = vbcast.lane.b32.xlu1 %v8042_v48, 257  ;;  %1842 = vbcast.lane.b32.xlu0 %v8046_v49, 257  ;;  %v135_v48 = vrot.slane %v8309_v46, %v7910_v3  ;;  %v128_v49 = vrot.slane %v8309_v46, %v7907_v2 }
 0x107   :  { %v8311_v47 = vpop.permute.xlu1 %1546  ;;  %v8313_v14 = vpop.permute.xlu0 %1539 }
 0x108   :  { %12612 = vst [vmem:[#allocation59_spill] sm:$0xff] %v8311_v47  ;;  %12613 = vst [vmem:[#allocation60_spill] sm:$0xff] %v8313_v14  ;;  %v8329_v14 = vrot.slane %v7966_v23, %v8160_v30  ;;  %v8334_v47 = vld [vmem:[%s12350_s1 + $0x8] sm:$0xff] }
 0x109   :  { %123 = vbcast.lane.b32.xlu1 %v121_v6, 256  ;;  %116 = vbcast.lane.b32.xlu0 %v114_v11, 256  ;;  %v8348_v23 = vrot.slane %v8334_v47, %v7907_v2 }
 0x10b   :  { %v8319_v54 = vpop.permute.xlu1 %1560  ;;  %v8321_v22 = vpop.permute.xlu0 %1553 }
 0x10c   :  { %12614 = vst [vmem:[#allocation61_spill] sm:$0xff] %v8319_v54  ;;  %12615 = vst [vmem:[#allocation62_spill] sm:$0xff] %v8321_v22  ;;  %v8344_v22 = vrot.slane %v8334_v47, %v7910_v3 }
 0x10d   :  { %137 = vbcast.lane.b32.xlu1 %v135_v48, 256  ;;  %130 = vbcast.lane.b32.xlu0 %v128_v49, 256 }
 0x10f   :  { %v8336_v53 = vpop.permute.xlu1 %1192  ;;  %v8338_v54 = vpop.permute.xlu0 %1185 }
 0x110   :  { %12616 = vst [vmem:[#allocation63_spill] sm:$0xff] %v8336_v53  ;;  %12617 = vst [vmem:[#allocation64_spill] sm:$0xff] %v8338_v54 }
 0x111   :  { %351 = vbcast.lane.b32.xlu1 %v8325_v0, 256  ;;  %344 = vbcast.lane.b32.xlu0 %v8329_v14, 256 }
 0x113   :  { %v8350_v34 = vpop.permute.xlu1 %1420  ;;  %v8352_v33 = vpop.permute.xlu0 %1413 }
 0x114   :  { %12618 = vst [vmem:[#allocation65_spill] sm:$0xff] %v8350_v34  ;;  %12619 = vst [vmem:[#allocation66_spill] sm:$0xff] %v8352_v33 }
 0x115   :  { %365 = vbcast.lane.b32.xlu1 %v8344_v22, 256  ;;  %358 = vbcast.lane.b32.xlu0 %v8348_v23, 256 }
 0x117   :  { %v8356_v54 = vpop.permute.xlu1 %1702  ;;  %v8358_v53 = vpop.permute.xlu0 %1698 }
 0x118   :  { %12620 = vst [vmem:[#allocation67_spill] sm:$0xff] %v8356_v54  ;;  %12621 = vst [vmem:[#allocation68_spill] sm:$0xff] %v8358_v53 }
 0x119   :  { %551 = vbcast.lane.b32.xlu1 %v121_v6, 257  ;;  %547 = vbcast.lane.b32.xlu0 %v114_v11, 257  ;;  %v8379_v6 = vld [vmem:[%s12349_s0 + $0x1a] sm:$0xff] }
 0x11b   :  { %v8360_v38 = vpop.permute.xlu1 %1206  ;;  %v8362_v31 = vpop.permute.xlu0 %1199 }
 0x11c   :  { %12622 = vst [vmem:[#allocation69_spill] sm:$0xff] %v8360_v38  ;;  %12623 = vst [vmem:[#allocation70_spill] sm:$0xff] %v8362_v31  ;;  %v8438_v31 = vrot.slane %v8334_v47, %v7927_v8 }
 0x11d   :  { %559 = vbcast.lane.b32.xlu1 %v135_v48, 257  ;;  %555 = vbcast.lane.b32.xlu0 %v128_v49, 257 }
 0x11f   :  { %v8364_v28 = vpop.permute.xlu1 %1220  ;;  %v8366_v34 = vpop.permute.xlu0 %1213 }
 0x120   :  { %12624 = vst [vmem:[#allocation71_spill] sm:$0xff] %v8364_v28  ;;  %12625 = vst [vmem:[#allocation72_spill] sm:$0xff] %v8366_v34 }
 0x121   :  { %743 = vbcast.lane.b32.xlu1 %v8187_v5, 257  ;;  %739 = vbcast.lane.b32.xlu0 %v8191_v45, 257  ;;  %v8389_v5 = vrot.slane %v8379_v6, %v7910_v3 }
 0x123   :  { %v8370_v33 = vpop.permute.xlu1 %1434  ;;  %v8372_v54 = vpop.permute.xlu0 %1427 }
 0x124   :  { %12626 = vst [vmem:[#allocation73_spill] sm:$0xff] %v8370_v33  ;;  %12627 = vst [vmem:[#allocation74_spill] sm:$0xff] %v8372_v54 }
 0x125   :  { %751 = vbcast.lane.b32.xlu1 %v8203_v44, 257  ;;  %747 = vbcast.lane.b32.xlu0 %v8206_v43, 257  ;;  %v8393_v43 = vrot.slane %v8379_v6, %v7907_v2  ;;  %v8398_v44 = vld [vmem:[%s12350_s1 + $0x1a] sm:$0xff] }
 0x127   :  { %v8381_v11 = vpop.permute.xlu1 %1448  ;;  %v8383_v48 = vpop.permute.xlu0 %1441 }
 0x128   :  { %12628 = vst [vmem:[#allocation75_spill] sm:$0xff] %v8381_v11  ;;  %12629 = vst [vmem:[#allocation76_spill] sm:$0xff] %v8383_v48 }
 0x129   :  { %1766 = vbcast.lane.b32.xlu1 %v8080_v58, 257  ;;  %1762 = vbcast.lane.b32.xlu0 %v8084_v59, 257  ;;  %v8408_v58 = vrot.slane %v8398_v44, %v7910_v3  ;;  %v8412_v59 = vrot.slane %v8398_v44, %v7907_v2 }
 0x12b   :  { %v8400_v45 = vpop.permute.xlu1 %1710  ;;  %v8402_v49 = vpop.permute.xlu0 %1706 }
 0x12c   :  { %12630 = vst [vmem:[#allocation77_spill] sm:$0xff] %v8400_v45  ;;  %12631 = vst [vmem:[#allocation78_spill] sm:$0xff] %v8402_v49  ;;  %v149_v49 = vrot.slane %v8309_v46, %v7927_v8  ;;  %v142_v45 = vrot.slane %v8309_v46, %v7930_v9 }
 0x12d   :  { %2415 = vbcast.lane.b32.xlu1 %v8389_v5, 256  ;;  %2408 = vbcast.lane.b32.xlu0 %v8393_v43, 256 }
 0x12f   :  { %v8414_v48 = vpop.permute.xlu1 %1718  ;;  %v8416_v11 = vpop.permute.xlu0 %1714 }
 0x130   :  { %12632 = vst [vmem:[#allocation79_spill] sm:$0xff] %v8414_v48  ;;  %12633 = vst [vmem:[#allocation80_spill] sm:$0xff] %v8416_v11  ;;  %v163_v48 = vrot.slane %v8309_v46, %v7937_v12  ;;  %v156_v11 = vrot.slane %v8309_v46, %v7940_v13  ;;  %v8452_v46 = vrot.slane %v8334_v47, %v7937_v12 }
 0x131   :  { %2643 = vbcast.lane.b32.xlu1 %v8408_v58, 256  ;;  %2636 = vbcast.lane.b32.xlu0 %v8412_v59, 256 }
 0x133   :  { %v8424_v54 = vpop.permute.xlu1 %235  ;;  %v8426_v33 = vpop.permute.xlu0 %228 }
 0x134   :  { %12634 = vst [vmem:[#allocation81_spill] sm:$0xff] %v8424_v54  ;;  %12635 = vst [vmem:[#allocation82_spill] sm:$0xff] %v8426_v33  ;;  %v8442_v33 = vrot.slane %v8334_v47, %v7930_v9 }
 0x135   :  { %151 = vbcast.lane.b32.xlu1 %v149_v49, 256  ;;  %144 = vbcast.lane.b32.xlu0 %v142_v45, 256 }
 0x137   :  { %v8432_v34 = vpop.permute.xlu1 %249  ;;  %v8434_v28 = vpop.permute.xlu0 %242 }
 0x138   :  { %12636 = vst [vmem:[#allocation83_spill] sm:$0xff] %v8432_v34  ;;  %12637 = vst [vmem:[#allocation84_spill] sm:$0xff] %v8434_v28  ;;  %v8456_v28 = vrot.slane %v8334_v47, %v7940_v13 }
 0x139   :  { %165 = vbcast.lane.b32.xlu1 %v163_v48, 256  ;;  %158 = vbcast.lane.b32.xlu0 %v156_v11, 256 }
 0x13b   :  { %v8444_v54 = vpop.permute.xlu1 %463  ;;  %v8446_v38 = vpop.permute.xlu0 %456 }
 0x13c   :  { %12638 = vst [vmem:[#allocation85_spill] sm:$0xff] %v8444_v54  ;;  %12639 = vst [vmem:[#allocation86_spill] sm:$0xff] %v8446_v38 }
 0x13d   :  { %379 = vbcast.lane.b32.xlu1 %v8438_v31, 256  ;;  %372 = vbcast.lane.b32.xlu0 %v8442_v33, 256 }
 0x13f   :  { %v8458_v34 = vpop.permute.xlu1 %477  ;;  %v8460_v53 = vpop.permute.xlu0 %470 }
 0x140   :  { %12640 = vst [vmem:[#allocation87_spill] sm:$0xff] %v8458_v34  ;;  %12641 = vst [vmem:[#allocation88_spill] sm:$0xff] %v8460_v53 }
 0x141   :  { %393 = vbcast.lane.b32.xlu1 %v8452_v46, 256  ;;  %386 = vbcast.lane.b32.xlu0 %v8456_v28, 256 }
 0x143   :  { %v8464_v38 = vpop.permute.xlu1 %615  ;;  %v8466_v54 = vpop.permute.xlu0 %611 }
 0x144   :  { %12642 = vst [vmem:[#allocation89_spill] sm:$0xff] %v8464_v38  ;;  %12643 = vst [vmem:[#allocation90_spill] sm:$0xff] %v8466_v54 }
 0x145   :  { %567 = vbcast.lane.b32.xlu1 %v149_v49, 257  ;;  %563 = vbcast.lane.b32.xlu0 %v142_v45, 257 }
 0x147   :  { %v8468_v32 = vpop.permute.xlu1 %623  ;;  %v8470_v10 = vpop.permute.xlu0 %619 }
 0x148   :  { %12644 = vst [vmem:[#allocation91_spill] sm:$0xff] %v8468_v32  ;;  %12645 = vst [vmem:[#allocation92_spill] sm:$0xff] %v8470_v10  ;;  %v8634_v32 = vld [vmem:[%s12350_s1 + $0x2] sm:$0xff] }
 0x149   :  { %575 = vbcast.lane.b32.xlu1 %v163_v48, 257  ;;  %571 = vbcast.lane.b32.xlu0 %v156_v11, 257 }
 0x14b   :  { %v8472_v47 = vpop.permute.xlu1 %1638  ;;  %v8474_v34 = vpop.permute.xlu0 %1634 }
 0x14c   :  { %12646 = vst [vmem:[#allocation93_spill] sm:$0xff] %v8472_v47  ;;  %12647 = vst [vmem:[#allocation94_spill] sm:$0xff] %v8474_v34 }
 0x14d   :  { %759 = vbcast.lane.b32.xlu1 %v8247_v40, 257  ;;  %755 = vbcast.lane.b32.xlu0 %v8250_v41, 257  ;;  %v8498_v41 = vrot.slane %v8379_v6, %v7927_v8 }
 0x14f   :  { %v8478_v53 = vpop.permute.xlu1 %1830  ;;  %v8480_v38 = vpop.permute.xlu0 %1826 }
 0x150   :  { %12648 = vst [vmem:[#allocation95_spill] sm:$0xff] %v8478_v53  ;;  %12649 = vst [vmem:[#allocation96_spill] sm:$0xff] %v8480_v38  ;;  %v8648_v38 = vrot.slane %v8634_v32, %v7907_v2 }
 0x151   :  { %767 = vbcast.lane.b32.xlu1 %v8259_v35, 257  ;;  %763 = vbcast.lane.b32.xlu0 %v8262_v37, 257  ;;  %v8502_v37 = vrot.slane %v8379_v6, %v7930_v9 }
 0x153   :  { %v8484_v45 = vpop.permute.xlu1 %263  ;;  %v8486_v48 = vpop.permute.xlu0 %256 }
 0x154   :  { %12650 = vst [vmem:[#allocation97_spill] sm:$0xff] %v8484_v45  ;;  %12651 = vst [vmem:[#allocation98_spill] sm:$0xff] %v8486_v48 }
 0x155   :  { %1774 = vbcast.lane.b32.xlu1 %v8126_v17, 257  ;;  %1770 = vbcast.lane.b32.xlu0 %v8130_v18, 257  ;;  %v8512_v18 = vrot.slane %v8379_v6, %v7937_v12 }
 0x157   :  { %v8490_v11 = vpop.permute.xlu1 %277  ;;  %v8492_v40 = vpop.permute.xlu0 %270 }
 0x158   :  { %12652 = vst [vmem:[#allocation99_spill] sm:$0xff] %v8490_v11  ;;  %12653 = vst [vmem:[#allocation100_spill] sm:$0xff] %v8492_v40  ;;  %v8526_v40 = vrot.slane %v8398_v44, %v7927_v8  ;;  %v8530_v11 = vrot.slane %v8398_v44, %v7930_v9 }
 0x159   :  { %1782 = vbcast.lane.b32.xlu1 %v8140_v21, 257  ;;  %1778 = vbcast.lane.b32.xlu0 %v8144_v24, 257  ;;  %v8516_v21 = vrot.slane %v8379_v6, %v7940_v13 }
 0x15b   :  { %v8504_v35 = vpop.permute.xlu1 %491  ;;  %v8506_v17 = vpop.permute.xlu0 %484 }
 0x15c   :  { %12654 = vst [vmem:[#allocation101_spill] sm:$0xff] %v8504_v35  ;;  %12655 = vst [vmem:[#allocation102_spill] sm:$0xff] %v8506_v17 }
 0x15d   :  { %2429 = vbcast.lane.b32.xlu1 %v8498_v41, 256  ;;  %2422 = vbcast.lane.b32.xlu0 %v8502_v37, 256 }
 0x15f   :  { %v8518_v24 = vpop.permute.xlu1 %505  ;;  %v8520_v49 = vpop.permute.xlu0 %498 }
 0x160   :  { %12656 = vst [vmem:[#allocation103_spill] sm:$0xff] %v8518_v24  ;;  %12657 = vst [vmem:[#allocation104_spill] sm:$0xff] %v8520_v49  ;;  %v8540_v49 = vrot.slane %v8398_v44, %v7937_v12  ;;  %v8544_v24 = vrot.slane %v8398_v44, %v7940_v13 }
 0x161   :  { %2443 = vbcast.lane.b32.xlu1 %v8512_v18, 256  ;;  %2436 = vbcast.lane.b32.xlu0 %v8516_v21, 256 }
 0x163   :  { %v8532_v48 = vpop.permute.xlu1 %631  ;;  %v8534_v6 = vpop.permute.xlu0 %627 }
 0x164   :  { %12658 = vst [vmem:[#allocation105_spill] sm:$0xff] %v8532_v48  ;;  %12659 = vst [vmem:[#allocation106_spill] sm:$0xff] %v8534_v6 }
 0x165   :  { %2657 = vbcast.lane.b32.xlu1 %v8526_v40, 256  ;;  %2650 = vbcast.lane.b32.xlu0 %v8530_v11, 256 }
 0x167   :  { %v8546_v17 = vpop.permute.xlu1 %639  ;;  %v8548_v35 = vpop.permute.xlu0 %635 }
 0x168   :  { %12660 = vst [vmem:[#allocation107_spill] sm:$0xff] %v8546_v17  ;;  %12661 = vst [vmem:[#allocation108_spill] sm:$0xff] %v8548_v35  ;;  %v8566_v35 = vrot.slane %v7995_v36, %v8157_v29  ;;  %v8599_v17 = vrot.slane %v8004_v39, %v8160_v30 }
 0x169   :  { %2671 = vbcast.lane.b32.xlu1 %v8540_v49, 256  ;;  %2664 = vbcast.lane.b32.xlu0 %v8544_v24, 256 }
 0x16b   :  { %v8552_v6 = vpop.permute.xlu1 %1646  ;;  %v8554_v48 = vpop.permute.xlu0 %1642 }
 0x16c   :  { %12662 = vst [vmem:[#allocation109_spill] sm:$0xff] %v8552_v6  ;;  %12663 = vst [vmem:[#allocation110_spill] sm:$0xff] %v8554_v48  ;;  %v8570_v6 = vrot.slane %v7995_v36, %v8160_v30  ;;  %v8595_v48 = vrot.slane %v8004_v39, %v8157_v29  ;;  %v2287_v39 = vld [vmem:[%s12349_s0 + $0x2] sm:$0xff] }
 0x16d   :  { %679 = vbcast.lane.b32.xlu1 %v8325_v0, 257  ;;  %675 = vbcast.lane.b32.xlu0 %v8329_v14, 257  ;;  %v1179_v0 = vld [vmem:[%s12349_s0 + $0x21] sm:$0xff] }
 0x16f   :  { %v8558_v45 = vpop.permute.xlu1 %1654  ;;  %v8560_v44 = vpop.permute.xlu0 %1650 }
 0x170   :  { %12664 = vst [vmem:[#allocation111_spill] sm:$0xff] %v8558_v45  ;;  %12665 = vst [vmem:[#allocation112_spill] sm:$0xff] %v8560_v44 }
 0x171   :  { %687 = vbcast.lane.b32.xlu1 %v8344_v22, 257  ;;  %683 = vbcast.lane.b32.xlu0 %v8348_v23, 257  ;;  %v8582_v22 = vrot.slane %v1179_v0, %v7910_v3  ;;  %v8585_v23 = vrot.slane %v1179_v0, %v7907_v2 }
 0x173   :  { %v8575_v14 = vpop.permute.xlu1 %1838  ;;  %v8577_v45 = vpop.permute.xlu0 %1834 }
 0x174   :  { %12666 = vst [vmem:[#allocation113_spill] sm:$0xff] %v8575_v14  ;;  %12667 = vst [vmem:[#allocation114_spill] sm:$0xff] %v8577_v45  ;;  %v1407_v45 = vld [vmem:[%s12350_s1 + $0x21] sm:$0xff] }
 0x175   :  { %1346 = vbcast.lane.b32.xlu1 %v8566_v35, 256  ;;  %1339 = vbcast.lane.b32.xlu0 %v8570_v6, 256  ;;  %v8614_v34 = vrot.slane %v1407_v45, %v7907_v2 }
 0x177   :  { %v8587_v36 = vpop.permute.xlu1 %1846  ;;  %v8589_v44 = vpop.permute.xlu0 %1842 }
 0x178   :  { %12668 = vst [vmem:[#allocation115_spill] sm:$0xff] %v8587_v36  ;;  %12669 = vst [vmem:[#allocation116_spill] sm:$0xff] %v8589_v44  ;;  %v8611_v44 = vrot.slane %v1407_v45, %v7910_v3 }
 0x179   :  { %1360 = vbcast.lane.b32.xlu1 %v8582_v22, 256  ;;  %1353 = vbcast.lane.b32.xlu0 %v8585_v23, 256 }
 0x17b   :  { %v8604_v14 = vpop.permute.xlu1 %123  ;;  %v8606_v36 = vpop.permute.xlu0 %116 }
 0x17c   :  { %12670 = vst [vmem:[#allocation117_spill] sm:$0xff] %v8604_v14  ;;  %12671 = vst [vmem:[#allocation118_spill] sm:$0xff] %v8606_v36  ;;  %v8626_v36 = vrot.slane %v2287_v39, %v7910_v3  ;;  %v8629_v14 = vrot.slane %v2287_v39, %v7907_v2 }
 0x17d   :  { %1574 = vbcast.lane.b32.xlu1 %v8595_v48, 256  ;;  %1567 = vbcast.lane.b32.xlu0 %v8599_v17, 256 }
 0x17f   :  { %v8619_v47 = vpop.permute.xlu1 %137  ;;  %v8621_v10 = vpop.permute.xlu0 %130 }
 0x180   :  { %12672 = vst [vmem:[#allocation119_spill] sm:$0xff] %v8619_v47  ;;  %12673 = vst [vmem:[#allocation120_spill] sm:$0xff] %v8621_v10  ;;  %v8644_v10 = vrot.slane %v8634_v32, %v7910_v3 }
 0x181   :  { %1588 = vbcast.lane.b32.xlu1 %v8611_v44, 256  ;;  %1581 = vbcast.lane.b32.xlu0 %v8614_v34, 256 }
 0x183   :  { %v8636_v54 = vpop.permute.xlu1 %351  ;;  %v8638_v47 = vpop.permute.xlu0 %344 }
 0x184   :  { %12674 = vst [vmem:[#allocation121_spill] sm:$0xff] %v8636_v54  ;;  %12675 = vst [vmem:[#allocation122_spill] sm:$0xff] %v8638_v47 }
 0x185   :  { %2303 = vbcast.lane.b32.xlu1 %v8626_v36, 256  ;;  %2296 = vbcast.lane.b32.xlu0 %v8629_v14, 256 }
 0x187   :  { %v8650_v53 = vpop.permute.xlu1 %365  ;;  %v8652_v4 = vpop.permute.xlu0 %358 }
 0x188   :  { %12676 = vst [vmem:[#allocation123_spill] sm:$0xff] %v8650_v53  ;;  %12677 = vst [vmem:[#allocation124_spill] sm:$0xff] %v8652_v4 }
 0x189   :  { %2531 = vbcast.lane.b32.xlu1 %v8644_v10, 256  ;;  %2524 = vbcast.lane.b32.xlu0 %v8648_v38, 256 }
 0x18b   :  { %v8656_v47 = vpop.permute.xlu1 %551  ;;  %v8658_v54 = vpop.permute.xlu0 %547 }
 0x18c   :  { %12678 = vst [vmem:[#allocation125_spill] sm:$0xff] %v8656_v47  ;;  %12679 = vst [vmem:[#allocation126_spill] sm:$0xff] %v8658_v54  ;;  %v8714_v54 = vrot.slane %v1407_v45, %v7940_v13 }
 0x18d   :  { %2813 = vbcast.lane.b32.xlu1 %v8389_v5, 257  ;;  %2809 = vbcast.lane.b32.xlu0 %v8393_v43, 257  ;;  %v8675_v5 = vrot.slane %v1179_v0, %v7927_v8  ;;  %v8678_v43 = vrot.slane %v1179_v0, %v7930_v9 }
 0x18e   :  { %12693 = vst [vmem:[#allocation140_spill] sm:$0xff] %v8714_v54 }
 0x18f   :  { %v8662_v42 = vpop.permute.xlu1 %559  ;;  %v8664_v27 = vpop.permute.xlu0 %555 }
 0x190   :  { %12680 = vst [vmem:[#allocation127_spill] sm:$0xff] %v8662_v42  ;;  %12681 = vst [vmem:[#allocation128_spill] sm:$0xff] %v8664_v27 }
 0x191   :  { %695 = vbcast.lane.b32.xlu1 %v8438_v31, 257  ;;  %691 = vbcast.lane.b32.xlu0 %v8442_v33, 257  ;;  %v8687_v31 = vrot.slane %v1179_v0, %v7937_v12  ;;  %v8690_v33 = vrot.slane %v1179_v0, %v7940_v13  ;;  %v8711_v0 = vrot.slane %v1407_v45, %v7937_v12 }
 0x193   :  { %v8668_v4 = vpop.permute.xlu1 %743  ;;  %v8670_v53 = vpop.permute.xlu0 %739  ;;  %12692 = vst [vmem:[#allocation139_spill] sm:$0xff] %v8711_v0 }
 0x194   :  { %12682 = vst [vmem:[#allocation129_spill] sm:$0xff] %v8668_v4  ;;  %12683 = vst [vmem:[#allocation130_spill] sm:$0xff] %v8670_v53 }
 0x195   :  { %703 = vbcast.lane.b32.xlu1 %v8452_v46, 257  ;;  %699 = vbcast.lane.b32.xlu0 %v8456_v28, 257 }
 0x197   :  { %v8680_v42 = vpop.permute.xlu1 %751  ;;  %v8682_v27 = vpop.permute.xlu0 %747 }
 0x198   :  { %12684 = vst [vmem:[#allocation131_spill] sm:$0xff] %v8680_v42  ;;  %12685 = vst [vmem:[#allocation132_spill] sm:$0xff] %v8682_v27  ;;  %v8699_v27 = vrot.slane %v1407_v45, %v7927_v8  ;;  %v8702_v42 = vrot.slane %v1407_v45, %v7930_v9  ;;  %v8735_v45 = vrot.slane %v2287_v39, %v7937_v12 }
 0x199   :  { %1374 = vbcast.lane.b32.xlu1 %v8675_v5, 256  ;;  %1367 = vbcast.lane.b32.xlu0 %v8678_v43, 256 }
 0x19a   :  { %12688 = vst [vmem:[#allocation135_spill] sm:$0xff] %v8699_v27  ;;  %12689 = vst [vmem:[#allocation136_spill] sm:$0xff] %v8702_v42 }
 0x19b   :  { %v8692_v28 = vpop.permute.xlu1 %1766  ;;  %v8694_v46 = vpop.permute.xlu0 %1762 }
 0x19c   :  { %12686 = vst [vmem:[#allocation133_spill] sm:$0xff] %v8692_v28  ;;  %12687 = vst [vmem:[#allocation134_spill] sm:$0xff] %v8694_v46  ;;  %v8723_v28 = vrot.slane %v2287_v39, %v7927_v8 }
 0x19d   :  { %1388 = vbcast.lane.b32.xlu1 %v8687_v31, 256  ;;  %1381 = vbcast.lane.b32.xlu0 %v8690_v33, 256 }
 0x19f   :  { %v8704_v53 = vpop.permute.xlu1 %2415  ;;  %v8706_v4 = vpop.permute.xlu0 %2408 }
 0x1a0   :  { %12690 = vst [vmem:[#allocation137_spill] sm:$0xff] %v8704_v53  ;;  %12691 = vst [vmem:[#allocation138_spill] sm:$0xff] %v8706_v4  ;;  %v8726_v4 = vrot.slane %v2287_v39, %v7930_v9 }
 0x1a1   :  { %1602 = vbcast.lane.b32.xlu1 %v8699_v27, 256  ;;  %1595 = vbcast.lane.b32.xlu0 %v8702_v42, 256 }
 0x1a3   :  { %v8716_v47 = vpop.permute.xlu1 %2643  ;;  %v8718_v46 = vpop.permute.xlu0 %2636 }
 0x1a4   :  { %12694 = vst [vmem:[#allocation141_spill] sm:$0xff] %v8716_v47  ;;  %12695 = vst [vmem:[#allocation142_spill] sm:$0xff] %v8718_v46  ;;  %v8738_v46 = vrot.slane %v2287_v39, %v7940_v13 }
 0x1a5   :  { %1616 = vbcast.lane.b32.xlu1 %v8711_v0, 256  ;;  %1609 = vbcast.lane.b32.xlu0 %v8714_v54, 256 }
 0x1a7   :  { %v8728_v53 = vpop.permute.xlu1 %151  ;;  %v8730_v42 = vpop.permute.xlu0 %144 }
 0x1a8   :  { %12696 = vst [vmem:[#allocation143_spill] sm:$0xff] %v8728_v53  ;;  %12697 = vst [vmem:[#allocation144_spill] sm:$0xff] %v8730_v42  ;;  %v8748_v42 = vrot.slane %v8634_v32, %v7927_v8  ;;  %v8752_v53 = vrot.slane %v8634_v32, %v7930_v9 }
 0x1a9   :  { %2317 = vbcast.lane.b32.xlu1 %v8723_v28, 256  ;;  %2310 = vbcast.lane.b32.xlu0 %v8726_v4, 256 }
 0x1aa   :  { %12700 = vst [vmem:[#allocation147_spill] sm:$0xff] %v8752_v53 }
 0x1ab   :  { %v8740_v47 = vpop.permute.xlu1 %165  ;;  %v8742_v54 = vpop.permute.xlu0 %158 }
 0x1ac   :  { %12698 = vst [vmem:[#allocation145_spill] sm:$0xff] %v8740_v47  ;;  %12699 = vst [vmem:[#allocation146_spill] sm:$0xff] %v8742_v54  ;;  %v8762_v54 = vrot.slane %v8634_v32, %v7937_v12  ;;  %v8766_v47 = vrot.slane %v8634_v32, %v7940_v13 }
 0x1ad   :  { %2331 = vbcast.lane.b32.xlu1 %v8735_v45, 256  ;;  %2324 = vbcast.lane.b32.xlu0 %v8738_v46, 256 }
 0x1af   :  { %v8754_v0 = vpop.permute.xlu1 %379  ;;  %v8756_v39 = vpop.permute.xlu0 %372 }
 0x1b0   :  { %12701 = vst [vmem:[#allocation148_spill] sm:$0xff] %v8754_v0  ;;  %12702 = vst [vmem:[#allocation149_spill] sm:$0xff] %v8756_v39 }
 0x1b1   :  { %2545 = vbcast.lane.b32.xlu1 %v8748_v42, 256  ;;  %2538 = vbcast.lane.b32.xlu0 %v8752_v53, 256 }
 0x1b3   :  { %v8768_v27 = vpop.permute.xlu1 %393  ;;  %v8770_v1 = vpop.permute.xlu0 %386 }
 0x1b4   :  { %12703 = vst [vmem:[#allocation150_spill] sm:$0xff] %v8768_v27  ;;  %12704 = vst [vmem:[#allocation151_spill] sm:$0xff] %v8770_v1  ;;  %v8788_v1 = vrot.slane %v8051_v50, %v8157_v29 }
 0x1b5   :  { %2559 = vbcast.lane.b32.xlu1 %v8762_v54, 256  ;;  %2552 = vbcast.lane.b32.xlu0 %v8766_v47, 256 }
 0x1b7   :  { %v8774_v39 = vpop.permute.xlu1 %567  ;;  %v8776_v0 = vpop.permute.xlu0 %563 }
 0x1b8   :  { %12705 = vst [vmem:[#allocation152_spill] sm:$0xff] %v8774_v39  ;;  %12706 = vst [vmem:[#allocation153_spill] sm:$0xff] %v8776_v0  ;;  %v8792_v39 = vrot.slane %v8051_v50, %v8160_v30  ;;  %v1405_v0 = vld [vmem:[%s12350_s1 + $0x9] sm:$0xff] }
 0x1b9   :  { %2821 = vbcast.lane.b32.xlu1 %v8498_v41, 257  ;;  %2817 = vbcast.lane.b32.xlu0 %v8502_v37, 257  ;;  %v1177_v41 = vld [vmem:[%s12349_s0 + $0x9] sm:$0xff] }
 0x1bb   :  { %v8780_v53 = vpop.permute.xlu1 %575  ;;  %v8782_v32 = vpop.permute.xlu0 %571 }
 0x1bc   :  { %12707 = vst [vmem:[#allocation154_spill] sm:$0xff] %v8780_v53  ;;  %12708 = vst [vmem:[#allocation155_spill] sm:$0xff] %v8782_v32 }
 0x1bd   :  { %2829 = vbcast.lane.b32.xlu1 %v8512_v18, 257  ;;  %2825 = vbcast.lane.b32.xlu0 %v8516_v21, 257  ;;  %v8804_v18 = vrot.slane %v1177_v41, %v7910_v3  ;;  %v8807_v21 = vrot.slane %v1177_v41, %v7907_v2 }
 0x1bf   :  { %v8797_v37 = vpop.permute.xlu1 %759  ;;  %v8799_v53 = vpop.permute.xlu0 %755 }
 0x1c0   :  { %12709 = vst [vmem:[#allocation156_spill] sm:$0xff] %v8797_v37  ;;  %12710 = vst [vmem:[#allocation157_spill] sm:$0xff] %v8799_v53  ;;  %v8817_v53 = vrot.slane %v8070_v55, %v8157_v29  ;;  %v8821_v37 = vrot.slane %v8070_v55, %v8160_v30  ;;  %v8836_v29 = vrot.slane %v1405_v0, %v7907_v2 }
 0x1c1   :  { %1234 = vbcast.lane.b32.xlu1 %v8788_v1, 256  ;;  %1227 = vbcast.lane.b32.xlu0 %v8792_v39, 256 }
 0x1c3   :  { %v8809_v50 = vpop.permute.xlu1 %767  ;;  %v8811_v32 = vpop.permute.xlu0 %763 }
 0x1c4   :  { %12711 = vst [vmem:[#allocation158_spill] sm:$0xff] %v8809_v50  ;;  %12712 = vst [vmem:[#allocation159_spill] sm:$0xff] %v8811_v32  ;;  %v8833_v32 = vrot.slane %v1405_v0, %v7910_v3 }
 0x1c5   :  { %1248 = vbcast.lane.b32.xlu1 %v8804_v18, 256  ;;  %1241 = vbcast.lane.b32.xlu0 %v8807_v21, 256 }
 0x1c7   :  { %v8826_v27 = vpop.permute.xlu1 %1774  ;;  %v8828_v50 = vpop.permute.xlu0 %1770 }
 0x1c8   :  { %12713 = vst [vmem:[#allocation160_spill] sm:$0xff] %v8826_v27  ;;  %12714 = vst [vmem:[#allocation161_spill] sm:$0xff] %v8828_v50 }
 0x1c9   :  { %1462 = vbcast.lane.b32.xlu1 %v8817_v53, 256  ;;  %1455 = vbcast.lane.b32.xlu0 %v8821_v37, 256 }
 0x1cb   :  { %v8838_v55 = vpop.permute.xlu1 %1782  ;;  %v8840_v30 = vpop.permute.xlu0 %1778 }
 0x1cc   :  { %12715 = vst [vmem:[#allocation162_spill] sm:$0xff] %v8838_v55  ;;  %12716 = vst [vmem:[#allocation163_spill] sm:$0xff] %v8840_v30 }
 0x1cd   :  { %1476 = vbcast.lane.b32.xlu1 %v8833_v32, 256  ;;  %1469 = vbcast.lane.b32.xlu0 %v8836_v29, 256 }
 0x1cf   :  { %v8844_v27 = vpop.permute.xlu1 %2429  ;;  %v8846_v50 = vpop.permute.xlu0 %2422 }
 0x1d0   :  { %12717 = vst [vmem:[#allocation164_spill] sm:$0xff] %v8844_v27  ;;  %12718 = vst [vmem:[#allocation165_spill] sm:$0xff] %v8846_v50 }
 0x1d1   :  { %1726 = vbcast.lane.b32.xlu1 %v8566_v35, 257  ;;  %1722 = vbcast.lane.b32.xlu0 %v8570_v6, 257  ;;  %v8869_v6 = vrot.slane %v1177_v41, %v7927_v8 }
 0x1d3   :  { %v8850_v3 = vpop.permute.xlu1 %2443  ;;  %v8852_v2 = vpop.permute.xlu0 %2436 }
 0x1d4   :  { %12719 = vst [vmem:[#allocation166_spill] sm:$0xff] %v8850_v3  ;;  %12720 = vst [vmem:[#allocation167_spill] sm:$0xff] %v8852_v2 }
 0x1d5   :  { %1734 = vbcast.lane.b32.xlu1 %v8582_v22, 257  ;;  %1730 = vbcast.lane.b32.xlu0 %v8585_v23, 257  ;;  %v8872_v22 = vrot.slane %v1177_v41, %v7930_v9 }
 0x1d7   :  { %v8856_v30 = vpop.permute.xlu1 %2657  ;;  %v8858_v55 = vpop.permute.xlu0 %2650 }
 0x1d8   :  { %12721 = vst [vmem:[#allocation168_spill] sm:$0xff] %v8856_v30  ;;  %12722 = vst [vmem:[#allocation169_spill] sm:$0xff] %v8858_v55 }
 0x1d9   :  { %2749 = vbcast.lane.b32.xlu1 %v8626_v36, 257  ;;  %2745 = vbcast.lane.b32.xlu0 %v8629_v14, 257  ;;  %v8881_v14 = vrot.slane %v1177_v41, %v7937_v12 }
 0x1db   :  { %v8862_v50 = vpop.permute.xlu1 %2671  ;;  %v8864_v35 = vpop.permute.xlu0 %2664 }
 0x1dc   :  { %12723 = vst [vmem:[#allocation170_spill] sm:$0xff] %v8862_v50  ;;  %12724 = vst [vmem:[#allocation171_spill] sm:$0xff] %v8864_v35 }
 0x1dd   :  { %2941 = vbcast.lane.b32.xlu1 %v8408_v58, 257  ;;  %2937 = vbcast.lane.b32.xlu0 %v8412_v59, 257  ;;  %v8884_v58 = vrot.slane %v1177_v41, %v7940_v13  ;;  %v8905_v41 = vrot.slane %v1405_v0, %v7937_v12 }
 0x1df   :  { %v8874_v23 = vpop.permute.xlu1 %679  ;;  %v8876_v55 = vpop.permute.xlu0 %675 }
 0x1e0   :  { %12725 = vst [vmem:[#allocation172_spill] sm:$0xff] %v8874_v23  ;;  %12726 = vst [vmem:[#allocation173_spill] sm:$0xff] %v8876_v55  ;;  %v8893_v55 = vrot.slane %v1405_v0, %v7927_v8  ;;  %v8896_v23 = vrot.slane %v1405_v0, %v7930_v9 }
 0x1e1   :  { %1262 = vbcast.lane.b32.xlu1 %v8869_v6, 256  ;;  %1255 = vbcast.lane.b32.xlu0 %v8872_v22, 256 }
 0x1e3   :  { %v8886_v59 = vpop.permute.xlu1 %687  ;;  %v8888_v36 = vpop.permute.xlu0 %683 }
 0x1e4   :  { %12727 = vst [vmem:[#allocation174_spill] sm:$0xff] %v8886_v59  ;;  %12728 = vst [vmem:[#allocation175_spill] sm:$0xff] %v8888_v36  ;;  %v8908_v36 = vrot.slane %v1405_v0, %v7940_v13 }
 0x1e5   :  { %1276 = vbcast.lane.b32.xlu1 %v8881_v14, 256  ;;  %1269 = vbcast.lane.b32.xlu0 %v8884_v58, 256 }
 0x1e7   :  { %v8898_v35 = vpop.permute.xlu1 %1346  ;;  %v8900_v50 = vpop.permute.xlu0 %1339 }
 0x1e8   :  { %12729 = vst [vmem:[#allocation176_spill] sm:$0xff] %v8898_v35  ;;  %12730 = vst [vmem:[#allocation177_spill] sm:$0xff] %v8900_v50  ;;  %v12449_v50 = vmov 0.0  }
 0x1e9   :  { %1490 = vbcast.lane.b32.xlu1 %v8893_v55, 256  ;;  %1483 = vbcast.lane.b32.xlu0 %v8896_v23, 256  ;;  %3553 = vst.msk [vmem:[#allocation2 + $0xa0] sm:$0xff] %vm3549_vm0, %v12449_v50  ;;  %3550 = vst.msk [vmem:[#allocation2] sm:$0xff] %vm3549_vm0, %v12449_v50 }
 0x1ea   :  { %3554 = vst.msk [vmem:[#allocation2 + $0xa8] sm:$0x3] %vm3551_vm1, %v12449_v50  ;;  %3552 = vst.msk [vmem:[#allocation2 + $0x8] sm:$0x3] %vm3551_vm1, %v12449_v50 }
 0x1eb   :  { %v8910_v59 = vpop.permute.xlu1 %1360  ;;  %v8912_v30 = vpop.permute.xlu0 %1353  ;;  %3556 = vst.msk [vmem:[#allocation2 + $0x90] sm:$0xff] %vm3549_vm0, %v12449_v50  ;;  %3558 = vst.msk [vmem:[#allocation2 + $0x130] sm:$0xff] %vm3549_vm0, %v12449_v50 }
 0x1ec   :  { %12731 = vst [vmem:[#allocation178_spill] sm:$0xff] %v8910_v59  ;;  %12732 = vst [vmem:[#allocation179_spill] sm:$0xff] %v8912_v30 }
 0x1ed   :  { %1504 = vbcast.lane.b32.xlu1 %v8905_v41, 256  ;;  %1497 = vbcast.lane.b32.xlu0 %v8908_v36, 256  ;;  %3557 = vst.msk [vmem:[#allocation2 + $0x98] sm:$0x3] %vm3551_vm1, %v12449_v50  ;;  %3559 = vst.msk [vmem:[#allocation2 + $0x138] sm:$0x3] %vm3551_vm1, %v12449_v50 }
 0x1ee   :  { %3562 = vst.msk [vmem:[#allocation2 + $0x10] sm:$0x1] %vm3561_vm2, %v12449_v50  ;;  %3563 = vst.msk [vmem:[#allocation2 + $0x20] sm:$0x1] %vm3561_vm2, %v12449_v50 }
 0x1ef   :  { %3564 = vst.msk [vmem:[#allocation2 + $0x30] sm:$0x1] %vm3561_vm2, %v12449_v50  ;;  %3565 = vst.msk [vmem:[#allocation2 + $0x40] sm:$0x1] %vm3561_vm2, %v12449_v50  ;;  %v8992_v0 = vpop.permute.xlu1 %1574  ;;  %v8994_v30 = vpop.permute.xlu0 %1567 }
 0x1f0   :  { %3566 = vst.msk [vmem:[#allocation2 + $0x50] sm:$0x1] %vm3561_vm2, %v12449_v50  ;;  %3567 = vst.msk [vmem:[#allocation2 + $0x60] sm:$0x1] %vm3561_vm2, %v12449_v50 }
 0x1f1   :  { %3568 = vst.msk [vmem:[#allocation2 + $0x70] sm:$0x1] %vm3561_vm2, %v12449_v50  ;;  %3569 = vst.msk [vmem:[#allocation2 + $0x80] sm:$0x1] %vm3561_vm2, %v12449_v50  ;;  %1742 = vbcast.lane.b32.xlu1 %v8675_v5, 257  ;;  %1738 = vbcast.lane.b32.xlu0 %v8678_v43, 257 }
 0x1f2   :  { %3570 = vst.msk [vmem:[#allocation2 + $0xb0] sm:$0x1] %vm3561_vm2, %v12449_v50  ;;  %3571 = vst.msk [vmem:[#allocation2 + $0xc0] sm:$0x1] %vm3561_vm2, %v12449_v50 }
 0x1f3   :  { %3572 = vst.msk [vmem:[#allocation2 + $0xd0] sm:$0x1] %vm3561_vm2, %v12449_v50  ;;  %3573 = vst.msk [vmem:[#allocation2 + $0xe0] sm:$0x1] %vm3561_vm2, %v12449_v50  ;;  %v8998_v59 = vpop.permute.xlu1 %1588  ;;  %v9000_v35 = vpop.permute.xlu0 %1581 }
 0x1f4   :  { %3574 = vst.msk [vmem:[#allocation2 + $0xf0] sm:$0x1] %vm3561_vm2, %v12449_v50  ;;  %3575 = vst.msk [vmem:[#allocation2 + $0x100] sm:$0x1] %vm3561_vm2, %v12449_v50 }
 0x1f5   :  { %3576 = vst.msk [vmem:[#allocation2 + $0x110] sm:$0x1] %vm3561_vm2, %v12449_v50  ;;  %3577 = vst.msk [vmem:[#allocation2 + $0x120] sm:$0x1] %vm3561_vm2, %v12449_v50  ;;  %1750 = vbcast.lane.b32.xlu1 %v8687_v31, 257  ;;  %1746 = vbcast.lane.b32.xlu0 %v8690_v33, 257 }
 0x1f6   :  { %3578 = vst.msk [vmem:[#allocation2 + $0x19] sm:$0x1] %vm3561_vm2, %v12449_v50  ;;  %3579 = vst.msk [vmem:[#allocation2 + $0x29] sm:$0x1] %vm3561_vm2, %v12449_v50 }
 0x1f7   :  { %3580 = vst.msk [vmem:[#allocation2 + $0x39] sm:$0x1] %vm3561_vm2, %v12449_v50  ;;  %3581 = vst.msk [vmem:[#allocation2 + $0x49] sm:$0x1] %vm3561_vm2, %v12449_v50  ;;  %v9004_v2 = vpop.permute.xlu1 %2303  ;;  %v9006_v3 = vpop.permute.xlu0 %2296 }
 0x1f8   :  { %3582 = vst.msk [vmem:[#allocation2 + $0x59] sm:$0x1] %vm3561_vm2, %v12449_v50  ;;  %3583 = vst.msk [vmem:[#allocation2 + $0x69] sm:$0x1] %vm3561_vm2, %v12449_v50 }
 0x1f9   :  { %3584 = vst.msk [vmem:[#allocation2 + $0x79] sm:$0x1] %vm3561_vm2, %v12449_v50  ;;  %3585 = vst.msk [vmem:[#allocation2 + $0x89] sm:$0x1] %vm3561_vm2, %v12449_v50  ;;  %2757 = vbcast.lane.b32.xlu1 %v8723_v28, 257  ;;  %2753 = vbcast.lane.b32.xlu0 %v8726_v4, 257 }
 0x1fa   :  { %3586 = vst.msk [vmem:[#allocation2 + $0xb9] sm:$0x1] %vm3561_vm2, %v12449_v50  ;;  %3587 = vst.msk [vmem:[#allocation2 + $0xc9] sm:$0x1] %vm3561_vm2, %v12449_v50 }
 0x1fb   :  { %3588 = vst.msk [vmem:[#allocation2 + $0xd9] sm:$0x1] %vm3561_vm2, %v12449_v50  ;;  %3589 = vst.msk [vmem:[#allocation2 + $0xe9] sm:$0x1] %vm3561_vm2, %v12449_v50  ;;  %v9012_v5 = vpop.permute.xlu0 %2524 }
 0x1fc   :  { %3590 = vst.msk [vmem:[#allocation2 + $0xf9] sm:$0x1] %vm3561_vm2, %v12449_v50  ;;  %3591 = vst.msk [vmem:[#allocation2 + $0x109] sm:$0x1] %vm3561_vm2, %v12449_v50 }
 0x1fd   :  { %3592 = vst.msk [vmem:[#allocation2 + $0x119] sm:$0x1] %vm3561_vm2, %v12449_v50  ;;  %3593 = vst.msk [vmem:[#allocation2 + $0x129] sm:$0x1] %vm3561_vm2, %v12449_v50  ;;  %v9010_v50 = vpop.permute.xlu1 %2531  ;;  %2765 = vbcast.lane.b32.xlu1 %v8735_v45, 257  ;;  %2761 = vbcast.lane.b32.xlu0 %v8738_v46, 257 }
 0x1fe   :  { %12733 = vst [vmem:[#allocation180_spill] sm:$0xff] %v8992_v0  ;;  %12734 = vst [vmem:[#allocation181_spill] sm:$0xff] %v8994_v30  ;;  %v9034_v46 = vld [vmem:[#allocation3] ss:$0 sm:$0xff]  ;;  %v12765_v30 = vld [vmem:[#allocation27_spill] sm:$0xff] }
 0x1ff   :  { %12735 = vst [vmem:[#allocation182_spill] sm:$0xff] %v8998_v59  ;;  %12736 = vst [vmem:[#allocation183_spill] sm:$0xff] %v9000_v35  ;;  %v9018_v31 = vpop.permute.xlu0 %2809 }
 0x200   :  { %12737 = vst [vmem:[#allocation184_spill] sm:$0xff] %v9004_v2  ;;  %12738 = vst [vmem:[#allocation185_spill] sm:$0xff] %v9006_v3  ;;  %v9240_v3 = vld [vmem:[#allocation3 + $0x3] ss:$0 sm:$0xff] }
 0x201   :  { %12739 = vst [vmem:[#allocation186_spill] sm:$0xff] %v9010_v50  ;;  %12740 = vst [vmem:[#allocation187_spill] sm:$0xff] %v9012_v5  ;;  %v9016_v43 = vpop.permute.xlu1 %2813  ;;  %2949 = vbcast.lane.b32.xlu1 %v8526_v40, 257  ;;  %2945 = vbcast.lane.b32.xlu0 %v8530_v11, 257  ;;  %v9036_v40 = vld [vmem:[#allocation3 + $0x1] ss:$0 sm:$0xff] }
 0x202   :  { %12745 = vst [vmem:[#allocation192_spill] sm:$0xff] %v9034_v46  ;;  %v9038_v11 = vld [vmem:[#allocation3 + $0x2] ss:$0 sm:$0xff]  ;;  %v12783_v50 = vld [vmem:[#allocation39_spill] sm:$0xff] }
 0x203   :  { %v9024_v28 = vpop.permute.xlu0 %691  ;;  %v1129_v0 = vmul.f32 %v9038_v11, %v12765_v30 }
 0x204   :  { %12742 = vst [vmem:[#allocation189_spill] sm:$0xff] %v9024_v28 }
 0x205   :  { %v9022_v33 = vpop.permute.xlu1 %695  ;;  %2957 = vbcast.lane.b32.xlu1 %v8540_v49, 257  ;;  %2953 = vbcast.lane.b32.xlu0 %v8544_v24, 257  ;;  %v869_v24 = vmul.f32 %v9036_v40, %v8072_v56  ;;  %v801_v49 = vmul.f32 %v9034_v46, %v8074_v57 }
 0x206   :  { %12741 = vst [vmem:[#allocation188_spill] sm:$0xff] %v9022_v33 }
 0x207   :  { %v9030_v45 = vpop.permute.xlu0 %699  ;;  %v901_v35 = vadd.f32 %v869_v24, %v801_v49  ;;  %v871_v24 = vmul.f32 %v9036_v40, %v8118_v15  ;;  %v12752_v49 = vld [vmem:[#allocation16_spill] sm:$0xff] }
 0x208   :  { %12744 = vst [vmem:[#allocation191_spill] sm:$0xff] %v9030_v45  ;;  %v936_v45 = vmul.f32 %v9038_v11, %v8088_v61 }
 0x209   :  { %v9028_v4 = vpop.permute.xlu1 %703  ;;  %1662 = vbcast.lane.b32.xlu1 %v8788_v1, 257  ;;  %1658 = vbcast.lane.b32.xlu0 %v8792_v39, 257  ;;  %v868_v1 = vmul.f32 %v9036_v40, %v8053_v51  ;;  %v800_v39 = vmul.f32 %v9034_v46, %v8055_v52  ;;  %v1001_v52 = vmul.f32 %v9034_v46, %v8072_v56 }
 0x20a   :  { %12743 = vst [vmem:[#allocation190_spill] sm:$0xff] %v9028_v4  ;;  %v870_v56 = vmul.f32 %v9036_v40, %v8120_v16 }
 0x20b   :  { %v9042_v28 = vpop.permute.xlu0 %1367  ;;  %v900_v59 = vadd.f32 %v868_v1, %v800_v39  ;;  %v804_v1 = vmul.f32 %v9034_v46, %v12752_v49  ;;  %v1066_v39 = vmul.f32 %v9036_v40, %v8148_v26 }
 0x20c   :  { %12747 = vst [vmem:[#allocation194_spill] sm:$0xff] %v9042_v28  ;;  %v1065_v28 = vmul.f32 %v9036_v40, %v8086_v60 }
 0x20d   :  { %v9040_v33 = vpop.permute.xlu1 %1374  ;;  %1670 = vbcast.lane.b32.xlu1 %v8804_v18, 257  ;;  %1666 = vbcast.lane.b32.xlu0 %v8807_v21, 257  ;;  %v1000_v18 = vmul.f32 %v9034_v46, %v8053_v51  ;;  %v1064_v21 = vmul.f32 %v9036_v40, %v8088_v61  ;;  %v803_v51 = vmul.f32 %v9034_v46, %v8092_v62 }
 0x20e   :  { %12746 = vst [vmem:[#allocation193_spill] sm:$0xff] %v9040_v33  ;;  %v937_v33 = vmul.f32 %v9038_v11, %v8086_v60  ;;  %v802_v61 = vmul.f32 %v9034_v46, %v8094_v63  ;;  %v805_v63 = vmul.f32 %v9034_v46, %v8104_v7  ;;  %v1005_v7 = vmul.f32 %v9034_v46, %v8132_v19 }
 0x20f   :  { %v9062_v4 = vpop.permute.xlu0 %1381  ;;  %v1096_v62 = vadd.f32 %v1064_v21, %v1000_v18 }
 0x210   :  { %12749 = vst [vmem:[#allocation196_spill] sm:$0xff] %v9062_v4  ;;  %v9070_v60 = vadd.f32 %v937_v33, %v901_v35  ;;  %v9076_v4 = vadd.f32 %v936_v45, %v900_v59  ;;  %v873_v35 = vmul.f32 %v9036_v40, %v8132_v19  ;;  %v872_v59 = vmul.f32 %v9036_v40, %v8134_v20 }
 0x211   :  { %v9060_v57 = vpop.permute.xlu1 %1388  ;;  %1854 = vbcast.lane.b32.xlu1 %v8595_v48, 257  ;;  %1850 = vbcast.lane.b32.xlu0 %v8599_v17, 257  ;;  %v939_v33 = vmul.f32 %v9038_v11, %v8146_v25  ;;  %v938_v45 = vmul.f32 %v9038_v11, %v8148_v26  ;;  %v1004_v26 = vmul.f32 %v9034_v46, %v8134_v20 }
 0x212   :  { %12748 = vst [vmem:[#allocation195_spill] sm:$0xff] %v9060_v57  ;;  %v9074_v57 = vadd.f32 %v1065_v28, %v1001_v52  ;;  %v1067_v28 = vmul.f32 %v9036_v40, %v8146_v25  ;;  %v903_v52 = vadd.f32 %v871_v24, %v803_v51  ;;  %v1003_v25 = vmul.f32 %v9034_v46, %v8118_v15 }
 0x213   :  { %v9084_v17 = vpop.permute.xlu0 %1595  ;;  %v905_v18 = vadd.f32 %v873_v35, %v805_v63  ;;  %v904_v21 = vadd.f32 %v872_v59, %v804_v1  ;;  %v12756_v35 = vld [vmem:[#allocation23_spill] sm:$0xff]  ;;  %v12757_v59 = vld [vmem:[#allocation18_spill] sm:$0xff] }
 0x214   :  { %12751 = vst [vmem:[#allocation198_spill] sm:$0xff] %v9084_v17  ;;  %v902_v17 = vadd.f32 %v870_v56, %v802_v61  ;;  %v9120_v24 = vadd.f32 %v939_v33, %v903_v52  ;;  %v9122_v51 = vadd.f32 %v1067_v28, %v1003_v25  ;;  %v12755_v56 = vld [vmem:[#allocation17_spill] sm:$0xff]  ;;  %v853_v20 = vmul.f32 %v9036_v40, %v12756_v35 }
 0x215   :  { %v9082_v48 = vpop.permute.xlu1 %1602  ;;  %1862 = vbcast.lane.b32.xlu1 %v8611_v44, 257  ;;  %1858 = vbcast.lane.b32.xlu0 %v8614_v34, 257  ;;  %v1002_v44 = vmul.f32 %v9034_v46, %v8120_v16  ;;  %v941_v61 = vmul.f32 %v9038_v11, %v12755_v56  ;;  %v1069_v19 = vmul.f32 %v9036_v40, %v12755_v56  ;;  %v12758_v33 = vld [vmem:[#allocation21_spill] sm:$0xff] }
 0x216   :  { %12750 = vst [vmem:[#allocation197_spill] sm:$0xff] %v9082_v48  ;;  %v9124_v15 = vadd.f32 %v938_v45, %v902_v17  ;;  %v7630_v17 = vld [vmem:[%s12353_s4 + $0x8] sm:$0xff]   ;;  %v785_v28 = vmul.f32 %v9034_v46, %v12758_v33  ;;  %v12759_v45 = vld [vmem:[#allocation24_spill] sm:$0xff]  ;;  %v12763_v25 = vld [vmem:[#allocation25_spill] sm:$0xff] }
 0x217   :  { %v9114_v34 = vpop.permute.xlu0 %1609  ;;  %v9128_v16 = vadd.f32 %v1066_v39, %v1002_v44  ;;  %v852_v63 = vmul.f32 %v9036_v40, %v12759_v45  ;;  %v12762_v39 = vld [vmem:[#allocation22_spill] sm:$0xff]  ;;  %v921_v44 = vmul.f32 %v9038_v11, %v12763_v25  ;;  %v1049_v56 = vmul.f32 %v9036_v40, %v12763_v25  ;;  %7619 = vmatprep.subr.bf16.mxu1 %v7630_v17  ;;  %v12766_v25 = vld [vmem:[#allocation28_spill] sm:$0xff] }
 0x218   :  { %12754 = vst [vmem:[#allocation199_spill] sm:$0xff] %v9114_v34  ;;  %v784_v52 = vmul.f32 %v9034_v46, %v12762_v39  ;;  %7309 = vmatprep.subr.bf16.mxu0 %v7630_v17  ;;  %v12764_v33 = vld [vmem:[#allocation26_spill] sm:$0xff]  ;;  %v885_v39 = vadd.f32 %v853_v20, %v785_v28  ;;  %7620 = vmatpush3.bf16.msra.mxu1 %v7630_v17 }
 0x219   :  { %v9112_v48 = vpop.permute.xlu1 %1616  ;;  %2877 = vbcast.lane.b32.xlu1 %v8644_v10, 257  ;;  %2873 = vbcast.lane.b32.xlu0 %v8648_v38, 257  ;;  %v940_v10 = vmul.f32 %v9038_v11, %v12757_v59  ;;  %v1068_v38 = vmul.f32 %v9036_v40, %v12757_v59  ;;  %v985_v59 = vmul.f32 %v9034_v46, %v12756_v35 }
 0x21a   :  { %12753 = vst [vmem:[#allocation16_spill] sm:$0xff] %v9112_v48  ;;  %v920_v34 = vmul.f32 %v9038_v11, %v12764_v33  ;;  %v1048_v48 = vmul.f32 %v9036_v40, %v12764_v33  ;;  %7310 = vmatpush3.bf16.msra.mxu0 %v7630_v17  ;;  %v9169_v35 = vadd.f32 %v941_v61, %v905_v18  ;;  %v12769_v61 = vld [vmem:[#allocation33_spill] sm:$0xff] }
 0x21b   :  { %v9149_v1 = vpop.permute.xlu0 %2310  ;;  %v884_v5 = vadd.f32 %v852_v63, %v784_v52  ;;  %v984_v33 = vmul.f32 %v9034_v46, %v12759_v45  ;;  %v9179_v20 = vadd.f32 %v940_v10, %v904_v21  ;;  %v9181_v30 = vadd.f32 %v1068_v38, %v1004_v26  ;;  %v12770_v17 = vld [vmem:[#allocation29_spill] sm:$0xff]  ;;  %v12771_v38 = vld [vmem:[#allocation34_spill] sm:$0xff]  ;;  %v12773_v45 = vld [vmem:[#allocation31_spill] sm:$0xff] }
 0x21c   :  { %12761 = vst [vmem:[#allocation23_spill] sm:$0xff] %v9149_v1  ;;  %v1128_v1 = vmul.f32 %v9038_v11, %v12766_v25  ;;  %v9183_v28 = vadd.f32 %v921_v44, %v885_v39  ;;  %v9185_v25 = vadd.f32 %v1049_v56, %v985_v59  ;;  %v9196_v21 = vadd.f32 %v1129_v0, %v9074_v57  ;;  %v12775_v52 = vld [vmem:[#allocation36_spill] sm:$0xff]  ;;  %v12779_v59 = vld [vmem:[#allocation37_spill] sm:$0xff] }
 0x21d   :  { %v9147_v49 = vpop.permute.xlu1 %2317  ;;  %1678 = vbcast.lane.b32.xlu1 %v8869_v6, 257  ;;  %1674 = vbcast.lane.b32.xlu0 %v8872_v22, 257  ;;  %v9187_v18 = vadd.f32 %v920_v34, %v884_v5  ;;  %v787_v10 = vmul.f32 %v9034_v46, %v12770_v17  ;;  %v854_v5 = vmul.f32 %v9036_v40, %v12771_v38 }
 0x21e   :  { %12760 = vst [vmem:[#allocation17_spill] sm:$0xff] %v9147_v49  ;;  %v9171_v49 = vadd.f32 %v1069_v19, %v1005_v7  ;;  %v9189_v7 = vadd.f32 %v1048_v48, %v984_v33  ;;  %v855_v19 = vmul.f32 %v9036_v40, %v12769_v61  ;;  %v9198_v26 = vadd.f32 %v1128_v1, %v1096_v62  ;;  %v12772_v48 = vld [vmem:[#allocation30_spill] sm:$0xff]  ;;  %v12778_v1 = vld [vmem:[#allocation32_spill] sm:$0xff] }
 0x21f   :  { %v9177_v22 = vpop.permute.xlu0 %2324  ;;  %v786_v34 = vmul.f32 %v9034_v46, %v12772_v48  ;;  %v789_v63 = vmul.f32 %v9034_v46, %v12773_v45  ;;  %v856_v0 = vmul.f32 %v9036_v40, %v12775_v52  ;;  %v788_v44 = vmul.f32 %v9034_v46, %v12778_v1  ;;  %v12780_v45 = vld [vmem:[#allocation38_spill] sm:$0xff] }
 0x220   :  { %12768 = vst [vmem:[#allocation21_spill] sm:$0xff] %v9177_v22  ;;  %v987_v56 = vmul.f32 %v9034_v46, %v12769_v61  ;;  %v923_v39 = vmul.f32 %v9038_v11, %v12779_v59  ;;  %v1051_v33 = vmul.f32 %v9036_v40, %v12779_v59  ;;  %v887_v17 = vadd.f32 %v855_v19, %v787_v10  ;;  %v12782_v22 = vld [vmem:[#allocation136_spill] sm:$0xff] }
 0x221   :  { %v9175_v6 = vpop.permute.xlu1 %2331  ;;  %1686 = vbcast.lane.b32.xlu1 %v8881_v14, 257  ;;  %1682 = vbcast.lane.b32.xlu0 %v8884_v58, 257  ;;  %v12774_v14 = vld [vmem:[#allocation35_spill] sm:$0xff]  ;;  %v986_v48 = vmul.f32 %v9034_v46, %v12771_v38  ;;  %v886_v1 = vadd.f32 %v854_v5, %v786_v34  ;;  %v925_v19 = vmul.f32 %v9038_v11, %v12783_v50 }
 0x222   :  { %12767 = vst [vmem:[#allocation18_spill] sm:$0xff] %v9175_v6  ;;  %v857_v58 = vmul.f32 %v9036_v40, %v12774_v14  ;;  %v989_v61 = vmul.f32 %v9034_v46, %v12774_v14  ;;  %v1050_v6 = vmul.f32 %v9036_v40, %v12780_v45  ;;  %v888_v59 = vadd.f32 %v856_v0, %v788_v44  ;;  %v12788_v0 = vld [vmem:[#allocation42_spill] sm:$0xff] }
 0x223   :  { %v9214_v62 = vpop.permute.xlu0 %2538  ;;  %v988_v38 = vmul.f32 %v9034_v46, %v12775_v52  ;;  %v9246_v34 = vadd.f32 %v923_v39, %v887_v17  ;;  %v1083_v14 = vadd.f32 %v1051_v33, %v987_v56  ;;  %v12787_v52 = vld [vmem:[#allocation41_spill] sm:$0xff]  ;;  %v1130_v44 = vmul.f32 %v9038_v11, %v12788_v0  ;;  %v12790_v39 = vld [vmem:[#allocation140_spill] sm:$0xff]  ;;  %v12791_v17 = vld [vmem:[#allocation43_spill] sm:$0xff] }
 0x224   :  { %12777 = vst [vmem:[#allocation22_spill] sm:$0xff] %v9214_v62  ;;  %v12781_v62 = vld [vmem:[#allocation135_spill] sm:$0xff]  ;;  %v889_v10 = vadd.f32 %v857_v58, %v789_v63  ;;  %v1082_v56 = vadd.f32 %v1050_v6, %v986_v48  ;;  %v12794_v0 = vld [vmem:[#allocation45_spill] sm:$0xff]  ;;  %v12795_v46 = vld [vmem:[#allocation46_spill] sm:$0xff] }
 0x225   :  { %v9212_v57 = vpop.permute.xlu1 %2545  ;;  %1870 = vbcast.lane.b32.xlu1 %v12781_v62, 257  ;;  %1866 = vbcast.lane.b32.xlu0 %v12782_v22, 257  ;;  %v1053_v62 = vmul.f32 %v9036_v40, %v12783_v50  ;;  %v1131_v50 = vmul.f32 %v9038_v11, %v12787_v52  ;;  %v12793_v52 = vld [vmem:[#allocation44_spill] sm:$0xff]  ;;  %v1113_v12 = vmul.f32 %v9038_v11, %v12794_v0  ;;  %v12798_v0 = vld [vmem:[#allocation147_spill] sm:$0xff] }
 0x226   :  { %12776 = vst [vmem:[#allocation24_spill] sm:$0xff] %v9212_v57  ;;  %v922_v57 = vmul.f32 %v9038_v11, %v12780_v45  ;;  %v12786_v45 = vld [vmem:[#allocation40_spill] sm:$0xff]  ;;  %v9262_v33 = vadd.f32 %v925_v19, %v889_v10  ;;  %v1132_v13 = vmul.f32 %v9038_v11, %v12793_v52  ;;  %v1162_v52 = vadd.f32 %v1130_v44, %v9128_v16 }
 0x227   :  { %v9244_v5 = vpop.permute.xlu0 %2552  ;;  %v924_v2 = vmul.f32 %v9038_v11, %v12786_v45  ;;  %v1052_v63 = vmul.f32 %v9036_v40, %v12786_v45  ;;  %v1133_v45 = vmul.f32 %v9038_v11, %v12791_v17  ;;  %v1085_v27 = vadd.f32 %v1053_v62, %v989_v61  ;;  %v12796_v10 = vld [vmem:[#allocation48_spill] sm:$0xff]  ;;  %v12797_v61 = vld [vmem:[#allocation49_spill] sm:$0xff] }
 0x228   :  { %12785 = vst [vmem:[#allocation26_spill] sm:$0xff] %v9244_v5  ;;  %v9252_v58 = vadd.f32 %v922_v57, %v886_v1  ;;  %v12789_v5 = vld [vmem:[#allocation139_spill] sm:$0xff]  ;;  %v1911_v17 = vmul.f32 %v9240_v3, %v12796_v10  ;;  %v9298_v16 = vadd.f32 %v1113_v12, %v9185_v25 }
 0x229   :  { %v9242_v22 = vpop.permute.xlu1 %2559  ;;  %1878 = vbcast.lane.b32.xlu1 %v12789_v5, 257  ;;  %1874 = vbcast.lane.b32.xlu0 %v12790_v39, 257  ;;  %v12792_v57 = vld [vmem:[#allocation47_spill] sm:$0xff]  ;;  %v1112_v5 = vmul.f32 %v9038_v11, %v12795_v46  ;;  %v9278_v48 = vadd.f32 %v924_v2, %v888_v59  ;;  %v1084_v19 = vadd.f32 %v1052_v63, %v988_v38  ;;  %v12799_v38 = vld [vmem:[#allocation50_spill] sm:$0xff] }
 0x22a   :  { %12784 = vst [vmem:[#allocation25_spill] sm:$0xff] %v9242_v22  ;;  %v9258_v22 = vld [vmem:[#allocation3 + $0x4] ss:$0 sm:$0xff]  ;;  %v1912_v1 = vmul.f32 %v9240_v3, %v12792_v57  ;;  %v1163_v57 = vadd.f32 %v1131_v50, %v9122_v51  ;;  %v2112_v46 = vmul.f32 %v9240_v3, %v12797_v61  ;;  %v1165_v2 = vadd.f32 %v1133_v45, %v9171_v49 }
 0x22b   :  { %v9276_v6 = vpop.permute.xlu0 %2817  ;;  %v1980_v62 = vmul.f32 %v9258_v22, %v12797_v61  ;;  %v1979_v63 = vmul.f32 %v9258_v22, %v12799_v38  ;;  %v2111_v10 = vmul.f32 %v9240_v3, %v12799_v38  ;;  %v1164_v51 = vadd.f32 %v1132_v13, %v9181_v30  ;;  %v12803_v61 = vld [vmem:[#allocation52_spill] sm:$0xff]  ;;  %v12804_v30 = vld [vmem:[#allocation53_spill] sm:$0xff] }
 0x22c   :  { %v1944_v59 = vadd.f32 %v1912_v1, %v9070_v60  ;;  %v9301_v50 = vadd.f32 %v1112_v5, %v9189_v7  ;;  %v1943_v45 = vadd.f32 %v1911_v17, %v9076_v4  ;;  %v1114_v13 = vmul.f32 %v9038_v11, %v12803_v61  ;;  %v12805_v7 = vld [vmem:[#allocation54_spill] sm:$0xff] }
 0x22d   :  { %v9274_v39 = vpop.permute.xlu1 %2821  ;;  %2885 = vbcast.lane.b32.xlu1 %v8748_v42, 257  ;;  %2881 = vbcast.lane.b32.xlu0 %v12798_v0, 257  ;;  %v12800_v42 = vld [vmem:[#allocation51_spill] sm:$0xff]  ;;  %v1117_v12 = vmul.f32 %v9038_v11, %v12804_v30  ;;  %v9317_v25 = vadd.f32 %v2112_v46, %v9196_v21  ;;  %v1116_v5 = vmul.f32 %v9038_v11, %v12805_v7  ;;  %v12808_v21 = vld [vmem:[#allocation57_spill] sm:$0xff]  ;;  %v12809_v61 = vld [vmem:[#allocation58_spill] sm:$0xff] }
 0x22e   :  { %v1115_v44 = vmul.f32 %v9038_v11, %v12800_v42  ;;  %v9310_v1 = vadd.f32 %v1980_v62, %v1944_v59  ;;  %v12806_v0 = vld [vmem:[#allocation55_spill] sm:$0xff]  ;;  %v9325_v4 = vadd.f32 %v1979_v63, %v1943_v45  ;;  %v9328_v17 = vadd.f32 %v2111_v10, %v9198_v26  ;;  %v12807_v62 = vld [vmem:[#allocation56_spill] sm:$0xff] }
 0x22f   :  { %v9307_v60 = vpop.permute.xlu0 %2825  ;;  %v1914_v38 = vmul.f32 %v9240_v3, %v12806_v0  ;;  %v1913_v59 = vmul.f32 %v9240_v3, %v12807_v62  ;;  %v1916_v46 = vmul.f32 %v9240_v3, %v12808_v21  ;;  %v1915_v30 = vmul.f32 %v9240_v3, %v12809_v61  ;;  %v12810_v7 = vld [vmem:[#allocation59_spill] sm:$0xff]  ;;  %v12813_v0 = vld [vmem:[#allocation60_spill] sm:$0xff]  ;;  %v12814_v61 = vld [vmem:[#allocation61_spill] sm:$0xff] }
 0x230   :  { %12802 = vst [vmem:[#allocation28_spill] sm:$0xff] %v9307_v60  ;;  %v9334_v42 = vadd.f32 %v1115_v44, %v1083_v14  ;;  %v9346_v10 = vadd.f32 %v1114_v13, %v1082_v56  ;;  %v9348_v45 = vadd.f32 %v1117_v12, %v1085_v27  ;;  %v1981_v14 = vmul.f32 %v9258_v22, %v12813_v0  ;;  %v12815_v12 = vld [vmem:[#allocation62_spill] sm:$0xff] }
 0x231   :  { %v9305_v49 = vpop.permute.xlu1 %2829  ;;  %2893 = vbcast.lane.b32.xlu1 %v8762_v54, 257  ;;  %2889 = vbcast.lane.b32.xlu0 %v8766_v47, 257  ;;  %v1982_v54 = vmul.f32 %v9258_v22, %v12810_v7  ;;  %v2114_v47 = vmul.f32 %v9240_v3, %v12810_v7  ;;  %v2113_v44 = vmul.f32 %v9240_v3, %v12813_v0 }
 0x232   :  { %12801 = vst [vmem:[#allocation27_spill] sm:$0xff] %v9305_v49  ;;  %v9354_v62 = vadd.f32 %v1116_v5, %v1084_v19  ;;  %v1946_v21 = vadd.f32 %v1914_v38, %v9120_v24  ;;  %v1984_v7 = vmul.f32 %v9258_v22, %v12814_v61  ;;  %v1945_v27 = vadd.f32 %v1913_v59, %v9124_v15  ;;  %v12836_v49 = vld [vmem:[#allocation71_spill] sm:$0xff] }
 0x233   :  { %v9344_v26 = vpop.permute.xlu0 %1227  ;;  %v1948_v56 = vadd.f32 %v1916_v46, %v9169_v35  ;;  %v2116_v13 = vmul.f32 %v9240_v3, %v12814_v61  ;;  %v1983_v19 = vmul.f32 %v9258_v22, %v12815_v12  ;;  %v1947_v5 = vadd.f32 %v1915_v30, %v9179_v20  ;;  %v12818_v46 = vld [vmem:[#allocation63_spill] sm:$0xff]  ;;  %v12819_v61 = vld [vmem:[#allocation64_spill] sm:$0xff]  ;;  %v9386_v30 = vld [vmem:[#allocation3 + $0x5] ss:$0 sm:$0xff] }
 0x234   :  { %12812 = vst [vmem:[#allocation29_spill] sm:$0xff] %v9344_v26  ;;  %v9368_v24 = vadd.f32 %v1982_v54, %v1946_v21  ;;  %v9370_v38 = vadd.f32 %v2114_v47, %v1163_v57  ;;  %v9378_v35 = vadd.f32 %v1981_v14, %v1945_v27  ;;  %v9380_v59 = vadd.f32 %v2113_v44, %v1162_v52  ;;  %v7729_v54 = vld [vmem:[%s12349_s0 + $0x1a] sm:$0xff]  ;;  %v12820_v52 = vld [vmem:[#allocation19_spill] sm:$0xff]  ;;  %v12822_v14 = vld [vmem:[#allocation20_spill] sm:$0xff] }
 0x235   :  { %v9342_v63 = vpop.permute.xlu1 %1234  ;;  %1790 = vbcast.lane.b32.xlu1 %v8817_v53, 257  ;;  %1786 = vbcast.lane.b32.xlu0 %v8821_v37, 257  ;;  %v2115_v53 = vmul.f32 %v9240_v3, %v12815_v12  ;;  %v1896_v0 = vmul.f32 %v9240_v3, %v12818_v46  ;;  %v1895_v20 = vmul.f32 %v9240_v3, %v12819_v61  ;;  %v12825_v46 = vld [vmem:[#allocation66_spill] sm:$0xff] }
 0x236   :  { %12811 = vst [vmem:[#allocation33_spill] sm:$0xff] %v9342_v63  ;;  %v9388_v57 = vadd.f32 %v1984_v7, %v1948_v56  ;;  %v9396_v47 = vrot.slane %v7729_v54, %v12820_v52  ;;  %v9399_v44 = vrot.slane %v7729_v54, %v12822_v14  ;;  %v9401_v21 = vadd.f32 %v2116_v13, %v1165_v2  ;;  %v12824_v7 = vld [vmem:[#allocation65_spill] sm:$0xff]  ;;  %v12826_v13 = vld [vmem:[#allocation67_spill] sm:$0xff]  ;;  %v12835_v26 = vld [vmem:[#allocation70_spill] sm:$0xff] }
 0x237   :  { %v9376_v15 = vpop.permute.xlu0 %1241  ;;  %v9403_v27 = vadd.f32 %v1983_v19, %v1947_v5  ;;  %v1964_v56 = vmul.f32 %v9258_v22, %v12824_v7  ;;  %v9414_v12 = vadd.f32 %v2115_v53, %v1164_v51  ;;  %v1963_v61 = vmul.f32 %v9258_v22, %v12825_v46  ;;  %v12829_v53 = vld [vmem:[#allocation68_spill] sm:$0xff] }
 0x238   :  { %12817 = vst [vmem:[#allocation30_spill] sm:$0xff] %v9376_v15  ;;  %12821 = vst [vmem:[#allocation31_spill] sm:$0xff] %v9396_v47  ;;  %v2095_v2 = vmul.f32 %v9240_v3, %v12825_v46  ;;  %v2048_v19 = vmul.f32 %v9386_v30, %v12826_v13  ;;  %v1927_v15 = vadd.f32 %v1895_v20, %v9187_v18 }
 0x239   :  { %v9374_v37 = vpop.permute.xlu1 %1248  ;;  %1798 = vbcast.lane.b32.xlu1 %v8833_v32, 257  ;;  %1794 = vbcast.lane.b32.xlu0 %v8836_v29, 257  ;;  %12823 = vst [vmem:[#allocation35_spill] sm:$0xff] %v9399_v44  ;;  %v2096_v29 = vmul.f32 %v9240_v3, %v12824_v7  ;;  %v9412_v32 = vld [vmem:[%s12349_s0 + $0x22] sm:$0xff]  ;;  %v1928_v7 = vadd.f32 %v1896_v0, %v9183_v28  ;;  %v12832_v28 = vld [vmem:[#allocation12_spill] sm:$0xff] }
 0x23a   :  { %12816 = vst [vmem:[#allocation34_spill] sm:$0xff] %v9374_v37  ;;  %v2176_v51 = vmul.f32 %v9258_v22, %v12826_v13  ;;  %v2047_v37 = vmul.f32 %v9386_v30, %v12829_v53  ;;  %v2175_v46 = vmul.f32 %v9258_v22, %v12829_v53  ;;  %v9442_v18 = vrot.slane %v9412_v32, %v12832_v28  ;;  %v12834_v13 = vld [vmem:[#allocation69_spill] sm:$0xff] }
 0x23b   :  { %v9424_v54 = vpop.permute.xlu0 %1455  ;;  %v9444_v0 = vadd.f32 %v1964_v56, %v1928_v7  ;;  %v9447_v20 = vadd.f32 %v2096_v29, %v9298_v16  ;;  %v1898_v53 = vmul.f32 %v9240_v3, %v12834_v13  ;;  %v1897_v63 = vmul.f32 %v9240_v3, %v12835_v26  ;;  %v12839_v26 = vld [vmem:[#allocation72_spill] sm:$0xff] }
 0x23c   :  { %12828 = vst [vmem:[#allocation32_spill] sm:$0xff] %v9424_v54  ;;  %12833 = vst [vmem:[#allocation38_spill] sm:$0xff] %v9442_v18  ;;  %v9459_v60 = vadd.f32 %v2048_v19, %v9310_v1  ;;  %v1900_v56 = vmul.f32 %v9240_v3, %v12836_v49  ;;  %v2208_v29 = vadd.f32 %v2176_v51, %v9317_v25  ;;  %v7730_v49 = vld [vmem:[%s12350_s1 + $0x1a] sm:$0xff]  ;;  %v12843_v19 = vld [vmem:[#allocation74_spill] sm:$0xff] }
 0x23d   :  { %v9422_v5 = vpop.permute.xlu1 %1462  ;;  %2457 = vbcast.lane.b32.xlu1 %v9396_v47, 256  ;;  %2450 = vbcast.lane.b32.xlu0 %v9399_v44, 256  ;;  %v9453_v44 = vadd.f32 %v1963_v61, %v1927_v15  ;;  %v9456_v47 = vadd.f32 %v2095_v2, %v9301_v50  ;;  %v9469_v13 = vadd.f32 %v2047_v37, %v9325_v4  ;;  %v12840_v50 = vld [vmem:[#allocation73_spill] sm:$0xff] }
 0x23e   :  { %12827 = vst [vmem:[#allocation36_spill] sm:$0xff] %v9422_v5  ;;  %v12830_v5 = vld [vmem:[#allocation13_spill] sm:$0xff]  ;;  %v1899_v15 = vmul.f32 %v9240_v3, %v12839_v26  ;;  %v1966_v61 = vmul.f32 %v9258_v22, %v12840_v50  ;;  %v2207_v1 = vadd.f32 %v2175_v46, %v9328_v17  ;;  %v9482_v25 = vrot.slane %v7730_v49, %v12820_v52  ;;  %v9496_v46 = vld [vmem:[%s12350_s1 + $0x22] sm:$0xff] }
 0x23f   :  { %v9438_v54 = vrot.slane %v9412_v32, %v12830_v5  ;;  %v9465_v16 = vpop.permute.xlu0 %1469  ;;  %v9485_v4 = vrot.slane %v7730_v49, %v12822_v14  ;;  %v1930_v37 = vadd.f32 %v1898_v53, %v9246_v34  ;;  %v1929_v2 = vadd.f32 %v1897_v63, %v9252_v58 }
 0x240   :  { %12838 = vst [vmem:[#allocation136_spill] sm:$0xff] %v9465_v16  ;;  %12841 = vst [vmem:[#allocation39_spill] sm:$0xff] %v9482_v25  ;;  %v2098_v17 = vmul.f32 %v9240_v3, %v12840_v50  ;;  %v1965_v51 = vmul.f32 %v9258_v22, %v12843_v19  ;;  %v1932_v26 = vadd.f32 %v1900_v56, %v9262_v33  ;;  %v12844_v16 = vld [vmem:[#allocation75_spill] sm:$0xff] }
 0x241   :  { %12831 = vst [vmem:[#allocation37_spill] sm:$0xff] %v9438_v54  ;;  %v9463_v7 = vpop.permute.xlu1 %1476  ;;  %2471 = vbcast.lane.b32.xlu1 %v9438_v54, 256  ;;  %2464 = vbcast.lane.b32.xlu0 %v9442_v18, 256  ;;  %12842 = vst [vmem:[#allocation40_spill] sm:$0xff] %v9485_v4  ;;  %v2097_v49 = vmul.f32 %v9240_v3, %v12843_v19  ;;  %v1968_v34 = vmul.f32 %v9258_v22, %v12844_v16  ;;  %v12848_v18 = vld [vmem:[#allocation76_spill] sm:$0xff]  ;;  %v12849_v19 = vld [vmem:[#allocation77_spill] sm:$0xff] }
 0x242   :  { %12837 = vst [vmem:[#allocation135_spill] sm:$0xff] %v9463_v7  ;;  %v2100_v58 = vmul.f32 %v9240_v3, %v12844_v16  ;;  %v1931_v50 = vadd.f32 %v1899_v15, %v9278_v48  ;;  %v9510_v7 = vadd.f32 %v1966_v61, %v1930_v37  ;;  %v1967_v33 = vmul.f32 %v9258_v22, %v12848_v18 }
 0x243   :  { %v9507_v53 = vpop.permute.xlu0 %1722  ;;  %v2099_v56 = vmul.f32 %v9240_v3, %v12848_v18  ;;  %v2050_v54 = vmul.f32 %v9386_v30, %v12849_v19  ;;  %v9522_v16 = vrot.slane %v9496_v46, %v12830_v5  ;;  %v9526_v48 = vrot.slane %v9496_v46, %v12832_v28  ;;  %v12854_v18 = vld [vmem:[#allocation78_spill] sm:$0xff] }
 0x244   :  { %12846 = vst [vmem:[#allocation42_spill] sm:$0xff] %v9507_v53  ;;  %12847 = vst [vmem:[#allocation139_spill] sm:$0xff] %v9510_v7  ;;  %v9529_v15 = vadd.f32 %v2098_v17, %v9334_v42  ;;  %v9531_v61 = vadd.f32 %v1965_v51, %v1929_v2  ;;  %v2178_v3 = vmul.f32 %v9258_v22, %v12849_v19  ;;  %v9537_v53 = vld [vmem:[#allocation3 + $0x6] ss:$0 sm:$0xff] }
 0x245   :  { %v9505_v63 = vpop.permute.xlu1 %1726  ;;  %2685 = vbcast.lane.b32.xlu1 %v9482_v25, 256  ;;  %2678 = vbcast.lane.b32.xlu0 %v9485_v4, 256  ;;  %12850 = vst [vmem:[#allocation140_spill] sm:$0xff] %v9522_v16  ;;  %12851 = vst [vmem:[#allocation43_spill] sm:$0xff] %v9526_v48  ;;  %v2049_v37 = vmul.f32 %v9386_v30, %v12854_v18  ;;  %v9542_v4 = vadd.f32 %v1968_v34, %v1932_v26  ;;  %v12863_v26 = vld [vmem:[#allocation96_spill] sm:$0xff] }
 0x246   :  { %12845 = vst [vmem:[#allocation41_spill] sm:$0xff] %v9505_v63  ;;  %12852 = vst [vmem:[#allocation47_spill] sm:$0xff] %v9529_v15  ;;  %v9540_v63 = vadd.f32 %v2097_v49, %v9346_v10  ;;  %v9545_v25 = vadd.f32 %v2100_v58, %v9348_v45  ;;  %v2177_v42 = vmul.f32 %v9258_v22, %v12854_v18  ;;  %v9562_v45 = vld [vmem:[#allocation3 + $0x7] ss:$0 sm:$0xff]  ;;  %v12864_v58 = vld [vmem:[#allocation137_spill] sm:$0xff] }
 0x247   :  { %12853 = vst [vmem:[#allocation44_spill] sm:$0xff] %v9531_v61  ;;  %12856 = vst [vmem:[#allocation46_spill] sm:$0xff] %v9542_v4  ;;  %v9551_v17 = vpop.permute.xlu0 %1730  ;;  %v9553_v51 = vadd.f32 %v1967_v33, %v1931_v50  ;;  %v9556_v19 = vadd.f32 %v2099_v56, %v9354_v62  ;;  %v12862_v61 = vld [vmem:[#allocation95_spill] sm:$0xff]  ;;  %v2239_v49 = vmul.f32 %v9386_v30, %v12863_v26  ;;  %v12866_v56 = vld [vmem:[#allocation141_spill] sm:$0xff] }
 0x248   :  { %12855 = vst [vmem:[#allocation45_spill] sm:$0xff] %v9540_v63  ;;  %12857 = vst [vmem:[#allocation48_spill] sm:$0xff] %v9545_v25  ;;  %v2240_v10 = vmul.f32 %v9386_v30, %v12862_v61  ;;  %v9565_v34 = vadd.f32 %v2050_v54, %v9368_v24  ;;  %v3023_v18 = vmul.f32 %v9537_v53, %v12864_v58  ;;  %v12867_v54 = vld [vmem:[#allocation142_spill] sm:$0xff] }
 0x249   :  { %v9549_v2 = vpop.permute.xlu1 %1734  ;;  %12859 = vst [vmem:[#allocation147_spill] sm:$0xff] %v9551_v17  ;;  %12860 = vst [vmem:[#allocation50_spill] sm:$0xff] %v9553_v51  ;;  %v12865_v17 = vld [vmem:[#allocation138_spill] sm:$0xff]  ;;  %2699 = vbcast.lane.b32.xlu1 %v9522_v16, 256  ;;  %2692 = vbcast.lane.b32.xlu0 %v9526_v48, 256  ;;  %v9574_v62 = vadd.f32 %v2178_v3, %v9370_v38  ;;  %v9577_v33 = vadd.f32 %v2049_v37, %v9378_v35  ;;  %v12899_v51 = vld [vmem:[#allocation93_spill] sm:$0xff] }
 0x24a   :  { %12858 = vst [vmem:[#allocation49_spill] sm:$0xff] %v9549_v2  ;;  %12861 = vst [vmem:[#allocation51_spill] sm:$0xff] %v9556_v19  ;;  %v3022_v50 = vmul.f32 %v9537_v53, %v12865_v17  ;;  %v3223_v24 = vmul.f32 %v9537_v53, %v12866_v56  ;;  %v3222_v61 = vmul.f32 %v9537_v53, %v12867_v54  ;;  %v12868_v17 = vld [vmem:[#allocation79_spill] sm:$0xff]  ;;  %v9592_v35 = vld [vmem:[#allocation3 + $0x8] ss:$0 sm:$0xff] }
 0x24b   :  { %v9584_v26 = vadd.f32 %v2177_v42, %v9380_v59  ;;  %v2052_v58 = vmul.f32 %v9386_v30, %v12868_v17  ;;  %v3091_v2 = vmul.f32 %v9562_v45, %v12866_v56  ;;  %v3090_v38 = vmul.f32 %v9562_v45, %v12867_v54  ;;  %v9596_v37 = vpop.permute.xlu0 %2745  ;;  %v12900_v4 = vld [vmem:[#allocation94_spill] sm:$0xff] }
 0x24c   :  { %12870 = vst [vmem:[#allocation53_spill] sm:$0xff] %v9596_v37  ;;  %v2272_v48 = vadd.f32 %v2240_v10, %v2208_v29  ;;  %v2271_v16 = vadd.f32 %v2239_v49, %v2207_v1  ;;  %v3287_v59 = vmul.f32 %v9562_v45, %v9016_v43  ;;  %v3286_v42 = vmul.f32 %v9562_v45, %v9018_v31  ;;  %v12871_v49 = vld [vmem:[#allocation80_spill] sm:$0xff] }
 0x24d   :  { %v9594_v3 = vpop.permute.xlu1 %2749  ;;  %v2180_v56 = vmul.f32 %v9258_v22, %v12868_v17  ;;  %v3055_v19 = vadd.f32 %v3023_v18, %v9459_v60  ;;  %v3054_v54 = vadd.f32 %v3022_v50, %v9469_v13  ;;  %1806 = vbcast.lane.b32.xlu1 %v8893_v55, 257  ;;  %1802 = vbcast.lane.b32.xlu0 %v8896_v23, 257 }
 0x24e   :  { %12869 = vst [vmem:[#allocation52_spill] sm:$0xff] %v9594_v3  ;;  %v3255_v37 = vadd.f32 %v3223_v24, %v2272_v48  ;;  %v3254_v29 = vadd.f32 %v3222_v61, %v2271_v16  ;;  %v3159_v1 = vmul.f32 %v9592_v35, %v9016_v43  ;;  %v3158_v10 = vmul.f32 %v9592_v35, %v9018_v31 }
 0x24f   :  { %v2051_v3 = vmul.f32 %v9386_v30, %v12871_v49  ;;  %v2179_v60 = vmul.f32 %v9258_v22, %v12871_v49  ;;  %v3123_v18 = vadd.f32 %v3091_v2, %v3055_v19  ;;  %v3122_v13 = vadd.f32 %v3090_v38, %v3054_v54  ;;  %v2938_v55 = vpop.permute.xlu0 %2937  ;;  %v12880_v49 = vld [vmem:[#allocation82_spill] sm:$0xff] }
 0x250   :  { %v3319_v17 = vadd.f32 %v3287_v59, %v3255_v37  ;;  %v3318_v23 = vadd.f32 %v3286_v42, %v3254_v29  ;;  %v3350_v48 = vmul.f32 %v9592_v35, %v2938_v55  ;;  %v9619_v43 = vadd.f32 %v2052_v58, %v9388_v57  ;;  %v12875_v58 = vld [vmem:[#allocation86_spill] sm:$0xff]  ;;  %v12878_v29 = vld [vmem:[#allocation81_spill] sm:$0xff] }
 0x251   :  { %v2942_v50 = vpop.permute.xlu1 %2941  ;;  %1814 = vbcast.lane.b32.xlu1 %v8905_v41, 257  ;;  %1810 = vbcast.lane.b32.xlu0 %v8908_v36, 257  ;;  %v9625_v31 = vrot.slane %v9412_v32, %v7927_v8  ;;  %v9629_v2 = vrot.slane %v9412_v32, %v7930_v9  ;;  %v3191_v19 = vadd.f32 %v3159_v1, %v3123_v18  ;;  %v12874_v41 = vld [vmem:[#allocation85_spill] sm:$0xff]  ;;  %v12879_v1 = vld [vmem:[#allocation192_spill] sm:$0xff] }
 0x252   :  { %v3351_v16 = vmul.f32 %v9592_v35, %v2942_v50  ;;  %v3190_v24 = vadd.f32 %v3158_v10, %v3122_v13  ;;  %v3382_v38 = vadd.f32 %v3350_v48, %v3318_v23  ;;  %v9632_v37 = vadd.f32 %v2180_v56, %v9401_v21  ;;  %v9654_v13 = vld [vmem:[%s12352_s3] ss:$0 sm:$0xff]  ;;  %v12882_v50 = vld [vmem:[#allocation14_spill] sm:$0xff]  ;;  %v12886_v48 = vld [vmem:[#allocation83_spill] sm:$0xff] }
 0x253   :  { %12872 = vst [vmem:[#allocation54_spill] sm:$0xff] %v9625_v31  ;;  %12873 = vst [vmem:[#allocation55_spill] sm:$0xff] %v9629_v2  ;;  %v9635_v57 = vadd.f32 %v2051_v3, %v9403_v27  ;;  %v875_v36 = vmul.f32 %v9036_v40, %v12874_v41  ;;  %v874_v59 = vmul.f32 %v9036_v40, %v12875_v58  ;;  %v9643_v54 = vpop.permute.xlu0 %1255  ;;  %v12881_v27 = vld [vmem:[#allocation87_spill] sm:$0xff] }
 0x254   :  { %v3383_v61 = vadd.f32 %v3351_v16, %v3319_v17  ;;  %12877 = vst [vmem:[#allocation57_spill] sm:$0xff] %v9643_v54  ;;  %v807_v10 = vmul.f32 %v12879_v1, %v12878_v29  ;;  %v806_v21 = vmul.f32 %v12879_v1, %v12880_v49  ;;  %v3414_v18 = vmax.f32 %v3190_v24, %v3382_v38  ;;  %v12884_v17 = vld [vmem:[#allocation15_spill] sm:$0xff]  ;;  %v12887_v24 = vld [vmem:[#allocation84_spill] sm:$0xff] }
 0x255   :  { %v9641_v42 = vpop.permute.xlu1 %1262  ;;  %v877_v3 = vmul.f32 %v9036_v40, %v12881_v27  ;;  %2485 = vbcast.lane.b32.xlu1 %v9625_v31, 256  ;;  %2478 = vbcast.lane.b32.xlu0 %v9629_v2, 256  ;;  %v9660_v55 = vrot.slane %v9412_v32, %v12882_v50  ;;  %v9664_v23 = vrot.slane %v9412_v32, %v12884_v17 }
 0x256   :  { %12876 = vst [vmem:[#allocation56_spill] sm:$0xff] %v9641_v42  ;;  %v3415_v56 = vmax.f32 %v3191_v19, %v3383_v61  ;;  %v9667_v16 = vadd.f32 %v2179_v60, %v9414_v12  ;;  %v809_v19 = vmul.f32 %v12879_v1, %v12886_v48  ;;  %v808_v61 = vmul.f32 %v12879_v1, %v12887_v24  ;;  %v12890_v60 = vld [vmem:[#allocation88_spill] sm:$0xff] }
 0x257   :  { %12883 = vst [vmem:[#allocation58_spill] sm:$0xff] %v9660_v55  ;;  %12885 = vst [vmem:[#allocation59_spill] sm:$0xff] %v9664_v23  ;;  %v907_v29 = vadd.f32 %v875_v36, %v807_v10  ;;  %v1007_v49 = vmul.f32 %v12879_v1, %v12874_v41  ;;  %v906_v54 = vadd.f32 %v874_v59, %v806_v21  ;;  %v9679_v2 = vpop.permute.xlu0 %1269  ;;  %v12893_v21 = vld [vmem:[#allocation89_spill] sm:$0xff] }
 0x258   :  { %v3438_v38 = vmax.f32 %v3414_v18, %v3415_v56  ;;  %v1006_v42 = vmul.f32 %v12879_v1, %v12875_v58  ;;  %12889 = vst [vmem:[#allocation61_spill] sm:$0xff] %v9679_v2  ;;  %v1009_v12 = vmul.f32 %v12879_v1, %v12881_v27  ;;  %v876_v48 = vmul.f32 %v9036_v40, %v12890_v60  ;;  %v12894_v27 = vld [vmem:[#allocation90_spill] sm:$0xff] }
 0x259   :  { %v9677_v32 = vpop.permute.xlu1 %1276  ;;  %v1008_v36 = vmul.f32 %v12879_v1, %v12890_v60  ;;  %v909_v41 = vadd.f32 %v877_v3, %v809_v19  ;;  %2499 = vbcast.lane.b32.xlu1 %v9660_v55, 256  ;;  %2492 = vbcast.lane.b32.xlu0 %v9664_v23, 256  ;;  %v9694_v58 = vrot.slane %v9496_v46, %v7927_v8 }
 0x25a   :  { %12888 = vst [vmem:[#allocation60_spill] sm:$0xff] %v9677_v32  ;;  %v9688_v10 = vadd.f32 %v9654_v13, %v3438_v38  ;;  %v9698_v59 = vrot.slane %v9496_v46, %v7930_v9  ;;  %v943_v56 = vmul.f32 %v9038_v11, %v12893_v21  ;;  %v1071_v18 = vmul.f32 %v9036_v40, %v12893_v21  ;;  %v12895_v38 = vld [vmem:[#allocation91_spill] sm:$0xff]  ;;  %v12896_v32 = vld [vmem:[#allocation92_spill] sm:$0xff] }
 0x25b   :  { %12891 = vst [vmem:[#allocation62_spill] sm:$0xff] %v9694_v58  ;;  %v942_v3 = vmul.f32 %v9038_v11, %v12894_v27  ;;  %v1070_v24 = vmul.f32 %v9036_v40, %v12894_v27  ;;  %v945_v60 = vmul.f32 %v9038_v11, %v12895_v38  ;;  %v1073_v2 = vmul.f32 %v9036_v40, %v12895_v38  ;;  %v9717_v21 = vpop.permute.xlu0 %1483 }
 0x25c   :  { %12892 = vst [vmem:[#allocation63_spill] sm:$0xff] %v9698_v59  ;;  %v3501_v19 = vmul.f32 1.442695, %v9688_v10  ;;  %v944_v23 = vmul.f32 %v9038_v11, %v12896_v32  ;;  %12898 = vst [vmem:[#allocation65_spill] sm:$0xff] %v9717_v21  ;;  %v1072_v31 = vmul.f32 %v9036_v40, %v12896_v32  ;;  %v2032_v25 = vmul.f32 %v9386_v30, %v12899_v51 }
 0x25d   :  { %v9715_v55 = vpop.permute.xlu1 %1490  ;;  %v2160_v27 = vmul.f32 %v9258_v22, %v12899_v51  ;;  %v2031_v38 = vmul.f32 %v9386_v30, %v12900_v4  ;;  %2713 = vbcast.lane.b32.xlu1 %v9694_v58, 256  ;;  %2706 = vbcast.lane.b32.xlu0 %v9698_v59, 256  ;;  %v9731_v21 = vrot.slane %v9496_v46, %v12882_v50  ;;  %vm3477_vm3 = vcmp.gt.f32.partialorder %v9688_v10, 0.0 }
 0x25e   :  { %12897 = vst [vmem:[#allocation64_spill] sm:$0xff] %v9715_v55  ;;  %7679 = vpow2.f32 %v3501_v19  ;;  %v9735_v32 = vrot.slane %v9496_v46, %v12884_v17  ;;  %v908_v55 = vadd.f32 %v876_v48, %v808_v61  ;;  %v9737_v63 = vadd.f32 %v943_v56, %v907_v29  ;;  %v9791_v48 = vld [vmem:[%s12349_s0 + $0xa] sm:$0xff] }
 0x25f   :  { %12901 = vst [vmem:[#allocation66_spill] sm:$0xff] %v9731_v21  ;;  %v9739_v51 = vadd.f32 %v1071_v18, %v1007_v49  ;;  %v2159_v19 = vmul.f32 %v9258_v22, %v12900_v4  ;;  %v9743_v15 = vadd.f32 %v942_v3, %v906_v54  ;;  %v9745_v58 = vadd.f32 %v1070_v24, %v1006_v42  ;;  %v9753_v46 = vpop.permute.xlu0 %1497  ;;  %v12914_v54 = vld [vmem:[#allocation101_spill] sm:$0xff]  ;;  %v12917_v56 = vld [vmem:[#allocation99_spill] sm:$0xff]  ;;  %v12919_v24 = vld [vmem:[#allocation104_spill] sm:$0xff] }
 0x260   :  { %12902 = vst [vmem:[#allocation67_spill] sm:$0xff] %v9735_v32  ;;  %12903 = vst [vmem:[#allocation68_spill] sm:$0xff] %v9737_v63  ;;  %v9747_v59 = vadd.f32 %v945_v60, %v909_v41  ;;  %v9749_v7 = vadd.f32 %v1073_v2, %v1009_v12  ;;  %v9755_v61 = vadd.f32 %v944_v23, %v908_v55  ;;  %v7731_v2 = vld [vmem:[%s12349_s0 + $0x2] sm:$0xff]  ;;  %v12918_v18 = vld [vmem:[#allocation103_spill] sm:$0xff] }
 0x261   :  { %12904 = vst [vmem:[#allocation13_spill] sm:$0xff] %v9739_v51  ;;  %12905 = vst [vmem:[#allocation12_spill] sm:$0xff] %v9743_v15  ;;  %v9751_v50 = vpop.permute.xlu1 %1504  ;;  %v9757_v29 = vadd.f32 %v1072_v31, %v1008_v36  ;;  %v9760_v49 = vadd.f32 %v2032_v25, %v9444_v0  ;;  %v9763_v4 = vadd.f32 %v2160_v27, %v9447_v20  ;;  %2727 = vbcast.lane.b32.xlu1 %v9731_v21, 256  ;;  %v12913_v25 = vld [vmem:[#allocation97_spill] sm:$0xff]  ;;  %v12915_v23 = vld [vmem:[#allocation102_spill] sm:$0xff] }
 0x262   :  { %12906 = vst [vmem:[#allocation69_spill] sm:$0xff] %v9745_v58  ;;  %12907 = vst [vmem:[#allocation70_spill] sm:$0xff] %v9747_v59  ;;  %v9766_v42 = vadd.f32 %v2031_v38, %v9453_v44  ;;  %2720 = vbcast.lane.b32.xlu0 %v9735_v32, 256  ;;  %v9774_v31 = vrot.slane %v7731_v2, %v12820_v52  ;;  %v9777_v0 = vrot.slane %v7731_v2, %v12822_v14  ;;  %v12916_v36 = vld [vmem:[#allocation98_spill] sm:$0xff] }
 0x263   :  { %12908 = vst [vmem:[#allocation71_spill] sm:$0xff] %v9749_v7  ;;  %12909 = vst [vmem:[#allocation72_spill] sm:$0xff] %v9751_v50  ;;  %v9780_v20 = vadd.f32 %v2159_v19, %v9456_v47  ;;  %v811_v44 = vmul.f32 %v12879_v1, %v12913_v25  ;;  %v879_v55 = vmul.f32 %v9036_v40, %v12914_v54  ;;  %v9803_v38 = vpop.permute.xlu0 %1738  ;;  %v12922_v19 = vld [vmem:[#allocation100_spill] sm:$0xff]  ;;  %v12924_v50 = vld [vmem:[#allocation113_spill] sm:$0xff] }
 0x264   :  { %12910 = vst [vmem:[#allocation73_spill] sm:$0xff] %v9753_v46  ;;  %12911 = vst [vmem:[#allocation74_spill] sm:$0xff] %v9755_v61  ;;  %v878_v12 = vmul.f32 %v9036_v40, %v12915_v23  ;;  %v810_v41 = vmul.f32 %v12879_v1, %v12916_v36  ;;  %v813_v47 = vmul.f32 %v12879_v1, %v12917_v56  ;;  %v12923_v36 = vld [vmem:[#allocation105_spill] sm:$0xff]  ;;  %v12925_v32 = vld [vmem:[#allocation114_spill] sm:$0xff] }
 0x265   :  { %12912 = vst [vmem:[#allocation75_spill] sm:$0xff] %v9757_v29  ;;  %v881_v3 = vmul.f32 %v9036_v40, %v12918_v18  ;;  %v880_v60 = vmul.f32 %v9036_v40, %v12919_v24  ;;  %v9801_v27 = vpop.permute.xlu1 %1742  ;;  %12921 = vst [vmem:[#allocation77_spill] sm:$0xff] %v9803_v38  ;;  %v812_v2 = vmul.f32 %v12879_v1, %v12922_v19  ;;  %2345 = vbcast.lane.b32.xlu1 %v9774_v31, 256  ;;  %v12943_v21 = vld [vmem:[#allocation170_spill] sm:$0xff]  ;;  %v12944_v29 = vld [vmem:[#allocation171_spill] sm:$0xff] }
 0x266   :  { %12920 = vst [vmem:[#allocation76_spill] sm:$0xff] %v9801_v27  ;;  %v1011_v25 = vmul.f32 %v12879_v1, %v12914_v54  ;;  %v947_v46 = vmul.f32 %v9038_v11, %v12923_v36  ;;  %v1075_v56 = vmul.f32 %v9036_v40, %v12923_v36  ;;  %v2242_v61 = vmul.f32 %v9386_v30, %v12924_v50 }
 0x267   :  { %2338 = vbcast.lane.b32.xlu0 %v9777_v0, 256  ;;  %v9819_v38 = vrot.slane %v9791_v48, %v12830_v5  ;;  %v9823_v54 = vrot.slane %v9791_v48, %v12832_v28  ;;  %v911_v19 = vadd.f32 %v879_v55, %v811_v44  ;;  %v9825_v27 = vadd.f32 %v878_v12, %v810_v41  ;;  %v9847_v12 = vpop.permute.xlu0 %1746 }
 0x268   :  { %v9829_v36 = vmul.f32 %v12879_v1, %v12915_v23  ;;  %v9833_v50 = vmul.f32 %v12879_v1, %v12918_v18  ;;  %v9835_v59 = vadd.f32 %v881_v3, %v813_v47  ;;  %v9837_v15 = vadd.f32 %v880_v60, %v812_v2  ;;  %12927 = vst [vmem:[#allocation95_spill] sm:$0xff] %v9847_v12  ;;  %v12930_v18 = vld [vmem:[#allocation106_spill] sm:$0xff]  ;;  %v12933_v60 = vld [vmem:[#allocation115_spill] sm:$0xff]  ;;  %v12934_v2 = vld [vmem:[#allocation116_spill] sm:$0xff] }
 0x269   :  { %v9841_v63 = vmul.f32 %v12879_v1, %v12919_v24  ;;  %v2241_v44 = vmul.f32 %v9386_v30, %v12925_v32  ;;  %v9845_v55 = vpop.permute.xlu1 %1750  ;;  %v9849_v23 = vadd.f32 %v947_v46, %v911_v19  ;;  %v9851_v41 = vadd.f32 %v1075_v56, %v1011_v25  ;;  %2359 = vbcast.lane.b32.xlu1 %v9819_v38, 256  ;;  %v7732_v32 = vld [vmem:[%s12350_s1 + $0x2] sm:$0xff]  ;;  %v9882_v19 = vld [vmem:[%s12350_s1 + $0xa] sm:$0xff]  ;;  %v12936_v12 = vld [vmem:[#allocation165_spill] sm:$0xff] }
 0x26a   :  { %12926 = vst [vmem:[#allocation78_spill] sm:$0xff] %v9845_v55  ;;  %v9855_v47 = vmul.f32 %v9038_v11, %v12930_v18  ;;  %v9859_v3 = vmul.f32 %v9036_v40, %v12930_v18  ;;  %v2274_v24 = vadd.f32 %v2242_v61, %v9574_v62  ;;  %v9868_v46 = vrot.slane %v7732_v32, %v12820_v52  ;;  %v12935_v61 = vld [vmem:[#allocation164_spill] sm:$0xff]  ;;  %v12937_v55 = vld [vmem:[#allocation166_spill] sm:$0xff] }
 0x26b   :  { %12928 = vst [vmem:[#allocation96_spill] sm:$0xff] %v9849_v23  ;;  %12929 = vst [vmem:[#allocation137_spill] sm:$0xff] %v9851_v41  ;;  %v7680_v1 = vpop.eup %7679  ;;  %2352 = vbcast.lane.b32.xlu0 %v9823_v54, 256  ;;  %v9871_v11 = vrot.slane %v7732_v32, %v12822_v14  ;;  %v2244_v40 = vmul.f32 %v9386_v30, %v12933_v60  ;;  %v2243_v62 = vmul.f32 %v9386_v30, %v12934_v2  ;;  %v9892_v23 = vpop.permute.xlu0 %2753  ;;  %v12939_v14 = vld [vmem:[#allocation168_spill] sm:$0xff] }
 0x26c   :  { %12931 = vst [vmem:[#allocation138_spill] sm:$0xff] %v9868_v46  ;;  %v3025_v25 = vmul.f32 %v9537_v53, %v12935_v61  ;;  %v6854_v56 = vadd.f32 -1.0, %v7680_v1  ;;  %v2273_v18 = vadd.f32 %v2241_v44, %v9584_v26  ;;  %v3024_v32 = vmul.f32 %v9537_v53, %v12936_v12  ;;  %v12938_v1 = vld [vmem:[#allocation167_spill] sm:$0xff]  ;;  %v12940_v12 = vld [vmem:[#allocation169_spill] sm:$0xff] }
 0x26d   :  { %12932 = vst [vmem:[#allocation141_spill] sm:$0xff] %v9871_v11  ;;  %v3027_v60 = vmul.f32 %v9537_v53, %v12937_v55  ;;  %v9890_v2 = vpop.permute.xlu1 %2757  ;;  %v3026_v61 = vmul.f32 %v9537_v53, %v12938_v1  ;;  %v3093_v52 = vmul.f32 %v9562_v45, %v12939_v14  ;;  %v3225_v26 = vmul.f32 %v9537_v53, %v12939_v14 }
 0x26e   :  { %v3541_v44 = vsel %vm3477_vm3, %v9688_v10, %v6854_v56  ;;  %v3092_v55 = vmul.f32 %v9562_v45, %v12940_v12  ;;  %2573 = vbcast.lane.b32.xlu1 %v9868_v46, 256  ;;  %v9908_v1 = vrot.slane %v9882_v19, %v12830_v5  ;;  %v9912_v41 = vrot.slane %v9882_v19, %v12832_v28 }
 0x26f   :  { %3602 = vst.msk [vmem:[#allocation2 + $0xb1] sm:$0xff] %vm3549_vm0, %v3541_v44  ;;  %2566 = vbcast.lane.b32.xlu0 %v9871_v11, 256  ;;  %v2276_v14 = vadd.f32 %v2244_v40, %v9632_v37  ;;  %v2275_v10 = vadd.f32 %v2243_v62, %v9667_v16  ;;  %v3057_v56 = vadd.f32 %v3025_v25, %v9565_v34  ;;  %v9927_v37 = vpop.permute.xlu0 %2761 }
 0x270   :  { %12941 = vst [vmem:[#allocation142_spill] sm:$0xff] %v9908_v1  ;;  %12942 = vst [vmem:[#allocation79_spill] sm:$0xff] %v9912_v41  ;;  %v3224_v44 = vmul.f32 %v9537_v53, %v12940_v12  ;;  %v3056_v46 = vadd.f32 %v3024_v32, %v9577_v33  ;;  %v3059_v11 = vadd.f32 %v3027_v60, %v9619_v43  ;;  %v12947_v12 = vld [vmem:[#allocation28_spill] sm:$0xff] }
 0x271   :  { %v3227_v5 = vmul.f32 %v9537_v53, %v12943_v21  ;;  %v3226_v28 = vmul.f32 %v9537_v53, %v12944_v29  ;;  %v9925_v7 = vpop.permute.xlu1 %2765  ;;  %12945 = vst [vmem:[#allocation80_spill] sm:$0xff] %v9927_v37  ;;  %v3058_v16 = vadd.f32 %v3026_v61, %v9635_v57  ;;  %v3125_v34 = vadd.f32 %v3093_v52, %v3057_v56  ;;  %v3652_v61 = vld [vmem:[#allocation2 + $0xa1] sm:$0xff] }
 0x272   :  { %v3289_v40 = vmul.f32 %v9562_v45, %v9274_v39  ;;  %v3288_v33 = vmul.f32 %v9562_v45, %v9276_v6  ;;  %v3257_v43 = vadd.f32 %v3225_v26, %v2274_v24  ;;  %v3124_v62 = vadd.f32 %v3092_v55, %v3056_v46  ;;  %2587 = vbcast.lane.b32.xlu1 %v9908_v1, 256  ;;  %v12946_v26 = vld [vmem:[#allocation27_spill] sm:$0xff] }
 0x273   :  { %v3161_v25 = vmul.f32 %v9592_v35, %v9274_v39  ;;  %2580 = vbcast.lane.b32.xlu0 %v9912_v41, 256  ;;  %v3256_v32 = vadd.f32 %v3224_v44, %v2273_v18  ;;  %v3095_v57 = vmul.f32 %v9562_v45, %v12943_v21  ;;  %v3094_v52 = vmul.f32 %v9562_v45, %v12944_v29  ;;  %v2946_v18 = vpop.permute.xlu0 %2945 }
 0x274   :  { %v3160_v60 = vmul.f32 %v9592_v35, %v9276_v6  ;;  %v3259_v24 = vadd.f32 %v3227_v5, %v2276_v14  ;;  %v3258_v46 = vadd.f32 %v3226_v28, %v2275_v10  ;;  %v3291_v39 = vmul.f32 %v9562_v45, %v12946_v26  ;;  %v12948_v14 = vld [vmem:[#allocation31_spill] sm:$0xff] }
 0x275   :  { %v3290_v55 = vmul.f32 %v9562_v45, %v12947_v12  ;;  %v2950_v56 = vpop.permute.xlu1 %2949  ;;  %v3321_v44 = vadd.f32 %v3289_v40, %v3257_v43  ;;  %v3320_v41 = vadd.f32 %v3288_v33, %v3256_v32  ;;  %v3352_v29 = vmul.f32 %v9592_v35, %v2946_v18  ;;  %v12949_v10 = vld [vmem:[#allocation35_spill] sm:$0xff] }
 0x276   :  { %v3353_v21 = vmul.f32 %v9592_v35, %v2950_v56  ;;  %v3653_v1 = vld [vmem:[#allocation2 + $0xb1] sm:$0xff]  ;;  %v3193_v58 = vadd.f32 %v3161_v25, %v3125_v34  ;;  %v3163_v6 = vmul.f32 %v9592_v35, %v12946_v26  ;;  %2837 = vbcast.lane.b32.xlu1 %v12948_v14, 257  ;;  %v3192_v28 = vadd.f32 %v3160_v60, %v3124_v62  ;;  %v12950_v60 = vld [vmem:[#allocation37_spill] sm:$0xff] }
 0x277   :  { %2833 = vbcast.lane.b32.xlu0 %v12949_v10, 257  ;;  %v7103_v5 = vpack.c.bf16 %v3653_v1, %v3652_v61  ;;  %v3162_v51 = vmul.f32 %v9592_v35, %v12947_v12  ;;  %v3384_v33 = vadd.f32 %v3352_v29, %v3320_v41  ;;  %v3127_v43 = vadd.f32 %v3095_v57, %v3059_v11  ;;  %v2954_v34 = vpop.permute.xlu0 %2953  ;;  %v12951_v61 = vld [vmem:[#allocation38_spill] sm:$0xff]  ;;  %v9977_v12 = vld [vmem:[#allocation3 + $0x1] ss:$0 sm:$0xff] }
 0x278   :  { %v3385_v40 = vadd.f32 %v3353_v21, %v3321_v44  ;;  %v3126_v32 = vadd.f32 %v3094_v52, %v3058_v16  ;;  %v3323_v56 = vadd.f32 %v3291_v39, %v3259_v24  ;;  %v3322_v18 = vadd.f32 %v3290_v55, %v3258_v46  ;;  %v9973_v24 = vld [vmem:[#allocation3 + $0x2] ss:$0 sm:$0xff]  ;;  %v12953_v46 = vld [vmem:[#allocation107_spill] sm:$0xff]  ;;  %v12954_v44 = vld [vmem:[#allocation108_spill] sm:$0xff] }
 0x279   :  { %v2958_v37 = vpop.permute.xlu1 %2957  ;;  %7319 = vmatprep.mubr.msk.bf16.mxu1 %vm3549_vm0, %v7103_v5  ;;  %v3416_v26 = vmax.f32 %v3192_v28, %v3384_v33  ;;  %v3354_v1 = vmul.f32 %v9592_v35, %v2954_v34  ;;  %v3195_v62 = vadd.f32 %v3163_v6, %v3127_v43  ;;  %v9963_v41 = vrot.slane %v9791_v48, %v7927_v8  ;;  %v12957_v5 = vld [vmem:[#allocation109_spill] sm:$0xff] }
 0x27a   :  { %v3417_v25 = vmax.f32 %v3193_v58, %v3385_v40  ;;  %v3355_v14 = vmul.f32 %v9592_v35, %v2958_v37  ;;  %2845 = vbcast.lane.b32.xlu1 %v12950_v60, 257  ;;  %v9967_v11 = vrot.slane %v9791_v48, %v7930_v9  ;;  %v3194_v16 = vadd.f32 %v3162_v51, %v3126_v32  ;;  %v12958_v40 = vld [vmem:[#allocation14_spill] sm:$0xff] }
 0x27b   :  { %2841 = vbcast.lane.b32.xlu0 %v12951_v61, 257  ;;  %v3386_v52 = vadd.f32 %v3354_v1, %v3322_v18  ;;  %v9971_v37 = vadd.f32 %v9855_v47, %v9825_v27  ;;  %v949_v39 = vmul.f32 %v9973_v24, %v12953_v46  ;;  %v1077_v55 = vmul.f32 %v9977_v12, %v12953_v46  ;;  %v9985_v29 = vpop.permute.xlu0 %1658 }
 0x27c   :  { %v3439_v58 = vmax.f32 %v3416_v26, %v3417_v25  ;;  %v3387_v57 = vadd.f32 %v3355_v14, %v3323_v56  ;;  %v948_v51 = vmul.f32 %v9973_v24, %v12954_v44  ;;  %12956 = vst [vmem:[#allocation81_spill] sm:$0xff] %v9985_v29  ;;  %v1076_v27 = vmul.f32 %v9977_v12, %v12954_v44  ;;  %v12960_v14 = vld [vmem:[#allocation110_spill] sm:$0xff] }
 0x27d   :  { %12952 = vst [vmem:[#allocation85_spill] sm:$0xff] %v9971_v37  ;;  %v9983_v21 = vpop.permute.xlu1 %1662  ;;  %v3418_v10 = vmax.f32 %v3194_v16, %v3386_v52  ;;  %v2034_v28 = vmul.f32 %v9386_v30, %v12957_v5  ;;  %v9998_v33 = vrot.slane %v9791_v48, %v12958_v40  ;;  %v10002_v43 = vrot.slane %v9791_v48, %v12884_v17 }
 0x27e   :  { %12955 = vst [vmem:[#allocation86_spill] sm:$0xff] %v9983_v21  ;;  %v9990_v47 = vadd.f32 %v9654_v13, %v3439_v58  ;;  %v3419_v6 = vmax.f32 %v3195_v62, %v3387_v57  ;;  %2373 = vbcast.lane.b32.xlu1 %v9963_v41, 256  ;;  %v10006_v32 = vadd.f32 %v9859_v3, %v9829_v36  ;;  %v12966_v57 = vld [vmem:[#allocation111_spill] sm:$0xff] }
 0x27f   :  { %2366 = vbcast.lane.b32.xlu0 %v9967_v11, 256  ;;  %v2162_v56 = vmul.f32 %v9258_v22, %v12957_v5  ;;  %v10012_v25 = vadd.f32 %v949_v39, %v9835_v59  ;;  %v10015_v26 = vadd.f32 %v1077_v55, %v9833_v50  ;;  %v2033_v48 = vmul.f32 %v9386_v30, %v12960_v14  ;;  %v10023_v3 = vpop.permute.xlu0 %1666  ;;  %v12964_v50 = vld [vmem:[#allocation139_spill] sm:$0xff]  ;;  %v12967_v55 = vld [vmem:[#allocation44_spill] sm:$0xff] }
 0x280   :  { %v3503_v18 = vmul.f32 1.442695, %v9990_v47  ;;  %v3440_v34 = vmax.f32 %v3418_v10, %v3419_v6  ;;  %v2161_v1 = vmul.f32 %v9258_v22, %v12960_v14  ;;  %12962 = vst [vmem:[#allocation87_spill] sm:$0xff] %v10023_v3  ;;  %v10026_v62 = vadd.f32 %v948_v51, %v9837_v15  ;;  %v12974_v14 = vld [vmem:[#allocation184_spill] sm:$0xff] }
 0x281   :  { %12959 = vst [vmem:[#allocation192_spill] sm:$0xff] %v10012_v25  ;;  %v10021_v36 = vpop.permute.xlu1 %1670  ;;  %v10029_v60 = vadd.f32 %v1076_v27, %v9841_v63  ;;  %v10035_v61 = vadd.f32 %v2034_v28, %v12964_v50  ;;  %v10041_v16 = vrot.slane %v9882_v19, %v7927_v8  ;;  %v10045_v15 = vrot.slane %v9882_v19, %v7930_v9  ;;  %v12965_v63 = vld [vmem:[#allocation47_spill] sm:$0xff]  ;;  %v12968_v8 = vld [vmem:[#allocation45_spill] sm:$0xff]  ;;  %v12969_v27 = vld [vmem:[#allocation112_spill] sm:$0xff] }
 0x282   :  { %12961 = vst [vmem:[#allocation82_spill] sm:$0xff] %v10021_v36  ;;  %12963 = vst [vmem:[#allocation15_spill] sm:$0xff] %v10026_v62  ;;  %7681 = vpow2.f32 %v3503_v18  ;;  %v10032_v59 = vadd.f32 %v9654_v13, %v3440_v34  ;;  %2387 = vbcast.lane.b32.xlu1 %v9998_v33, 256  ;;  %v10048_v58 = vadd.f32 %v2162_v56, %v12965_v63  ;;  %v12972_v28 = vld [vmem:[#allocation133_spill] sm:$0xff]  ;;  %v12973_v18 = vld [vmem:[#allocation134_spill] sm:$0xff]  ;;  %vm3478_vm4 = vcmp.gt.f32.partialorder %v9990_v47, 0.0 }
 0x283   :  { %2380 = vbcast.lane.b32.xlu0 %v10002_v43, 256  ;;  %v2036_v52 = vmul.f32 %v9386_v30, %v12966_v57  ;;  %v2164_v46 = vmul.f32 %v9258_v22, %v12966_v57  ;;  %v10056_v44 = vadd.f32 %v2033_v48, %v12967_v55  ;;  %v10059_v51 = vadd.f32 %v2161_v1, %v12968_v8  ;;  %v10067_v5 = vpop.permute.xlu0 %1850  ;;  %v12975_v1 = vld [vmem:[#allocation185_spill] sm:$0xff]  ;;  %v12977_v57 = vld [vmem:[#allocation46_spill] sm:$0xff]  ;;  %v12978_v8 = vld [vmem:[#allocation48_spill] sm:$0xff] }
 0x284   :  { %v3505_v39 = vmul.f32 1.442695, %v10032_v59  ;;  %v2035_v9 = vmul.f32 %v9386_v30, %v12969_v27  ;;  %v2163_v6 = vmul.f32 %v9258_v22, %v12969_v27  ;;  %12971 = vst [vmem:[#allocation84_spill] sm:$0xff] %v10067_v5  ;;  %v2224_v56 = vmul.f32 %v9386_v30, %v12972_v28  ;;  %v12979_v27 = vld [vmem:[#allocation186_spill] sm:$0xff]  ;;  %v12985_v3 = vld [vmem:[#allocation52_spill] sm:$0xff] }
 0x285   :  { %v10065_v10 = vpop.permute.xlu1 %1854  ;;  %v2223_v34 = vmul.f32 %v9386_v30, %v12973_v18  ;;  %v3007_v48 = vmul.f32 %v9537_v53, %v12974_v14  ;;  %v3006_v50 = vmul.f32 %v9537_v53, %v12975_v1  ;;  %v10081_v22 = vrot.slane %v9882_v19, %v12958_v40  ;;  %v12980_v18 = vld [vmem:[#allocation187_spill] sm:$0xff]  ;;  %v12981_v1 = vld [vmem:[#allocation50_spill] sm:$0xff] }
 0x286   :  { %12970 = vst [vmem:[#allocation83_spill] sm:$0xff] %v10065_v10  ;;  %7683 = vpow2.f32 %v3505_v39  ;;  %2601 = vbcast.lane.b32.xlu1 %v10041_v16, 256  ;;  %v10085_v63 = vrot.slane %v9882_v19, %v12884_v17  ;;  %v10088_v55 = vadd.f32 %v2036_v52, %v12977_v57  ;;  %v10091_v39 = vadd.f32 %v2164_v46, %v12978_v8  ;;  %v12982_v40 = vld [vmem:[#allocation51_spill] sm:$0xff] }
 0x287   :  { %2594 = vbcast.lane.b32.xlu0 %v10045_v15, 256  ;;  %v3207_v28 = vmul.f32 %v9537_v53, %v12979_v27  ;;  %v3206_v14 = vmul.f32 %v9537_v53, %v12980_v18  ;;  %v10098_v5 = vadd.f32 %v2035_v9, %v12981_v1  ;;  %v10101_v10 = vadd.f32 %v2163_v6, %v12982_v40  ;;  %v10109_v46 = vpop.permute.xlu0 %1858  ;;  %v12986_v1 = vld [vmem:[#allocation53_spill] sm:$0xff] }
 0x288   :  { %12976 = vst [vmem:[#allocation88_spill] sm:$0xff] %v10085_v63  ;;  %v3075_v17 = vmul.f32 %v9562_v45, %v12979_v27  ;;  %v3074_v19 = vmul.f32 %v9562_v45, %v12980_v18  ;;  %12984 = vst [vmem:[#allocation90_spill] sm:$0xff] %v10109_v46  ;;  %v2256_v57 = vadd.f32 %v2224_v56, %v9763_v4  ;;  %v10123_v4 = vld [vmem:[#allocation3] ss:$0 sm:$0xff]  ;;  %vm3479_vm5 = vcmp.gt.f32.partialorder %v10032_v59, 0.0 }
 0x289   :  { %v10107_v52 = vpop.permute.xlu1 %1862  ;;  %v2255_v8 = vadd.f32 %v2223_v34, %v9780_v20  ;;  %v3271_v9 = vmul.f32 %v9562_v45, %v12985_v3  ;;  %v3270_v6 = vmul.f32 %v9562_v45, %v12986_v1  ;;  %v3039_v40 = vadd.f32 %v3007_v48, %v9760_v49  ;;  %v12987_v20 = vld [vmem:[#allocation117_spill] sm:$0xff]  ;;  %v12988_v49 = vld [vmem:[#allocation118_spill] sm:$0xff]  ;;  %v12989_v48 = vld [vmem:[#allocation119_spill] sm:$0xff] }
 0x28a   :  { %12983 = vst [vmem:[#allocation89_spill] sm:$0xff] %v10107_v52  ;;  %v3038_v27 = vadd.f32 %v3006_v50, %v9766_v42  ;;  %v3143_v18 = vmul.f32 %v9592_v35, %v12985_v3  ;;  %2615 = vbcast.lane.b32.xlu1 %v10081_v22, 256  ;;  %v791_v56 = vmul.f32 %v10123_v4, %v12987_v20 }
 0x28b   :  { %2608 = vbcast.lane.b32.xlu0 %v10085_v63, 256  ;;  %v3239_v34 = vadd.f32 %v3207_v28, %v2256_v57  ;;  %v3238_v46 = vadd.f32 %v3206_v14, %v2255_v8  ;;  %v3142_v52 = vmul.f32 %v9592_v35, %v12986_v1  ;;  %v790_v42 = vmul.f32 %v10123_v4, %v12988_v49  ;;  %v2874_v21 = vpop.permute.xlu0 %2873  ;;  %v12990_v57 = vld [vmem:[#allocation121_spill] sm:$0xff]  ;;  %v12991_v1 = vld [vmem:[#allocation122_spill] sm:$0xff] }
 0x28c   :  { %v793_v3 = vmul.f32 %v10123_v4, %v12989_v48  ;;  %v3107_v50 = vadd.f32 %v3075_v17, %v3039_v40  ;;  %v3106_v36 = vadd.f32 %v3074_v19, %v3038_v27  ;;  %v3334_v28 = vmul.f32 %v9592_v35, %v2874_v21  ;;  %v12992_v63 = vld [vmem:[#allocation54_spill] sm:$0xff]  ;;  %v12993_v17 = vld [vmem:[#allocation55_spill] sm:$0xff] }
 0x28d   :  { %v2878_v29 = vpop.permute.xlu1 %2877  ;;  %v3303_v62 = vadd.f32 %v3271_v9, %v3239_v34  ;;  %v3302_v25 = vadd.f32 %v3270_v6, %v3238_v46  ;;  %v859_v8 = vmul.f32 %v9977_v12, %v12990_v57  ;;  %v858_v20 = vmul.f32 %v9977_v12, %v12991_v1  ;;  %v12994_v6 = vld [vmem:[#allocation120_spill] sm:$0xff]  ;;  %v12995_v21 = vld [vmem:[#allocation123_spill] sm:$0xff] }
 0x28e   :  { %v3335_v37 = vmul.f32 %v9592_v35, %v2878_v29  ;;  %v3175_v49 = vadd.f32 %v3143_v18, %v3107_v50  ;;  %2853 = vbcast.lane.b32.xlu1 %v12992_v63, 257  ;;  %v3174_v19 = vadd.f32 %v3142_v52, %v3106_v36  ;;  %v792_v29 = vmul.f32 %v10123_v4, %v12994_v6  ;;  %v12996_v34 = vld [vmem:[#allocation124_spill] sm:$0xff]  ;;  %v12999_v6 = vld [vmem:[#allocation59_spill] sm:$0xff] }
 0x28f   :  { %v7682_v14 = vpop.eup %7681  ;;  %2849 = vbcast.lane.b32.xlu0 %v12993_v17, 257  ;;  %v3366_v46 = vadd.f32 %v3334_v28, %v3302_v25  ;;  %v861_v27 = vmul.f32 %v9977_v12, %v12995_v21  ;;  %v860_v48 = vmul.f32 %v9977_v12, %v12996_v34  ;;  %v10150_v63 = vpop.permute.xlu0 %1674  ;;  %v10154_v36 = vmul.f32 %v10123_v4, %v12990_v57  ;;  %v12998_v17 = vld [vmem:[#allocation58_spill] sm:$0xff] }
 0x290   :  { %v6855_v40 = vadd.f32 -1.0, %v7682_v14  ;;  %v3367_v9 = vadd.f32 %v3335_v37, %v3303_v62  ;;  %12997 = vst [vmem:[#allocation91_spill] sm:$0xff] %v10150_v63  ;;  %v891_v50 = vadd.f32 %v859_v8, %v791_v56  ;;  %v10157_v28 = vadd.f32 %v858_v20, %v790_v42  ;;  %v13000_v20 = vld [vmem:[#allocation125_spill] sm:$0xff] }
 0x291   :  { %v10148_v18 = vpop.permute.xlu1 %1678  ;;  %v3398_v62 = vmax.f32 %v3174_v19, %v3366_v46  ;;  %v10161_v14 = vmul.f32 %v10123_v4, %v12991_v1  ;;  %v10168_v57 = vmul.f32 %v10123_v4, %v12995_v21  ;;  %v10174_v8 = vadd.f32 %v861_v27, %v793_v3  ;;  %v13003_v46 = vld [vmem:[#allocation160_spill] sm:$0xff]  ;;  %v13004_v27 = vld [vmem:[#allocation126_spill] sm:$0xff] }
 0x292   :  { %v3542_v37 = vsel %vm3478_vm4, %v9990_v47, %v6855_v40  ;;  %v3399_v25 = vmax.f32 %v3175_v49, %v3367_v9  ;;  %2861 = vbcast.lane.b32.xlu1 %v12998_v17, 257  ;;  %v10172_v47 = vmul.f32 %v10123_v4, %v12996_v34  ;;  %v10176_v1 = vadd.f32 %v860_v48, %v792_v29 }
 0x293   :  { %v7684_v52 = vpop.eup %7683  ;;  %3603 = vst.msk [vmem:[#allocation2 + $0xc1] sm:$0xff] %vm3549_vm0, %v3542_v37  ;;  %2857 = vbcast.lane.b32.xlu0 %v12999_v6, 257  ;;  %v927_v49 = vmul.f32 %v9973_v24, %v13000_v20  ;;  %v10183_v40 = vpop.permute.xlu0 %1682  ;;  %v10187_v9 = vmul.f32 %v9977_v12, %v13000_v20  ;;  %v2226_v21 = vmul.f32 %v9386_v30, %v13003_v46  ;;  %v13005_v37 = vld [vmem:[#allocation161_spill] sm:$0xff]  ;;  %v13009_v46 = vld [vmem:[#allocation23_spill] sm:$0xff] }
 0x294   :  { %v6856_v56 = vadd.f32 -1.0, %v7684_v52  ;;  %v3430_v42 = vmax.f32 %v3398_v62, %v3399_v25  ;;  %13002 = vst [vmem:[#allocation93_spill] sm:$0xff] %v10183_v40  ;;  %v10197_v34 = vmul.f32 %v9973_v24, %v13004_v27  ;;  %v10201_v48 = vmul.f32 %v9977_v12, %v13004_v27  ;;  %v13007_v52 = vld [vmem:[#allocation163_spill] sm:$0xff]  ;;  %v13008_v6 = vld [vmem:[#allocation17_spill] sm:$0xff]  ;;  %v13010_v27 = vld [vmem:[#allocation18_spill] sm:$0xff] }
 0x295   :  { %v10181_v19 = vpop.permute.xlu1 %1686  ;;  %v2225_v25 = vmul.f32 %v9386_v30, %v13005_v37  ;;  %v2227_v17 = vmul.f32 %v9386_v30, %v13007_v52  ;;  %v10215_v20 = vadd.f32 %v927_v49, %v891_v50  ;;  %v13014_v52 = vld [vmem:[#allocation24_spill] sm:$0xff] }
 0x296   :  { %13001 = vst [vmem:[#allocation92_spill] sm:$0xff] %v10181_v19  ;;  %v3543_v3 = vsel %vm3479_vm5, %v10032_v59, %v6856_v56  ;;  %v10193_v29 = vadd.f32 %v9654_v13, %v3430_v42  ;;  %2773 = vbcast.lane.b32.xlu1 %v9774_v31, 257  ;;  %v13006_v59 = vld [vmem:[#allocation162_spill] sm:$0xff]  ;;  %v3009_v56 = vmul.f32 %v9537_v53, %v13008_v6  ;;  %v10232_v49 = vld [vmem:[#allocation2 + $0xb2] sm:$0xff]  ;;  %v13018_v19 = vld [vmem:[#allocation25_spill] sm:$0xff] }
 0x297   :  { %3604 = vst.msk [vmem:[#allocation2 + $0xd1] sm:$0xff] %vm3549_vm0, %v3543_v3  ;;  %2769 = vbcast.lane.b32.xlu0 %v9777_v0, 257  ;;  %v2228_v62 = vmul.f32 %v9386_v30, %v13006_v59  ;;  %v3008_v3 = vmul.f32 %v9537_v53, %v13009_v46  ;;  %v3011_v31 = vmul.f32 %v9537_v53, %v13010_v27  ;;  %v13011_v0 = vld [vmem:[#allocation21_spill] sm:$0xff]  ;;  %v10225_v40 = vpop.permute.xlu0 %1866  ;;  %13015 = vst [vmem:[#allocation101_spill] sm:$0xff] %v10232_v49 }
 0x298   :  { %v3485_v42 = vmul.f32 1.442695, %v10193_v29  ;;  %v3010_v37 = vmul.f32 %v9537_v53, %v13011_v0  ;;  %13013 = vst [vmem:[#allocation97_spill] sm:$0xff] %v10225_v40  ;;  %v2258_v30 = vadd.f32 %v2226_v21, %v10048_v58  ;;  %v3077_v6 = vmul.f32 %v9562_v45, %v13014_v52  ;;  %v13017_v0 = vld [vmem:[#allocation22_spill] sm:$0xff] }
 0x299   :  { %v10223_v59 = vpop.permute.xlu1 %1870  ;;  %v3209_v50 = vmul.f32 %v9537_v53, %v13014_v52  ;;  %v2257_v27 = vadd.f32 %v2225_v25, %v10059_v51  ;;  %v2260_v21 = vadd.f32 %v2228_v62, %v10091_v39  ;;  %v3041_v52 = vadd.f32 %v3009_v56, %v10035_v61  ;;  %v13021_v56 = vld [vmem:[#allocation26_spill] sm:$0xff] }
 0x29a   :  { %13012 = vst [vmem:[#allocation94_spill] sm:$0xff] %v10223_v59  ;;  %7685 = vpow2.f32 %v3485_v42  ;;  %v10234_v46 = vld [vmem:[#allocation2 + $0xc2] sm:$0xff]  ;;  %v3076_v59 = vmul.f32 %v9562_v45, %v13017_v0  ;;  %2781 = vbcast.lane.b32.xlu1 %v9819_v38, 257  ;;  %v2259_v42 = vadd.f32 %v2227_v17, %v10101_v10  ;;  %v3208_v40 = vmul.f32 %v9537_v53, %v13017_v0 }
 0x29b   :  { %13016 = vst [vmem:[#allocation102_spill] sm:$0xff] %v10234_v46  ;;  %2777 = vbcast.lane.b32.xlu0 %v9823_v54, 257  ;;  %v3040_v51 = vadd.f32 %v3008_v3, %v10056_v44  ;;  %v3043_v25 = vadd.f32 %v3011_v31, %v10088_v55  ;;  %v3042_v38 = vadd.f32 %v3010_v37, %v10098_v5  ;;  %v10255_v58 = vpop.permute.xlu0 %1874  ;;  %v3654_v44 = vld [vmem:[#allocation2 + $0xc1] sm:$0xff]  ;;  %v13022_v3 = vld [vmem:[#allocation39_spill] sm:$0xff]  ;;  %v13023_v31 = vld [vmem:[#allocation40_spill] sm:$0xff]  ;;  %vm3469_vm6 = vcmp.gt.f32.partialorder %v10193_v29, 0.0 }
 0x29c   :  { %v3211_v54 = vmul.f32 %v9537_v53, %v13018_v19  ;;  %13020 = vst [vmem:[#allocation99_spill] sm:$0xff] %v10255_v58  ;;  %v3109_v39 = vadd.f32 %v3077_v6, %v3041_v52  ;;  %v3241_v10 = vadd.f32 %v3209_v50, %v2258_v30  ;;  %v3273_v61 = vmul.f32 %v9562_v45, %v9890_v2 }
 0x29d   :  { %v10253_v63 = vpop.permute.xlu1 %1878  ;;  %v3272_v62 = vmul.f32 %v9562_v45, %v9892_v23  ;;  %v3108_v55 = vadd.f32 %v3076_v59, %v3040_v51  ;;  %v3210_v5 = vmul.f32 %v9537_v53, %v13021_v56  ;;  %v3240_v0 = vadd.f32 %v3208_v40, %v2257_v27  ;;  %v13024_v51 = vld [vmem:[#allocation80_spill] sm:$0xff] }
 0x29e   :  { %13019 = vst [vmem:[#allocation98_spill] sm:$0xff] %v10253_v63  ;;  %v3655_v17 = vld [vmem:[#allocation2 + $0xd1] sm:$0xff]  ;;  %2965 = vbcast.lane.b32.xlu1 %v13022_v3, 257  ;;  %v3079_v30 = vmul.f32 %v9562_v45, %v13018_v19  ;;  %v3145_v6 = vmul.f32 %v9592_v35, %v9890_v2  ;;  %v3144_v50 = vmul.f32 %v9592_v35, %v9892_v23 }
 0x29f   :  { %2961 = vbcast.lane.b32.xlu0 %v13023_v31, 257  ;;  %v7104_v37 = vpack.c.bf16 %v3655_v17, %v3654_v44  ;;  %v3243_v52 = vadd.f32 %v3211_v54, %v2260_v21  ;;  %v3078_v59 = vmul.f32 %v9562_v45, %v13021_v56  ;;  %v3275_v53 = vmul.f32 %v9562_v45, %v9925_v7  ;;  %v2882_v19 = vpop.permute.xlu0 %2881  ;;  %v13025_v3 = vld [vmem:[#allocation140_spill] sm:$0xff] }
 0x2a0   :  { %v3274_v44 = vmul.f32 %v9562_v45, %v13024_v51  ;;  %v3305_v27 = vadd.f32 %v3273_v61, %v3241_v10  ;;  %v3304_v17 = vadd.f32 %v3272_v62, %v3240_v0  ;;  %v3336_v23 = vmul.f32 %v9592_v35, %v2882_v19  ;;  %v13026_v45 = vld [vmem:[#allocation43_spill] sm:$0xff] }
 0x2a1   :  { %v2886_v40 = vpop.permute.xlu1 %2885  ;;  %7320 = vmatmul.mubr.msk.bf16.vlgmr.msra.gmra.mxu1 %vm3549_vm0, %v7104_v37  ;;  %v3242_v21 = vadd.f32 %v3210_v5, %v2259_v42  ;;  %v3147_v54 = vmul.f32 %v9592_v35, %v9925_v7  ;;  %v3146_v56 = vmul.f32 %v9592_v35, %v13024_v51  ;;  %v3177_v31 = vadd.f32 %v3145_v6, %v3109_v39 }
 0x2a2   :  { %v3337_v2 = vmul.f32 %v9592_v35, %v2886_v40  ;;  %2973 = vbcast.lane.b32.xlu1 %v13025_v3, 257  ;;  %v3176_v37 = vadd.f32 %v3144_v50, %v3108_v55  ;;  %v3368_v10 = vadd.f32 %v3336_v23, %v3304_v17  ;;  %v3111_v61 = vadd.f32 %v3079_v30, %v3043_v25  ;;  %v13027_v3 = vld [vmem:[#allocation127_spill] sm:$0xff]  ;;  %v13028_v50 = vld [vmem:[#allocation128_spill] sm:$0xff]  ;;  %v13032_v17 = vld [vmem:[#allocation130_spill] sm:$0xff] }
 0x2a3   :  { %2969 = vbcast.lane.b32.xlu0 %v13026_v45, 257  ;;  %v3110_v62 = vadd.f32 %v3078_v59, %v3042_v38  ;;  %v3307_v0 = vadd.f32 %v3275_v53, %v3243_v52  ;;  %v3306_v40 = vadd.f32 %v3274_v44, %v3242_v21  ;;  %v2890_v42 = vpop.permute.xlu0 %2889  ;;  %v929_v45 = vmul.f32 %v9973_v24, %v13027_v3  ;;  %v13031_v44 = vld [vmem:[#allocation129_spill] sm:$0xff]  ;;  %v13033_v23 = vld [vmem:[#allocation131_spill] sm:$0xff] }
 0x2a4   :  { %v3369_v49 = vadd.f32 %v3337_v2, %v3305_v27  ;;  %v3400_v46 = vmax.f32 %v3176_v37, %v3368_v10  ;;  %v3338_v51 = vmul.f32 %v9592_v35, %v2890_v42  ;;  %v3179_v39 = vadd.f32 %v3147_v54, %v3111_v61  ;;  %v13034_v54 = vld [vmem:[#allocation132_spill] sm:$0xff]  ;;  %v13042_v42 = vld [vmem:[#allocation75_spill] sm:$0xff] }
 0x2a5   :  { %v2894_v19 = vpop.permute.xlu1 %2893  ;;  %v3178_v55 = vadd.f32 %v3146_v56, %v3110_v62  ;;  %v1056_v52 = vmul.f32 %v9977_v12, %v13028_v50  ;;  %v1135_v27 = vmul.f32 %v9973_v24, %v13031_v44  ;;  %v1134_v2 = vmul.f32 %v9973_v24, %v13032_v17  ;;  %v13052_v44 = vld [vmem:[#allocation151_spill] sm:$0xff] }
 0x2a6   :  { %v3401_v5 = vmax.f32 %v3177_v31, %v3369_v49  ;;  %v3339_v7 = vmul.f32 %v9592_v35, %v2894_v19  ;;  %2789 = vbcast.lane.b32.xlu1 %v9963_v41, 257  ;;  %v3370_v6 = vadd.f32 %v3338_v51, %v3306_v40  ;;  %v1057_v49 = vmul.f32 %v9977_v12, %v13027_v3  ;;  %v13040_v19 = vld [vmem:[#allocation62_spill] sm:$0xff] }
 0x2a7   :  { %v7686_v58 = vpop.eup %7685  ;;  %2785 = vbcast.lane.b32.xlu0 %v9967_v11, 257  ;;  %v928_v35 = vmul.f32 %v9973_v24, %v13028_v50  ;;  %v10301_v41 = vpop.permute.xlu0 %1786  ;;  %v1137_v21 = vmul.f32 %v9973_v24, %v13033_v23  ;;  %v1136_v56 = vmul.f32 %v9973_v24, %v13034_v54  ;;  %v10325_v10 = vadd.f32 %v10197_v34, %v10157_v28  ;;  %v13037_v34 = vld [vmem:[#allocation13_spill] sm:$0xff]  ;;  %v13054_v54 = vld [vmem:[#allocation66_spill] sm:$0xff] }
 0x2a8   :  { %v6846_v25 = vadd.f32 -1.0, %v7686_v58  ;;  %v3431_v38 = vmax.f32 %v3400_v46, %v3401_v5  ;;  %v3371_v30 = vadd.f32 %v3339_v7, %v3307_v0  ;;  %13030 = vst [vmem:[#allocation104_spill] sm:$0xff] %v10301_v41  ;;  %v3402_v53 = vmax.f32 %v3178_v55, %v3370_v6  ;;  %v13039_v0 = vld [vmem:[#allocation71_spill] sm:$0xff]  ;;  %v13043_v5 = vld [vmem:[#allocation148_spill] sm:$0xff]  ;;  %v13044_v7 = vld [vmem:[#allocation149_spill] sm:$0xff] }
 0x2a9   :  { %v10299_v59 = vpop.permute.xlu1 %1790  ;;  %v10329_v61 = vadd.f32 %v10201_v48, %v10161_v14  ;;  %v10342_v62 = vadd.f32 %v928_v35, %v10176_v1  ;;  %v10345_v28 = vadd.f32 %v1056_v52, %v10172_v47  ;;  %v13038_v48 = vld [vmem:[#allocation69_spill] sm:$0xff]  ;;  %v10357_v40 = vadd.f32 %v1137_v21, %v13039_v0  ;;  %v13041_v1 = vld [vmem:[#allocation63_spill] sm:$0xff] }
 0x2aa   :  { %13029 = vst [vmem:[#allocation103_spill] sm:$0xff] %v10299_v59  ;;  %v3533_v11 = vsel %vm3469_vm6, %v10193_v29, %v6846_v25  ;;  %v10305_v46 = vadd.f32 %v9654_v13, %v3431_v38  ;;  %v3403_v58 = vmax.f32 %v3179_v39, %v3371_v30  ;;  %2797 = vbcast.lane.b32.xlu1 %v9998_v33, 257  ;;  %v13045_v39 = vld [vmem:[#allocation143_spill] sm:$0xff]  ;;  %v13046_v25 = vld [vmem:[#allocation144_spill] sm:$0xff]  ;;  %v13047_v30 = vld [vmem:[#allocation145_spill] sm:$0xff] }
 0x2ab   :  { %3594 = vst.msk [vmem:[#allocation2 + $0x11] sm:$0xff] %vm3549_vm0, %v3533_v11  ;;  %2793 = vbcast.lane.b32.xlu0 %v10002_v43, 257  ;;  %v10318_v29 = vadd.f32 %v10187_v9, %v10154_v36  ;;  %v10332_v33 = vadd.f32 %v929_v45, %v10174_v8  ;;  %v10335_v43 = vadd.f32 %v1057_v49, %v10168_v57  ;;  %v10339_v9 = vpop.permute.xlu0 %1794  ;;  %v3644_v45 = vld [vmem:[#allocation2 + $0x1] sm:$0xff] }
 0x2ac   :  { %v3487_v31 = vmul.f32 1.442695, %v10305_v46  ;;  %v3432_v37 = vmax.f32 %v3402_v53, %v3403_v58  ;;  %13036 = vst [vmem:[#allocation105_spill] sm:$0xff] %v10339_v9  ;;  %v10351_v8 = vadd.f32 %v1135_v27, %v13037_v34  ;;  %v10354_v57 = vadd.f32 %v1134_v2, %v13038_v48  ;;  %v13048_v49 = vld [vmem:[#allocation146_spill] sm:$0xff]  ;;  %v13053_v2 = vld [vmem:[#allocation152_spill] sm:$0xff]  ;;  %v13056_v0 = vld [vmem:[#allocation153_spill] sm:$0xff] }
 0x2ad   :  { %v10337_v36 = vpop.permute.xlu1 %1798  ;;  %v10362_v47 = vadd.f32 %v1136_v56, %v13042_v42  ;;  %v862_v51 = vmul.f32 %v9977_v12, %v13044_v7  ;;  %v795_v55 = vmul.f32 %v10123_v4, %v13045_v39  ;;  %v794_v38 = vmul.f32 %v10123_v4, %v13046_v25  ;;  %v13051_v58 = vld [vmem:[#allocation150_spill] sm:$0xff]  ;;  %v13055_v56 = vld [vmem:[#allocation67_spill] sm:$0xff]  ;;  %v13117_v59 = vld [vmem:[#allocation29_spill] sm:$0xff] }
 0x2ae   :  { %13035 = vst [vmem:[#allocation100_spill] sm:$0xff] %v10337_v36  ;;  %7687 = vpow2.f32 %v3487_v31  ;;  %v10348_v14 = vadd.f32 %v9654_v13, %v3432_v37  ;;  %2981 = vbcast.lane.b32.xlu1 %v13040_v19, 257  ;;  %v863_v13 = vmul.f32 %v9977_v12, %v13043_v5  ;;  %v797_v6 = vmul.f32 %v10123_v4, %v13047_v30  ;;  %v13060_v25 = vld [vmem:[#allocation155_spill] sm:$0xff]  ;;  %v13116_v36 = vld [vmem:[#allocation33_spill] sm:$0xff] }
 0x2af   :  { %2977 = vbcast.lane.b32.xlu0 %v13041_v1, 257  ;;  %v796_v50 = vmul.f32 %v10123_v4, %v13048_v49  ;;  %v10379_v52 = vpop.permute.xlu0 %2450  ;;  %v995_v11 = vmul.f32 %v10123_v4, %v13043_v5  ;;  %v865_v53 = vmul.f32 %v9977_v12, %v13051_v58  ;;  %v864_v27 = vmul.f32 %v9977_v12, %v13052_v44  ;;  %v13057_v5 = vld [vmem:[#allocation154_spill] sm:$0xff]  ;;  %v13115_v9 = vld [vmem:[#allocation199_spill] sm:$0xff] }
 0x2b0   :  { %v3489_v3 = vmul.f32 1.442695, %v10348_v14  ;;  %13050 = vst [vmem:[#allocation114_spill] sm:$0xff] %v10379_v52  ;;  %v931_v23 = vmul.f32 %v9973_v24, %v13053_v2  ;;  %v1059_v21 = vmul.f32 %v9977_v12, %v13053_v2  ;;  %v895_v37 = vadd.f32 %v863_v13, %v795_v55  ;;  %v13062_v2 = vld [vmem:[#allocation141_spill] sm:$0xff] }
 0x2b1   :  { %v10377_v35 = vpop.permute.xlu1 %2457  ;;  %v894_v34 = vadd.f32 %v862_v51, %v794_v38  ;;  %v994_v48 = vmul.f32 %v10123_v4, %v13044_v7  ;;  %v930_v19 = vmul.f32 %v9973_v24, %v13056_v0  ;;  %v997_v1 = vmul.f32 %v10123_v4, %v13051_v58 }
 0x2b2   :  { %13049 = vst [vmem:[#allocation113_spill] sm:$0xff] %v10377_v35  ;;  %7689 = vpow2.f32 %v3489_v3  ;;  %v3645_v17 = vld [vmem:[#allocation2 + $0x11] sm:$0xff]  ;;  %2989 = vbcast.lane.b32.xlu1 %v13054_v54, 257  ;;  %v1058_v42 = vmul.f32 %v9977_v12, %v13056_v0  ;;  %v933_v3 = vmul.f32 %v9973_v24, %v13057_v5  ;;  %v897_v51 = vadd.f32 %v865_v53, %v797_v6 }
 0x2b3   :  { %2985 = vbcast.lane.b32.xlu0 %v13055_v56, 257  ;;  %v7099_v31 = vpack.c.bf16 %v3645_v17, %v3644_v45  ;;  %v1061_v45 = vmul.f32 %v9977_v12, %v13057_v5  ;;  %v10408_v7 = vpop.permute.xlu0 %2464  ;;  %v896_v39 = vadd.f32 %v864_v27, %v796_v50  ;;  %v996_v55 = vmul.f32 %v10123_v4, %v13052_v44  ;;  %v13061_v17 = vld [vmem:[#allocation138_spill] sm:$0xff]  ;;  %v13063_v6 = vld [vmem:[#allocation156_spill] sm:$0xff]  ;;  %v13064_v4 = vld [vmem:[#allocation157_spill] sm:$0xff] }
 0x2b4   :  { %13059 = vst [vmem:[#allocation115_spill] sm:$0xff] %v10408_v7  ;;  %v932_v38 = vmul.f32 %v9973_v24, %v13060_v25  ;;  %v10414_v30 = vadd.f32 %v931_v23, %v895_v37  ;;  %v10416_v49 = vadd.f32 %v1059_v21, %v995_v11  ;;  %v1060_v58 = vmul.f32 %v9977_v12, %v13060_v25  ;;  %v13065_v44 = vld [vmem:[#allocation158_spill] sm:$0xff]  ;;  %v13066_v21 = vld [vmem:[#allocation159_spill] sm:$0xff]  ;;  %v13069_v0 = vld [vmem:[#allocation172_spill] sm:$0xff] }
 0x2b5   :  { %v10405_v13 = vpop.permute.xlu1 %2471  ;;  %7311 = vmatprep.mubr.msk.bf16.mxu0 %vm3549_vm0, %v7099_v31  ;;  %v10422_v54 = vadd.f32 %v930_v19, %v894_v34  ;;  %v1139_v50 = vmul.f32 %v9973_v24, %v13063_v6  ;;  %v1138_v53 = vmul.f32 %v9973_v24, %v13064_v4  ;;  %v1141_v27 = vmul.f32 %v9973_v24, %v13065_v44  ;;  %v13070_v5 = vld [vmem:[#allocation173_spill] sm:$0xff]  ;;  %v13075_v6 = vld [vmem:[#allocation79_spill] sm:$0xff] }
 0x2b6   :  { %13058 = vst [vmem:[#allocation106_spill] sm:$0xff] %v10405_v13  ;;  %2901 = vbcast.lane.b32.xlu1 %v13061_v17, 257  ;;  %v10430_v11 = vadd.f32 %v1058_v42, %v994_v48  ;;  %v10432_v23 = vadd.f32 %v933_v3, %v897_v51  ;;  %v10434_v12 = vadd.f32 %v1061_v45, %v997_v1  ;;  %v13071_v42 = vld [vmem:[#allocation174_spill] sm:$0xff]  ;;  %v13072_v51 = vld [vmem:[#allocation175_spill] sm:$0xff]  ;;  %v13076_v4 = vld [vmem:[#allocation137_spill] sm:$0xff]  ;;  %vm3470_vm7 = vcmp.gt.f32.partialorder %v10305_v46, 0.0 }
 0x2b7   :  { %2897 = vbcast.lane.b32.xlu0 %v13062_v2, 257  ;;  %v1140_v56 = vmul.f32 %v9973_v24, %v13066_v21  ;;  %v10440_v37 = vpop.permute.xlu0 %2678  ;;  %v10442_v34 = vadd.f32 %v932_v38, %v896_v39  ;;  %v1119_v19 = vmul.f32 %v9973_v24, %v13069_v0  ;;  %v1118_v48 = vmul.f32 %v9973_v24, %v13070_v5  ;;  %v10454_v17 = vld [vmem:[#allocation3 + $0x3] ss:$0 sm:$0xff]  ;;  %v13073_v2 = vld [vmem:[#allocation176_spill] sm:$0xff]  ;;  %v13077_v5 = vld [vmem:[#allocation177_spill] sm:$0xff] }
 0x2b8   :  { %13068 = vst [vmem:[#allocation164_spill] sm:$0xff] %v10440_v37  ;;  %v1121_v3 = vmul.f32 %v9973_v24, %v13071_v42  ;;  %v10450_v45 = vadd.f32 %v1060_v58, %v996_v55  ;;  %v1120_v25 = vmul.f32 %v9973_v24, %v13072_v51  ;;  %v1918_v39 = vmul.f32 %v10454_v17, %v13073_v2  ;;  %v13074_v38 = vld [vmem:[#allocation142_spill] sm:$0xff]  ;;  %v13114_v13 = vld [vmem:[#allocation192_spill] sm:$0xff] }
 0x2b9   :  { %v10438_v31 = vpop.permute.xlu1 %2685  ;;  %v10461_v44 = vadd.f32 %v1139_v50, %v13076_v4  ;;  %v10464_v21 = vadd.f32 %v1138_v53, %v10006_v32  ;;  %v10467_v55 = vadd.f32 %v1141_v27, %v10015_v26  ;;  %v10470_v0 = vadd.f32 %v1140_v56, %v10029_v60  ;;  %v13078_v51 = vld [vmem:[#allocation178_spill] sm:$0xff]  ;;  %v13082_v4 = vld [vmem:[#allocation179_spill] sm:$0xff] }
 0x2ba   :  { %13067 = vst [vmem:[#allocation116_spill] sm:$0xff] %v10438_v31  ;;  %2909 = vbcast.lane.b32.xlu1 %v13074_v38, 257  ;;  %v1917_v42 = vmul.f32 %v10454_v17, %v13077_v5  ;;  %v1920_v2 = vmul.f32 %v10454_v17, %v13078_v51  ;;  %v10482_v32 = vadd.f32 %v1119_v19, %v10318_v29  ;;  %v10500_v29 = vld [vmem:[#allocation3 + $0x4] ss:$0 sm:$0xff]  ;;  %vm3471_vm8 = vcmp.gt.f32.partialorder %v10348_v14, 0.0 }
 0x2bb   :  { %v7688_v1 = vpop.eup %7687  ;;  %2905 = vbcast.lane.b32.xlu0 %v13075_v6, 257  ;;  %v10479_v38 = vpop.permute.xlu0 %2692  ;;  %v10485_v26 = vadd.f32 %v1118_v48, %v10329_v61  ;;  %v10488_v60 = vadd.f32 %v1121_v3, %v10335_v43  ;;  %v10492_v56 = vadd.f32 %v1120_v25, %v10345_v28  ;;  %v1919_v5 = vmul.f32 %v10454_v17, %v13082_v4  ;;  %v13083_v61 = vld [vmem:[#allocation180_spill] sm:$0xff]  ;;  %v13084_v28 = vld [vmem:[#allocation181_spill] sm:$0xff]  ;;  %v13097_v37 = vld [vmem:[#allocation190_spill] sm:$0xff] }
 0x2bc   :  { %v6847_v58 = vadd.f32 -1.0, %v7688_v1  ;;  %13080 = vst [vmem:[#allocation166_spill] sm:$0xff] %v10479_v38  ;;  %v13081_v1 = vld [vmem:[#allocation68_spill] sm:$0xff]  ;;  %v2118_v43 = vmul.f32 %v10454_v17, %v13083_v61  ;;  %v1985_v19 = vmul.f32 %v10500_v29, %v13084_v28  ;;  %v1125_v31 = vmul.f32 %v9973_v24, %v13097_v37 }
 0x2bd   :  { %v10477_v50 = vpop.permute.xlu1 %2699  ;;  %v1950_v6 = vadd.f32 %v1918_v39, %v13081_v1  ;;  %v13085_v3 = vld [vmem:[#allocation12_spill] sm:$0xff]  ;;  %v13086_v39 = vld [vmem:[#allocation70_spill] sm:$0xff]  ;;  %v1991_v35 = vmul.f32 %v10500_v29, %v13115_v9  ;;  %v1902_v41 = vmul.f32 %v10454_v17, %v13116_v36 }
 0x2be   :  { %13079 = vst [vmem:[#allocation165_spill] sm:$0xff] %v10477_v50  ;;  %v3534_v53 = vsel %vm3470_vm7, %v10305_v46, %v6847_v58  ;;  %2917 = vbcast.lane.b32.xlu1 %v10041_v16, 257  ;;  %v1986_v46 = vmul.f32 %v10500_v29, %v13083_v61  ;;  %v1949_v25 = vadd.f32 %v1917_v42, %v13085_v3  ;;  %v13091_v61 = vld [vmem:[#allocation74_spill] sm:$0xff] }
 0x2bf   :  { %v7690_v27 = vpop.eup %7689  ;;  %3595 = vst.msk [vmem:[#allocation2 + $0x21] sm:$0xff] %vm3549_vm0, %v3534_v53  ;;  %2913 = vbcast.lane.b32.xlu0 %v10045_v15, 257  ;;  %v1952_v58 = vadd.f32 %v1920_v2, %v13086_v39  ;;  %v2117_v16 = vmul.f32 %v10454_v17, %v13084_v28  ;;  %v10515_v51 = vpop.permute.xlu0 %1802  ;;  %v13089_v53 = vld [vmem:[#allocation182_spill] sm:$0xff]  ;;  %v1951_v3 = vadd.f32 %v1919_v5, %v13091_v61  ;;  %v13092_v28 = vld [vmem:[#allocation88_spill] sm:$0xff]  ;;  %v13096_v61 = vld [vmem:[#allocation189_spill] sm:$0xff] }
 0x2c0   :  { %v6848_v48 = vadd.f32 -1.0, %v7690_v27  ;;  %13088 = vst [vmem:[#allocation168_spill] sm:$0xff] %v10515_v51  ;;  %v1988_v1 = vmul.f32 %v10500_v29, %v13089_v53  ;;  %v2120_v4 = vmul.f32 %v10454_v17, %v13089_v53  ;;  %v13090_v27 = vld [vmem:[#allocation183_spill] sm:$0xff]  ;;  %v13094_v53 = vld [vmem:[#allocation20_spill] sm:$0xff]  ;;  %v10535_v50 = vadd.f32 %v1986_v46, %v1950_v6 }
 0x2c1   :  { %v10513_v15 = vpop.permute.xlu1 %1806  ;;  %v1987_v42 = vmul.f32 %v10500_v29, %v13090_v27  ;;  %v7738_v39 = vld [vmem:[%s12349_s0 + $0x8] sm:$0xff]  ;;  %v10540_v5 = vadd.f32 %v1985_v19, %v1949_v25 }
 0x2c2   :  { %13087 = vst [vmem:[#allocation167_spill] sm:$0xff] %v10513_v15  ;;  %v3535_v2 = vsel %vm3471_vm8, %v10348_v14, %v6848_v48  ;;  %2925 = vbcast.lane.b32.xlu1 %v10081_v22, 257  ;;  %v13093_v51 = vld [vmem:[#allocation19_spill] sm:$0xff]  ;;  %v170_v38 = vrot.slane %v7738_v39, %v13094_v53  ;;  %v10538_v14 = vadd.f32 %v2118_v43, %v10351_v8  ;;  %v13095_v48 = vld [vmem:[#allocation188_spill] sm:$0xff] }
 0x2c3   :  { %3596 = vst.msk [vmem:[#allocation2 + $0x31] sm:$0xff] %vm3549_vm0, %v3535_v2  ;;  %2921 = vbcast.lane.b32.xlu0 %v13092_v28, 257  ;;  %v10532_v15 = vrot.slane %v7738_v39, %v13093_v51  ;;  %v2119_v22 = vmul.f32 %v10454_v17, %v13090_v27  ;;  %v1123_v2 = vmul.f32 %v9973_v24, %v13095_v48  ;;  %v13098_v39 = vld [vmem:[#allocation191_spill] sm:$0xff]  ;;  %v10554_v8 = vpop.permute.xlu0 %1810  ;;  %v10566_v48 = vld [vmem:[#allocation2 + $0x12] sm:$0xff] }
 0x2c4   :  { %v1122_v28 = vmul.f32 %v9973_v24, %v13096_v61  ;;  %v1124_v6 = vmul.f32 %v9973_v24, %v13098_v39  ;;  %13100 = vst [vmem:[#allocation170_spill] sm:$0xff] %v10554_v8  ;;  %v10557_v43 = vadd.f32 %v2117_v16, %v10354_v57  ;;  %v10559_v19 = vadd.f32 %v1988_v1, %v1952_v58  ;;  %v7739_v24 = vld [vmem:[%s12350_s1 + $0x8] sm:$0xff]  ;;  %v13103_v1 = vld [vmem:[#allocation193_spill] sm:$0xff] }
 0x2c5   :  { %v10552_v46 = vpop.permute.xlu1 %1814  ;;  %v10562_v25 = vadd.f32 %v2120_v4, %v10357_v40  ;;  %v10564_v27 = vadd.f32 %v1987_v42, %v1951_v3  ;;  %13101 = vst [vmem:[#allocation171_spill] sm:$0xff] %v10566_v48  ;;  %v405_v57 = vrot.slane %v7739_v24, %v13093_v51  ;;  %v398_v58 = vrot.slane %v7739_v24, %v13094_v53  ;;  %v13104_v42 = vld [vmem:[#allocation194_spill] sm:$0xff]  ;;  %v13105_v61 = vld [vmem:[#allocation195_spill] sm:$0xff] }
 0x2c6   :  { %13099 = vst [vmem:[#allocation169_spill] sm:$0xff] %v10552_v46  ;;  %v10568_v37 = vld [vmem:[#allocation2 + $0x22] sm:$0xff]  ;;  %179 = vbcast.lane.b32.xlu1 %v10532_v15, 256  ;;  %v10579_v16 = vadd.f32 %v2119_v22, %v10362_v47  ;;  %v1922_v4 = vmul.f32 %v10454_v17, %v13103_v1  ;;  %v1921_v3 = vmul.f32 %v10454_v17, %v13104_v42  ;;  %v13108_v42 = vld [vmem:[#allocation196_spill] sm:$0xff] }
 0x2c7   :  { %13102 = vst [vmem:[#allocation27_spill] sm:$0xff] %v10568_v37  ;;  %172 = vbcast.lane.b32.xlu0 %v170_v38, 256  ;;  %v1924_v39 = vmul.f32 %v10454_v17, %v13105_v61  ;;  %v10588_v8 = vadd.f32 %v1123_v2, %v10416_v49  ;;  %v10591_v24 = vadd.f32 %v1122_v28, %v10430_v11  ;;  %v10601_v1 = vpop.permute.xlu0 %2478  ;;  %v13109_v61 = vld [vmem:[#allocation197_spill] sm:$0xff]  ;;  %v13110_v2 = vld [vmem:[#allocation198_spill] sm:$0xff] }
 0x2c8   :  { %v10594_v40 = vadd.f32 %v1125_v31, %v10434_v12  ;;  %v10597_v47 = vadd.f32 %v1124_v6, %v10450_v45  ;;  %13107 = vst [vmem:[#allocation31_spill] sm:$0xff] %v10601_v1  ;;  %v1923_v48 = vmul.f32 %v10454_v17, %v13108_v42  ;;  %v1990_v49 = vmul.f32 %v10500_v29, %v13109_v61  ;;  %v3646_v31 = vld [vmem:[#allocation2 + $0x21] sm:$0xff]  ;;  %v13111_v6 = vld [vmem:[#allocation16_spill] sm:$0xff] }
 0x2c9   :  { %v10599_v22 = vpop.permute.xlu1 %2485  ;;  %v2122_v11 = vmul.f32 %v10454_v17, %v13109_v61  ;;  %v1989_v12 = vmul.f32 %v10500_v29, %v13110_v2  ;;  %v2121_v45 = vmul.f32 %v10454_v17, %v13110_v2  ;;  %v1992_v37 = vmul.f32 %v10500_v29, %v13111_v6  ;;  %v13112_v1 = vld [vmem:[#allocation96_spill] sm:$0xff] }
 0x2ca   :  { %13106 = vst [vmem:[#allocation28_spill] sm:$0xff] %v10599_v22  ;;  %v3647_v28 = vld [vmem:[#allocation2 + $0x31] sm:$0xff]  ;;  %407 = vbcast.lane.b32.xlu1 %v405_v57, 256  ;;  %v1954_v46 = vadd.f32 %v1922_v4, %v13112_v1  ;;  %v13113_v22 = vld [vmem:[#allocation85_spill] sm:$0xff]  ;;  %v1956_v61 = vadd.f32 %v1924_v39, %v13114_v13  ;;  %v2124_v52 = vmul.f32 %v10454_v17, %v13111_v6 }
 0x2cb   :  { %400 = vbcast.lane.b32.xlu0 %v398_v58, 256  ;;  %v7100_v42 = vpack.c.bf16 %v3647_v28, %v3646_v31  ;;  %v1953_v7 = vadd.f32 %v1921_v3, %v13113_v22  ;;  %v2123_v2 = vmul.f32 %v10454_v17, %v13115_v9  ;;  %v1901_v31 = vmul.f32 %v10454_v17, %v13117_v59  ;;  %v10631_v13 = vpop.permute.xlu0 %2492  ;;  %v13120_v3 = vld [vmem:[#allocation15_spill] sm:$0xff]  ;;  %v13121_v59 = vld [vmem:[#allocation34_spill] sm:$0xff] }
 0x2cc   :  { %13119 = vst [vmem:[#allocation37_spill] sm:$0xff] %v10631_v13  ;;  %v1955_v39 = vadd.f32 %v1923_v48, %v13120_v3  ;;  %v10634_v22 = vadd.f32 %v1990_v49, %v1954_v46  ;;  %v10637_v1 = vadd.f32 %v2122_v11, %v10461_v44  ;;  %v10642_v36 = vadd.f32 %v2121_v45, %v10464_v21  ;;  %v13122_v46 = vld [vmem:[#allocation30_spill] sm:$0xff]  ;;  %v13123_v49 = vld [vmem:[#allocation36_spill] sm:$0xff]  ;;  %v13127_v3 = vld [vmem:[#allocation135_spill] sm:$0xff] }
 0x2cd   :  { %v10628_v4 = vpop.permute.xlu1 %2499  ;;  %7312 = vmatmul.mubr.msk.bf16.vlgmr.msra.gmra.mxu0 %vm3549_vm0, %v7100_v42  ;;  %v10639_v9 = vadd.f32 %v1989_v12, %v1953_v7  ;;  %v10644_v28 = vadd.f32 %v1992_v37, %v1956_v61  ;;  %v1904_v6 = vmul.f32 %v10454_v17, %v13121_v59  ;;  %v10650_v48 = vadd.f32 %v2124_v52, %v10467_v55  ;;  %v7631_v37 = vld [vmem:[%s12353_s4] sm:$0xff]   ;;  %v13126_v45 = vld [vmem:[#allocation32_spill] sm:$0xff] }
 0x2ce   :  { %13118 = vst [vmem:[#allocation35_spill] sm:$0xff] %v10628_v4  ;;  %583 = vbcast.lane.b32.xlu1 %v10532_v15, 257  ;;  %v1903_v44 = vmul.f32 %v10454_v17, %v13122_v46  ;;  %v1970_v7 = vmul.f32 %v10500_v29, %v13123_v49  ;;  %v2102_v21 = vmul.f32 %v10454_v17, %v13123_v49  ;;  %v13128_v46 = vld [vmem:[#allocation136_spill] sm:$0xff] }
 0x2cf   :  { %579 = vbcast.lane.b32.xlu0 %v170_v38, 257  ;;  %v10661_v11 = vadd.f32 %v1991_v35, %v1955_v39  ;;  %v10664_v38 = vadd.f32 %v2123_v2, %v10470_v0  ;;  %v1934_v52 = vadd.f32 %v1902_v41, %v10215_v20  ;;  %v1933_v55 = vadd.f32 %v1901_v31, %v10325_v10  ;;  %v10670_v12 = vpop.permute.xlu0 %2706  ;;  %v7740_v41 = vld [vmem:[%s12349_s0 + $0x9] sm:$0xff] }
 0x2d0   :  { %13125 = vst [vmem:[#allocation107_spill] sm:$0xff] %v10670_v12  ;;  %v1969_v42 = vmul.f32 %v10500_v29, %v13126_v45  ;;  %v2101_v61 = vmul.f32 %v10454_v17, %v13126_v45  ;;  %v1972_v35 = vmul.f32 %v10500_v29, %v13127_v3  ;;  %v2104_v0 = vmul.f32 %v10454_v17, %v13127_v3 }
 0x2d1   :  { %v10668_v15 = vpop.permute.xlu1 %2713  ;;  %7327 = vmatprep.subr.bf16.mxu1 %v7631_v37  ;;  %v1936_v20 = vadd.f32 %v1904_v6, %v10332_v33  ;;  %v1288_v10 = vrot.slane %v7740_v41, %v13093_v51  ;;  %v1281_v2 = vrot.slane %v7740_v41, %v13094_v53  ;;  %v1935_v31 = vadd.f32 %v1903_v44, %v10342_v62  ;;  %v13130_v62 = vld [vmem:[#allocation42_spill] sm:$0xff] }
 0x2d2   :  { %13124 = vst [vmem:[#allocation38_spill] sm:$0xff] %v10668_v15  ;;  %711 = vbcast.lane.b32.xlu1 %v405_v57, 257  ;;  %v2002_v39 = vadd.f32 %v1970_v7, %v1934_v52  ;;  %v10688_v59 = vadd.f32 %v2102_v21, %v10482_v32  ;;  %v1971_v49 = vmul.f32 %v10500_v29, %v13128_v46  ;;  %v10694_v57 = vld [vmem:[#allocation3 + $0x5] ss:$0 sm:$0xff]  ;;  %v13138_v15 = vld [vmem:[#allocation57_spill] sm:$0xff] }
 0x2d3   :  { %707 = vbcast.lane.b32.xlu0 %v398_v58, 257  ;;  %7328 = vmatpush3.bf16.msra.mxu1 %v7631_v37  ;;  %v2103_v33 = vmul.f32 %v10454_v17, %v13128_v46  ;;  %v13129_v58 = vld [vmem:[#allocation41_spill] sm:$0xff]  ;;  %v2053_v44 = vmul.f32 %v10694_v57, %v13130_v62  ;;  %v2001_v21 = vadd.f32 %v1969_v42, %v1933_v55  ;;  %v7742_v46 = vld [vmem:[%s12350_s1 + $0x9] sm:$0xff] }
 0x2d4   :  { %v2054_v6 = vmul.f32 %v10694_v57, %v13129_v58  ;;  %v2182_v45 = vmul.f32 %v10500_v29, %v13129_v58  ;;  %v10704_v7 = vpop.permute.xlu0 %2720  ;;  %v10707_v37 = vadd.f32 %v2101_v61, %v10485_v26  ;;  %v10709_v52 = vadd.f32 %v1972_v35, %v1936_v20  ;;  %v13133_v42 = vld [vmem:[#allocation49_spill] sm:$0xff]  ;;  %v13134_v35 = vld [vmem:[#allocation147_spill] sm:$0xff] }
 0x2d5   :  { %v10702_v32 = vpop.permute.xlu1 %2727  ;;  %13132 = vst [vmem:[#allocation109_spill] sm:$0xff] %v10704_v7  ;;  %v10712_v3 = vadd.f32 %v2104_v0, %v10488_v60  ;;  %v2181_v41 = vmul.f32 %v10500_v29, %v13130_v62  ;;  %v1516_v58 = vrot.slane %v7742_v46, %v13093_v51  ;;  %v1509_v55 = vrot.slane %v7742_v46, %v13094_v53 }
 0x2d6   :  { %13131 = vst [vmem:[#allocation108_spill] sm:$0xff] %v10702_v32  ;;  %1290 = vbcast.lane.b32.xlu1 %v1288_v10, 256  ;;  %v10721_v26 = vadd.f32 %v1971_v49, %v1935_v31  ;;  %v2056_v61 = vmul.f32 %v10694_v57, %v13133_v42  ;;  %v2184_v60 = vmul.f32 %v10500_v29, %v13133_v42  ;;  %v13137_v32 = vld [vmem:[#allocation56_spill] sm:$0xff] }
 0x2d7   :  { %1283 = vbcast.lane.b32.xlu0 %v1281_v2, 256  ;;  %v2055_v0 = vmul.f32 %v10694_v57, %v13134_v35  ;;  %v10730_v20 = vadd.f32 %v2103_v33, %v10492_v56  ;;  %v10733_v62 = vadd.f32 %v2054_v6, %v10535_v50  ;;  %v10736_v7 = vadd.f32 %v2182_v45, %v10538_v14  ;;  %v13139_v33 = vld [vmem:[#allocation60_spill] sm:$0xff]  ;;  %v13140_v6 = vld [vmem:[#allocation86_spill] sm:$0xff]  ;;  %v13141_v45 = vld [vmem:[#allocation81_spill] sm:$0xff] }
 0x2d8   :  { %v10739_v31 = vadd.f32 %v2053_v44, %v10540_v5  ;;  %v2183_v42 = vmul.f32 %v10500_v29, %v13134_v35  ;;  %v1906_v12 = vmul.f32 %v10454_v17, %v13137_v32  ;;  %v1905_v56 = vmul.f32 %v10454_v17, %v13138_v15 }
 0x2d9   :  { %13135 = vst [vmem:[#allocation14_spill] sm:$0xff] %v10733_v62  ;;  %v2346_v49 = vpop.permute.xlu1 %2345  ;;  %v2339_v46 = vpop.permute.xlu0 %2338  ;;  %v1908_v50 = vmul.f32 %v10454_v17, %v13139_v33  ;;  %v10750_v14 = vadd.f32 %v2181_v41, %v10557_v43  ;;  %v2038_v5 = vmul.f32 %v10694_v57, %v13140_v6  ;;  %v2037_v44 = vmul.f32 %v10694_v57, %v13141_v45  ;;  %v13144_v33 = vld [vmem:[#allocation61_spill] sm:$0xff]  ;;  %v13145_v41 = vld [vmem:[#allocation64_spill] sm:$0xff] }
 0x2da   :  { %13136 = vst [vmem:[#allocation110_spill] sm:$0xff] %v10739_v31  ;;  %1518 = vbcast.lane.b32.xlu1 %v1516_v58, 256  ;;  %v10757_v35 = vadd.f32 %v2056_v61, %v10559_v19  ;;  %v10760_v32 = vadd.f32 %v2184_v60, %v10562_v25  ;;  %v10763_v15 = vadd.f32 %v2055_v0, %v10564_v27  ;;  %v10771_v31 = vld [vmem:[#allocation3 + $0x6] ss:$0 sm:$0xff] }
 0x2db   :  { %1511 = vbcast.lane.b32.xlu0 %v1509_v55, 256  ;;  %v1907_v43 = vmul.f32 %v10454_v17, %v13144_v33  ;;  %v1974_v13 = vmul.f32 %v10500_v29, %v13145_v41  ;;  %v2106_v4 = vmul.f32 %v10454_v17, %v13145_v41  ;;  %v3013_v19 = vmul.f32 %v10771_v31, %v2346_v49 }
 0x2dc   :  { %13142 = vst [vmem:[#allocation139_spill] sm:$0xff] %v10757_v35  ;;  %13143 = vst [vmem:[#allocation47_spill] sm:$0xff] %v10763_v15  ;;  %v3012_v61 = vmul.f32 %v10771_v31, %v2339_v46  ;;  %v10776_v27 = vadd.f32 %v2183_v42, %v10579_v16  ;;  %v1938_v0 = vadd.f32 %v1906_v12, %v10414_v30  ;;  %v13146_v35 = vld [vmem:[#allocation65_spill] sm:$0xff]  ;;  %v13147_v16 = vld [vmem:[#allocation82_spill] sm:$0xff] }
 0x2dd   :  { %v2360_v25 = vpop.permute.xlu1 %2359  ;;  %v2353_v60 = vpop.permute.xlu0 %2352  ;;  %v1937_v33 = vadd.f32 %v1905_v56, %v10422_v54  ;;  %v1940_v15 = vadd.f32 %v1908_v50, %v10432_v23  ;;  %v1973_v41 = vmul.f32 %v10500_v29, %v13146_v35  ;;  %v2070_v62 = vadd.f32 %v2038_v5, %v2002_v39  ;;  %v13148_v30 = vld [vmem:[#allocation87_spill] sm:$0xff]  ;;  %v10804_v5 = vld [vmem:[#allocation3 + $0x7] ss:$0 sm:$0xff] }
 0x2de   :  { %v2069_v63 = vadd.f32 %v2037_v44, %v2001_v21  ;;  %1694 = vbcast.lane.b32.xlu1 %v1288_v10, 257  ;;  %v1939_v49 = vadd.f32 %v1907_v43, %v10442_v34  ;;  %v2105_v46 = vmul.f32 %v10454_v17, %v13146_v35  ;;  %v2040_v42 = vmul.f32 %v10694_v57, %v13147_v16  ;;  %v7632_v23 = vld [vmem:[%s12353_s4 + $0x10] sm:$0xff]  }
 0x2df   :  { %1690 = vbcast.lane.b32.xlu0 %v1281_v2, 257  ;;  %v2039_v54 = vmul.f32 %v10694_v57, %v13148_v30  ;;  %v10793_v12 = vadd.f32 %v1974_v13, %v1938_v0  ;;  %v10796_v10 = vadd.f32 %v2106_v4, %v10588_v8  ;;  %v3045_v2 = vadd.f32 %v3013_v19, %v2070_v62 }
 0x2e0   :  { %v3044_v34 = vadd.f32 %v3012_v61, %v2069_v63  ;;  %v3015_v56 = vmul.f32 %v10771_v31, %v2360_v25  ;;  %v3014_v50 = vmul.f32 %v10771_v31, %v2353_v60  ;;  %7345 = vmatprep.subr.bf16.mxu0 %v7632_v23  ;;  %v10810_v8 = vadd.f32 %v1973_v41, %v1937_v33  ;;  %v7745_v63 = vld [vmem:[%s12349_s0 + $0xa] sm:$0xff]  ;;  %v13151_v25 = vld [vmem:[#allocation72_spill] sm:$0xff]  ;;  %v13152_v60 = vld [vmem:[#allocation73_spill] sm:$0xff] }
 0x2e1   :  { %v10798_v39 = vpop.permute.xlu1 %2573  ;;  %v10800_v21 = vpop.permute.xlu0 %2566  ;;  %v2399_v4 = vrot.slane %v7745_v63, %v13093_v51  ;;  %v2392_v62 = vrot.slane %v7745_v63, %v13094_v53  ;;  %v2072_v35 = vadd.f32 %v2040_v42, %v10709_v52  ;;  %v2071_v43 = vadd.f32 %v2039_v54, %v10721_v26  ;;  %7346 = vmatpush3.bf16.msra.mxu0 %v7632_v23 }
 0x2e2   :  { %v3081_v44 = vmul.f32 %v10804_v5, %v10798_v39  ;;  %v3080_v13 = vmul.f32 %v10804_v5, %v10800_v21  ;;  %1822 = vbcast.lane.b32.xlu1 %v1516_v58, 257  ;;  %v1976_v58 = vmul.f32 %v10500_v29, %v13151_v25  ;;  %v1975_v0 = vmul.f32 %v10500_v29, %v13152_v60 }
 0x2e3   :  { %1818 = vbcast.lane.b32.xlu0 %v1509_v55, 257  ;;  %v2108_v55 = vmul.f32 %v10454_v17, %v13151_v25  ;;  %v2107_v33 = vmul.f32 %v10454_v17, %v13152_v60  ;;  %v3047_v41 = vadd.f32 %v3015_v56, %v2072_v35  ;;  %v3046_v42 = vadd.f32 %v3014_v50, %v2071_v43  ;;  %v7746_v17 = vld [vmem:[%s12350_s1 + $0xa] sm:$0xff] }
 0x2e4   :  { %v10819_v19 = vadd.f32 %v3081_v44, %v3045_v2  ;;  %v10821_v61 = vadd.f32 %v3080_v13, %v3044_v34  ;;  %v13154_v2 = vld [vmem:[#allocation76_spill] sm:$0xff]  ;;  %v2627_v44 = vrot.slane %v7746_v17, %v13093_v51  ;;  %v2620_v56 = vrot.slane %v7746_v17, %v13094_v53  ;;  %v13155_v13 = vld [vmem:[#allocation77_spill] sm:$0xff] }
 0x2e5   :  { %v10831_v52 = vpop.permute.xlu1 %2587  ;;  %v10833_v26 = vpop.permute.xlu0 %2580  ;;  %v2058_v34 = vmul.f32 %v10694_v57, %v13154_v2  ;;  %v2186_v50 = vmul.f32 %v10500_v29, %v13154_v2  ;;  %v2057_v63 = vmul.f32 %v10694_v57, %v13155_v13  ;;  %v10855_v25 = vadd.f32 %v2105_v46, %v10591_v24  ;;  %v13159_v24 = vld [vmem:[#allocation95_spill] sm:$0xff] }
 0x2e6   :  { %13149 = vst [vmem:[#allocation111_spill] sm:$0xff] %v10819_v19  ;;  %13150 = vst [vmem:[#allocation44_spill] sm:$0xff] %v10821_v61  ;;  %v3083_v54 = vmul.f32 %v10804_v5, %v10831_v52  ;;  %v3082_v23 = vmul.f32 %v10804_v5, %v10833_v26  ;;  %2401 = vbcast.lane.b32.xlu1 %v2399_v4, 256  ;;  %v10857_v60 = vadd.f32 %v1976_v58, %v1940_v15  ;;  %v13158_v19 = vld [vmem:[#allocation78_spill] sm:$0xff] }
 0x2e7   :  { %13153 = vst [vmem:[#allocation45_spill] sm:$0xff] %v10833_v26  ;;  %2394 = vbcast.lane.b32.xlu0 %v2392_v62, 256  ;;  %v2185_v61 = vmul.f32 %v10500_v29, %v13155_v13  ;;  %v2060_v17 = vmul.f32 %v10694_v57, %v13158_v19  ;;  %v2059_v15 = vmul.f32 %v10694_v57, %v13159_v24  ;;  %v13161_v13 = vld [vmem:[#allocation84_spill] sm:$0xff] }
 0x2e8   :  { %v10850_v35 = vadd.f32 %v3083_v54, %v3047_v41  ;;  %v10852_v43 = vadd.f32 %v3082_v23, %v3046_v42  ;;  %v10868_v41 = vadd.f32 %v2108_v55, %v10594_v40  ;;  %v2188_v42 = vmul.f32 %v10500_v29, %v13158_v19 }
 0x2e9   :  { %v10863_v26 = vpop.permute.xlu1 %2837  ;;  %v10865_v2 = vpop.permute.xlu0 %2833  ;;  %v2187_v46 = vmul.f32 %v10500_v29, %v13159_v24  ;;  %v10876_v58 = vadd.f32 %v1975_v0, %v1939_v49  ;;  %v10879_v54 = vadd.f32 %v2107_v33, %v10597_v47  ;;  %v10882_v23 = vadd.f32 %v2058_v34, %v10634_v22 }
 0x2ea   :  { %13156 = vst [vmem:[#allocation112_spill] sm:$0xff] %v10850_v35  ;;  %13157 = vst [vmem:[#allocation133_spill] sm:$0xff] %v10852_v43  ;;  %2629 = vbcast.lane.b32.xlu1 %v2627_v44, 256  ;;  %v10885_v40 = vadd.f32 %v2186_v50, %v10637_v1  ;;  %v10888_v19 = vadd.f32 %v2057_v63, %v10639_v9  ;;  %v2166_v55 = vmul.f32 %v10500_v29, %v13140_v6  ;;  %v13167_v43 = vld [vmem:[#allocation93_spill] sm:$0xff] }
 0x2eb   :  { %2622 = vbcast.lane.b32.xlu0 %v2620_v56, 256  ;;  %v2165_v49 = vmul.f32 %v10500_v29, %v13141_v45  ;;  %v10895_v47 = vadd.f32 %v2185_v61, %v10642_v36  ;;  %v10898_v22 = vadd.f32 %v2060_v17, %v10644_v28  ;;  %v2168_v0 = vmul.f32 %v10500_v29, %v13147_v16  ;;  %v7747_v28 = vld [vmem:[%s12349_s0 + $0x20] sm:$0xff] }
 0x2ec   :  { %v2167_v1 = vmul.f32 %v10500_v29, %v13148_v30  ;;  %v10909_v6 = vadd.f32 %v2188_v42, %v10650_v48  ;;  %v10912_v45 = vadd.f32 %v2059_v15, %v10661_v11  ;;  %v10915_v36 = vadd.f32 %v2187_v46, %v10664_v38  ;;  %v13160_v30 = vld [vmem:[#allocation83_spill] sm:$0xff]  ;;  %v7748_v11 = vld [vmem:[%s12350_s1 + $0x20] sm:$0xff] }
 0x2ed   :  { %v10904_v9 = vpop.permute.xlu1 %2845  ;;  %v10906_v33 = vpop.permute.xlu0 %2841  ;;  %v10921_v16 = vrot.slane %v7747_v28, %v13093_v51  ;;  %v2246_v61 = vmul.f32 %v10694_v57, %v13160_v30  ;;  %v10926_v48 = vrot.slane %v7747_v28, %v13094_v53  ;;  %v10932_v38 = vrot.slane %v7748_v11, %v13093_v51  ;;  %v13162_v42 = vld [vmem:[#allocation89_spill] sm:$0xff]  ;;  %v13165_v30 = vld [vmem:[#allocation91_spill] sm:$0xff] }
 0x2ee   :  { %2805 = vbcast.lane.b32.xlu1 %v2399_v4, 257  ;;  %v10935_v34 = vadd.f32 %v2166_v55, %v10688_v59  ;;  %v10938_v50 = vadd.f32 %v2165_v49, %v10707_v37  ;;  %v2245_v4 = vmul.f32 %v10694_v57, %v13161_v13  ;;  %v10946_v63 = vadd.f32 %v2168_v0, %v10712_v3  ;;  %v7749_v37 = vld [vmem:[%s12349_s0 + $0x21] sm:$0xff]  ;;  %v10966_v3 = vld [vmem:[%s12353_s4 + $0x18] sm:$0xff]  }
 0x2ef   :  { %2801 = vbcast.lane.b32.xlu0 %v2392_v62, 257  ;;  %v10943_v62 = vrot.slane %v7748_v11, %v13094_v53  ;;  %v10949_v17 = vadd.f32 %v2167_v1, %v10730_v20  ;;  %v2248_v24 = vmul.f32 %v10694_v57, %v13162_v42  ;;  %v10961_v46 = vrot.slane %v7749_v37, %v13093_v51  ;;  %v13164_v20 = vld [vmem:[#allocation90_spill] sm:$0xff] }
 0x2f0   :  { %13163 = vst [vmem:[#allocation134_spill] sm:$0xff] %v10966_v3  ;;  %v2247_v55 = vmul.f32 %v10694_v57, %v13164_v20  ;;  %v2042_v49 = vmul.f32 %v10694_v57, %v10148_v18  ;;  %v2170_v0 = vmul.f32 %v10500_v29, %v10148_v18  ;;  %v10975_v1 = vrot.slane %v7749_v37, %v13094_v53  ;;  %v13166_v20 = vld [vmem:[#allocation92_spill] sm:$0xff] }
 0x2f1   :  { %v10953_v59 = vpop.permute.xlu1 %2373  ;;  %v10955_v15 = vpop.permute.xlu0 %2366  ;;  %v10978_v28 = vadd.f32 %v2246_v61, %v10736_v7  ;;  %v2041_v11 = vmul.f32 %v10694_v57, %v13165_v30  ;;  %v2169_v13 = vmul.f32 %v10500_v29, %v13165_v30  ;;  %v10985_v42 = vadd.f32 %v2245_v4, %v10750_v14  ;;  %7363 = vmatprep.subr.bf16.mxu1 %v10966_v3  ;;  %v7750_v4 = vld [vmem:[%s12350_s1 + $0x21] sm:$0xff] }
 0x2f2   :  { %2933 = vbcast.lane.b32.xlu1 %v2627_v44, 257  ;;  %v2044_v18 = vmul.f32 %v10694_v57, %v13166_v20  ;;  %v2172_v37 = vmul.f32 %v10500_v29, %v13166_v20  ;;  %v2171_v7 = vmul.f32 %v10500_v29, %v13167_v43  ;;  %v10995_v61 = vadd.f32 %v2248_v24, %v10760_v32 }
 0x2f3   :  { %2929 = vbcast.lane.b32.xlu0 %v2620_v56, 257  ;;  %v2043_v44 = vmul.f32 %v10694_v57, %v13167_v43  ;;  %v11007_v30 = vrot.slane %v7750_v4, %v13093_v51  ;;  %v11010_v29 = vrot.slane %v7750_v4, %v13094_v53  ;;  %v11013_v32 = vadd.f32 %v2247_v55, %v10776_v27  ;;  %v13169_v43 = vld [vmem:[#allocation94_spill] sm:$0xff]  ;;  %v13173_v55 = vld [vmem:[#allocation97_spill] sm:$0xff] }
 0x2f4   :  { %v11016_v24 = vadd.f32 %v2170_v0, %v10796_v10  ;;  %v2250_v20 = vmul.f32 %v10694_v57, %v13169_v43  ;;  %v11021_v3 = vadd.f32 %v2042_v49, %v10793_v12  ;;  %v11024_v35 = vadd.f32 %v2169_v13, %v10855_v25  ;;  %v7751_v27 = vld [vmem:[%s12349_s0 + $0x22] sm:$0xff] }
 0x2f5   :  { %v10999_v56 = vpop.permute.xlu1 %2387  ;;  %v11001_v14 = vpop.permute.xlu0 %2380  ;;  %v11035_v10 = vrot.slane %v7751_v27, %v13093_v51  ;;  %v11038_v12 = vadd.f32 %v2172_v37, %v10868_v41  ;;  %v11041_v25 = vadd.f32 %v2171_v7, %v10879_v54  ;;  %v11046_v49 = vadd.f32 %v2044_v18, %v10857_v60  ;;  %v13175_v0 = vld [vmem:[#allocation98_spill] sm:$0xff]  ;;  %v13180_v37 = vld [vmem:[#allocation99_spill] sm:$0xff] }
 0x2f6   :  { %13168 = vst [vmem:[#allocation184_spill] sm:$0xff] %v11001_v14  ;;  %13170 = vst [vmem:[#allocation185_spill] sm:$0xff] %v11021_v3  ;;  %v11027_v14 = vadd.f32 %v2041_v11, %v10810_v8  ;;  %291 = vbcast.lane.b32.xlu1 %v10921_v16, 256  ;;  %v2249_v8 = vmul.f32 %v10694_v57, %v13173_v55  ;;  %v2252_v11 = vmul.f32 %v10694_v57, %v13175_v0  ;;  %v7752_v54 = vld [vmem:[%s12350_s1 + $0x22] sm:$0xff]  ;;  %v13181_v7 = vld [vmem:[#allocation103_spill] sm:$0xff] }
 0x2f7   :  { %284 = vbcast.lane.b32.xlu0 %v10926_v48, 256  ;;  %13172 = vst [vmem:[#allocation48_spill] sm:$0xff] %v11035_v10  ;;  %13174 = vst [vmem:[#allocation186_spill] sm:$0xff] %v11046_v49  ;;  %v11051_v13 = vadd.f32 %v2043_v44, %v10876_v58  ;;  %v11058_v41 = vrot.slane %v7751_v27, %v13094_v53  ;;  %v11064_v60 = vrot.slane %v7752_v54, %v13093_v51  ;;  %v13183_v27 = vld [vmem:[#allocation104_spill] sm:$0xff]  ;;  %v13185_v51 = vld [vmem:[#allocation113_spill] sm:$0xff] }
 0x2f8   :  { %13171 = vst [vmem:[#allocation46_spill] sm:$0xff] %v11027_v14  ;;  %v11067_v18 = vadd.f32 %v2250_v20, %v10885_v40  ;;  %v2251_v58 = vmul.f32 %v10694_v57, %v13180_v37  ;;  %v2230_v44 = vmul.f32 %v10694_v57, %v13181_v7  ;;  %v11074_v55 = vrot.slane %v7752_v54, %v13094_v53  ;;  %v13186_v20 = vld [vmem:[#allocation105_spill] sm:$0xff]  ;;  %v13187_v54 = vld [vmem:[#allocation114_spill] sm:$0xff]  ;;  %v13190_v10 = vld [vmem:[#allocation116_spill] sm:$0xff] }
 0x2f9   :  { %13176 = vst [vmem:[#allocation187_spill] sm:$0xff] %v11051_v13  ;;  %v11053_v4 = vpop.permute.xlu1 %2601  ;;  %v11055_v43 = vpop.permute.xlu0 %2594  ;;  %13178 = vst [vmem:[#allocation51_spill] sm:$0xff] %v11058_v41  ;;  %v2229_v0 = vmul.f32 %v10694_v57, %v13183_v27  ;;  %v13184_v13 = vld [vmem:[#allocation100_spill] sm:$0xff]  ;;  %v11085_v40 = vadd.f32 %v2249_v8, %v10895_v47  ;;  %v2231_v53 = vmul.f32 %v10694_v57, %v13186_v20  ;;  %v13188_v7 = vld [vmem:[#allocation106_spill] sm:$0xff] }
 0x2fa   :  { %13177 = vst [vmem:[#allocation50_spill] sm:$0xff] %v11055_v43  ;;  %13179 = vst [vmem:[#allocation52_spill] sm:$0xff] %v11064_v60  ;;  %v2232_v41 = vmul.f32 %v10694_v57, %v13184_v13  ;;  %v3029_v60 = vmul.f32 %v10771_v31, %v13185_v51  ;;  %519 = vbcast.lane.b32.xlu1 %v10932_v38, 256  ;;  %v3028_v37 = vmul.f32 %v10771_v31, %v13187_v54  ;;  %v13189_v51 = vld [vmem:[#allocation115_spill] sm:$0xff] }
 0x2fb   :  { %13182 = vst [vmem:[#allocation53_spill] sm:$0xff] %v11074_v55  ;;  %512 = vbcast.lane.b32.xlu0 %v10943_v62, 256  ;;  %v3031_v27 = vmul.f32 %v10771_v31, %v13188_v7  ;;  %v11094_v13 = vadd.f32 %v2252_v11, %v10909_v6  ;;  %v3030_v55 = vmul.f32 %v10771_v31, %v13189_v51  ;;  %v13193_v6 = vld [vmem:[#allocation164_spill] sm:$0xff] }
 0x2fc   :  { %v3097_v49 = vmul.f32 %v10804_v5, %v13190_v10  ;;  %v3229_v47 = vmul.f32 %v10771_v31, %v13190_v10  ;;  %v11107_v54 = vadd.f32 %v2251_v58, %v10915_v36  ;;  %v11110_v7 = vadd.f32 %v2230_v44, %v10935_v34  ;;  %v13195_v34 = vld [vmem:[#allocation110_spill] sm:$0xff]  ;;  %v13196_v44 = vld [vmem:[#allocation139_spill] sm:$0xff] }
 0x2fd   :  { %v11102_v8 = vpop.permute.xlu1 %2615  ;;  %v11104_v20 = vpop.permute.xlu0 %2608  ;;  %v3096_v11 = vmul.f32 %v10804_v5, %v13193_v6  ;;  %v3228_v51 = vmul.f32 %v10771_v31, %v13193_v6  ;;  %v11117_v14 = vadd.f32 %v2229_v0, %v10938_v50  ;;  %v11120_v10 = vadd.f32 %v2232_v41, %v10946_v63  ;;  %v13197_v6 = vld [vmem:[#allocation165_spill] sm:$0xff]  ;;  %v13198_v0 = vld [vmem:[#allocation47_spill] sm:$0xff] }
 0x2fe   :  { %13191 = vst [vmem:[#allocation117_spill] sm:$0xff] %v11102_v8  ;;  %13192 = vst [vmem:[#allocation118_spill] sm:$0xff] %v11104_v20  ;;  %v13194_v8 = vld [vmem:[#allocation14_spill] sm:$0xff]  ;;  %647 = vbcast.lane.b32.xlu1 %v10921_v16, 257  ;;  %v11126_v36 = vadd.f32 %v2231_v53, %v10949_v17  ;;  %v3060_v58 = vadd.f32 %v3028_v37, %v13195_v34  ;;  %v3063_v3 = vadd.f32 %v3031_v27, %v13196_v44  ;;  %v13201_v27 = vld [vmem:[#allocation167_spill] sm:$0xff] }
 0x2ff   :  { %v3061_v20 = vadd.f32 %v3029_v60, %v13194_v8  ;;  %643 = vbcast.lane.b32.xlu0 %v10926_v48, 257  ;;  %v3099_v50 = vmul.f32 %v10804_v5, %v13197_v6  ;;  %v3062_v43 = vadd.f32 %v3030_v55, %v13198_v0  ;;  %v11136_v41 = vadd.f32 %v3229_v47, %v10978_v28  ;;  %v11147_v60 = vld [vmem:[%s12353_s4 + $0x20] sm:$0xff]   ;;  %v13202_v8 = vld [vmem:[#allocation168_spill] sm:$0xff]  ;;  %v13206_v0 = vld [vmem:[#allocation31_spill] sm:$0xff] }
 0x300   :  { %v3231_v16 = vmul.f32 %v10771_v31, %v13197_v6  ;;  %13199 = vst [vmem:[#allocation119_spill] sm:$0xff] %v11147_v60  ;;  %v11149_v53 = vadd.f32 %v3096_v11, %v3060_v58  ;;  %v13200_v55 = vld [vmem:[#allocation166_spill] sm:$0xff]  ;;  %v2234_v47 = vmul.f32 %v10694_v57, %v13201_v27  ;;  %v13203_v34 = vld [vmem:[#allocation28_spill] sm:$0xff]  ;;  %v13204_v11 = vld [vmem:[#allocation169_spill] sm:$0xff]  ;;  %7381 = vmatprep.subr.bf16.mxu0 %v11147_v60 }
 0x301   :  { %v11133_v63 = vadd.f32 %v3097_v49, %v3061_v20  ;;  %v11140_v48 = vpop.permute.xlu1 %2853  ;;  %v11142_v17 = vpop.permute.xlu0 %2849  ;;  %v11152_v49 = vadd.f32 %v3228_v51, %v10985_v42  ;;  %v3098_v28 = vmul.f32 %v10804_v5, %v13200_v55  ;;  %v3230_v37 = vmul.f32 %v10771_v31, %v13200_v55  ;;  %v13205_v58 = vld [vmem:[#allocation170_spill] sm:$0xff] }
 0x302   :  { %v2233_v20 = vmul.f32 %v10694_v57, %v13202_v8  ;;  %v3033_v44 = vmul.f32 %v10771_v31, %v13203_v34  ;;  %775 = vbcast.lane.b32.xlu1 %v10932_v38, 257  ;;  %v11166_v42 = vadd.f32 %v3099_v50, %v3063_v3  ;;  %v2236_v51 = vmul.f32 %v10694_v57, %v13204_v11  ;;  %v13207_v8 = vld [vmem:[#allocation35_spill] sm:$0xff]  ;;  %v13209_v50 = vld [vmem:[#allocation38_spill] sm:$0xff] }
 0x303   :  { %771 = vbcast.lane.b32.xlu0 %v10943_v62, 257  ;;  %v2235_v6 = vmul.f32 %v10694_v57, %v13205_v58  ;;  %v3032_v55 = vmul.f32 %v10771_v31, %v13206_v0  ;;  %v11176_v27 = vadd.f32 %v3231_v16, %v10995_v61  ;;  %v3035_v38 = vmul.f32 %v10771_v31, %v13207_v8  ;;  %v13208_v62 = vld [vmem:[#allocation37_spill] sm:$0xff]  ;;  %v13211_v16 = vld [vmem:[#allocation107_spill] sm:$0xff] }
 0x304   :  { %v3034_v3 = vmul.f32 %v10771_v31, %v13208_v62  ;;  %v3101_v34 = vmul.f32 %v10804_v5, %v13209_v50  ;;  %v11188_v58 = vadd.f32 %v3098_v28, %v3062_v43  ;;  %v11191_v0 = vadd.f32 %v3230_v37, %v11013_v32 }
 0x305   :  { %v11184_v11 = vpop.permute.xlu1 %2861  ;;  %v11186_v57 = vpop.permute.xlu0 %2857  ;;  %v3233_v61 = vmul.f32 %v10771_v31, %v13209_v50  ;;  %v3100_v8 = vmul.f32 %v10804_v5, %v13211_v16  ;;  %v11198_v62 = vadd.f32 %v2234_v47, %v11016_v24  ;;  %v11201_v60 = vadd.f32 %v2233_v20, %v11024_v35  ;;  %v13212_v47 = vld [vmem:[#allocation108_spill] sm:$0xff]  ;;  %v13214_v50 = vld [vmem:[#allocation45_spill] sm:$0xff] }
 0x306   :  { %13210 = vst [vmem:[#allocation121_spill] sm:$0xff] %v11184_v11  ;;  %v3065_v11 = vadd.f32 %v3033_v44, %v10882_v23  ;;  %1402 = vbcast.lane.b32.xlu1 %v10961_v46, 256  ;;  %v11207_v32 = vadd.f32 %v2236_v51, %v11038_v12  ;;  %v11210_v43 = vadd.f32 %v2235_v6, %v11041_v25 }
 0x307   :  { %1395 = vbcast.lane.b32.xlu0 %v10975_v1, 256  ;;  %v3064_v28 = vadd.f32 %v3032_v55, %v10888_v19  ;;  %v3232_v24 = vmul.f32 %v10771_v31, %v13211_v16  ;;  %v3067_v35 = vadd.f32 %v3035_v38, %v10898_v22  ;;  %v3066_v37 = vadd.f32 %v3034_v3, %v10912_v45  ;;  %v13213_v22 = vld [vmem:[#allocation109_spill] sm:$0xff] }
 0x308   :  { %v11217_v23 = vadd.f32 %v3101_v34, %v3065_v11  ;;  %v3103_v20 = vmul.f32 %v10804_v5, %v13212_v47  ;;  %v11226_v25 = vadd.f32 %v3233_v61, %v11067_v18  ;;  %v3235_v51 = vmul.f32 %v10771_v31, %v13212_v47  ;;  %v11249_v11 = vld [vmem:[#allocation3 + $0x8] ss:$0 sm:$0xff] }
 0x309   :  { %v11221_v44 = vpop.permute.xlu1 %2773  ;;  %v11223_v12 = vpop.permute.xlu0 %2769  ;;  %v11228_v19 = vadd.f32 %v3100_v8, %v3064_v28  ;;  %v3102_v45 = vmul.f32 %v10804_v5, %v13213_v22  ;;  %v3234_v6 = vmul.f32 %v10771_v31, %v13213_v22  ;;  %v3213_v55 = vmul.f32 %v10771_v31, %v10798_v39 }
 0x30a   :  { %v3212_v38 = vmul.f32 %v10771_v31, %v10800_v21  ;;  %1630 = vbcast.lane.b32.xlu1 %v11007_v30, 256  ;;  %v11243_v18 = vadd.f32 %v3232_v24, %v11085_v40  ;;  %v3215_v3 = vmul.f32 %v10771_v31, %v10831_v52  ;;  %v3214_v34 = vmul.f32 %v10771_v31, %v13214_v50 }
 0x30b   :  { %1623 = vbcast.lane.b32.xlu0 %v11010_v29, 256  ;;  %v3165_v39 = vmul.f32 %v11249_v11, %v10863_v26  ;;  %v11253_v61 = vadd.f32 %v3103_v20, %v3067_v35  ;;  %v3293_v21 = vmul.f32 %v10804_v5, %v10863_v26  ;;  %v3164_v40 = vmul.f32 %v11249_v11, %v10865_v2 }
 0x30c   :  { %v3292_v16 = vmul.f32 %v10804_v5, %v10865_v2  ;;  %v11266_v28 = vadd.f32 %v3235_v51, %v11094_v13  ;;  %v11268_v24 = vadd.f32 %v3102_v45, %v3066_v37  ;;  %v3167_v35 = vmul.f32 %v11249_v11, %v10904_v9 }
 0x30d   :  { %v11261_v52 = vpop.permute.xlu1 %2781  ;;  %v11263_v8 = vpop.permute.xlu0 %2777  ;;  %v3295_v26 = vmul.f32 %v10804_v5, %v10904_v9  ;;  %v11275_v47 = vadd.f32 %v3234_v6, %v11107_v54  ;;  %v11278_v2 = vadd.f32 %v3213_v55, %v11110_v7  ;;  %v11281_v20 = vadd.f32 %v3212_v38, %v11117_v14 }
 0x30e   :  { %1758 = vbcast.lane.b32.xlu1 %v10961_v46, 257  ;;  %v11286_v13 = vadd.f32 %v3215_v3, %v11120_v10  ;;  %v11289_v37 = vadd.f32 %v3214_v34, %v11126_v36  ;;  %v3197_v9 = vadd.f32 %v3165_v39, %v11133_v63  ;;  %v3166_v54 = vmul.f32 %v11249_v11, %v10906_v33 }
 0x30f   :  { %1754 = vbcast.lane.b32.xlu0 %v10975_v1, 257  ;;  %v3325_v7 = vadd.f32 %v3293_v21, %v11136_v41  ;;  %v3196_v14 = vadd.f32 %v3164_v40, %v11149_v53  ;;  %v3324_v51 = vadd.f32 %v3292_v16, %v11152_v49  ;;  %v3294_v46 = vmul.f32 %v10804_v5, %v10906_v33  ;;  %v13217_v21 = vld [vmem:[#allocation185_spill] sm:$0xff] }
 0x310   :  { %v3199_v22 = vadd.f32 %v3167_v35, %v11166_v42  ;;  %v3327_v36 = vadd.f32 %v3295_v26, %v11176_v27  ;;  %v3017_v41 = vmul.f32 %v10771_v31, %v10953_v59  ;;  %v3016_v53 = vmul.f32 %v10771_v31, %v10955_v15  ;;  %v13215_v42 = vld [vmem:[#allocation184_spill] sm:$0xff]  ;;  %v13219_v35 = vld [vmem:[#allocation186_spill] sm:$0xff] }
 0x311   :  { %v2966_v1 = vpop.permute.xlu1 %2965  ;;  %v2962_v10 = vpop.permute.xlu0 %2961  ;;  %v3019_v49 = vmul.f32 %v10771_v31, %v10999_v56  ;;  %v3198_v33 = vadd.f32 %v3166_v54, %v11188_v58  ;;  %v3018_v27 = vmul.f32 %v10771_v31, %v13215_v42  ;;  %v3326_v38 = vadd.f32 %v3294_v46, %v11191_v0  ;;  %v13216_v56 = vld [vmem:[#allocation50_spill] sm:$0xff]  ;;  %v13220_v54 = vld [vmem:[#allocation48_spill] sm:$0xff] }
 0x312   :  { %v3357_v63 = vmul.f32 %v11249_v11, %v2966_v1  ;;  %v3356_v45 = vmul.f32 %v11249_v11, %v2962_v10  ;;  %1886 = vbcast.lane.b32.xlu1 %v11007_v30, 257  ;;  %v3085_v59 = vmul.f32 %v10804_v5, %v11053_v4  ;;  %v3217_v15 = vmul.f32 %v10771_v31, %v11053_v4  ;;  %v13218_v0 = vld [vmem:[#allocation46_spill] sm:$0xff]  ;;  %v13221_v4 = vld [vmem:[#allocation51_spill] sm:$0xff] }
 0x313   :  { %1882 = vbcast.lane.b32.xlu0 %v11010_v29, 257  ;;  %v3084_v30 = vmul.f32 %v10804_v5, %v13216_v56  ;;  %v3049_v40 = vadd.f32 %v3017_v41, %v13217_v21  ;;  %v3048_v16 = vadd.f32 %v3016_v53, %v13218_v0  ;;  %v3051_v26 = vadd.f32 %v3019_v49, %v13219_v35  ;;  %v13223_v49 = vld [vmem:[#allocation117_spill] sm:$0xff] }
 0x314   :  { %v3389_v6 = vadd.f32 %v3357_v63, %v3325_v7  ;;  %v3388_v55 = vadd.f32 %v3356_v45, %v3324_v51  ;;  %v13222_v7 = vld [vmem:[#allocation187_spill] sm:$0xff]  ;;  %v11332_v10 = vadd.f32 %v3217_v15, %v11198_v62  ;;  %v3216_v45 = vmul.f32 %v10771_v31, %v13216_v56  ;;  %v13225_v56 = vld [vmem:[#allocation52_spill] sm:$0xff] }
 0x315   :  { %v2974_v3 = vpop.permute.xlu1 %2973  ;;  %v2970_v29 = vpop.permute.xlu0 %2969  ;;  %v3050_v51 = vadd.f32 %v3018_v27, %v13222_v7  ;;  %v11334_v63 = vadd.f32 %v3084_v30, %v3048_v16  ;;  %v3087_v42 = vmul.f32 %v10804_v5, %v13223_v49  ;;  %v13226_v30 = vld [vmem:[#allocation53_spill] sm:$0xff] }
 0x316   :  { %v3421_v50 = vmax.f32 %v3197_v9, %v3389_v6  ;;  %v3420_v58 = vmax.f32 %v3196_v14, %v3388_v55  ;;  %v3359_v34 = vmul.f32 %v11249_v11, %v2974_v3  ;;  %v3358_v39 = vmul.f32 %v11249_v11, %v2970_v29  ;;  %2513 = vbcast.lane.b32.xlu1 %v13220_v54, 256 }
 0x317   :  { %2506 = vbcast.lane.b32.xlu0 %v13221_v4, 256  ;;  %v11329_v14 = vadd.f32 %v3085_v59, %v3049_v40  ;;  %v3219_v55 = vmul.f32 %v10771_v31, %v13223_v49  ;;  %v3169_v3 = vmul.f32 %v11249_v11, %v11140_v48  ;;  %v3149_v49 = vmul.f32 %v11249_v11, %v11221_v44 }
 0x318   :  { %v3441_v46 = vmax.f32 %v3420_v58, %v3421_v50  ;;  %v3391_v1 = vadd.f32 %v3359_v34, %v3327_v36  ;;  %v3390_v9 = vadd.f32 %v3358_v39, %v3326_v38  ;;  %v11347_v36 = vld [vmem:[%s12352_s3] ss:$0 sm:$0xff]  ;;  %v13224_v38 = vld [vmem:[#allocation118_spill] sm:$0xff]  ;;  %v11366_v50 = vadd.f32 %v3216_v45, %v11201_v60 }
 0x319   :  { %v11338_v41 = vpop.permute.xlu1 %2789  ;;  %v11340_v53 = vpop.permute.xlu0 %2785  ;;  %v3086_v59 = vmul.f32 %v10804_v5, %v13224_v38  ;;  %v3218_v15 = vmul.f32 %v10771_v31, %v13224_v38  ;;  %v3168_v58 = vmul.f32 %v11249_v11, %v11142_v17  ;;  %v3296_v31 = vmul.f32 %v10804_v5, %v11142_v17  ;;  %v13227_v34 = vld [vmem:[#allocation121_spill] sm:$0xff] }
 0x31a   :  { %v11350_v62 = vadd.f32 %v11347_v36, %v3441_v46  ;;  %v3423_v27 = vmax.f32 %v3199_v22, %v3391_v1  ;;  %v3422_v6 = vmax.f32 %v3198_v33, %v3390_v9  ;;  %2741 = vbcast.lane.b32.xlu1 %v13225_v56, 256  ;;  %v3297_v22 = vmul.f32 %v10804_v5, %v11140_v48 }
 0x31b   :  { %2734 = vbcast.lane.b32.xlu0 %v13226_v30, 256  ;;  %v3171_v39 = vmul.f32 %v11249_v11, %v13227_v34  ;;  %v11378_v48 = vadd.f32 %v3087_v42, %v3051_v26  ;;  %v3299_v0 = vmul.f32 %v10804_v5, %v13227_v34  ;;  %v11386_v16 = vadd.f32 %v3219_v55, %v11207_v32 }
 0x31c   :  { %v3507_v33 = vmul.f32 1.442695, %v11350_v62  ;;  %v3442_v29 = vmax.f32 %v3422_v6, %v3423_v27  ;;  %v11388_v17 = vadd.f32 %v3086_v59, %v3050_v51  ;;  %v11391_v35 = vadd.f32 %v3218_v15, %v11210_v43 }
 0x31d   :  { %v11374_v21 = vpop.permute.xlu1 %2797  ;;  %v11376_v40 = vpop.permute.xlu0 %2793  ;;  %v3201_v26 = vadd.f32 %v3169_v3, %v11217_v23  ;;  %v3329_v7 = vadd.f32 %v3297_v22, %v11226_v25  ;;  %v3170_v46 = vmul.f32 %v11249_v11, %v11186_v57  ;;  %v3200_v32 = vadd.f32 %v3168_v58, %v11228_v19  ;;  %v13229_v22 = vld [vmem:[#allocation44_spill] sm:$0xff] }
 0x31e   :  { %7691 = vpow2.f32 %v3507_v33  ;;  %v11383_v60 = vadd.f32 %v11347_v36, %v3442_v29  ;;  %2869 = vbcast.lane.b32.xlu1 %v13220_v54, 257  ;;  %v3328_v51 = vadd.f32 %v3296_v31, %v11243_v18  ;;  %v3203_v43 = vadd.f32 %v3171_v39, %v11253_v61  ;;  %v13230_v39 = vld [vmem:[#allocation112_spill] sm:$0xff] }
 0x31f   :  { %2865 = vbcast.lane.b32.xlu0 %v13221_v4, 257  ;;  %v3298_v54 = vmul.f32 %v10804_v5, %v11186_v57  ;;  %v3331_v23 = vadd.f32 %v3299_v0, %v11266_v28  ;;  %v3277_v19 = vmul.f32 %v10804_v5, %v11221_v44  ;;  %v3148_v18 = vmul.f32 %v11249_v11, %v11223_v12 }
 0x320   :  { %v3509_v1 = vmul.f32 1.442695, %v11383_v60  ;;  %v3202_v57 = vadd.f32 %v3170_v46, %v11268_v24  ;;  %v3276_v61 = vmul.f32 %v10804_v5, %v11223_v12  ;;  %v3151_v6 = vmul.f32 %v11249_v11, %v11261_v52 }
 0x321   :  { %v2982_v9 = vpop.permute.xlu1 %2981  ;;  %v2978_v4 = vpop.permute.xlu0 %2977  ;;  %v3330_v27 = vadd.f32 %v3298_v54, %v11275_v47  ;;  %v3279_v44 = vmul.f32 %v10804_v5, %v11261_v52  ;;  %v3150_v55 = vmul.f32 %v11249_v11, %v11263_v8  ;;  %v3309_v47 = vadd.f32 %v3277_v19, %v11278_v2 }
 0x322   :  { %7693 = vpow2.f32 %v3509_v1  ;;  %v3361_v25 = vmul.f32 %v11249_v11, %v2982_v9  ;;  %v3360_v45 = vmul.f32 %v11249_v11, %v2978_v4  ;;  %2997 = vbcast.lane.b32.xlu1 %v13225_v56, 257  ;;  %v3180_v33 = vadd.f32 %v3148_v18, %v13229_v22 }
 0x323   :  { %2993 = vbcast.lane.b32.xlu0 %v13226_v30, 257  ;;  %v13228_v30 = vld [vmem:[#allocation111_spill] sm:$0xff]  ;;  %v3278_v52 = vmul.f32 %v10804_v5, %v11263_v8  ;;  %v3308_v29 = vadd.f32 %v3276_v61, %v11281_v20  ;;  %v3183_v0 = vadd.f32 %v3151_v6, %v13230_v39  ;;  %v3153_v1 = vmul.f32 %v11249_v11, %v11338_v41 }
 0x324   :  { %v3393_v28 = vadd.f32 %v3361_v25, %v3329_v7  ;;  %v3392_v42 = vadd.f32 %v3360_v45, %v3328_v51  ;;  %v3181_v3 = vadd.f32 %v3149_v49, %v13228_v30  ;;  %v13231_v7 = vld [vmem:[#allocation133_spill] sm:$0xff]  ;;  %v3280_v49 = vmul.f32 %v10804_v5, %v11340_v53 }
 0x325   :  { %v2990_v38 = vpop.permute.xlu1 %2989  ;;  %v2986_v59 = vpop.permute.xlu0 %2985  ;;  %v3182_v46 = vadd.f32 %v3150_v55, %v13231_v7  ;;  %v3310_v4 = vadd.f32 %v3278_v52, %v11289_v37  ;;  %vm3480_vm9 = vcmp.gt.f32.partialorder %v11350_v62, 0.0  ;;  %v3185_v18 = vadd.f32 %v3153_v1, %v11329_v14 }
 0x326   :  { %v3425_v15 = vmax.f32 %v3201_v26, %v3393_v28  ;;  %v3424_v24 = vmax.f32 %v3200_v32, %v3392_v42  ;;  %v3363_v56 = vmul.f32 %v11249_v11, %v2990_v38  ;;  %v3362_v12 = vmul.f32 %v11249_v11, %v2986_v59 }
 0x327   :  { %v3311_v26 = vadd.f32 %v3279_v44, %v11286_v13  ;;  %v3281_v13 = vmul.f32 %v10804_v5, %v11338_v41  ;;  %v3283_v59 = vmul.f32 %v10804_v5, %v11374_v21  ;;  %vm3481_vm10 = vcmp.gt.f32.partialorder %v11383_v60, 0.0 }
 0x328   :  { %v3443_v58 = vmax.f32 %v3424_v24, %v3425_v15  ;;  %v3395_v31 = vadd.f32 %v3363_v56, %v3331_v23  ;;  %v3394_v34 = vadd.f32 %v3362_v12, %v3330_v27  ;;  %v3152_v23 = vmul.f32 %v11249_v11, %v11340_v53 }
 0x329   :  { %v2902_v2 = vpop.permute.xlu1 %2901  ;;  %v2898_v32 = vpop.permute.xlu0 %2897  ;;  %v3313_v6 = vadd.f32 %v3281_v13, %v11332_v10  ;;  %v3282_v24 = vmul.f32 %v10804_v5, %v11376_v40  ;;  %v3315_v39 = vadd.f32 %v3283_v59, %v11386_v16 }
 0x32a   :  { %v11440_v51 = vadd.f32 %v11347_v36, %v3443_v58  ;;  %v3427_v8 = vmax.f32 %v3203_v43, %v3395_v31  ;;  %v3426_v54 = vmax.f32 %v3202_v57, %v3394_v34  ;;  %v3341_v20 = vmul.f32 %v11249_v11, %v2902_v2 }
 0x32b   :  { %v7692_v9 = vpop.eup %7691  ;;  %v3340_v25 = vmul.f32 %v11249_v11, %v2898_v32  ;;  %v3184_v58 = vadd.f32 %v3152_v23, %v11334_v63  ;;  %v3155_v31 = vmul.f32 %v11249_v11, %v11374_v21 }
 0x32c   :  { %v6857_v45 = vadd.f32 -1.0, %v7692_v9  ;;  %v3511_v43 = vmul.f32 1.442695, %v11440_v51  ;;  %v3444_v19 = vmax.f32 %v3426_v54, %v3427_v8  ;;  %v3373_v37 = vadd.f32 %v3341_v20, %v3309_v47 }
 0x32d   :  { %v3372_v57 = vadd.f32 %v3340_v25, %v3308_v29  ;;  %v2910_v61 = vpop.permute.xlu1 %2909  ;;  %v2906_v41 = vpop.permute.xlu0 %2905  ;;  %v3187_v8 = vadd.f32 %v3155_v31, %v11378_v48  ;;  %vm3482_vm11 = vcmp.gt.f32.partialorder %v11440_v51, 0.0 }
 0x32e   :  { %v3544_v28 = vsel %vm3480_vm9, %v11350_v62, %v6857_v45  ;;  %7695 = vpow2.f32 %v3511_v43  ;;  %v11456_v42 = vadd.f32 %v11347_v36, %v3444_v19  ;;  %v3343_v27 = vmul.f32 %v11249_v11, %v2910_v61 }
 0x32f   :  { %v7694_v53 = vpop.eup %7693  ;;  %3605 = vst.msk [vmem:[#allocation2 + $0xe1] sm:$0xff] %vm3549_vm0, %v3544_v28  ;;  %v3405_v44 = vmax.f32 %v3181_v3, %v3373_v37  ;;  %v3404_v55 = vmax.f32 %v3180_v33, %v3372_v57  ;;  %v3342_v14 = vmul.f32 %v11249_v11, %v2906_v41  ;;  %v3312_v33 = vadd.f32 %v3280_v49, %v11366_v50 }
 0x330   :  { %v6858_v38 = vadd.f32 -1.0, %v7694_v53  ;;  %v3513_v62 = vmul.f32 1.442695, %v11456_v42  ;;  %v3375_v15 = vadd.f32 %v3343_v27, %v3311_v26  ;;  %vm3483_vm12 = vcmp.gt.f32.partialorder %v11456_v42, 0.0 }
 0x331   :  { %v3433_v56 = vmax.f32 %v3404_v55, %v3405_v44  ;;  %v3374_v12 = vadd.f32 %v3342_v14, %v3310_v4  ;;  %v2918_v30 = vpop.permute.xlu1 %2917  ;;  %v2914_v10 = vpop.permute.xlu0 %2913 }
 0x332   :  { %v3545_v3 = vsel %vm3481_vm10, %v11383_v60, %v6858_v38  ;;  %7697 = vpow2.f32 %v3513_v62  ;;  %v3407_v47 = vmax.f32 %v3183_v0, %v3375_v15  ;;  %v3345_v22 = vmul.f32 %v11249_v11, %v2918_v30 }
 0x333   :  { %3606 = vst.msk [vmem:[#allocation2 + $0xf1] sm:$0xff] %vm3549_vm0, %v3545_v3  ;;  %v11473_v52 = vadd.f32 %v11347_v36, %v3433_v56  ;;  %v3406_v29 = vmax.f32 %v3182_v46, %v3374_v12  ;;  %v3344_v5 = vmul.f32 %v11249_v11, %v2914_v10  ;;  %v3154_v60 = vmul.f32 %v11249_v11, %v11376_v40 }
 0x334   :  { %v3377_v34 = vadd.f32 %v3345_v22, %v3313_v6  ;;  %v3314_v46 = vadd.f32 %v3282_v24, %v11391_v35  ;;  %vm5658_vm10 = vcmask 1041409  }
 0x335   :  { %v3491_v0 = vmul.f32 1.442695, %v11473_v52  ;;  %v3434_v50 = vmax.f32 %v3406_v29, %v3407_v47  ;;  %v3376_v26 = vadd.f32 %v3344_v5, %v3312_v33  ;;  %v2926_v7 = vpop.permute.xlu1 %2925  ;;  %v2922_v1 = vpop.permute.xlu0 %2921  ;;  %v3186_v16 = vadd.f32 %v3154_v60, %v11388_v17  ;;  %v3610_v33 = vld [vmem:[#allocation2] sm:$0xff]  ;;  %v11537_v29 = vld [vmem:[#allocation2 + $0x10] sm:$0xff] }
 0x336   :  { %v3409_v2 = vmax.f32 %v3185_v18, %v3377_v34  ;;  %v3347_v63 = vmul.f32 %v11249_v11, %v2926_v7  ;;  %v3346_v32 = vmul.f32 %v11249_v11, %v2922_v1  ;;  %v11493_v45 = vld [vmem:[#allocation2 + $0xe1] sm:$0xff]  ;;  %vm3472_vm13 = vcmp.gt.f32.partialorder %v11473_v52, 0.0  ;;  %v11555_v1 = vld [vmem:[#allocation2 + $0x30] sm:$0xff] }
 0x337   :  { %7699 = vpow2.f32 %v3491_v0  ;;  %v3457_v21 = vadd.f32 %v11347_v36, %v3434_v50  ;;  %v3408_v40 = vmax.f32 %v3184_v58, %v3376_v26  ;;  %v7107_v60 = vpack.c.bf16 %v11537_v29, %v3610_v33 }
 0x338   :  { %v3379_v54 = vadd.f32 %v3347_v63, %v3315_v39  ;;  %v3378_v20 = vadd.f32 %v3346_v32, %v3314_v46  ;;  %v11557_v46 = vld [vmem:[#allocation2 + $0xa0] sm:$0xff] }
 0x339   :  { %v3493_v9 = vmul.f32 1.442695, %v3457_v21  ;;  %v3435_v4 = vmax.f32 %v3408_v40, %v3409_v2  ;;  %v11489_v13 = vpop.permute.xlu1 %179  ;;  %v11491_v35 = vpop.permute.xlu0 %172  ;;  %vm3473_vm14 = vcmp.gt.f32.partialorder %v3457_v21, 0.0  ;;  %v11559_v2 = vld [vmem:[#allocation2 + $0x2] sm:$0xff] }
 0x33a   :  { %v3411_v23 = vmax.f32 %v3187_v8, %v3379_v54  ;;  %v3410_v25 = vmax.f32 %v3186_v16, %v3378_v20  ;;  %v11495_v49 = vld [vmem:[#allocation2 + $0xf1] sm:$0xff]  ;;  %v11567_v40 = vld [vmem:[#allocation2 + $0xc0] sm:$0xff] }
 0x33b   :  { %13232 = vst [vmem:[#allocation122_spill] sm:$0xff] %v11495_v49  ;;  %v7696_v43 = vpop.eup %7695  ;;  %7701 = vpow2.f32 %v3493_v9  ;;  %v3458_v48 = vadd.f32 %v11347_v36, %v3435_v4  ;;  %v7105_v17 = vpack.c.bf16 %v11495_v49, %v11493_v45  ;;  %v11523_v24 = vld [vmem:[#allocation2 + $0xf2] sm:$0xff]  ;;  %v11571_v54 = vld [vmem:[#allocation2 + $0x20] sm:$0xff]  ;;  %v11578_v9 = vld [vmem:[%s12353_s4 + $0x28] sm:$0xff]  }
 0x33c   :  { %v6859_v19 = vadd.f32 -1.0, %v7696_v43  ;;  %v3436_v18 = vmax.f32 %v3410_v25, %v3411_v23  ;;  %v11569_v8 = vld [vmem:[#allocation2 + $0xd0] sm:$0xff]  ;;  %v11581_v4 = vld [vmem:[#allocation3 + $0x1] ss:$0 sm:$0xff] }
 0x33d   :  { %v3495_v37 = vmul.f32 1.442695, %v3458_v48  ;;  %v11501_v57 = vpop.permute.xlu1 %407  ;;  %7323 = vmatprep.mubr.msk.bf16.mxu1 %vm3549_vm0, %v7105_v17  ;;  %v11504_v61 = vpop.permute.xlu0 %400  ;;  %vm3474_vm15 = vcmp.gt.f32.partialorder %v3458_v48, 0.0  ;;  %v11573_v20 = vld [vmem:[#allocation2 + $0x32] sm:$0xff] }
 0x33e   :  { %v3546_v41 = vsel %vm3482_vm11, %v11440_v51, %v6859_v19  ;;  %v3459_v28 = vadd.f32 %v11347_v36, %v3436_v18  ;;  %13236 = vst [vmem:[#allocation123_spill] sm:$0xff] %v11573_v20  ;;  %v867_v23 = vmul.f32 %v11581_v4, %v11501_v57 }
 0x33f   :  { %v7698_v27 = vpop.eup %7697  ;;  %3607 = vst.msk [vmem:[#allocation2 + $0x101] sm:$0xff] %vm3549_vm0, %v3546_v41  ;;  %7703 = vpow2.f32 %v3495_v37  ;;  %v11603_v41 = vld [vmem:[#allocation2 + $0x12] sm:$0xff] }
 0x340   :  { %v6860_v53 = vadd.f32 -1.0, %v7698_v27  ;;  %v3497_v6 = vmul.f32 1.442695, %v3459_v28  ;;  %vm3475_vm1 = vcmp.gt.f32.partialorder %v3459_v28, 0.0  ;;  %v11609_v27 = vpack.c.bf16 %v11569_v8, %v11567_v40 }
 0x341   :  { %v11510_v44 = vpop.permute.xlu1 %583  ;;  %v11512_v55 = vpop.permute.xlu0 %579 }
 0x342   :  { %v3547_v14 = vsel %vm3483_vm12, %v11456_v42, %v6860_v53  ;;  %7705 = vpow2.f32 %v3497_v6  ;;  %v11611_v53 = vld [vmem:[#allocation2 + $0xf0] sm:$0xff]  ;;  %v11613_v6 = vld [vmem:[#allocation3] ss:$0 sm:$0xff]  ;;  %vm5673_vm12 = vcmask 261120  }
 0x343   :  { %3608 = vst.msk [vmem:[#allocation2 + $0x111] sm:$0xff] %vm3549_vm0, %v3547_v14  ;;  %v799_v14 = vmul.f32 %v11613_v6, %v11489_v13  ;;  %v1063_v13 = vmul.f32 %v11581_v4, %v11510_v44 }
 0x344   :  { %v7700_v51 = vpop.eup %7699 }
 0x345   :  { %v6849_v38 = vadd.f32 -1.0, %v7700_v51  ;;  %v11516_v59 = vpop.permute.xlu1 %711  ;;  %v11518_v62 = vpop.permute.xlu0 %707  ;;  %v866_v51 = vmul.f32 %v11581_v4, %v11504_v61 }
 0x346   :  { %v11521_v15 = vld [vmem:[#allocation2 + $0x101] sm:$0xff] }
 0x347   :  { %13233 = vst [vmem:[#allocation54_spill] sm:$0xff] %v11521_v15  ;;  %v11525_v56 = vld [vmem:[#allocation2 + $0x102] sm:$0xff]  ;;  %v3536_v12 = vsel %vm3472_vm13, %v11473_v52, %v6849_v38 }
 0x348   :  { %v7702_v10 = vpop.eup %7701  ;;  %3597 = vst.msk [vmem:[#allocation2 + $0x41] sm:$0xff] %vm3549_vm0, %v3536_v12  ;;  %v11619_v38 = vld [vmem:[#allocation3 + $0x2] ss:$0 sm:$0xff] }
 0x349   :  { %v6850_v3 = vadd.f32 -1.0, %v7702_v10  ;;  %v11533_v47 = vpop.permute.xlu1 %1290  ;;  %v11535_v22 = vpop.permute.xlu0 %1283  ;;  %v935_v12 = vmul.f32 %v11619_v38, %v11510_v44 }
 0x34a   :  { %v11539_v5 = vld [vmem:[#allocation2 + $0x111] sm:$0xff] }
 0x34b   :  { %13234 = vst [vmem:[#allocation55_spill] sm:$0xff] %v11539_v5  ;;  %v3537_v52 = vsel %vm3473_vm14, %v3457_v21, %v6850_v3  ;;  %v11543_v58 = vpack.c.bf16 %v11539_v5, %v11521_v15  ;;  %v11565_v21 = vld [vmem:[#allocation2 + $0xb0] sm:$0xff] }
 0x34c   :  { %v7704_v31 = vpop.eup %7703  ;;  %3598 = vst.msk [vmem:[#allocation2 + $0x51] sm:$0xff] %vm3549_vm0, %v3537_v52  ;;  %v1062_v52 = vmul.f32 %v11581_v4, %v11512_v55 }
 0x34d   :  { %13235 = vst [vmem:[#allocation120_spill] sm:$0xff] %v11543_v58  ;;  %v6851_v34 = vadd.f32 -1.0, %v7704_v31  ;;  %v11547_v39 = vpop.permute.xlu1 %1518  ;;  %7324 = vmatmul.mubr.msk.bf16.gmra.mxu1 %vm3549_vm0, %v11543_v58  ;;  %v11551_v0 = vpop.permute.xlu0 %1511  ;;  %v7759_v31 = vld [vmem:[#allocation2 + $0x22] sm:$0xff] }
 0x34e   :  { %7329 = vmatprep.mubr.msk.bf16.mxu1 %vm3549_vm0, %v7107_v60  ;;  %v11636_v60 = vpack.c.bf16 %v11573_v20, %v7759_v31  ;;  %v999_v31 = vmul.f32 %v11613_v6, %v11501_v57  ;;  %v11692_v57 = vld [vmem:[#allocation3 + $0x4] ss:$0 sm:$0xff] }
 0x34f   :  { %v7706_v50 = vpop.eup %7705  ;;  %v3538_v26 = vsel %vm3474_vm15, %v3458_v48, %v6851_v34  ;;  %v11585_v25 = vld [vmem:[#allocation2 + $0x41] sm:$0xff]  ;;  %v11591_v48 = vpack.c.bf16 %v11555_v1, %v11571_v54  ;;  %v1978_v20 = vmul.f32 %v11692_v57, %v11547_v39  ;;  %v1977_v5 = vmul.f32 %v11692_v57, %v11551_v0 }
 0x350   :  { %3599 = vst.msk [vmem:[#allocation2 + $0x61] sm:$0xff] %vm3549_vm0, %v3538_v26  ;;  %v6852_v7 = vadd.f32 -1.0, %v7706_v50  ;;  %v11599_v18 = vld [vmem:[#allocation2 + $0x40] sm:$0xff]  ;;  %13240 = vst [vmem:[#allocation125_spill] sm:$0xff] %v11636_v60  ;;  %v798_v26 = vmul.f32 %v11613_v6, %v11491_v35  ;;  %v934_v35 = vmul.f32 %v11619_v38, %v11512_v55 }
 0x351   :  { %v11561_v63 = vpop.permute.xlu1 %1694  ;;  %v11563_v32 = vpop.permute.xlu0 %1690  ;;  %13237 = vst [vmem:[#allocation124_spill] sm:$0xff] %v11591_v48  ;;  %v11638_v34 = vld [vmem:[#allocation2 + $0xe0] sm:$0xff] }
 0x352   :  { %v3539_v16 = vsel %vm3475_vm1, %v3459_v28, %v6852_v7  ;;  %v13241_v50 = vld [vmem:[#allocation134_spill] sm:$0xff]  ;;  %v899_v7 = vadd.f32 %v867_v23, %v799_v14  ;;  %v11647_v44 = vpack.c.bf16 %v11611_v53, %v11638_v34  ;;  %v1127_v23 = vmul.f32 %v11619_v38, %v11516_v59 }
 0x353   :  { %3600 = vst.msk [vmem:[#allocation2 + $0x71] sm:$0xff] %vm3549_vm0, %v3539_v16  ;;  %v11587_v43 = vld [vmem:[#allocation2 + $0x51] sm:$0xff]  ;;  %v898_v30 = vadd.f32 %v866_v51, %v798_v26  ;;  %v1126_v28 = vmul.f32 %v11619_v38, %v11518_v62  ;;  %v11668_v55 = vld [vmem:[#allocation3 + $0x3] ss:$0 sm:$0xff]  ;;  %v2173_v49 = vmul.f32 %v11692_v57, %v11563_v32 }
 0x354   :  { %v11593_v17 = vld [vmem:[#allocation2 + $0x50] sm:$0xff]  ;;  %v11597_v19 = vpack.c.bf16 %v11587_v43, %v11585_v25  ;;  %v967_v42 = vadd.f32 %v935_v12, %v899_v7  ;;  %v1910_v59 = vmul.f32 %v11668_v55, %v11533_v47  ;;  %v2110_v51 = vmul.f32 %v11668_v55, %v11547_v39 }
 0x355   :  { %v1823_v10 = vpop.permute.xlu1 %1822  ;;  %7330 = vmatmul.mubr.msk.bf16.vlgmr.msra.gmra.mxu1 %vm3549_vm0, %v11591_v48  ;;  %v1819_v3 = vpop.permute.xlu0 %1818  ;;  %v11627_v33 = vpack.c.bf16 %v11593_v17, %v11599_v18  ;;  %v11660_v14 = vld [vmem:[#allocation2 + $0x52] sm:$0xff]  ;;  %v1909_v7 = vmul.f32 %v11668_v55, %v11535_v22  ;;  %v2174_v22 = vmul.f32 %v11692_v57, %v11561_v63 }
 0x356   :  { %13238 = vst [vmem:[#allocation58_spill] sm:$0xff] %v11597_v19  ;;  %7315 = vmatprep.mubr.msk.bf16.mxu0 %vm3549_vm0, %v11597_v19  ;;  %7364 = vmatpush3.bf16.msra.mxu1 %v13241_v50  ;;  %v998_v50 = vmul.f32 %v11613_v6, %v11504_v61  ;;  %v1095_v61 = vadd.f32 %v1063_v13, %v999_v31 }
 0x357   :  { %13239 = vst [vmem:[#allocation59_spill] sm:$0xff] %v11627_v33  ;;  %7333 = vmatprep.mubr.msk.bf16.mxu1 %vm3549_vm0, %v11627_v33  ;;  %v11649_v16 = vld [vmem:[#allocation2 + $0x62] sm:$0xff]  ;;  %7399 = vmatprep.subr.bf16.mxu1 %v11578_v9  ;;  %v2109_v13 = vmul.f32 %v11668_v55, %v11551_v0  ;;  %v966_v31 = vadd.f32 %v934_v35, %v898_v30 }
 0x358   :  { %v11664_v19 = vld [vmem:[#allocation2 + $0x61] sm:$0xff]  ;;  %v1094_v33 = vadd.f32 %v1062_v52, %v998_v50  ;;  %v1159_v50 = vadd.f32 %v1127_v23, %v1095_v61  ;;  %v1942_v35 = vadd.f32 %v1910_v59, %v967_v42  ;;  %v13245_v59 = vpack.c.bf16 %v11603_v41, %v11559_v2 }
 0x359   :  { %v2402_v37 = vpop.permute.xlu1 %2401  ;;  %v2395_v58 = vpop.permute.xlu0 %2394  ;;  %v11676_v62 = vld [vmem:[#allocation2 + $0x60] sm:$0xff]  ;;  %v1941_v61 = vadd.f32 %v1909_v7, %v966_v31 }
 0x35a   :  { %v11674_v12 = vld [vmem:[#allocation2 + $0x71] sm:$0xff]  ;;  %v1158_v48 = vadd.f32 %v1126_v28, %v1094_v33  ;;  %v2142_v39 = vadd.f32 %v2110_v51, %v1159_v50  ;;  %v11706_v23 = vld [vmem:[#allocation3 + $0x5] ss:$0 sm:$0xff]  ;;  %v13244_v33 = vpack.c.bf16 %v11565_v21, %v11557_v46  ;;  %v11728_v2 = vld [vmem:[#allocation3 + $0x7] ss:$0 sm:$0xff] }
 0x35b   :  { %v11678_v26 = vld [vmem:[#allocation2 + $0x70] sm:$0xff]  ;;  %v11686_v52 = vpack.c.bf16 %v11674_v12, %v11664_v19  ;;  %v2046_v28 = vmul.f32 %v11706_v23, %v11561_v63  ;;  %v2238_v0 = vmul.f32 %v11706_v23, %v1823_v10  ;;  %v2237_v42 = vmul.f32 %v11706_v23, %v1819_v3  ;;  %v11722_v10 = vld [vmem:[#allocation3 + $0x6] ss:$0 sm:$0xff] }
 0x35c   :  { %v11690_v47 = vpack.c.bf16 %v11678_v26, %v11676_v62  ;;  %v2010_v63 = vadd.f32 %v1978_v20, %v1942_v35  ;;  %v2206_v51 = vadd.f32 %v2174_v22, %v2142_v39  ;;  %v3021_v46 = vmul.f32 %v11722_v10, %v2402_v37 }
 0x35d   :  { %13242 = vst [vmem:[#allocation160_spill] sm:$0xff] %v11686_v52  ;;  %v2630_v15 = vpop.permute.xlu1 %2629  ;;  %7316 = vmatmul.mubr.msk.bf16.gmra.mxu0 %vm3549_vm0, %v11686_v52  ;;  %v2623_v30 = vpop.permute.xlu0 %2622  ;;  %v2141_v52 = vadd.f32 %v2109_v13, %v1158_v48  ;;  %v2009_v7 = vadd.f32 %v1977_v5, %v1941_v61  ;;  %v3020_v13 = vmul.f32 %v11722_v10, %v2395_v58  ;;  %v11734_v5 = vld [vmem:[#allocation2 + $0x42] sm:$0xff] }
 0x35e   :  { %13243 = vst [vmem:[#allocation126_spill] sm:$0xff] %v11690_v47  ;;  %7334 = vmatmul.mubr.msk.bf16.gmra.mxu1 %vm3549_vm0, %v11690_v47  ;;  %v2045_v47 = vmul.f32 %v11706_v23, %v11563_v32  ;;  %7347 = vmatprep.mubr.msk.bf16.mxu0 %vm3549_vm0, %v13245_v59  ;;  %v3221_v50 = vmul.f32 %v11722_v10, %v2630_v15 }
 0x35f   :  { %7337 = vmatprep.mubr.msk.bf16.mxu1 %vm3549_vm0, %v13244_v33  ;;  %v2205_v48 = vadd.f32 %v2173_v49, %v2141_v52  ;;  %v3220_v32 = vmul.f32 %v11722_v10, %v2623_v30  ;;  %v2078_v31 = vadd.f32 %v2046_v28, %v2010_v63  ;;  %v2270_v33 = vadd.f32 %v2238_v0, %v2206_v51 }
 0x360   :  { %v3089_v20 = vmul.f32 %v11728_v2, %v2630_v15  ;;  %v2077_v35 = vadd.f32 %v2045_v47, %v2009_v7  ;;  %v3088_v39 = vmul.f32 %v11728_v2, %v2623_v30  ;;  %v11739_v0 = vpack.c.bf16 %v11660_v14, %v11734_v5  ;;  %v11744_v15 = vld [vmem:[%s12353_s4 + $0x30] sm:$0xff]  }
 0x361   :  { %v2806_v3 = vpop.permute.xlu1 %2805  ;;  %v2802_v22 = vpop.permute.xlu0 %2801  ;;  %v2269_v37 = vadd.f32 %v2237_v42, %v2205_v48  ;;  %v3053_v58 = vadd.f32 %v3021_v46, %v2078_v31  ;;  %v3253_v52 = vadd.f32 %v3221_v50, %v2270_v33  ;;  %v11758_v31 = vld [vmem:[#allocation2 + $0x110] sm:$0xff] }
 0x362   :  { %v3285_v41 = vmul.f32 %v11728_v2, %v2806_v3  ;;  %v3284_v49 = vmul.f32 %v11728_v2, %v2802_v22  ;;  %v3157_v28 = vmul.f32 %v11249_v11, %v2806_v3  ;;  %13246 = vst [vmem:[#allocation161_spill] sm:$0xff] %v11739_v0  ;;  %v3052_v47 = vadd.f32 %v3020_v13, %v2077_v35  ;;  %v13247_v13 = vld [vmem:[#allocation119_spill] sm:$0xff]  ;;  %v11760_v33 = vld [vmem:[#allocation2 + $0x72] sm:$0xff]  ;;  %v4021_v35 = vld [vmem:[#allocation2 + $0xa2] sm:$0xff] }
 0x363   :  { %v3252_v61 = vadd.f32 %v3220_v32, %v2269_v37  ;;  %v3156_v30 = vmul.f32 %v11249_v11, %v2802_v22  ;;  %v3121_v59 = vadd.f32 %v3089_v20, %v3053_v58 }
 0x364   :  { %v3317_v63 = vadd.f32 %v3285_v41, %v3253_v52  ;;  %v3120_v50 = vadd.f32 %v3088_v39, %v3052_v47  ;;  %v11775_v52 = vpack.c.bf16 %v11760_v33, %v11649_v16 }
 0x365   :  { %v2934_v42 = vpop.permute.xlu1 %2933  ;;  %7348 = vmatmul.mubr.msk.bf16.vlgmr.msra.gmra.mxu0 %vm3549_vm0, %v11636_v60  ;;  %v2930_v46 = vpop.permute.xlu0 %2929  ;;  %v3316_v7 = vadd.f32 %v3284_v49, %v3252_v61  ;;  %v3189_v32 = vadd.f32 %v3157_v28, %v3121_v59  ;;  %v11767_v49 = vld [vmem:[#allocation2 + $0x100] sm:$0xff]  ;;  %v7765_v28 = vld [vmem:[#allocation2 + $0xb2] sm:$0xff]  ;;  %v7123_v61 = vpack.c.bf16 %v11571_v54, %v11537_v29 }
 0x366   :  { %7338 = vmatmul.mubr.msk.bf16.gmra.mxu1 %vm3549_vm0, %v11609_v27  ;;  %v3349_v51 = vmul.f32 %v11249_v11, %v2934_v42  ;;  %7351 = vmatprep.mubr.msk.bf16.mxu0 %vm3549_vm0, %v11739_v0  ;;  %v3348_v48 = vmul.f32 %v11249_v11, %v2930_v46  ;;  %v3188_v20 = vadd.f32 %v3156_v30, %v3120_v50  ;;  %v7766_v54 = vld [vmem:[#allocation2 + $0xc2] sm:$0xff] }
 0x367   :  { %7341 = vmatprep.mubr.msk.bf16.mxu1 %vm3549_vm0, %v11647_v44  ;;  %7382 = vmatpush3.bf16.msra.mxu0 %v13247_v13  ;;  %v11771_v58 = vpack.c.bf16 %v11758_v31, %v11767_v49  ;;  %13248 = vst [vmem:[#allocation162_spill] sm:$0xff] %v11775_v52  ;;  %v7119_v47 = vpack.c.bf16 %v7765_v28, %v4021_v35  ;;  %v11793_v13 = vld [vmem:[#allocation2 + $0xe2] sm:$0xff] }
 0x368   :  { %v3381_v3 = vadd.f32 %v3349_v51, %v3317_v63  ;;  %7417 = vmatprep.subr.bf16.mxu0 %v11744_v15  ;;  %v3380_v41 = vadd.f32 %v3348_v48, %v3316_v7  ;;  %v11786_v51 = vld [vmem:[#allocation2 + $0xd2] sm:$0xff]  ;;  %v7124_v48 = vpack.c.bf16 %v11599_v18, %v11555_v1 }
 0x369   :  { %v11763_v22 = vpop.permute.xlu1 %291  ;;  %v11765_v39 = vpop.permute.xlu0 %284  ;;  %v11789_v7 = vpack.c.bf16 %v11786_v51, %v7766_v54 }
 0x36a   :  { %v3413_v37 = vmax.f32 %v3189_v32, %v3381_v3  ;;  %v3412_v11 = vmax.f32 %v3188_v20, %v3380_v41  ;;  %v11797_v32 = vpack.c.bf16 %v11523_v24, %v11793_v13  ;;  %v7125_v3 = vpack.c.bf16 %v11676_v62, %v11593_v17  ;;  %v11804_v20 = vld [vmem:[%s12353_s4 + $0x38] sm:$0xff]   ;;  %v11816_v62 = vld [vmem:[#allocation2 + $0x21] sm:$0xff] }
 0x36b   :  { %13249 = vst [vmem:[#allocation163_spill] sm:$0xff] %v11789_v7  ;;  %v11813_v17 = vld [vmem:[#allocation2 + $0x112] sm:$0xff]  ;;  %13251 = vst [vmem:[#allocation23_spill] sm:$0xff] %v11816_v62 }
 0x36c   :  { %v3437_v30 = vmax.f32 %v3412_v11, %v3413_v37  ;;  %13250 = vst [vmem:[#allocation17_spill] sm:$0xff] %v11797_v32  ;;  %v11820_v37 = vpack.c.bf16 %v11813_v17, %v11525_v56  ;;  %v4449_v11 = vld [vmem:[#allocation2 + $0x11] sm:$0xff] }
 0x36d   :  { %v520_v42 = vpop.permute.xlu1 %519  ;;  %7352 = vmatmul.mubr.msk.bf16.gmra.mxu0 %vm3549_vm0, %v11775_v52  ;;  %v513_v59 = vpop.permute.xlu0 %512  ;;  %v7131_v28 = vpack.c.bf16 %v11816_v62, %v4449_v11  ;;  %v11833_v11 = vld [vmem:[%s12353_s4 + $0x40] sm:$0xff]  }
 0x36e   :  { %7342 = vmatmul.mubr.msk.bf16.gmra.mxu1 %vm3549_vm0, %v11771_v58  ;;  %7355 = vmatprep.mubr.msk.bf16.mxu0 %vm3549_vm0, %v7119_v47  ;;  %v3460_v63 = vadd.f32 %v11347_v36, %v3437_v30  ;;  %13252 = vst [vmem:[#allocation18_spill] sm:$0xff] %v11820_v37  ;;  %v1015_v52 = vmul.f32 %v11613_v6, %v520_v42 }
 0x36f   :  { %7365 = vmatprep.mubr.msk.bf16.mxu1 %vm3549_vm0, %v7123_v61 }
 0x370   :  { %v3499_v46 = vmul.f32 1.442695, %v3460_v63  ;;  %vm3476_vm2 = vcmp.gt.f32.partialorder %v3460_v63, 0.0 }
 0x371   :  { %v648_v50 = vpop.permute.xlu1 %647  ;;  %v644_v29 = vpop.permute.xlu0 %643 }
 0x372   :  { %7707 = vpow2.f32 %v3499_v46  ;;  %v951_v0 = vmul.f32 %v11619_v38, %v648_v50 }
 0x375   :  { %v776_v41 = vpop.permute.xlu1 %775  ;;  %7356 = vmatmul.mubr.msk.bf16.gmra.mxu0 %vm3549_vm0, %v11789_v7  ;;  %v772_v1 = vpop.permute.xlu0 %771 }
 0x376   :  { %7366 = vmatmul.mubr.msk.bf16.vlgmr.msra.gmra.mxu1 %vm3549_vm0, %v7124_v48  ;;  %7359 = vmatprep.mubr.msk.bf16.mxu0 %vm3549_vm0, %v11797_v32  ;;  %v11826_v48 = vld [vmem:[#allocation2 + $0x31] sm:$0xff] }
 0x377   :  { %7369 = vmatprep.mubr.msk.bf16.mxu1 %vm3549_vm0, %v7125_v3  ;;  %7400 = vmatpush3.bf16.msra.mxu1 %v11578_v9  ;;  %13253 = vst [vmem:[#allocation21_spill] sm:$0xff] %v11826_v48  ;;  %v7132_v32 = vpack.c.bf16 %v11585_v25, %v11826_v48  ;;  %v1078_v25 = vmul.f32 %v11581_v4, %v644_v29 }
 0x378   :  { %7435 = vmatprep.subr.bf16.mxu1 %v11804_v20 }
 0x379   :  { %v1403_v18 = vpop.permute.xlu1 %1402  ;;  %v1396_v35 = vpop.permute.xlu0 %1395 }
 0x37d   :  { %v1631_v47 = vpop.permute.xlu1 %1630  ;;  %7360 = vmatmul.mubr.msk.bf16.gmra.mxu0 %vm3549_vm0, %v11820_v37  ;;  %v1624_v9 = vpop.permute.xlu0 %1623  ;;  %v7133_v37 = vpack.c.bf16 %v11664_v19, %v11587_v43  ;;  %v1014_v43 = vmul.f32 %v11613_v6, %v513_v59  ;;  %v950_v19 = vmul.f32 %v11619_v38, %v644_v29  ;;  %v4457_v29 = vld [vmem:[#allocation2 + $0xb1] sm:$0xff] }
 0x37e   :  { %7383 = vmatprep.mubr.msk.bf16.mxu0 %vm3549_vm0, %v7131_v28  ;;  %v883_v28 = vmul.f32 %v11581_v4, %v520_v42 }
 0x37f   :  { %v7708_v61 = vpop.eup %7707  ;;  %v1110_v48 = vadd.f32 %v1078_v25, %v1014_v43 }
 0x380   :  { %v6853_v30 = vadd.f32 -1.0, %v7708_v61  ;;  %v882_v61 = vmul.f32 %v11581_v4, %v513_v59 }
 0x381   :  { %v1759_v46 = vpop.permute.xlu1 %1758  ;;  %v1755_v54 = vpop.permute.xlu0 %1754 }
 0x382   :  { %v3540_v3 = vsel %vm3476_vm2, %v3460_v63, %v6853_v30  ;;  %v815_v63 = vmul.f32 %v11613_v6, %v11763_v22  ;;  %v1079_v30 = vmul.f32 %v11581_v4, %v648_v50  ;;  %v1143_v4 = vmul.f32 %v11619_v38, %v776_v41 }
 0x383   :  { %3601 = vst.msk [vmem:[#allocation2 + $0x81] sm:$0xff] %vm3549_vm0, %v3540_v3  ;;  %v814_v3 = vmul.f32 %v11613_v6, %v11765_v39  ;;  %v1142_v22 = vmul.f32 %v11619_v38, %v772_v1  ;;  %v7127_v50 = vpack.c.bf16 %v11567_v40, %v11565_v21  ;;  %v1925_v6 = vmul.f32 %v11668_v55, %v1396_v35 }
 0x384   :  { %v915_v39 = vadd.f32 %v883_v28, %v815_v63  ;;  %v2126_v38 = vmul.f32 %v11668_v55, %v1631_v47  ;;  %v7128_v28 = vpack.c.bf16 %v11638_v34, %v11569_v8  ;;  %v2125_v40 = vmul.f32 %v11668_v55, %v1624_v9 }
 0x385   :  { %v1887_v7 = vpop.permute.xlu1 %1886  ;;  %7384 = vmatmul.mubr.msk.bf16.vlgmr.msra.gmra.mxu0 %vm3549_vm0, %v7132_v32  ;;  %v1883_v60 = vpop.permute.xlu0 %1882  ;;  %v11855_v32 = vld [vmem:[#allocation2 + $0xc1] sm:$0xff]  ;;  %v914_v42 = vadd.f32 %v882_v61, %v814_v3  ;;  %v1174_v21 = vadd.f32 %v1142_v22, %v1110_v48  ;;  %v1994_v35 = vmul.f32 %v11692_v57, %v1631_v47  ;;  %v1993_v48 = vmul.f32 %v11692_v57, %v1624_v9 }
 0x386   :  { %7387 = vmatprep.mubr.msk.bf16.mxu0 %vm3549_vm0, %v7133_v37  ;;  %7418 = vmatpush3.bf16.msra.mxu0 %v11744_v15  ;;  %v1111_v37 = vadd.f32 %v1079_v30, %v1015_v52  ;;  %v1926_v15 = vmul.f32 %v11668_v55, %v1403_v18  ;;  %v983_v41 = vadd.f32 %v951_v0, %v915_v39 }
 0x387   :  { %7453 = vmatprep.subr.bf16.mxu0 %v11833_v11  ;;  %v7135_v62 = vpack.c.bf16 %v11855_v32, %v4457_v29  ;;  %v982_v61 = vadd.f32 %v950_v19, %v914_v42  ;;  %v2190_v0 = vmul.f32 %v11692_v57, %v1759_v46  ;;  %v2189_v55 = vmul.f32 %v11692_v57, %v1755_v54 }
 0x388   :  { %v1175_v63 = vadd.f32 %v1143_v4, %v1111_v37  ;;  %v1958_v8 = vadd.f32 %v1926_v15, %v983_v41  ;;  %v2062_v19 = vmul.f32 %v11706_v23, %v1759_v46  ;;  %v2254_v47 = vmul.f32 %v11706_v23, %v1887_v7 }
 0x389   :  { %v2514_v59 = vpop.permute.xlu1 %2513  ;;  %v2507_v1 = vpop.permute.xlu0 %2506  ;;  %v1957_v34 = vadd.f32 %v1925_v6, %v982_v61  ;;  %v2157_v4 = vadd.f32 %v2125_v40, %v1174_v21  ;;  %v2253_v22 = vmul.f32 %v11706_v23, %v1883_v60  ;;  %v11895_v61 = vld [vmem:[#allocation2 + $0xd1] sm:$0xff]  ;;  %v7767_v21 = vld [vmem:[#allocation3 + $0x8] ss:$0 sm:$0xff] }
 0x38a   :  { %v11867_v52 = vld [vmem:[#allocation2 + $0x80] sm:$0xff]  ;;  %v2158_v43 = vadd.f32 %v2126_v38, %v1175_v63  ;;  %v2026_v57 = vadd.f32 %v1994_v35, %v1958_v8  ;;  %v3037_v46 = vmul.f32 %v11722_v10, %v2514_v59  ;;  %v3036_v37 = vmul.f32 %v11722_v10, %v2507_v1 }
 0x38b   :  { %v11869_v18 = vld [vmem:[#allocation2 + $0x81] sm:$0xff]  ;;  %v7126_v30 = vpack.c.bf16 %v11867_v52, %v11678_v26  ;;  %v2025_v39 = vadd.f32 %v1993_v48, %v1957_v34  ;;  %v2221_v42 = vadd.f32 %v2189_v55, %v2157_v4  ;;  %v7136_v40 = vpack.c.bf16 %v11493_v45, %v11895_v61 }
 0x38c   :  { %v7134_v25 = vpack.c.bf16 %v11869_v18, %v11674_v12  ;;  %v2061_v12 = vmul.f32 %v11706_v23, %v1755_v54  ;;  %v2222_v9 = vadd.f32 %v2190_v0, %v2158_v43  ;;  %v2094_v54 = vadd.f32 %v2062_v19, %v2026_v57  ;;  %v13254_v45 = vld [vmem:[#allocation54_spill] sm:$0xff] }
 0x38d   :  { %v2742_v3 = vpop.permute.xlu1 %2741  ;;  %7370 = vmatmul.mubr.msk.bf16.gmra.mxu1 %vm3549_vm0, %v7126_v30  ;;  %v2735_v26 = vpop.permute.xlu0 %2734  ;;  %v2285_v41 = vadd.f32 %v2253_v22, %v2221_v42  ;;  %v7129_v8 = vpack.c.bf16 %v11767_v49, %v11611_v53 }
 0x38e   :  { %7388 = vmatmul.mubr.msk.bf16.gmra.mxu0 %vm3549_vm0, %v7134_v25  ;;  %7373 = vmatprep.mubr.msk.bf16.mxu1 %vm3549_vm0, %v7127_v50  ;;  %v3237_v7 = vmul.f32 %v11722_v10, %v2742_v3  ;;  %v3236_v15 = vmul.f32 %v11722_v10, %v2735_v26  ;;  %v2286_v29 = vadd.f32 %v2254_v47, %v2222_v9  ;;  %v13255_v47 = vld [vmem:[#allocation122_spill] sm:$0xff] }
 0x38f   :  { %7391 = vmatprep.mubr.msk.bf16.mxu0 %vm3549_vm0, %v7135_v62  ;;  %v3105_v60 = vmul.f32 %v11728_v2, %v2742_v3  ;;  %v2093_v50 = vadd.f32 %v2061_v12, %v2025_v39  ;;  %v3104_v59 = vmul.f32 %v11728_v2, %v2735_v26  ;;  %v3069_v63 = vadd.f32 %v3037_v46, %v2094_v54  ;;  %v13257_v54 = vld [vmem:[#allocation55_spill] sm:$0xff] }
 0x390   :  { %v3269_v1 = vadd.f32 %v3237_v7, %v2286_v29  ;;  %v3268_v0 = vadd.f32 %v3236_v15, %v2285_v41  ;;  %v13256_v26 = vpack.c.bf16 %v13254_v45, %v13255_v47  ;;  %v5337_v45 = vld [vmem:[#allocation2 + $0x132] sm:$0xff] }
 0x391   :  { %v2870_v6 = vpop.permute.xlu1 %2869  ;;  %v2866_v62 = vpop.permute.xlu0 %2865  ;;  %v3068_v35 = vadd.f32 %v3036_v37, %v2093_v50  ;;  %v3137_v34 = vadd.f32 %v3105_v60, %v3069_v63  ;;  %v13259_v60 = vld [vmem:[#allocation171_spill] sm:$0xff]  ;;  %v4674_v63 = vld [vmem:[#allocation2 + $0x82] sm:$0xff] }
 0x392   :  { %v3301_v23 = vmul.f32 %v11728_v2, %v2870_v6  ;;  %v3300_v38 = vmul.f32 %v11728_v2, %v2866_v62  ;;  %v3173_v10 = vmul.f32 %v7767_v21, %v2870_v6  ;;  %v3172_v30 = vmul.f32 %v7767_v21, %v2866_v62  ;;  %v13261_v62 = vld [vmem:[#allocation124_spill] sm:$0xff]  ;;  %v13262_v50 = vld [vmem:[#allocation123_spill] sm:$0xff] }
 0x393   :  { %v3136_v3 = vadd.f32 %v3104_v59, %v3068_v35  ;;  %v7140_v41 = vpack.c.bf16 %v11734_v5, %v13262_v50  ;;  %v13264_v59 = vpack.c.bf16 %v11649_v16, %v11660_v14  ;;  %v13266_v5 = vmov 0.0   ;;  %v13267_v16 = vld [vmem:[#allocation102_spill] sm:$0xff]  ;;  %v13268_v14 = vld [vmem:[#allocation101_spill] sm:$0xff] }
 0x394   :  { %v3333_v48 = vadd.f32 %v3301_v23, %v3269_v1  ;;  %v3332_v43 = vadd.f32 %v3300_v38, %v3268_v0  ;;  %v3205_v4 = vadd.f32 %v3173_v10, %v3137_v34  ;;  %v13265_v38 = vld [vmem:[#allocation126_spill] sm:$0xff]  ;;  %v4893_v1 = vld [vmem:[#allocation2 + $0x90] sm:$0xff]  ;;  %v13269_v10 = vpack.c.bf16 %v13267_v16, %v13268_v14 }
 0x395   :  { %v2998_v25 = vpop.permute.xlu1 %2997  ;;  %7374 = vmatmul.mubr.msk.bf16.gmra.mxu1 %vm3549_vm0, %v7128_v28  ;;  %v2994_v2 = vpop.permute.xlu0 %2993  ;;  %v3204_v49 = vadd.f32 %v3172_v30, %v3136_v3  ;;  %v13271_v0 = vld [vmem:[#allocation23_spill] sm:$0xff]  ;;  %v5114_v3 = vld [vmem:[#allocation2 + $0xe1] sm:$0xff] }
 0x396   :  { %v3365_v55 = vmul.f32 %v7767_v21, %v2998_v25  ;;  %7392 = vmatmul.mubr.msk.bf16.gmra.mxu0 %vm3549_vm0, %v7136_v40  ;;  %v3364_v19 = vmul.f32 %v7767_v21, %v2994_v2  ;;  %7377 = vmatprep.mubr.msk.bf16.mxu1 %vm3549_vm0, %v7129_v8  ;;  %v7142_v21 = vpack.c.bf16 %v4674_v63, %v11760_v33  ;;  %v4901_v40 = vld [vmem:[#allocation2 + $0x130] sm:$0xff] }
 0x397   :  { %7395 = vmatprep.mubr.msk.bf16.mxu0 %vm3549_vm0, %v13256_v26  ;;  %v13270_v33 = vpack.c.bf16 %v11525_v56, %v11523_v24  ;;  %v13273_v24 = vld [vmem:[#allocation125_spill] sm:$0xff]  ;;  %v13274_v56 = vld [vmem:[#allocation58_spill] sm:$0xff]  ;;  %v5111_v30 = vld [vmem:[#allocation2 + $0x91] sm:$0xff] }
 0x398   :  { %v3397_v53 = vadd.f32 %v3365_v55, %v3333_v48  ;;  %v3396_v12 = vadd.f32 %v3364_v19, %v3332_v43  ;;  %v5329_v25 = vld [vmem:[#allocation2 + $0x92] sm:$0xff]  ;;  %v7158_v8 = vpack.c.bf16 %v5111_v30, %v11869_v18  ;;  %v7159_v48 = vpack.c.bf16 %v11895_v61, %v11855_v32  ;;  %v13278_v55 = vld [vmem:[#allocation163_spill] sm:$0xff]  ;;  %v13279_v19 = vld [vmem:[#allocation17_spill] sm:$0xff] }
 0x399   :  { %v7166_v34 = vpack.c.bf16 %v5329_v25, %v4674_v63  ;;  %v5115_v2 = vld [vmem:[#allocation2 + $0xf1] sm:$0xff]  ;;  %v13281_v32 = vld [vmem:[#allocation18_spill] sm:$0xff] }
 0x39a   :  { %v3429_v22 = vmax.f32 %v3205_v4, %v3397_v53  ;;  %v3428_v57 = vmax.f32 %v3204_v49, %v3396_v12  ;;  %v7160_v43 = vpack.c.bf16 %v5115_v2, %v5114_v3  ;;  %v13280_v18 = vld [vmem:[#allocation120_spill] sm:$0xff]  ;;  %v7321_v4 = vpop.f32.mrf.mxu1 }
 0x39b   :  { %v5119_v61 = vld [vmem:[#allocation2 + $0x131] sm:$0xff] }
 0x39c   :  { %v3445_v28 = vmax.f32 %v3428_v57, %v3429_v22  ;;  %v11993_v53 = vpop.f32.mrf.mxu1  ;;  %v7313_v57 = vpop.f32.mrf.mxu0 }
 0x39e   :  { %v3468_v9 = vadd.f32 %v11347_v36, %v3445_v28  ;;  %v13258_v36 = vld [vmem:[#allocation27_spill] sm:$0xff]  ;;  %v11995_v49 = vpop.f32.mrf.mxu1 }
 0x39f   :  { %v13260_v23 = vpack.c.bf16 %v13258_v36, %v13259_v60 }
 0x3a0   :  { %v3515_v46 = vmul.f32 1.442695, %v3468_v9  ;;  %vm3484_vm3 = vcmp.gt.f32.partialorder %v3468_v9, 0.0  ;;  %v3818_v12 = vpop.f32.mrf.mxu1 }
 0x3a2   :  { %7709 = vpow2.f32 %v3515_v46  ;;  %v3783_v46 = vpop.f32.mrf.mxu0 }
 0x3af   :  { %v7710_v7 = vpop.eup %7709 }
 0x3b0   :  { %v6861_v39 = vadd.f32 -1.0, %v7710_v7 }
 0x3b2   :  { %v3548_v42 = vsel %vm3484_vm3, %v3468_v9, %v6861_v39 }
 0x3b3   :  { %3609 = vst.msk [vmem:[#allocation2 + $0x121] sm:$0xff] %vm3549_vm0, %v3548_v42  ;;  %v7314_v42 = vpop.f32.mrf.mxu0 }
 0x3ba   :  { %v4246_v37 = vld [vmem:[#allocation2 + $0x120] sm:$0xff] }
 0x3bb   :  { %v11910_v15 = vld [vmem:[#allocation2 + $0x121] sm:$0xff]  ;;  %v7130_v6 = vpack.c.bf16 %v4246_v37, %v11758_v31  ;;  %v13263_v31 = vld [vmem:[#allocation59_spill] sm:$0xff]  ;;  %v7154_v35 = vpack.c.bf16 %v4901_v40, %v4246_v37 }
 0x3bc   :  { %v7138_v29 = vpack.c.bf16 %v11910_v15, %v13257_v54  ;;  %v7162_v47 = vpack.c.bf16 %v5119_v61, %v11910_v15 }
 0x3bd   :  { %7378 = vmatmul.mubr.msk.bf16.gmra.mxu1 %vm3549_vm0, %v7130_v6  ;;  %v3786_v6 = vpop.f32.mrf.mxu0 }
 0x3be   :  { %7396 = vmatmul.mubr.msk.bf16.gmra.mxu0 %vm3549_vm0, %v7138_v29  ;;  %7401 = vmatprep.mubr.msk.bf16.mxu1 %vm3549_vm0, %v13260_v23 }
 0x3bf   :  { %7419 = vmatprep.mubr.msk.bf16.mxu0 %vm3549_vm0, %v13261_v62 }
 0x3c5   :  { %7402 = vmatmul.mubr.msk.bf16.vlgmr.msra.gmra.mxu1 %vm3549_vm0, %v7140_v41 }
 0x3c6   :  { %7420 = vmatmul.mubr.msk.bf16.vlgmr.msra.gmra.mxu0 %vm3549_vm0, %v13263_v31  ;;  %7436 = vmatpush3.bf16.msra.mxu1 %v11804_v20  ;;  %v7150_v20 = vpack.c.bf16 %v4893_v1, %v11867_v52  ;;  %v4682_v52 = vld [vmem:[#allocation2 + $0x122] sm:$0xff] }
 0x3c7   :  { %7405 = vmatprep.mubr.msk.bf16.mxu1 %vm3549_vm0, %v13264_v59  ;;  %7423 = vmatprep.mubr.msk.bf16.mxu0 %vm3549_vm0, %v13265_v38  ;;  %v7170_v26 = vpack.c.bf16 %v5337_v45, %v4682_v52 }
 0x3c8   :  { %7454 = vmatpush3.bf16.msra.mxu0 %v11833_v11  ;;  %7471 = vmatprep.subr.bf16.mxu1 %v13266_v5  ;;  %v7144_v11 = vpack.c.bf16 %v11793_v13, %v11786_v51  ;;  %v13272_v51 = vld [vmem:[#allocation21_spill] sm:$0xff] }
 0x3c9   :  { %7503 = vmatprep.subr.bf16.mxu0 %v13266_v5  ;;  %v7155_v13 = vpack.c.bf16 %v13272_v51, %v13271_v0 }
 0x3cd   :  { %7406 = vmatmul.mubr.msk.bf16.gmra.mxu1 %vm3549_vm0, %v7142_v21 }
 0x3ce   :  { %7424 = vmatmul.mubr.msk.bf16.gmra.mxu0 %vm3549_vm0, %v7150_v20  ;;  %7409 = vmatprep.mubr.msk.bf16.mxu1 %vm3549_vm0, %v13269_v10 }
 0x3cf   :  { %7427 = vmatprep.mubr.msk.bf16.mxu0 %vm3549_vm0, %v11609_v27  ;;  %v7146_v27 = vpack.c.bf16 %v4682_v52, %v11813_v17  ;;  %v13277_v17 = vld [vmem:[#allocation162_spill] sm:$0xff] }
 0x3d5   :  { %7410 = vmatmul.mubr.msk.bf16.gmra.mxu1 %vm3549_vm0, %v7144_v11 }
 0x3d6   :  { %7428 = vmatmul.mubr.msk.bf16.gmra.mxu0 %vm3549_vm0, %v11647_v44  ;;  %7413 = vmatprep.mubr.msk.bf16.mxu1 %vm3549_vm0, %v13270_v33  ;;  %v13275_v44 = vld [vmem:[#allocation161_spill] sm:$0xff] }
 0x3d7   :  { %7431 = vmatprep.mubr.msk.bf16.mxu0 %vm3549_vm0, %v11771_v58  ;;  %v13276_v58 = vld [vmem:[#allocation160_spill] sm:$0xff] }
 0x3dd   :  { %7414 = vmatmul.mubr.msk.bf16.gmra.mxu1 %vm3549_vm0, %v7146_v27 }
 0x3de   :  { %7432 = vmatmul.mubr.msk.bf16.gmra.mxu0 %vm3549_vm0, %v7154_v35  ;;  %7437 = vmatprep.mubr.msk.bf16.mxu1 %vm3549_vm0, %v7155_v13 }
 0x3df   :  { %7455 = vmatprep.mubr.msk.bf16.mxu0 %vm3549_vm0, %v13273_v24 }
 0x3e5   :  { %7438 = vmatmul.mubr.msk.bf16.vlgmr.msra.gmra.mxu1 %vm3549_vm0, %v13274_v56 }
 0x3e6   :  { %7456 = vmatmul.mubr.msk.bf16.vlgmr.msra.gmra.mxu0 %vm3549_vm0, %v13275_v44  ;;  %7441 = vmatprep.mubr.msk.bf16.mxu1 %vm3549_vm0, %v13276_v58 }
 0x3e7   :  { %7459 = vmatprep.mubr.msk.bf16.mxu0 %vm3549_vm0, %v13277_v17 }
 0x3ed   :  { %7442 = vmatmul.mubr.msk.bf16.gmra.mxu1 %vm3549_vm0, %v7158_v8 }
 0x3ee   :  { %7460 = vmatmul.mubr.msk.bf16.gmra.mxu0 %vm3549_vm0, %v7166_v34  ;;  %7445 = vmatprep.mubr.msk.bf16.mxu1 %vm3549_vm0, %v7159_v48 }
 0x3ef   :  { %7463 = vmatprep.mubr.msk.bf16.mxu0 %vm3549_vm0, %v13278_v55 }
 0x3f5   :  { %7446 = vmatmul.mubr.msk.bf16.gmra.mxu1 %vm3549_vm0, %v7160_v43 }
 0x3f6   :  { %7464 = vmatmul.mubr.msk.bf16.gmra.mxu0 %vm3549_vm0, %v13279_v19  ;;  %7449 = vmatprep.mubr.msk.bf16.mxu1 %vm3549_vm0, %v13280_v18 }
 0x3f7   :  { %7467 = vmatprep.mubr.msk.bf16.mxu0 %vm3549_vm0, %v13281_v32 }
 0x3fd   :  { %7450 = vmatmul.mubr.msk.bf16.gmra.mxu1 %vm3549_vm0, %v7162_v47 }
 0x3fe   :  { %7468 = vmatmul.mubr.msk.bf16.gmra.mxu0 %vm3549_vm0, %v7170_v26  ;;  %vm7841_vm0 = vmmov 0  }
 0x3ff   :  { %7507 = vmatprep.mubr.msk.bf16.mxu0 %vm7841_vm0, %v13266_v5  ;;  %7475 = vmatprep.mubr.msk.bf16.mxu1 %vm7841_vm0, %v13266_v5 }
 0x40d   :  { %v7325_v22 = vpop.f32.mrf.mxu1 }
 0x40f   :  { %v3831_v28 = vpop.f32.mrf.mxu1 }
 0x411   :  { %v7326_v9 = vpop.f32.mrf.mxu1 }
 0x413   :  { %v3834_v7 = vpop.f32.mrf.mxu1 }
 0x415   :  { %v7331_v39 = vpop.f32.mrf.mxu1 }
 0x416   :  { %v3959_v21 = vadd.f32 %v7331_v39, %v7313_v57 }
 0x417   :  { %v3950_v37 = vpop.f32.mrf.mxu1 }
 0x418   :  { %v3951_v10 = vadd.f32 %v3950_v37, %v3783_v46 }
 0x419   :  { %v7332_v15 = vpop.f32.mrf.mxu1 }
 0x41a   :  { %v3962_v40 = vadd.f32 %v7332_v15, %v7314_v42 }
 0x41b   :  { %v3953_v54 = vpop.f32.mrf.mxu1 }
 0x41c   :  { %v3954_v29 = vadd.f32 %v3953_v54, %v3786_v6 }
 0x41d   :  { %v7317_v36 = vpop.f32.mrf.mxu0 }
 0x41e   :  { %v7335_v60 = vpop.f32.mrf.mxu1 }
 0x41f   :  { %v3975_v23 = vadd.f32 %v7335_v60, %v7317_v36  ;;  %v3799_v62 = vpop.f32.mrf.mxu0 }
 0x420   :  { %v3966_v50 = vpop.f32.mrf.mxu1 }
 0x421   :  { %v3967_v41 = vadd.f32 %v3966_v50, %v3799_v62  ;;  %v7318_v31 = vpop.f32.mrf.mxu0 }
 0x422   :  { %v7336_v59 = vpop.f32.mrf.mxu1 }
 0x423   :  { %v3978_v38 = vadd.f32 %v7336_v59, %v7318_v31  ;;  %v3802_v63 = vpop.f32.mrf.mxu0 }
 0x424   :  { %v3969_v1 = vpop.f32.mrf.mxu1 }
 0x425   :  { %v3970_v20 = vadd.f32 %v3969_v1, %v3802_v63  ;;  %v7349_v14 = vpop.f32.mrf.mxu0 }
 0x426   :  { %v7339_v16 = vpop.f32.mrf.mxu1  ;;  %v4217_v11 = vadd.f32 %v7349_v14, %v3959_v21 }
 0x427   :  { %v4152_v52 = vpop.f32.mrf.mxu0  ;;  %v3991_v61 = vadd.f32 %v7339_v16, %v7321_v4 }
 0x428   :  { %v3982_v33 = vpop.f32.mrf.mxu1  ;;  %v4215_v27 = vadd.f32 %v4152_v52, %v3951_v10 }
 0x429   :  { %v7350_v0 = vpop.f32.mrf.mxu0  ;;  %v3983_v57 = vadd.f32 %v3982_v33, %v11993_v53 }
 0x42a   :  { %v7340_v35 = vpop.f32.mrf.mxu1  ;;  %v4218_v51 = vadd.f32 %v7350_v0, %v3962_v40 }
 0x42b   :  { %v4155_v24 = vpop.f32.mrf.mxu0 }
 0x42c   :  { %v3985_v13 = vpop.f32.mrf.mxu1  ;;  %v4216_v44 = vadd.f32 %v4155_v24, %v3954_v29 }
 0x42d   :  { %v3986_v56 = vadd.f32 %v3985_v13, %v3818_v12  ;;  %v7353_v17 = vpop.f32.mrf.mxu0 }
 0x42e   :  { %v7343_v58 = vpop.f32.mrf.mxu1  ;;  %v4221_v25 = vadd.f32 %v7353_v17, %v3975_v23 }
 0x42f   :  { %v4007_v30 = vadd.f32 %v7343_v58, %v7325_v22  ;;  %v4168_v34 = vpop.f32.mrf.mxu0 }
 0x430   :  { %v3998_v8 = vpop.f32.mrf.mxu1  ;;  %v4219_v55 = vadd.f32 %v4168_v34, %v3967_v41  ;;  %v7641_v34 = vld [vmem:[#allocation6 + $0x48] sm:$0xff]  }
 0x431   :  { %v3999_v48 = vadd.f32 %v3998_v8, %v3831_v28  ;;  %v7354_v3 = vpop.f32.mrf.mxu0  ;;  %v3994_v28 = vadd.f32 %v7340_v35, %v11995_v49  ;;  %7504 = vmatpush3.bf16.msra.mxu0 %v7641_v34 }
 0x432   :  { %v7344_v2 = vpop.f32.mrf.mxu1  ;;  %v4222_v19 = vadd.f32 %v7354_v3, %v3978_v38  ;;  %7505 = vmatprep.subr.bf16.mxu0 %v13266_v5 }
 0x433   :  { %v4010_v43 = vadd.f32 %v7344_v2, %v7326_v9  ;;  %v4171_v32 = vpop.f32.mrf.mxu0 }
 0x434   :  { %v4001_v18 = vpop.f32.mrf.mxu1  ;;  %v4220_v47 = vadd.f32 %v4171_v32, %v3970_v20 }
 0x435   :  { %v4002_v45 = vadd.f32 %v4001_v18, %v3834_v7  ;;  %v7357_v26 = vpop.f32.mrf.mxu0 }
 0x436   :  { %v7367_v12 = vpop.f32.mrf.mxu1  ;;  %v11998_v46 = vadd.f32 %v7357_v26, %v3991_v61 }
 0x437   :  { %v4435_v22 = vadd.f32 %v7367_v12, %v4217_v11  ;;  %v4184_v39 = vpop.f32.mrf.mxu0 }
 0x438   :  { %v4370_v42 = vpop.f32.mrf.mxu1  ;;  %v12001_v37 = vadd.f32 %v4184_v39, %v3983_v57 }
 0x439   :  { %v4433_v9 = vadd.f32 %v4370_v42, %v4215_v27  ;;  %v7358_v15 = vpop.f32.mrf.mxu0 }
 0x43a   :  { %v7368_v6 = vpop.f32.mrf.mxu1  ;;  %v12003_v54 = vadd.f32 %v7358_v15, %v3994_v28 }
 0x43b   :  { %v4436_v4 = vadd.f32 %v7368_v6, %v4218_v51  ;;  %v4187_v7 = vpop.f32.mrf.mxu0 }
 0x43c   :  { %v4373_v29 = vpop.f32.mrf.mxu1  ;;  %v12005_v36 = vadd.f32 %v4187_v7, %v3986_v56 }
 0x43d   :  { %v4434_v53 = vadd.f32 %v4373_v29, %v4216_v44  ;;  %v7361_v60 = vpop.f32.mrf.mxu0 }
 0x43e   :  { %v4229_v23 = vadd.f32 %v7361_v60, %v4007_v30 }
 0x43f   :  { %v4200_v62 = vpop.f32.mrf.mxu0 }
 0x440   :  { %v4227_v50 = vadd.f32 %v4200_v62, %v3999_v48  ;;  %v7639_v48 = vld [vmem:[#allocation6 + $0x18] sm:$0xff]  }
 0x441   :  { %v7362_v41 = vpop.f32.mrf.mxu0  ;;  %7472 = vmatpush3.bf16.msra.mxu1 %v7639_v48 }
 0x442   :  { %v4230_v31 = vadd.f32 %v7362_v41, %v4010_v43  ;;  %7473 = vmatprep.subr.bf16.mxu1 %v13266_v5 }
 0x443   :  { %v4203_v49 = vpop.f32.mrf.mxu0 }
 0x444   :  { %v12007_v59 = vadd.f32 %v4203_v49, %v4002_v45 }
 0x445   :  { %v7385_v38 = vpop.f32.mrf.mxu0 }
 0x446   :  { %v12009_v63 = vadd.f32 %v7385_v38, %v4435_v22 }
 0x447   :  { %v4588_v1 = vpop.f32.mrf.mxu0 }
 0x448   :  { %v12011_v21 = vadd.f32 %v4588_v1, %v4433_v9 }
 0x449   :  { %v7386_v20 = vpop.f32.mrf.mxu0 }
 0x44a   :  { %v12013_v16 = vadd.f32 %v7386_v20, %v4436_v4 }
 0x44b   :  { %v4591_v14 = vpop.f32.mrf.mxu0 }
 0x44c   :  { %v12015_v10 = vadd.f32 %v4591_v14, %v4434_v53 }
 0x44d   :  { %v7371_v11 = vpop.f32.mrf.mxu1 }
 0x44e   :  { %v7389_v33 = vpop.f32.mrf.mxu0  ;;  %v4439_v52 = vadd.f32 %v7371_v11, %v4221_v25  ;;  %v7642_v25 = vld [vmem:[#allocation6 + $0x40] sm:$0xff]  }
 0x44f   :  { %v4386_v40 = vpop.f32.mrf.mxu1  ;;  %7506 = vmatpush3.bf16.msra.mxu0 %v7642_v25 }
 0x450   :  { %v4604_v27 = vpop.f32.mrf.mxu0  ;;  %v4657_v35 = vadd.f32 %v7389_v33, %v4439_v52  ;;  %v4437_v0 = vadd.f32 %v4386_v40, %v4219_v55  ;;  %v7640_v55 = vld [vmem:[#allocation6 + $0x10] sm:$0xff]   ;;  %7519 = vmatprep.subr.bf16.mxu0 %v13266_v5 }
 0x451   :  { %v7372_v51 = vpop.f32.mrf.mxu1  ;;  %7474 = vmatpush3.bf16.msra.mxu1 %v7640_v55 }
 0x452   :  { %v7390_v13 = vpop.f32.mrf.mxu0  ;;  %v12017_v24 = vadd.f32 %v4604_v27, %v4437_v0  ;;  %v4440_v56 = vadd.f32 %v7372_v51, %v4222_v19  ;;  %7479 = vmatprep.subr.bf16.mxu1 %v13266_v5 }
 0x453   :  { %v4389_v44 = vpop.f32.mrf.mxu1 }
 0x454   :  { %v4658_v58 = vadd.f32 %v7390_v13, %v4440_v56  ;;  %v4438_v17 = vadd.f32 %v4389_v44, %v4220_v47  ;;  %v4607_v30 = vpop.f32.mrf.mxu0 }
 0x455   :  { %v12029_v2 = vpop.f32.mrf.mxu1 }
 0x456   :  { %v12019_v8 = vadd.f32 %v4607_v30, %v4438_v17  ;;  %v12031_v3 = vpop.f32.mrf.mxu0 }
 0x457   :  { %v12033_v43 = vpop.f32.mrf.mxu1 }
 0x458   :  { %v12035_v19 = vpop.f32.mrf.mxu0 }
 0x459   :  { %v12037_v18 = vpop.f32.mrf.mxu1 }
 0x45a   :  { %v12039_v32 = vpop.f32.mrf.mxu0 }
 0x45b   :  { %v12041_v61 = vpop.f32.mrf.mxu1 }
 0x45c   :  { %v12043_v45 = vpop.f32.mrf.mxu0 }
 0x47d   :  { %v7379_v47 = vpop.f32.mrf.mxu1 }
 0x47e   :  { %v7397_v26 = vpop.f32.mrf.mxu0  ;;  %v4447_v12 = vadd.f32 %v7379_v47, %v4229_v23 }
 0x47f   :  { %v4418_v57 = vpop.f32.mrf.mxu1 }
 0x480   :  { %v4636_v22 = vpop.f32.mrf.mxu0  ;;  %v12045_v39 = vadd.f32 %v7397_v26, %v4447_v12  ;;  %v4445_v42 = vadd.f32 %v4418_v57, %v4227_v50 }
 0x481   :  { %v7380_v28 = vpop.f32.mrf.mxu1 }
 0x482   :  { %v7398_v9 = vpop.f32.mrf.mxu0  ;;  %v12047_v15 = vadd.f32 %v4636_v22, %v4445_v42  ;;  %v4448_v6 = vadd.f32 %v7380_v28, %v4230_v31 }
 0x483   :  { %v12049_v4 = vpop.f32.mrf.mxu1 }
 0x484   :  { %v12051_v7 = vpop.f32.mrf.mxu0  ;;  %v12053_v29 = vadd.f32 %v7398_v9, %v4448_v6 }
 0x485   :  { %v7403_v53 = vpop.f32.mrf.mxu1 }
 0x486   :  { %13282 = vst [vmem:[#allocation24_spill] sm:$0xff] %v12053_v29  ;;  %v7421_v60 = vpop.f32.mrf.mxu0  ;;  %v4871_v22 = vadd.f32 %v7403_v53, %v12009_v63 }
 0x487   :  { %v4806_v62 = vpop.f32.mrf.mxu1 }
 0x488   :  { %v5025_v23 = vpop.f32.mrf.mxu0  ;;  %v4869_v9 = vadd.f32 %v4806_v62, %v12011_v21  ;;  %v4443_v21 = vadd.f32 %v12029_v2, %v11998_v46 }
 0x489   :  { %v7404_v41 = vpop.f32.mrf.mxu1 }
 0x48a   :  { %v7422_v49 = vpop.f32.mrf.mxu0  ;;  %v4872_v6 = vadd.f32 %v7404_v41, %v12013_v16  ;;  %v5088_v5 = vadd.f32 %v5025_v23, %v4869_v9  ;;  %v4441_v23 = vadd.f32 %v12033_v43, %v12001_v37  ;;  %v4442_v37 = vadd.f32 %v12041_v61, %v12005_v36 }
 0x48b   :  { %v4809_v38 = vpop.f32.mrf.mxu1 }
 0x48c   :  { %v5028_v1 = vpop.f32.mrf.mxu0 }
 0x48d   :  { %v7407_v50 = vpop.f32.mrf.mxu1 }
 0x48e   :  { %v7425_v20 = vpop.f32.mrf.mxu0  ;;  %v4875_v14 = vadd.f32 %v7407_v50, %v4657_v35 }
 0x48f   :  { %v4822_v11 = vpop.f32.mrf.mxu1 }
 0x490   :  { %v5041_v33 = vpop.f32.mrf.mxu0  ;;  %v12055_v31 = vadd.f32 %v7425_v20, %v4875_v14  ;;  %v5090_v14 = vadd.f32 %v7421_v60, %v4871_v22  ;;  %v4873_v41 = vadd.f32 %v4822_v11, %v12017_v24 }
 0x491   :  { %v7408_v52 = vpop.f32.mrf.mxu1 }
 0x492   :  { %v7426_v40 = vpop.f32.mrf.mxu0  ;;  %v4876_v27 = vadd.f32 %v7408_v52, %v4658_v58  ;;  %v4870_v52 = vadd.f32 %v4809_v38, %v12015_v10 }
 0x493   :  { %v4825_v0 = vpop.f32.mrf.mxu1 }
 0x494   :  { %v12057_v51 = vpop.f32.mrf.mxu0  ;;  %v12059_v13 = vadd.f32 %v7426_v40, %v4876_v27  ;;  %v5089_v53 = vadd.f32 %v5028_v1, %v4870_v52  ;;  %v4874_v2 = vadd.f32 %v4825_v0, %v12019_v8 }
 0x495   :  { %v7411_v56 = vpop.f32.mrf.mxu1 }
 0x496   :  { %v12061_v44 = vpop.f32.mrf.mxu0 }
 0x497   :  { %v12063_v17 = vpop.f32.mrf.mxu1 }
 0x498   :  { %v12065_v30 = vpop.f32.mrf.mxu0 }
 0x499   :  { %v12067_v35 = vpop.f32.mrf.mxu1 }
 0x49a   :  { %v12069_v34 = vpop.f32.mrf.mxu0 }
 0x49b   :  { %v12071_v48 = vpop.f32.mrf.mxu1 }
 0x49c   :  { %v12073_v25 = vpop.f32.mrf.mxu0 }
 0x49d   :  { %v12075_v58 = vpop.f32.mrf.mxu1 }
 0x49e   :  { %v12077_v55 = vpop.f32.mrf.mxu0 }
 0x49f   :  { %v12079_v47 = vpop.f32.mrf.mxu1 }
 0x4a0   :  { %v12081_v26 = vpop.f32.mrf.mxu0 }
 0x4a1   :  { %13283 = vst [vmem:[#allocation22_spill] sm:$0xff] %v12081_v26  ;;  %v12083_v12 = vpop.f32.mrf.mxu1  ;;  %v5091_v26 = vadd.f32 %v7422_v49, %v4872_v6  ;;  %v4444_v49 = vadd.f32 %v12037_v18, %v12003_v54  ;;  %v5092_v54 = vadd.f32 %v5041_v33, %v4873_v41 }
 0x4a2   :  { %13284 = vst [vmem:[#allocation25_spill] sm:$0xff] %v12083_v12  ;;  %v12085_v57 = vpop.f32.mrf.mxu0 }
 0x4a3   :  { %13285 = vst [vmem:[#allocation26_spill] sm:$0xff] %v12085_v57  ;;  %v12088_v42 = vpop.f32.mrf.mxu1  ;;  %v4662_v9 = vadd.f32 %v12039_v32, %v4444_v49 }
 0x4a4   :  { %13286 = vst [vmem:[#allocation39_spill] sm:$0xff] %v12088_v42  ;;  %v12090_v28 = vpop.f32.mrf.mxu0 }
 0x4a5   :  { %v7439_v50 = vpop.f32.mrf.mxu1 }
 0x4a6   :  { %v7457_v20 = vpop.f32.mrf.mxu0  ;;  %v5308_v57 = vadd.f32 %v7439_v50, %v5090_v14  ;;  %v4660_v50 = vadd.f32 %v12043_v45, %v4442_v37  ;;  %v13287_v37 = vld [vmem:[#allocation24_spill] sm:$0xff] }
 0x4a7   :  { %v5243_v40 = vpop.f32.mrf.mxu1 }
 0x4a8   :  { %v5461_v27 = vpop.f32.mrf.mxu0  ;;  %v5306_v42 = vadd.f32 %v5243_v40, %v5088_v5  ;;  %v5526_v60 = vadd.f32 %v7457_v20, %v5308_v57  ;;  %v12105_v5 = vld [vmem:[%s12354_s5] ss:$0 sm:$0xff]  ;;  %v4659_v57 = vadd.f32 %v12035_v19, %v4441_v23  ;;  %v4878_v45 = vadd.f32 %v12071_v48, %v4660_v50 }
 0x4a9   :  { %v7440_v12 = vpop.f32.mrf.mxu1 }
 0x4aa   :  { %v7458_v63 = vpop.f32.mrf.mxu0  ;;  %v5309_v29 = vadd.f32 %v7440_v12, %v5091_v26  ;;  %v5524_v1 = vadd.f32 %v5461_v27, %v5306_v42  ;;  %v4877_v20 = vadd.f32 %v12063_v17, %v4659_v57 }
 0x4ab   :  { %v5246_v62 = vpop.f32.mrf.mxu1 }
 0x4ac   :  { %v5464_v16 = vpop.f32.mrf.mxu0  ;;  %v5527_v22 = vadd.f32 %v7458_v63, %v5309_v29  ;;  %v5307_v10 = vadd.f32 %v5246_v62, %v5089_v53  ;;  %v4661_v29 = vadd.f32 %v12031_v3, %v4443_v21  ;;  %v5093_v3 = vadd.f32 %v12057_v51, %v4874_v2 }
 0x4ad   :  { %v7443_v38 = vpop.f32.mrf.mxu1  ;;  %v5096_v41 = vadd.f32 %v12065_v30, %v4877_v20  ;;  %v13291_v20 = vld [vmem:[#allocation22_spill] sm:$0xff] }
 0x4ae   :  { %v7461_v46 = vpop.f32.mrf.mxu0  ;;  %v5541_v24 = vmax.f32 %v5526_v60, %v5527_v22  ;;  %v5525_v11 = vadd.f32 %v5464_v16, %v5307_v10  ;;  %v4879_v8 = vadd.f32 %v7411_v56, %v4661_v29  ;;  %v5312_v0 = vadd.f32 %v7443_v38, %v12055_v31 }
 0x4af   :  { %v5259_v43 = vpop.f32.mrf.mxu1  ;;  %v4880_v31 = vadd.f32 %v12067_v35, %v4662_v9  ;;  %v4883_v10 = vadd.f32 %v12075_v58, %v12045_v39  ;;  %v5097_v38 = vadd.f32 %v12073_v25, %v4878_v45  ;;  %v4881_v25 = vadd.f32 %v12079_v47, %v12047_v15  ;;  %v13290_v15 = vld [vmem:[#allocation26_spill] sm:$0xff] }
 0x4b0   :  { %v5477_v26 = vpop.f32.mrf.mxu0  ;;  %v12112_v18 = vadd.f32 %v12105_v5, %v5541_v24  ;;  %v5540_v12 = vmax.f32 %v5524_v1, %v5525_v11  ;;  %v5310_v33 = vadd.f32 %v5259_v43, %v5092_v54  ;;  %v5098_v52 = vadd.f32 %v12061_v44, %v4879_v8  ;;  %v13288_v43 = vld [vmem:[#allocation25_spill] sm:$0xff]  ;;  %v13289_v8 = vld [vmem:[#allocation39_spill] sm:$0xff] }
 0x4b1   :  { %v7444_v42 = vpop.f32.mrf.mxu1  ;;  %v5530_v40 = vadd.f32 %v7461_v46, %v5312_v0  ;;  %v5099_v60 = vadd.f32 %v12069_v34, %v4880_v31  ;;  %v5102_v29 = vadd.f32 %v12077_v55, %v4883_v10 }
 0x4b2   :  { %v7462_v6 = vpop.f32.mrf.mxu0  ;;  %v5573_v36 = vmul.f32 1.442695, %v12112_v18  ;;  %v12120_v61 = vadd.f32 %v12105_v5, %v5540_v12  ;;  %v5313_v19 = vadd.f32 %v7444_v42, %v12059_v13  ;;  %v5528_v17 = vadd.f32 %v5477_v26, %v5310_v33 }
 0x4b3   :  { %v5262_v32 = vpop.f32.mrf.mxu1  ;;  %v4446_v13 = vadd.f32 %v12049_v4, %v12007_v59  ;;  %v4884_v26 = vadd.f32 %v13288_v43, %v13287_v37  ;;  %vm5564_vm4 = vcmp.gt.f32.partialorder %v12112_v18, 0.0 }
 0x4b4   :  { %v5480_v56 = vpop.f32.mrf.mxu0  ;;  %7711 = vpow2.f32 %v5573_v36  ;;  %v5571_v14 = vmul.f32 1.442695, %v12120_v61  ;;  %v5311_v51 = vadd.f32 %v5262_v32, %v5093_v3  ;;  %v5531_v27 = vadd.f32 %v7462_v6, %v5313_v19 }
 0x4b5   :  { %v7447_v63 = vpop.f32.mrf.mxu1  ;;  %v4664_v30 = vadd.f32 %v12051_v7, %v4446_v13  ;;  %v5103_v47 = vadd.f32 %v13290_v15, %v4884_v26  ;;  %v5100_v19 = vadd.f32 %v13291_v20, %v4881_v25  ;;  %vm5563_vm5 = vcmp.gt.f32.partialorder %v12120_v61, 0.0 }
 0x4b6   :  { %v7465_v53 = vpop.f32.mrf.mxu0  ;;  %7713 = vpow2.f32 %v5571_v14  ;;  %v5529_v21 = vadd.f32 %v5480_v56, %v5311_v51  ;;  %v5543_v62 = vmax.f32 %v5530_v40, %v5531_v27  ;;  %v5316_v22 = vadd.f32 %v7447_v63, %v5098_v52 }
 0x4b7   :  { %v5275_v35 = vpop.f32.mrf.mxu1  ;;  %v4882_v0 = vadd.f32 %v13289_v8, %v4664_v30 }
 0x4b8   :  { %v5493_v16 = vpop.f32.mrf.mxu0  ;;  %v5542_v44 = vmax.f32 %v5528_v17, %v5529_v21  ;;  %v12136_v48 = vadd.f32 %v12105_v5, %v5543_v62  ;;  %v5314_v4 = vadd.f32 %v5275_v35, %v5096_v41  ;;  %v5534_v58 = vadd.f32 %v7465_v53, %v5316_v22 }
 0x4b9   :  { %v7448_v23 = vpop.f32.mrf.mxu1  ;;  %v5101_v14 = vadd.f32 %v12090_v28, %v4882_v0 }
 0x4ba   :  { %v7466_v49 = vpop.f32.mrf.mxu0  ;;  %v12140_v59 = vadd.f32 %v12105_v5, %v5542_v44  ;;  %v5317_v46 = vadd.f32 %v7448_v23, %v5099_v60  ;;  %v5577_v34 = vmul.f32 1.442695, %v12136_v48  ;;  %v5532_v12 = vadd.f32 %v5493_v16, %v5314_v4 }
 0x4bb   :  { %v5278_v2 = vpop.f32.mrf.mxu1  ;;  %vm5566_vm6 = vcmp.gt.f32.partialorder %v12136_v48, 0.0 }
 0x4bc   :  { %v5496_v1 = vpop.f32.mrf.mxu0  ;;  %v5575_v39 = vmul.f32 1.442695, %v12140_v59  ;;  %v5535_v24 = vadd.f32 %v7466_v49, %v5317_v46  ;;  %v5315_v11 = vadd.f32 %v5278_v2, %v5097_v38  ;;  %7715 = vpow2.f32 %v5577_v34 }
 0x4bd   :  { %v7451_v54 = vpop.f32.mrf.mxu1  ;;  %vm5565_vm7 = vcmp.gt.f32.partialorder %v12140_v59, 0.0 }
 0x4be   :  { %v7469_v7 = vpop.f32.mrf.mxu0  ;;  %7717 = vpow2.f32 %v5575_v39  ;;  %v5545_v57 = vmax.f32 %v5534_v58, %v5535_v24  ;;  %v5533_v9 = vadd.f32 %v5496_v1, %v5315_v11  ;;  %v5320_v36 = vadd.f32 %v7451_v54, %v5102_v29 }
 0x4bf   :  { %v5291_v42 = vpop.f32.mrf.mxu1 }
 0x4c0   :  { %v5509_v6 = vpop.f32.mrf.mxu0  ;;  %v5560_v3 = vadd.f32 %v12105_v5, %v5545_v57  ;;  %v5544_v55 = vmax.f32 %v5532_v12, %v5533_v9  ;;  %v5538_v63 = vadd.f32 %v7469_v7, %v5320_v36  ;;  %v5318_v53 = vadd.f32 %v5291_v42, %v5100_v19 }
 0x4c1   :  { %v7712_v33 = vpop.eup %7711  ;;  %v7452_v50 = vpop.f32.mrf.mxu1 }
 0x4c2   :  { %v5581_v32 = vmul.f32 1.442695, %v5560_v3  ;;  %v5559_v56 = vadd.f32 %v12105_v5, %v5544_v55  ;;  %v5321_v51 = vadd.f32 %v7452_v50, %v5103_v47  ;;  %v7470_v52 = vpop.f32.mrf.mxu0  ;;  %v7033_v27 = vadd.f32 -1.0, %v7712_v33 }
 0x4c3   :  { %v7714_v31 = vpop.eup %7713  ;;  %v5294_v40 = vpop.f32.mrf.mxu1  ;;  %v5536_v28 = vadd.f32 %v5509_v6, %v5318_v53  ;;  %vm5568_vm8 = vcmp.gt.f32.partialorder %v5560_v3, 0.0 }
 0x4c4   :  { %7719 = vpow2.f32 %v5581_v32  ;;  %v7032_v45 = vadd.f32 -1.0, %v7714_v31  ;;  %v5579_v17 = vmul.f32 1.442695, %v5559_v56  ;;  %v5539_v21 = vadd.f32 %v7470_v52, %v5321_v51  ;;  %v5512_v35 = vpop.f32.mrf.mxu0 }
 0x4c5   :  { %v5319_v13 = vadd.f32 %v5294_v40, %v5101_v14  ;;  %v5596_v16 = vsel %vm5564_vm4, %v12112_v18, %v7033_v27  ;;  %vm5567_vm9 = vcmp.gt.f32.partialorder %v5559_v56, 0.0 }
 0x4c6   :  { %7721 = vpow2.f32 %v5579_v17  ;;  %v5547_v62 = vmax.f32 %v5538_v63, %v5539_v21  ;;  %v5595_v60 = vsel %vm5563_vm5, %v12120_v61, %v7032_v45  ;;  %v5612_v49 = vrot.slane %v5596_v16, 1  ;;  %v7643_v17 = vld [vmem:[#allocation6 + $0x68] sm:$0xff]  }
 0x4c7   :  { %v5537_v41 = vadd.f32 %v5512_v35, %v5319_v13  ;;  %v5611_v4 = vrot.slane %v5595_v60, 1 }
 0x4c8   :  { %v5562_v44 = vadd.f32 %v12105_v5, %v5547_v62  ;;  %v5628_v34 = vmax.f32 %v5596_v16, %v5612_v49 }
 0x4c9   :  { %v7716_v22 = vpop.eup %7715  ;;  %v5546_v10 = vmax.f32 %v5536_v28, %v5537_v41  ;;  %v5627_v1 = vmax.f32 %v5595_v60, %v5611_v4 }
 0x4ca   :  { %v7035_v38 = vadd.f32 -1.0, %v7716_v22  ;;  %v5585_v46 = vmul.f32 1.442695, %v5562_v44  ;;  %vm5570_vm11 = vcmp.gt.f32.partialorder %v5562_v44, 0.0 }
 0x4cb   :  { %v7718_v23 = vpop.eup %7717  ;;  %v12162_v30 = vadd.f32 %v12105_v5, %v5546_v10  ;;  %v5636_v5 = vpack.c.bf16 %v5628_v34, %v5628_v34  ;;  %v5635_v25 = vpack.c.bf16 %v5627_v1, %v5627_v1  ;;  %v13292_v34 = vmov 0.0  }
 0x4cc   :  { %v7034_v18 = vadd.f32 -1.0, %v7718_v23  ;;  %7723 = vpow2.f32 %v5585_v46  ;;  %v5598_v2 = vsel %vm5566_vm6, %v12136_v48, %v7035_v38  ;;  %v7644_v23 = vld [vmem:[#allocation6 + $0x8] sm:$0xff]  }
 0x4cd   :  { %v5583_v61 = vmul.f32 1.442695, %v12162_v30  ;;  %v5614_v58 = vrot.slane %v5598_v2, 1  ;;  %v12169_v7 = vunpack.c.l.b16 %v5636_v5  ;;  %v5654_v9 = vunpack.c.l.b16 %v5635_v25  ;;  %v7646_v5 = vld [vmem:[#allocation6] sm:$0xff]  }
 0x4ce   :  { %v5597_v24 = vsel %vm5565_vm7, %v12140_v59, %v7034_v18  ;;  %vm5569_vm13 = vcmp.gt.f32.partialorder %v12162_v30, 0.0  ;;  %v7645_v18 = vld [vmem:[#allocation6 + $0x60] sm:$0xff]  }
 0x4cf   :  { %7725 = vpow2.f32 %v5583_v61  ;;  %v5613_v43 = vrot.slane %v5597_v24, 1  ;;  %v5630_v48 = vmax.f32 %v5598_v2, %v5614_v58  ;;  %v6043_v36 = vrot.slane %v12169_v7, 4 }
 0x4d0   :  { %v5978_v33 = vrot.slane %v12169_v7, 2  ;;  %v5656_v15 = vrot.slane %v5654_v9, 2  ;;  %v5780_v20 = vrot.slane %v5654_v9, 4  ;;  %v5845_v31 = vrot.slane %v5654_v9, 6 }
 0x4d1   :  { %v7720_v39 = vpop.eup %7719  ;;  %v5629_v0 = vmax.f32 %v5597_v24, %v5613_v43  ;;  %v5638_v59 = vpack.c.bf16 %v5630_v48, %v5630_v48  ;;  %v7647_v43 = vld [vmem:[#allocation6 + $0x88] sm:$0xff]  }
 0x4d2   :  { %v7037_v11 = vadd.f32 -1.0, %v7720_v39 }
 0x4d3   :  { %v7722_v29 = vpop.eup %7721  ;;  %v5637_v19 = vpack.c.bf16 %v5629_v0, %v5629_v0  ;;  %v6438_v51 = vunpack.c.l.b16 %v5638_v59  ;;  %v7648_v59 = vld [vmem:[#allocation6 + $0x28] sm:$0xff]  }
 0x4d4   :  { %v5600_v37 = vsel %vm5568_vm8, %v5560_v3, %v7037_v11  ;;  %v7036_v54 = vadd.f32 -1.0, %v7722_v29 }
 0x4d5   :  { %v5616_v26 = vrot.slane %v5600_v37, 1  ;;  %v6175_v39 = vunpack.c.l.b16 %v5637_v19  ;;  %v6569_v29 = vrot.slane %v6438_v51, 4  ;;  %v6504_v25 = vrot.slane %v6438_v51, 2 }
 0x4d6   :  { %v5599_v57 = vsel %vm5567_vm9, %v5559_v56, %v7036_v54 }
 0x4d7   :  { %v5632_v12 = vmax.f32 %v5600_v37, %v5616_v26  ;;  %v5615_v8 = vrot.slane %v5599_v57, 1  ;;  %v6634_v37 = vrot.slane %v6438_v51, 6 }
 0x4d9   :  { %v5640_v42 = vpack.c.bf16 %v5632_v12, %v5632_v12  ;;  %v5631_v6 = vmax.f32 %v5599_v57, %v5615_v8  ;;  %v7724_v55 = vpop.eup %7723 }
 0x4da   :  { %v7039_v50 = vadd.f32 -1.0, %v7724_v55  ;;  %v6306_v55 = vrot.slane %v6175_v39, 4 }
 0x4db   :  { %v5913_v3 = vunpack.c.l.b16 %v5640_v42  ;;  %v5639_v47 = vpack.c.bf16 %v5631_v6, %v5631_v6 }
 0x4dc   :  { %v7726_v14 = vpop.eup %7725  ;;  %v5602_v40 = vsel %vm5570_vm11, %v5562_v44, %v7039_v50  ;;  %v6371_v50 = vrot.slane %v6175_v39, 6 }
 0x4dd   :  { %v5914_v32 = vrot.slane %v5913_v3, 7  ;;  %v6044_v56 = vrot.slane %v5913_v3, 3  ;;  %v5655_v52 = vunpack.c.l.b16 %v5639_v47  ;;  %v5979_v27 = vrot.slane %v5913_v3, 1 }
 0x4de   :  { %v5618_v63 = vrot.slane %v5602_v40, 1  ;;  %v7038_v53 = vadd.f32 -1.0, %v7726_v14  ;;  %v6109_v16 = vrot.slane %v5913_v3, 5  ;;  %v7650_v14 = vld [vmem:[#allocation6 + $0x20] sm:$0xff]  }
 0x4df   :  { %v5915_v45 = vsel %vm5658_vm10, %v5914_v32, %v12169_v7  ;;  %v6045_v21 = vsel %vm5658_vm10, %v6044_v56, %v6043_v36  ;;  %v5657_v13 = vrot.slane %v5655_v52, 1  ;;  %v5717_v35 = vrot.slane %v5655_v52, 7 }
 0x4e0   :  { %v5916_v62 = vpack.c.b16 %v5915_v45, %v5915_v45  ;;  %v5634_v28 = vmax.f32 %v5602_v40, %v5618_v63  ;;  %v5601_v41 = vsel %vm5569_vm13, %v12162_v30, %v7038_v53  ;;  %v5781_v60 = vrot.slane %v5655_v52, 3  ;;  %v7652_v40 = vld [vmem:[#allocation6 + $0x38] sm:$0xff]   ;;  %v7653_v63 = vld [vmem:[#allocation6 + $0xa0] sm:$0xff]   ;;  %v7654_v53 = vld [vmem:[#allocation6 + $0x30] sm:$0xff]  }
 0x4e1   :  { %v5846_v44 = vrot.slane %v5655_v52, 5  ;;  %v5617_v22 = vrot.slane %v5601_v41, 1  ;;  %v5659_v10 = vsel %vm5658_vm10, %v5657_v13, %v5656_v15  ;;  %v5718_v49 = vsel %vm5658_vm10, %v5717_v35, %v5654_v9  ;;  %v7649_v15 = vld [vmem:[#allocation6 + $0x80] sm:$0xff]   ;;  %v7655_v45 = vld [vmem:[#allocation6 + $0xc8] sm:$0xff]   ;;  %v7658_v35 = vld [vmem:[#allocation6 + $0x50] sm:$0xff]  }
 0x4e2   :  { %7508 = vmatmul.mubr.msk.bf16.vlgmr.msra.gmra.mxu0 %vm5673_vm12, %v5916_v62  ;;  %v12185_v38 = vsel %vm5658_vm10, %v5979_v27, %v5978_v33  ;;  %v5642_v4 = vpack.c.bf16 %v5634_v28, %v5634_v28  ;;  %v5660_v46 = vpack.c.b16 %v5659_v10, %v5659_v10  ;;  %v6108_v30 = vrot.slane %v12169_v7, 6  ;;  %v7657_v62 = vld [vmem:[#allocation6 + $0xc0] sm:$0xff]  }
 0x4e3   :  { %7520 = vmatpush3.bf16.msra.mxu0 %v7643_v17  ;;  %7523 = vmatprep.mubr.msk.bf16.mxu0 %vm7841_vm0, %v13292_v34  ;;  %v5633_v2 = vmax.f32 %v5601_v41, %v5617_v22  ;;  %v12192_v61 = vsel %vm5658_vm10, %v5781_v60, %v5780_v20  ;;  %v12195_v1 = vsel %vm5658_vm10, %v5846_v44, %v5845_v31  ;;  %v6241_v36 = vrot.slane %v6175_v39, 2  ;;  %v7660_v41 = vld [vmem:[#allocation6 + $0x78] sm:$0xff]   ;;  %v7661_v44 = vld [vmem:[#allocation6 + $0xe0] sm:$0xff]   ;;  %v7662_v22 = vld [vmem:[#allocation6 + $0x70] sm:$0xff]  }
 0x4e4   :  { %7521 = vmatprep.subr.bf16.mxu0 %v13292_v34  ;;  %v6439_v58 = vunpack.c.l.b16 %v5642_v4  ;;  %7476 = vmatmul.mubr.msk.bf16.vlgmr.msra.gmra.mxu1 %vm5673_vm12, %v5660_v46  ;;  %v12199_v24 = vsel %vm5658_vm10, %v6109_v16, %v6108_v30  ;;  %v6046_v57 = vpack.c.b16 %v6045_v21, %v6045_v21  ;;  %v5719_v33 = vpack.c.b16 %v5718_v49, %v5718_v49  ;;  %v7656_v21 = vld [vmem:[#allocation6 + $0x58] sm:$0xff]   ;;  %v7659_v16 = vld [vmem:[#allocation6 + $0xe8] sm:$0xff]  }
 0x4e5   :  { %v5641_v11 = vpack.c.bf16 %v5633_v2, %v5633_v2  ;;  %7480 = vmatpush3.bf16.msra.mxu1 %v7644_v23  ;;  %7483 = vmatprep.mubr.msk.bf16.mxu1 %vm7841_vm0, %v13292_v34  ;;  %v5783_v27 = vpack.c.b16 %v12192_v61, %v12192_v61  ;;  %v5848_v13 = vpack.c.b16 %v12195_v1, %v12195_v1  ;;  %v7663_v23 = vld [vmem:[#allocation6 + $0x98] sm:$0xff]   ;;  %v7668_v61 = vld [vmem:[#allocation6 + $0xd0] sm:$0xff]  }
 0x4e6   :  { %7481 = vmatprep.subr.bf16.mxu1 %v13292_v34  ;;  %v6440_v26 = vrot.slane %v6439_v58, 7  ;;  %v6570_v54 = vrot.slane %v6439_v58, 3  ;;  %v6505_v48 = vrot.slane %v6439_v58, 1  ;;  %v6635_v7 = vrot.slane %v6439_v58, 5  ;;  %v7665_v4 = vld [vmem:[#allocation6 + $0xb8] sm:$0xff]   ;;  %v7670_v58 = vld [vmem:[#allocation6 + $0xf0] sm:$0xff]  }
 0x4e7   :  { %7522 = vmatpush3.bf16.msra.mxu0 %v7645_v18  ;;  %v6176_v12 = vunpack.c.l.b16 %v5641_v11  ;;  %v5981_v60 = vpack.c.b16 %v12185_v38, %v12185_v38  ;;  %v6111_v49 = vpack.c.b16 %v12199_v24, %v12199_v24  ;;  %v7664_v38 = vld [vmem:[#allocation6 + $0x90] sm:$0xff]   ;;  %v7667_v30 = vld [vmem:[#allocation6 + $0xd8] sm:$0xff]   ;;  %v7671_v11 = vld [vmem:[%s12357_s8 + $0x38] sm:$0xff]  }
 0x4e8   :  { %7535 = vmatprep.subr.bf16.mxu0 %v13292_v34  ;;  %v12206_v9 = vsel %vm5658_vm10, %v6440_v26, %v6438_v51  ;;  %v12209_v8 = vsel %vm5658_vm10, %v6570_v54, %v6569_v29  ;;  %v12212_v0 = vsel %vm5658_vm10, %v6505_v48, %v6504_v25  ;;  %v12215_v42 = vsel %vm5658_vm10, %v6635_v7, %v6634_v37  ;;  %v7651_v51 = vld [vmem:[#allocation6 + $0xa8] sm:$0xff]   ;;  %v7666_v18 = vld [vmem:[#allocation6 + $0xb0] sm:$0xff]   ;;  %v7669_v1 = vld [vmem:[#allocation6 + $0xf8] sm:$0xff]  }
 0x4e9   :  { %7482 = vmatpush3.bf16.msra.mxu1 %v7646_v5  ;;  %v6177_v6 = vrot.slane %v6176_v12, 7  ;;  %v6307_v3 = vrot.slane %v6176_v12, 3  ;;  %v6242_v47 = vrot.slane %v6176_v12, 1  ;;  %v6372_v20 = vrot.slane %v6176_v12, 5  ;;  %v7672_v5 = vld [vmem:[%s12357_s8 + $0x30] sm:$0xff]   ;;  %v7673_v29 = vld [vmem:[%s12357_s8 + $0x28] sm:$0xff]  }
 0x4ea   :  { %7524 = vmatmul.mubr.msk.bf16.vlgmr.msra.gmra.mxu0 %vm5673_vm12, %v6046_v57  ;;  %7487 = vmatprep.subr.bf16.mxu1 %v13292_v34  ;;  %v6442_v28 = vpack.c.b16 %v12206_v9, %v12206_v9  ;;  %v6572_v10 = vpack.c.b16 %v12209_v8, %v12209_v8  ;;  %v6637_v24 = vpack.c.b16 %v12215_v42, %v12215_v42  ;;  %v7674_v25 = vld [vmem:[%s12357_s8 + $0x20] sm:$0xff]   ;;  %v7675_v37 = vld [vmem:[%s12357_s8 + $0x18] sm:$0xff]   ;;  %v7677_v26 = vld [vmem:[%s12357_s8 + $0x8] sm:$0xff]  }
 0x4eb   :  { %7536 = vmatpush3.bf16.msra.mxu0 %v7647_v43  ;;  %7539 = vmatprep.mubr.msk.bf16.mxu0 %vm7841_vm0, %v13292_v34  ;;  %v6178_v19 = vsel %vm5658_vm10, %v6177_v6, %v6175_v39  ;;  %v6308_v32 = vsel %vm5658_vm10, %v6307_v3, %v6306_v55  ;;  %v12226_v56 = vsel %vm5658_vm10, %v6242_v47, %v6241_v36  ;;  %v7676_v43 = vld [vmem:[%s12357_s8 + $0x10] sm:$0xff]   ;;  %v7678_v54 = vld [vmem:[%s12357_s8] sm:$0xff]  }
 0x4ec   :  { %7537 = vmatprep.subr.bf16.mxu0 %v13292_v34  ;;  %7484 = vmatmul.mubr.msk.bf16.vlgmr.msra.gmra.mxu1 %vm5673_vm12, %v5719_v33  ;;  %v12229_v31 = vsel %vm5658_vm10, %v6372_v20, %v6371_v50  ;;  %v6179_v52 = vpack.c.b16 %v6178_v19, %v6178_v19  ;;  %v6309_v17 = vpack.c.b16 %v6308_v32, %v6308_v32 }
 0x4ed   :  { %7488 = vmatpush3.bf16.msra.mxu1 %v7648_v59  ;;  %7491 = vmatprep.mubr.msk.bf16.mxu1 %vm7841_vm0, %v13292_v34  ;;  %v6244_v46 = vpack.c.b16 %v12226_v56, %v12226_v56  ;;  %v6374_v2 = vpack.c.b16 %v12229_v31, %v12229_v31  ;;  %v6507_v39 = vpack.c.b16 %v12212_v0, %v12212_v0 }
 0x4ee   :  { %7489 = vmatprep.subr.bf16.mxu1 %v13292_v34 }
 0x4ef   :  { %7538 = vmatpush3.bf16.msra.mxu0 %v7649_v15 }
 0x4f0   :  { %7551 = vmatprep.subr.bf16.mxu0 %v13292_v34 }
 0x4f1   :  { %7490 = vmatpush3.bf16.msra.mxu1 %v7650_v14 }
 0x4f2   :  { %7540 = vmatmul.mubr.msk.bf16.vlgmr.msra.gmra.mxu0 %vm5673_vm12, %v6179_v52  ;;  %7495 = vmatprep.subr.bf16.mxu1 %v13292_v34 }
 0x4f3   :  { %7552 = vmatpush3.bf16.msra.mxu0 %v7651_v51  ;;  %7555 = vmatprep.mubr.msk.bf16.mxu0 %vm7841_vm0, %v13292_v34 }
 0x4f4   :  { %7553 = vmatprep.subr.bf16.mxu0 %v13292_v34  ;;  %7492 = vmatmul.mubr.msk.bf16.vlgmr.msra.gmra.mxu1 %vm5673_vm12, %v5783_v27 }
 0x4f5   :  { %7496 = vmatpush3.bf16.msra.mxu1 %v7652_v40  ;;  %7499 = vmatprep.mubr.msk.bf16.mxu1 %vm7841_vm0, %v13292_v34 }
 0x4f6   :  { %7497 = vmatprep.subr.bf16.mxu1 %v13292_v34 }
 0x4f7   :  { %7554 = vmatpush3.bf16.msra.mxu0 %v7653_v63 }
 0x4f8   :  { %7567 = vmatprep.subr.bf16.mxu0 %v13292_v34 }
 0x4f9   :  { %7498 = vmatpush3.bf16.msra.mxu1 %v7654_v53 }
 0x4fa   :  { %7556 = vmatmul.mubr.msk.bf16.vlgmr.msra.gmra.mxu0 %vm5673_vm12, %v6309_v17  ;;  %7511 = vmatprep.subr.bf16.mxu1 %v13292_v34 }
 0x4fb   :  { %7568 = vmatpush3.bf16.msra.mxu0 %v7655_v45  ;;  %7571 = vmatprep.mubr.msk.bf16.mxu0 %vm7841_vm0, %v13292_v34 }
 0x4fc   :  { %7569 = vmatprep.subr.bf16.mxu0 %v13292_v34  ;;  %7500 = vmatmul.mubr.msk.bf16.vlgmr.msra.gmra.mxu1 %vm5673_vm12, %v5848_v13 }
 0x4fd   :  { %7512 = vmatpush3.bf16.msra.mxu1 %v7656_v21  ;;  %7515 = vmatprep.mubr.msk.bf16.mxu1 %vm7841_vm0, %v13292_v34 }
 0x4fe   :  { %7513 = vmatprep.subr.bf16.mxu1 %v13292_v34 }
 0x4ff   :  { %7570 = vmatpush3.bf16.msra.mxu0 %v7657_v62 }
 0x500   :  { %7583 = vmatprep.subr.bf16.mxu0 %v13292_v34 }
 0x501   :  { %7514 = vmatpush3.bf16.msra.mxu1 %v7658_v35 }
 0x502   :  { %7572 = vmatmul.mubr.msk.bf16.vlgmr.msra.gmra.mxu0 %vm5673_vm12, %v6442_v28  ;;  %7527 = vmatprep.subr.bf16.mxu1 %v13292_v34 }
 0x503   :  { %7584 = vmatpush3.bf16.msra.mxu0 %v7659_v16  ;;  %7587 = vmatprep.mubr.msk.bf16.mxu0 %vm7841_vm0, %v13292_v34 }
 0x504   :  { %7585 = vmatprep.subr.bf16.mxu0 %v13292_v34  ;;  %7516 = vmatmul.mubr.msk.bf16.vlgmr.msra.gmra.mxu1 %vm5673_vm12, %v5981_v60 }
 0x505   :  { %7528 = vmatpush3.bf16.msra.mxu1 %v7660_v41  ;;  %7531 = vmatprep.mubr.msk.bf16.mxu1 %vm7841_vm0, %v13292_v34 }
 0x506   :  { %7529 = vmatprep.subr.bf16.mxu1 %v13292_v34 }
 0x507   :  { %7586 = vmatpush3.bf16.msra.mxu0 %v7661_v44 }
 0x508   :  { %7599 = vmatprep.subr.bf16.mxu0 %v13292_v34 }
 0x509   :  { %7530 = vmatpush3.bf16.msra.mxu1 %v7662_v22 }
 0x50a   :  { %7588 = vmatmul.mubr.msk.bf16.vlgmr.msra.gmra.mxu0 %vm5673_vm12, %v6572_v10  ;;  %7543 = vmatprep.subr.bf16.mxu1 %v13292_v34 }
 0x50b   :  { %7615 = vmatprep.mubr.msk.bf16.mxu0 %vm7841_vm0, %v13292_v34  ;;  %7600 = vmatpush3.bf16.msra.mxu0 %v7671_v11 }
 0x50c   :  { %7532 = vmatmul.mubr.msk.bf16.vlgmr.msra.gmra.mxu1 %vm5673_vm12, %v6111_v49  ;;  %7601 = vmatprep.subr.bf16.mxu0 %v13292_v34 }
 0x50d   :  { %7544 = vmatpush3.bf16.msra.mxu1 %v7663_v23  ;;  %7547 = vmatprep.mubr.msk.bf16.mxu1 %vm7841_vm0, %v13292_v34 }
 0x50e   :  { %7545 = vmatprep.subr.bf16.mxu1 %v13292_v34 }
 0x50f   :  { %7602 = vmatpush3.bf16.msra.mxu0 %v7672_v5 }
 0x510   :  { %7603 = vmatprep.subr.bf16.mxu0 %v13292_v34 }
 0x511   :  { %7546 = vmatpush3.bf16.msra.mxu1 %v7664_v38 }
 0x512   :  { %7559 = vmatprep.subr.bf16.mxu1 %v13292_v34 }
 0x513   :  { %7604 = vmatpush3.bf16.msra.mxu0 %v7673_v29 }
 0x514   :  { %7548 = vmatmul.mubr.msk.bf16.vlgmr.msra.gmra.mxu1 %vm5673_vm12, %v6244_v46  ;;  %7605 = vmatprep.subr.bf16.mxu0 %v13292_v34 }
 0x515   :  { %7560 = vmatpush3.bf16.msra.mxu1 %v7665_v4  ;;  %7563 = vmatprep.mubr.msk.bf16.mxu1 %vm7841_vm0, %v13292_v34 }
 0x516   :  { %7561 = vmatprep.subr.bf16.mxu1 %v13292_v34 }
 0x517   :  { %7606 = vmatpush3.bf16.msra.mxu0 %v7674_v25 }
 0x518   :  { %7607 = vmatprep.subr.bf16.mxu0 %v13292_v34 }
 0x519   :  { %7562 = vmatpush3.bf16.msra.mxu1 %v7666_v18 }
 0x51a   :  { %7575 = vmatprep.subr.bf16.mxu1 %v13292_v34 }
 0x51b   :  { %7608 = vmatpush3.bf16.msra.mxu0 %v7675_v37 }
 0x51c   :  { %7564 = vmatmul.mubr.msk.bf16.vlgmr.msra.gmra.mxu1 %vm5673_vm12, %v6374_v2  ;;  %7609 = vmatprep.subr.bf16.mxu0 %v13292_v34 }
 0x51d   :  { %7576 = vmatpush3.bf16.msra.mxu1 %v7667_v30  ;;  %7579 = vmatprep.mubr.msk.bf16.mxu1 %vm7841_vm0, %v13292_v34 }
 0x51e   :  { %7577 = vmatprep.subr.bf16.mxu1 %v13292_v34 }
 0x51f   :  { %7610 = vmatpush3.bf16.msra.mxu0 %v7676_v43 }
 0x520   :  { %7611 = vmatprep.subr.bf16.mxu0 %v13292_v34 }
 0x521   :  { %7578 = vmatpush3.bf16.msra.mxu1 %v7668_v61 }
 0x522   :  { %7591 = vmatprep.subr.bf16.mxu1 %v13292_v34 }
 0x523   :  { %7612 = vmatpush3.bf16.msra.mxu0 %v7677_v26 }
 0x524   :  { %7580 = vmatmul.mubr.msk.bf16.vlgmr.msra.gmra.mxu1 %vm5673_vm12, %v6507_v39  ;;  %7613 = vmatprep.subr.bf16.mxu0 %v13292_v34 }
 0x525   :  { %7592 = vmatpush3.bf16.msra.mxu1 %v7669_v1  ;;  %7595 = vmatprep.mubr.msk.bf16.mxu1 %vm7841_vm0, %v13292_v34 }
 0x526   :  { %7593 = vmatprep.subr.bf16.mxu1 %v13292_v34 }
 0x527   :  { %7614 = vmatpush3.bf16.msra.mxu0 %v7678_v54 }
 0x529   :  { %7594 = vmatpush3.bf16.msra.mxu1 %v7670_v58 }
 0x52c   :  { %7596 = vmatmul.mubr.msk.bf16.vlgmr.msra.gmra.mxu1 %vm5673_vm12, %v6637_v24 }
 0x5a2   :  { %v5966_v48 = vpop.f32.mrf.mxu0 }
 0x5a4   :  { %v7509_v7 = vpop.f32.mrf.mxu0  ;;  %v5711_v12 = vpop.f32.mrf.mxu1 }
 0x5a6   :  { %v5969_v57 = vpop.f32.mrf.mxu0  ;;  %v7477_v9 = vpop.f32.mrf.mxu1 }
 0x5a8   :  { %v7510_v8 = vpop.f32.mrf.mxu0  ;;  %v5714_v0 = vpop.f32.mrf.mxu1 }
 0x5aa   :  { %v6096_v42 = vpop.f32.mrf.mxu0  ;;  %v7478_v59 = vpop.f32.mrf.mxu1 }
 0x5ac   :  { %v7525_v6 = vpop.f32.mrf.mxu0  ;;  %v5769_v55 = vpop.f32.mrf.mxu1 }
 0x5ad   :  { %v5770_v35 = vadd.f32 %v5769_v55, %v5711_v12 }
 0x5ae   :  { %v6099_v3 = vpop.f32.mrf.mxu0  ;;  %v7485_v36 = vpop.f32.mrf.mxu1 }
 0x5af   :  { %v7088_v3 = vld [vmem:[%s12356_s7] ss:$0 sm:$0xff]  ;;  %s7808_s7 = scalar_lea.vmem %s6827_s11, 32 }
 0x5b0   :  { %v7526_v33 = vpop.f32.mrf.mxu0  ;;  %v5772_v15 = vpop.f32.mrf.mxu1  ;;  %p7809_p10 = scmp.ne.s32.totalorder %s6827_s11, %s7808_s7  ;;  %p7814_p12 = scmp.lt.s32.totalorder %s7808_s7, %s7808_s7 }
 0x5b2   :  { %v6229_v47 = vpop.f32.mrf.mxu0  ;;  %v7486_v50 = vpop.f32.mrf.mxu1  ;;  %p7815_p13 = por %p7814_p12, %p7813_p11 }
 0x5b4   :  { %v7541_v20 = vpop.f32.mrf.mxu0  ;;  %v5833_v34 = vpop.f32.mrf.mxu1  ;;  %p7816_p0 = pnand %p7815_p13, %p7809_p10 }
 0x5b5   :  { %v5839_v41 = vadd.f32 %v5833_v34, %v5770_v35 }
 0x5b6   :  { %v6232_v19 = vpop.f32.mrf.mxu0  ;;  %v7493_v32 = vpop.f32.mrf.mxu1 }
 0x5b8   :  { %v7542_v56 = vpop.f32.mrf.mxu0  ;;  %v5836_v31 = vpop.f32.mrf.mxu1 }
 0x5b9   :  { %v7090_v31 = vld [vmem:[%s12358_s9] ss:$0 sm:$0xff] }
 0x5ba   :  { %v6359_v14 = vpop.f32.mrf.mxu0  ;;  %v7494_v51 = vpop.f32.mrf.mxu1 }
 0x5bc   :  { %v7557_v52 = vpop.f32.mrf.mxu0  ;;  %v5898_v40 = vpop.f32.mrf.mxu1 }
 0x5bd   :  { %v5904_v22 = vadd.f32 %v5898_v40, %v5839_v41 }
 0x5be   :  { %v6362_v27 = vpop.f32.mrf.mxu0  ;;  %v7501_v63 = vpop.f32.mrf.mxu1 }
 0x5bf   :  { %v5972_v4 = vadd.f32 %v5966_v48, %v5904_v22 }
 0x5c0   :  { %v7558_v53 = vpop.f32.mrf.mxu0  ;;  %v5901_v45 = vpop.f32.mrf.mxu1 }
 0x5c2   :  { %v6492_v17 = vpop.f32.mrf.mxu0  ;;  %v7502_v21 = vpop.f32.mrf.mxu1 }
 0x5c4   :  { %v7573_v13 = vpop.f32.mrf.mxu0  ;;  %v6031_v62 = vpop.f32.mrf.mxu1 }
 0x5c5   :  { %v6037_v30 = vadd.f32 %v6031_v62, %v5972_v4 }
 0x5c6   :  { %v6495_v16 = vpop.f32.mrf.mxu0  ;;  %v7517_v28 = vpop.f32.mrf.mxu1 }
 0x5c7   :  { %v6102_v39 = vadd.f32 %v6096_v42, %v6037_v30 }
 0x5c8   :  { %v7574_v60 = vpop.f32.mrf.mxu0  ;;  %v6034_v44 = vpop.f32.mrf.mxu1 }
 0x5ca   :  { %v6622_v10 = vpop.f32.mrf.mxu0  ;;  %v7518_v23 = vpop.f32.mrf.mxu1 }
 0x5cc   :  { %v7589_v49 = vpop.f32.mrf.mxu0  ;;  %v6161_v38 = vpop.f32.mrf.mxu1 }
 0x5cd   :  { %v6167_v24 = vadd.f32 %v6161_v38, %v6102_v39 }
 0x5ce   :  { %v6625_v46 = vpop.f32.mrf.mxu0  ;;  %v7533_v18 = vpop.f32.mrf.mxu1 }
 0x5cf   :  { %v6235_v29 = vadd.f32 %v6229_v47, %v6167_v24 }
 0x5d0   :  { %v7590_v2 = vpop.f32.mrf.mxu0  ;;  %v6164_v61 = vpop.f32.mrf.mxu1 }
 0x5d2   :  { %v7534_v1 = vpop.f32.mrf.mxu1 }
 0x5d4   :  { %v6294_v58 = vpop.f32.mrf.mxu1 }
 0x5d5   :  { %v6300_v37 = vadd.f32 %v6294_v58, %v6235_v29 }
 0x5d6   :  { %v7549_v11 = vpop.f32.mrf.mxu1 }
 0x5d7   :  { %v6365_v54 = vadd.f32 %v6359_v14, %v6300_v37 }
 0x5d8   :  { %v6297_v5 = vpop.f32.mrf.mxu1 }
 0x5da   :  { %v7550_v25 = vpop.f32.mrf.mxu1 }
 0x5dc   :  { %v6424_v43 = vpop.f32.mrf.mxu1 }
 0x5dd   :  { %v6430_v12 = vadd.f32 %v6424_v43, %v6365_v54 }
 0x5de   :  { %v7565_v26 = vpop.f32.mrf.mxu1 }
 0x5df   :  { %v6498_v9 = vadd.f32 %v6492_v17, %v6430_v12 }
 0x5e0   :  { %v6427_v7 = vpop.f32.mrf.mxu1 }
 0x5e2   :  { %v7566_v48 = vpop.f32.mrf.mxu1 }
 0x5e4   :  { %v6557_v57 = vpop.f32.mrf.mxu1 }
 0x5e5   :  { %v6563_v0 = vadd.f32 %v6557_v57, %v6498_v9 }
 0x5e6   :  { %v7581_v8 = vpop.f32.mrf.mxu1 }
 0x5e7   :  { %v6628_v42 = vadd.f32 %v6622_v10, %v6563_v0 }
 0x5e8   :  { %v6560_v59 = vpop.f32.mrf.mxu1 }
 0x5ea   :  { %v7582_v6 = vpop.f32.mrf.mxu1 }
 0x5ec   :  { %v6687_v55 = vpop.f32.mrf.mxu1 }
 0x5ed   :  { %v6693_v36 = vadd.f32 %v6687_v55, %v6628_v42 }
 0x5ee   :  { %v7597_v33 = vpop.f32.mrf.mxu1 }
 0x5ef   :  { %v6701_v15 = vadd.f32 %v7088_v3, %v6693_v36 }
 0x5f0   :  { %v6690_v47 = vpop.f32.mrf.mxu1 }
 0x5f1   :  { %v6703_v50 = vmul.f32 1.442695, %v6701_v15  ;;  %vm6702_vm14 = vcmp.gt.f32.partialorder %v6701_v15, 0.0 }
 0x5f2   :  { %v7598_v20 = vpop.f32.mrf.mxu1 }
 0x5f3   :  { %7727 = vpow2.f32 %v6703_v50 }
 0x600   :  { %v7728_v34 = vpop.eup %7727 }
 0x601   :  { %v7089_v19 = vadd.f32 -1.0, %v7728_v34 }
 0x603   :  { %v6706_v32 = vsel %vm6702_vm14, %v6701_v15, %v7089_v19 }
 0x604   :  { %v6707_v56 = vpack.c.bf16 %v6706_v32, %v6706_v32 }
 0x606   :  { %7616 = vmatmul.mubr.bf16.vlgmr.msra.gmra.mxu0 %v6707_v56 }
 0x6c6   :  { %v6813_v14 = vpop.f32.mrf.mxu0 }
 0x6c7   :  { %v6814_v51 = vadd.f32 %v7090_v31, %v6813_v14 }
 0x6c8   :  { %v7617_v52 = vpop.f32.mrf.mxu0 }
 0x6c9   :  { %6819 = vst [vmem:[#allocation8] sm:$0x3] %v6814_v51 }
 0x6ca   :  { %v6816_v40 = vpop.f32.mrf.mxu0 }
 0x6cb   :  { %7819 = shalt.err (!%p7816_p0)
}
 0x6cc   :  { %6829 = dma.vmem_to_hbm [thread:$0]  %s6827_s11, 32, %s12359_s10, [#allocation5]   ;;  %v7618_v27 = vpop.f32.mrf.mxu0 }
 0x6cd   :  { %7832 = dma.done.wait [#allocation5], 32  }
 0x6ce   :  { %7833 = vsyncadd [#allocation5], 4294967264 }
 0x6cf   :  { %6833 = vsyncpa [#allocation4], 1 }
 0x6d0   :  { %6834 = vsyncpa [#allocation7], 1 }
 0x6d1   :  { %6835 = vsyncpa [#allocation5], 1 }

</bundles_post_ra>
